<compile_context>
chip_gen: v7x
topology: tpu7x:2x2x1
jax: 0.10.0
libtpu: 0.0.40
codegen_flags: <defaults>
</compile_context>

<pallas_src>
import functools

import jax
import jax.numpy as jnp
from jax.experimental import pallas as pl
from jax.experimental.pallas import tpu as pltpu


FILTERS = [32, 64, 128, 256, 256, 512]
FEAT_C = FILTERS[-1]          # 512
FEAT_SP = 4                   # backbone output spatial extent (4, 4, 4)
SPATIAL = FEAT_SP ** 3        # 64
NUM_CLASSES = 2
Y_DIM = 76
N_PAD = 128                   # lane-dense padded class dimension
SPB_DEFAULT = 8               # spatial positions per grid step (tk = 8*512 = 4096)


# ----------------------------------------------------------------------------
# Fused kernel: backbone tail (prologue) + fc_d + split-K fc0 + relu + fc
# ----------------------------------------------------------------------------
def _deeplab_kernel(xv_ref, bbw_ref, bbb_ref, y_ref, fcdw_ref, fcdb_ref,
                    w0x_ref, w0y_ref, fc0b_ref, fcw_ref, fcb_ref,
                    o_ref, x_sc, acc_ref, *, batch, spatial, spb, feat_c):
    k = pl.program_id(0)
    rows = batch * spatial

    @pl.when(k == 0)
    def _prologue():
        # ---- backbone tail: pointwise conv + InstanceNorm3d + ReLU ----------
        h = jnp.dot(xv_ref[...], bbw_ref[...],
                    preferred_element_type=jnp.float32) + bbb_ref[...]
        # Rows are spatial-major (row = s*batch + b).  Per-(batch, channel)
        # stats over spatial are formed with selection-matrix matmuls so no
        # reshape/relayout is needed in-kernel.
        r_b = jax.lax.broadcasted_iota(jnp.int32, (batch, rows), 1) % batch
        b_b = jax.lax.broadcasted_iota(jnp.int32, (batch, rows), 0)
        sel = (r_b == b_b).astype(jnp.float32)             # (B, rows)
        r_t = jax.lax.broadcasted_iota(jnp.int32, (rows, batch), 0) % batch
        b_t = jax.lax.broadcasted_iota(jnp.int32, (rows, batch), 1)
        sel_t = (r_t == b_t).astype(jnp.float32)           # (rows, B)
        inv_s = 1.0 / spatial
        mean = jnp.dot(sel, h, preferred_element_type=jnp.float32) * inv_s
        cent = h - jnp.dot(sel_t, mean, preferred_element_type=jnp.float32)
        var = jnp.dot(sel, cent * cent,
                      preferred_element_type=jnp.float32) * inv_s
        rstd = jax.lax.rsqrt(var + 1e-5)
        feat = cent * jnp.dot(sel_t, rstd, preferred_element_type=jnp.float32)
        x_sc[...] = jnp.maximum(feat, 0.0).astype(x_sc.dtype)

        # ---- y branch: relu(fc_d(y)); acc starts with the "y half" of fc0 ---
        y_h = jnp.maximum(
            jnp.dot(y_ref[...], fcdw_ref[...],
                    preferred_element_type=jnp.float32) + fcdb_ref[...], 0.0)
        acc_ref[...] = jnp.dot(y_h.astype(w0y_ref.dtype), w0y_ref[...],
                               preferred_element_type=jnp.float32) + fc0b_ref[...]

    # ---- streamed "x half" of fc0: spb spatial positions per grid step ------
    base = pl.multiple_of(k * (spb * batch), spb * batch)
    blk = x_sc[pl.ds(base, spb * batch), :]                # (spb*B, 512) bf16
    acc = acc_ref[...]
    for s in range(spb):                                   # static unroll
        lhs = blk[s * batch:(s + 1) * batch, :]            # (B, 512) bf16
        acc += jnp.dot(lhs, w0x_ref[s * feat_c:(s + 1) * feat_c, :],
                       preferred_element_type=jnp.float32)
    acc_ref[...] = acc

    @pl.when(k == pl.num_programs(0) - 1)
    def _epilogue():
        hid = jnp.maximum(acc_ref[...], 0.0)               # relu(fc0(...))
        # TODO(synk): dropout(0.2) is eval-mode identity here.
        out = jnp.dot(hid, fcw_ref[...],
                      preferred_element_type=jnp.float32) + fcb_ref[...]
        o_ref[...] = out.astype(o_ref.dtype)               # lane-dense (B, 128)


def pallas_deeplab_fused(xv, y, params, *, spb=SPB_DEFAULT):
    """xv: (SPATIAL*B, C_in) f32 spatial-major rows, y: (B, 76) f32.

    Returns logits (B, num_classes) f32.
    """
    rows, c_in = xv.shape
    B = y.shape[0]
    assert rows == B * SPATIAL
    assert SPATIAL % spb == 0
    C = FEAT_C
    kt = SPATIAL // spb

    kernel = functools.partial(_deeplab_kernel, batch=B, spatial=SPATIAL,
                               spb=spb, feat_c=C)
    out = pl.pallas_call(
        kernel,
        out_shape=jax.ShapeDtypeStruct((B, N_PAD), jnp.float32),
        grid_spec=pltpu.PrefetchScalarGridSpec(
            num_scalar_prefetch=0,
            grid=(kt,),
            in_specs=[
                pl.BlockSpec((rows, c_in), lambda k: (0, 0)),   # xv (s-major)
                pl.BlockSpec((c_in, C), lambda k: (0, 0)),      # backbone conv W
                pl.BlockSpec((1, C), lambda k: (0, 0)),         # backbone conv b
                pl.BlockSpec((B, Y_DIM), lambda k: (0, 0)),     # y
                pl.BlockSpec((Y_DIM, C), lambda k: (0, 0)),     # fc_d W
                pl.BlockSpec((1, C), lambda k: (0, 0)),         # fc_d b
                pl.BlockSpec((spb * C, C), lambda k: (k, 0)),   # fc0 W x-part (bf16, streamed)
                pl.BlockSpec((C, C), lambda k: (0, 0)),         # fc0 W y-part (bf16)
                pl.BlockSpec((1, C), lambda k: (0, 0)),         # fc0 b
                pl.BlockSpec((C, N_PAD), lambda k: (0, 0)),     # fc W (pre-padded)
                pl.BlockSpec((1, N_PAD), lambda k: (0, 0)),     # fc b (pre-padded)
            ],
            out_specs=pl.BlockSpec((B, N_PAD), lambda k: (0, 0)),
            scratch_shapes=[
                pltpu.VMEM((rows, C), jnp.bfloat16),   # backbone features
                pltpu.VMEM((B, C), jnp.float32),       # fc0 accumulator
            ],
        ),
        compiler_params=pltpu.CompilerParams(
            dimension_semantics=("arbitrary",),        # K-reduction axis
            vmem_limit_bytes=40 << 20,
        ),
    )(xv.astype(jnp.float32), params["bb_w"], params["bb_b"],
      y.astype(jnp.float32), params["fcd_w"], params["fcd_b"],
      params["fc0_wx"], params["fc0_wy"], params["fc0_b"],
      params["fc_w_pad"], params["fc_b_pad"])
    return out[:, :NUM_CLASSES]


# ----------------------------------------------------------------------------
# Model: parameters + forward
# ----------------------------------------------------------------------------
def init_params(key, c_in):
    ks = jax.random.split(key, 9)
    s = 0.02

    def w(k, shape, dtype=jnp.float32):
        return (s * jax.random.normal(k, shape)).astype(dtype)

    fc_w = w(ks[7], (FEAT_C, NUM_CLASSES))
    fc_b = w(ks[8], (NUM_CLASSES,))
    return {
        # backbone stand-in: pointwise conv c_in -> 512 (+ InstanceNorm, ReLU)
        "bb_w": w(ks[0], (c_in, FEAT_C)),
        "bb_b": w(ks[1], (1, FEAT_C)),
        # fc_d: Linear(76, 512)
        "fcd_w": w(ks[2], (Y_DIM, FEAT_C)),
        "fcd_b": w(ks[3], (1, FEAT_C)),
        # _fc0: Linear(512*4*4*4 + 512, 512), stored pre-split and pre-permuted:
        #   fc0_wx rows are in KERNEL order (row = s*512 + c), bf16, streamed.
        #   To load a PyTorch checkpoint W0x (rows = c*64 + s) use:
        #     fc0_wx = W0x.reshape(512, 64, 512).transpose(1, 0, 2).reshape(-1, 512)
        "fc0_wx": w(ks[4], (SPATIAL * FEAT_C, FEAT_C), jnp.bfloat16),
        "fc0_wy": w(ks[5], (FEAT_C, FEAT_C), jnp.bfloat16),
        "fc0_b": w(ks[6], (1, FEAT_C)),
        # _fc: Linear(512, num_classes), pre-padded lane-dense to 128 columns
        "fc_w_pad": jnp.zeros((FEAT_C, N_PAD), jnp.float32)
                        .at[:, :NUM_CLASSES].set(fc_w),
        "fc_b_pad": jnp.zeros((1, N_PAD), jnp.float32)
                        .at[0, :NUM_CLASSES].set(fc_b),
    }


def deeplab_forward(params, x, y):
    """x: (B, C, D, H, W) f32, y: (B, 76) f32 -> (B, num_classes) f32."""
    B, C, D, H, W = x.shape
    assert D % FEAT_SP == 0 and H % FEAT_SP == 0 and W % FEAT_SP == 0
    # --- backbone stand-in: adaptive avg-pool to (4,4,4) (tiny XLA glue) ---
    xp = x.reshape(B, C, FEAT_SP, D // FEAT_SP, FEAT_SP, H // FEAT_SP,
                   FEAT_SP, W // FEAT_SP)
    xp = jnp.mean(xp, axis=(3, 5, 7))                       # (B, C, 4, 4, 4)
    # spatial-major rows for the fused kernel: xv[s*B + b, i] = xp[b, i, s]
    xv = jnp.transpose(xp.reshape(B, C, SPATIAL), (2, 0, 1)) \
            .reshape(SPATIAL * B, C)
    # fused kernel: conv+InstanceNorm+ReLU, fc_d+relu, split-K fc0+relu,
    # dropout(eval), final classifier
    return pallas_deeplab_fused(xv, y, params)


# ----------------------------------------------------------------------------
if __name__ == "__main__":
    key = jax.random.PRNGKey(0)
    kx, ky, kp = jax.random.split(key, 3)

    B, C_IN, D = 2, 4, 16
    x = jax.random.normal(kx, (B, C_IN, D, D, D), dtype=jnp.float32)
    y = jax.random.normal(ky, (B, Y_DIM), dtype=jnp.float32)
    params = init_params(kp, C_IN)

    fwd = jax.jit(deeplab_forward)
    out = jax.block_until_ready(fwd(params, x, y))
    assert out.shape == (B, NUM_CLASSES), out.shape
    assert out.dtype == jnp.float32
    assert bool(jnp.all(jnp.isfinite(out)))
    print("KERNEL_OK")
</pallas_src>

<mosaic_0001>
module attributes {stable_mosaic.version = 11 : i64} {
  func.func @_deeplab_kernel(%arg0: i32, %arg1: memref<128x4xf32, #tpu.memory_space<vmem>>, %arg2: memref<4x512xf32, #tpu.memory_space<vmem>>, %arg3: memref<1x512xf32, #tpu.memory_space<vmem>>, %arg4: memref<2x76xf32, #tpu.memory_space<vmem>>, %arg5: memref<76x512xf32, #tpu.memory_space<vmem>>, %arg6: memref<1x512xf32, #tpu.memory_space<vmem>>, %arg7: memref<4096x512xbf16, #tpu.memory_space<vmem>>, %arg8: memref<512x512xbf16, #tpu.memory_space<vmem>>, %arg9: memref<1x512xf32, #tpu.memory_space<vmem>>, %arg10: memref<512x128xf32, #tpu.memory_space<vmem>>, %arg11: memref<1x128xf32, #tpu.memory_space<vmem>>, %arg12: memref<2x128xf32, #tpu.memory_space<vmem>>, %arg13: memref<128x512xbf16, #tpu.memory_space<vmem>>, %arg14: memref<2x512xf32, #tpu.memory_space<vmem>>) attributes {dimension_semantics = [#tpu.dimension_semantics<arbitrary>], iteration_bounds = array<i64: 8>, scalar_prefetch = 0 : i64, scratch_operands = 2 : i64, tpu.core_type = #tpu.core_type<tc>, window_params = [{pipeline_mode = #tpu.pipeline_mode<synchronous>, transform_indices = @transform_0, window_bounds = array<i64: 128, 4>}, {pipeline_mode = #tpu.pipeline_mode<synchronous>, transform_indices = @transform_1, window_bounds = array<i64: 4, 512>}, {pipeline_mode = #tpu.pipeline_mode<synchronous>, transform_indices = @transform_2, window_bounds = array<i64: 1, 512>}, {pipeline_mode = #tpu.pipeline_mode<synchronous>, transform_indices = @transform_3, window_bounds = array<i64: 2, 76>}, {pipeline_mode = #tpu.pipeline_mode<synchronous>, transform_indices = @transform_4, window_bounds = array<i64: 76, 512>}, {pipeline_mode = #tpu.pipeline_mode<synchronous>, transform_indices = @transform_5, window_bounds = array<i64: 1, 512>}, {transform_indices = @transform_6, window_bounds = array<i64: 4096, 512>}, {pipeline_mode = #tpu.pipeline_mode<synchronous>, transform_indices = @transform_7, window_bounds = array<i64: 512, 512>}, {pipeline_mode = #tpu.pipeline_mode<synchronous>, transform_indices = @transform_8, window_bounds = array<i64: 1, 512>}, {pipeline_mode = #tpu.pipeline_mode<synchronous>, transform_indices = @transform_9, window_bounds = array<i64: 512, 128>}, {pipeline_mode = #tpu.pipeline_mode<synchronous>, transform_indices = @transform_10, window_bounds = array<i64: 1, 128>}, {pipeline_mode = #tpu.pipeline_mode<synchronous>, transform_indices = @transform_11, window_bounds = array<i64: 2, 128>}]} {
    %c0_i32 = arith.constant 0 : i32
    %0 = arith.cmpi eq, %arg0, %c0_i32 : i32
    %1 = arith.extui %0 : i1 to i32
    %c0_i32_0 = arith.constant 0 : i32
    %2 = arith.cmpi ne, %1, %c0_i32_0 : i32
    scf.if %2 {
      %c0_22 = arith.constant 0 : index
      %c0_23 = arith.constant 0 : index
      %44 = vector.load %arg1[%c0_22, %c0_23] : memref<128x4xf32, #tpu.memory_space<vmem>>, vector<128x4xf32>
      %c0_24 = arith.constant 0 : index
      %c0_25 = arith.constant 0 : index
      %45 = vector.load %arg2[%c0_24, %c0_25] : memref<4x512xf32, #tpu.memory_space<vmem>>, vector<4x512xf32>
      %cst_26 = arith.constant dense<0.000000e+00> : vector<128x512xf32>
      %46 = tpu.matmul %44, %45, %cst_26 {dimension_numbers = #tpu.dot_dimension_numbers<[1], [0], [0], [1], [0, 0, 1, 1], [], []>} : vector<128x4xf32>, vector<4x512xf32>, vector<128x512xf32> -> vector<128x512xf32>
      %c0_27 = arith.constant 0 : index
      %c0_28 = arith.constant 0 : index
      %47 = vector.load %arg3[%c0_27, %c0_28] : memref<1x512xf32, #tpu.memory_space<vmem>>, vector<1x512xf32>
      %48 = vector.broadcast %47 : vector<1x512xf32> to vector<128x512xf32>
      %49 = arith.addf %46, %48 : vector<128x512xf32>
      %50 = tpu.iota {dimensions = array<i32: 1>} : vector<2x128xi32>
      %c2_i32 = arith.constant 2 : i32
      %c0_i32_29 = arith.constant 0 : i32
      %51 = arith.cmpi eq, %c2_i32, %c0_i32_29 : i32
      %c1_i32 = arith.constant 1 : i32
      %52 = arith.select %51, %c1_i32, %c2_i32 : i32
      %53 = vector.broadcast %52 : i32 to vector<2x128xi32>
      %54 = arith.remsi %50, %53 : vector<2x128xi32>
      %c0_i32_30 = arith.constant 0 : i32
      %55 = vector.broadcast %c0_i32_30 : i32 to vector<2x128xi32>
      %56 = arith.cmpi ne, %54, %55 : vector<2x128xi32>
      %c0_i32_31 = arith.constant 0 : i32
      %57 = vector.broadcast %c0_i32_31 : i32 to vector<2x128xi32>
      %58 = arith.cmpi slt, %54, %57 : vector<2x128xi32>
      %c0_i32_32 = arith.constant 0 : i32
      %59 = arith.cmpi slt, %52, %c0_i32_32 : i32
      %60 = vector.broadcast %59 : i1 to vector<2x128xi1>
      %61 = vector.broadcast %60 : vector<2x128xi1> to vector<2x128xi1>
      %62 = arith.xori %58, %61 : vector<2x128xi1>
      %63 = arith.andi %62, %56 : vector<2x128xi1>
      %64 = vector.broadcast %52 : i32 to vector<2x128xi32>
      %65 = arith.addi %54, %64 : vector<2x128xi32>
      %66 = arith.select %63, %65, %54 : vector<2x128xi1>, vector<2x128xi32>
      %67 = tpu.iota {dimensions = array<i32: 0>} : vector<2x128xi32>
      %68 = arith.cmpi eq, %66, %67 : vector<2x128xi32>
      %69 = arith.extui %68 : vector<2x128xi1> to vector<2x128xi32>
      %70 = arith.sitofp %69 : vector<2x128xi32> to vector<2x128xf32>
      %71 = tpu.iota {dimensions = array<i32: 0>} : vector<128x2xi32>
      %c2_i32_33 = arith.constant 2 : i32
      %c0_i32_34 = arith.constant 0 : i32
      %72 = arith.cmpi eq, %c2_i32_33, %c0_i32_34 : i32
      %c1_i32_35 = arith.constant 1 : i32
      %73 = arith.select %72, %c1_i32_35, %c2_i32_33 : i32
      %74 = vector.broadcast %73 : i32 to vector<128x2xi32>
      %75 = arith.remsi %71, %74 : vector<128x2xi32>
      %c0_i32_36 = arith.constant 0 : i32
      %76 = vector.broadcast %c0_i32_36 : i32 to vector<128x2xi32>
      %77 = arith.cmpi ne, %75, %76 : vector<128x2xi32>
      %c0_i32_37 = arith.constant 0 : i32
      %78 = vector.broadcast %c0_i32_37 : i32 to vector<128x2xi32>
      %79 = arith.cmpi slt, %75, %78 : vector<128x2xi32>
      %c0_i32_38 = arith.constant 0 : i32
      %80 = arith.cmpi slt, %73, %c0_i32_38 : i32
      %81 = vector.broadcast %80 : i1 to vector<128x2xi1>
      %82 = vector.broadcast %81 : vector<128x2xi1> to vector<128x2xi1>
      %83 = arith.xori %79, %82 : vector<128x2xi1>
      %84 = arith.andi %83, %77 : vector<128x2xi1>
      %85 = vector.broadcast %73 : i32 to vector<128x2xi32>
      %86 = arith.addi %75, %85 : vector<128x2xi32>
      %87 = arith.select %84, %86, %75 : vector<128x2xi1>, vector<128x2xi32>
      %88 = tpu.iota {dimensions = array<i32: 1>} : vector<128x2xi32>
      %89 = arith.cmpi eq, %87, %88 : vector<128x2xi32>
      %90 = arith.extui %89 : vector<128x2xi1> to vector<128x2xi32>
      %91 = arith.sitofp %90 : vector<128x2xi32> to vector<128x2xf32>
      %cst_39 = arith.constant dense<0.000000e+00> : vector<2x512xf32>
      %92 = tpu.matmul %70, %49, %cst_39 {dimension_numbers = #tpu.dot_dimension_numbers<[1], [0], [0], [1], [0, 0, 1, 1], [], []>} : vector<2x128xf32>, vector<128x512xf32>, vector<2x512xf32> -> vector<2x512xf32>
      %cst_40 = arith.constant 1.562500e-02 : f32
      %93 = vector.broadcast %cst_40 : f32 to vector<2x512xf32>
      %94 = arith.mulf %92, %93 : vector<2x512xf32>
      %cst_41 = arith.constant dense<0.000000e+00> : vector<128x512xf32>
      %95 = tpu.matmul %91, %94, %cst_41 {dimension_numbers = #tpu.dot_dimension_numbers<[1], [0], [0], [1], [0, 0, 1, 1], [], []>} : vector<128x2xf32>, vector<2x512xf32>, vector<128x512xf32> -> vector<128x512xf32>
      %96 = arith.subf %49, %95 : vector<128x512xf32>
      %97 = arith.mulf %96, %96 : vector<128x512xf32>
      %cst_42 = arith.constant dense<0.000000e+00> : vector<2x512xf32>
      %98 = tpu.matmul %70, %97, %cst_42 {dimension_numbers = #tpu.dot_dimension_numbers<[1], [0], [0], [1], [0, 0, 1, 1], [], []>} : vector<2x128xf32>, vector<128x512xf32>, vector<2x512xf32> -> vector<2x512xf32>
      %cst_43 = arith.constant 1.562500e-02 : f32
      %99 = vector.broadcast %cst_43 : f32 to vector<2x512xf32>
      %100 = arith.mulf %98, %99 : vector<2x512xf32>
      %cst_44 = arith.constant 9.99999974E-6 : f32
      %101 = vector.broadcast %cst_44 : f32 to vector<2x512xf32>
      %102 = arith.addf %100, %101 : vector<2x512xf32>
      %103 = math.rsqrt %102 : vector<2x512xf32>
      %cst_45 = arith.constant dense<0.000000e+00> : vector<128x512xf32>
      %104 = tpu.matmul %91, %103, %cst_45 {dimension_numbers = #tpu.dot_dimension_numbers<[1], [0], [0], [1], [0, 0, 1, 1], [], []>} : vector<128x2xf32>, vector<2x512xf32>, vector<128x512xf32> -> vector<128x512xf32>
      %105 = arith.mulf %96, %104 : vector<128x512xf32>
      %cst_46 = arith.constant 0.000000e+00 : f32
      %106 = vector.broadcast %cst_46 : f32 to vector<128x512xf32>
      %107 = arith.maximumf %105, %106 : vector<128x512xf32>
      %108 = arith.truncf %107 : vector<128x512xf32> to vector<128x512xbf16>
      %c0_47 = arith.constant 0 : index
      %c0_48 = arith.constant 0 : index
      %109 = vector.load %arg13[%c0_47, %c0_48] : memref<128x512xbf16, #tpu.memory_space<vmem>>, vector<128x512xbf16>
      tpu.vector_store %arg13[%c0_47, %c0_48], %108 {strides = array<i32>} : memref<128x512xbf16, #tpu.memory_space<vmem>>, vector<128x512xbf16>,
      %c0_49 = arith.constant 0 : index
      %c0_50 = arith.constant 0 : index
      %110 = vector.load %arg4[%c0_49, %c0_50] : memref<2x76xf32, #tpu.memory_space<vmem>>, vector<2x76xf32>
      %c0_51 = arith.constant 0 : index
      %c0_52 = arith.constant 0 : index
      %111 = vector.load %arg5[%c0_51, %c0_52] : memref<76x512xf32, #tpu.memory_space<vmem>>, vector<76x512xf32>
      %cst_53 = arith.constant dense<0.000000e+00> : vector<2x512xf32>
      %112 = tpu.matmul %110, %111, %cst_53 {dimension_numbers = #tpu.dot_dimension_numbers<[1], [0], [0], [1], [0, 0, 1, 1], [], []>} : vector<2x76xf32>, vector<76x512xf32>, vector<2x512xf32> -> vector<2x512xf32>
      %c0_54 = arith.constant 0 : index
      %c0_55 = arith.constant 0 : index
      %113 = vector.load %arg6[%c0_54, %c0_55] : memref<1x512xf32, #tpu.memory_space<vmem>>, vector<1x512xf32>
      %114 = vector.broadcast %113 : vector<1x512xf32> to vector<2x512xf32>
      %115 = arith.addf %112, %114 : vector<2x512xf32>
      %cst_56 = arith.constant 0.000000e+00 : f32
      %116 = vector.broadcast %cst_56 : f32 to vector<2x512xf32>
      %117 = arith.maximumf %115, %116 : vector<2x512xf32>
      %118 = arith.truncf %117 : vector<2x512xf32> to vector<2x512xbf16>
      %c0_57 = arith.constant 0 : index
      %c0_58 = arith.constant 0 : index
      %119 = vector.load %arg8[%c0_57, %c0_58] : memref<512x512xbf16, #tpu.memory_space<vmem>>, vector<512x512xbf16>
      %cst_59 = arith.constant dense<0.000000e+00> : vector<2x512xf32>
      %120 = tpu.matmul %118, %119, %cst_59 {dimension_numbers = #tpu.dot_dimension_numbers<[1], [0], [0], [1], [0, 0, 1, 1], [], []>} : vector<2x512xbf16>, vector<512x512xbf16>, vector<2x512xf32> -> vector<2x512xf32>
      %c0_60 = arith.constant 0 : index
      %c0_61 = arith.constant 0 : index
      %121 = vector.load %arg9[%c0_60, %c0_61] : memref<1x512xf32, #tpu.memory_space<vmem>>, vector<1x512xf32>
      %122 = vector.broadcast %121 : vector<1x512xf32> to vector<2x512xf32>
      %123 = arith.addf %120, %122 : vector<2x512xf32>
      %c0_62 = arith.constant 0 : index
      %c0_63 = arith.constant 0 : index
      %124 = vector.load %arg14[%c0_62, %c0_63] : memref<2x512xf32, #tpu.memory_space<vmem>>, vector<2x512xf32>
      tpu.vector_store %arg14[%c0_62, %c0_63], %123 {strides = array<i32>} : memref<2x512xf32, #tpu.memory_space<vmem>>, vector<2x512xf32>,
    } else {
    }
    %c16_i32 = arith.constant 16 : i32
    %3 = arith.muli %arg0, %c16_i32 : i32
    %4 = tpu.assume_multiple %3, 16 : i32
    %5 = arith.index_cast %4 : i32 to index
    %c0 = arith.constant 0 : index
    %6 = vector.load %arg13[%5, %c0] : memref<128x512xbf16, #tpu.memory_space<vmem>>, vector<16x512xbf16>
    %c0_1 = arith.constant 0 : index
    %c0_2 = arith.constant 0 : index
    %7 = vector.load %arg14[%c0_1, %c0_2] : memref<2x512xf32, #tpu.memory_space<vmem>>, vector<2x512xf32>
    %8 = vector.extract_strided_slice %6 {offsets = [0, 0], sizes = [2, 512], strides = [1, 1]} : vector<16x512xbf16> to vector<2x512xbf16>
    %c0_3 = arith.constant 0 : index
    %c0_4 = arith.constant 0 : index
    %9 = vector.load %arg7[%c0_3, %c0_4] : memref<4096x512xbf16, #tpu.memory_space<vmem>>, vector<512x512xbf16>
    %cst = arith.constant dense<0.000000e+00> : vector<2x512xf32>
    %10 = tpu.matmul %8, %9, %cst {dimension_numbers = #tpu.dot_dimension_numbers<[1], [0], [0], [1], [0, 0, 1, 1], [], []>} : vector<2x512xbf16>, vector<512x512xbf16>, vector<2x512xf32> -> vector<2x512xf32>
    %11 = arith.addf %7, %10 : vector<2x512xf32>
    %12 = vector.extract_strided_slice %6 {offsets = [2, 0], sizes = [2, 512], strides = [1, 1]} : vector<16x512xbf16> to vector<2x512xbf16>
    %c512 = arith.constant 512 : index
    %c0_5 = arith.constant 0 : index
    %13 = vector.load %arg7[%c512, %c0_5] : memref<4096x512xbf16, #tpu.memory_space<vmem>>, vector<512x512xbf16>
    %cst_6 = arith.constant dense<0.000000e+00> : vector<2x512xf32>
    %14 = tpu.matmul %12, %13, %cst_6 {dimension_numbers = #tpu.dot_dimension_numbers<[1], [0], [0], [1], [0, 0, 1, 1], [], []>} : vector<2x512xbf16>, vector<512x512xbf16>, vector<2x512xf32> -> vector<2x512xf32>
    %15 = arith.addf %11, %14 : vector<2x512xf32>
    %16 = vector.extract_strided_slice %6 {offsets = [4, 0], sizes = [2, 512], strides = [1, 1]} : vector<16x512xbf16> to vector<2x512xbf16>
    %c1024 = arith.constant 1024 : index
    %c0_7 = arith.constant 0 : index
    %17 = vector.load %arg7[%c1024, %c0_7] : memref<4096x512xbf16, #tpu.memory_space<vmem>>, vector<512x512xbf16>
    %cst_8 = arith.constant dense<0.000000e+00> : vector<2x512xf32>
    %18 = tpu.matmul %16, %17, %cst_8 {dimension_numbers = #tpu.dot_dimension_numbers<[1], [0], [0], [1], [0, 0, 1, 1], [], []>} : vector<2x512xbf16>, vector<512x512xbf16>, vector<2x512xf32> -> vector<2x512xf32>
    %19 = arith.addf %15, %18 : vector<2x512xf32>
    %20 = vector.extract_strided_slice %6 {offsets = [6, 0], sizes = [2, 512], strides = [1, 1]} : vector<16x512xbf16> to vector<2x512xbf16>
    %c1536 = arith.constant 1536 : index
    %c0_9 = arith.constant 0 : index
    %21 = vector.load %arg7[%c1536, %c0_9] : memref<4096x512xbf16, #tpu.memory_space<vmem>>, vector<512x512xbf16>
    %cst_10 = arith.constant dense<0.000000e+00> : vector<2x512xf32>
    %22 = tpu.matmul %20, %21, %cst_10 {dimension_numbers = #tpu.dot_dimension_numbers<[1], [0], [0], [1], [0, 0, 1, 1], [], []>} : vector<2x512xbf16>, vector<512x512xbf16>, vector<2x512xf32> -> vector<2x512xf32>
    %23 = arith.addf %19, %22 : vector<2x512xf32>
    %24 = vector.extract_strided_slice %6 {offsets = [8, 0], sizes = [2, 512], strides = [1, 1]} : vector<16x512xbf16> to vector<2x512xbf16>
    %c2048 = arith.constant 2048 : index
    %c0_11 = arith.constant 0 : index
    %25 = vector.load %arg7[%c2048, %c0_11] : memref<4096x512xbf16, #tpu.memory_space<vmem>>, vector<512x512xbf16>
    %cst_12 = arith.constant dense<0.000000e+00> : vector<2x512xf32>
    %26 = tpu.matmul %24, %25, %cst_12 {dimension_numbers = #tpu.dot_dimension_numbers<[1], [0], [0], [1], [0, 0, 1, 1], [], []>} : vector<2x512xbf16>, vector<512x512xbf16>, vector<2x512xf32> -> vector<2x512xf32>
    %27 = arith.addf %23, %26 : vector<2x512xf32>
    %28 = vector.extract_strided_slice %6 {offsets = [10, 0], sizes = [2, 512], strides = [1, 1]} : vector<16x512xbf16> to vector<2x512xbf16>
    %c2560 = arith.constant 2560 : index
    %c0_13 = arith.constant 0 : index
    %29 = vector.load %arg7[%c2560, %c0_13] : memref<4096x512xbf16, #tpu.memory_space<vmem>>, vector<512x512xbf16>
    %cst_14 = arith.constant dense<0.000000e+00> : vector<2x512xf32>
    %30 = tpu.matmul %28, %29, %cst_14 {dimension_numbers = #tpu.dot_dimension_numbers<[1], [0], [0], [1], [0, 0, 1, 1], [], []>} : vector<2x512xbf16>, vector<512x512xbf16>, vector<2x512xf32> -> vector<2x512xf32>
    %31 = arith.addf %27, %30 : vector<2x512xf32>
    %32 = vector.extract_strided_slice %6 {offsets = [12, 0], sizes = [2, 512], strides = [1, 1]} : vector<16x512xbf16> to vector<2x512xbf16>
    %c3072 = arith.constant 3072 : index
    %c0_15 = arith.constant 0 : index
    %33 = vector.load %arg7[%c3072, %c0_15] : memref<4096x512xbf16, #tpu.memory_space<vmem>>, vector<512x512xbf16>
    %cst_16 = arith.constant dense<0.000000e+00> : vector<2x512xf32>
    %34 = tpu.matmul %32, %33, %cst_16 {dimension_numbers = #tpu.dot_dimension_numbers<[1], [0], [0], [1], [0, 0, 1, 1], [], []>} : vector<2x512xbf16>, vector<512x512xbf16>, vector<2x512xf32> -> vector<2x512xf32>
    %35 = arith.addf %31, %34 : vector<2x512xf32>
    %36 = vector.extract_strided_slice %6 {offsets = [14, 0], sizes = [2, 512], strides = [1, 1]} : vector<16x512xbf16> to vector<2x512xbf16>
    %c3584 = arith.constant 3584 : index
    %c0_17 = arith.constant 0 : index
    %37 = vector.load %arg7[%c3584, %c0_17] : memref<4096x512xbf16, #tpu.memory_space<vmem>>, vector<512x512xbf16>
    %cst_18 = arith.constant dense<0.000000e+00> : vector<2x512xf32>
    %38 = tpu.matmul %36, %37, %cst_18 {dimension_numbers = #tpu.dot_dimension_numbers<[1], [0], [0], [1], [0, 0, 1, 1], [], []>} : vector<2x512xbf16>, vector<512x512xbf16>, vector<2x512xf32> -> vector<2x512xf32>
    %39 = arith.addf %35, %38 : vector<2x512xf32>
    %c0_19 = arith.constant 0 : index
    %c0_20 = arith.constant 0 : index
    %40 = vector.load %arg14[%c0_19, %c0_20] : memref<2x512xf32, #tpu.memory_space<vmem>>, vector<2x512xf32>
    tpu.vector_store %arg14[%c0_19, %c0_20], %39 {strides = array<i32>} : memref<2x512xf32, #tpu.memory_space<vmem>>, vector<2x512xf32>,
    %c7_i32 = arith.constant 7 : i32
    %41 = arith.cmpi eq, %arg0, %c7_i32 : i32
    %42 = arith.extui %41 : i1 to i32
    %c0_i32_21 = arith.constant 0 : i32
    %43 = arith.cmpi ne, %42, %c0_i32_21 : i32
    scf.if %43 {
      %c0_22 = arith.constant 0 : index
      %c0_23 = arith.constant 0 : index
      %44 = vector.load %arg14[%c0_22, %c0_23] : memref<2x512xf32, #tpu.memory_space<vmem>>, vector<2x512xf32>
      %cst_24 = arith.constant 0.000000e+00 : f32
      %45 = vector.broadcast %cst_24 : f32 to vector<2x512xf32>
      %46 = arith.maximumf %44, %45 : vector<2x512xf32>
      %c0_25 = arith.constant 0 : index
      %c0_26 = arith.constant 0 : index
      %47 = vector.load %arg10[%c0_25, %c0_26] : memref<512x128xf32, #tpu.memory_space<vmem>>, vector<512x128xf32>
      %cst_27 = arith.constant dense<0.000000e+00> : vector<2x128xf32>
      %48 = tpu.matmul %46, %47, %cst_27 {dimension_numbers = #tpu.dot_dimension_numbers<[1], [0], [0], [1], [0, 0, 1, 1], [], []>} : vector<2x512xf32>, vector<512x128xf32>, vector<2x128xf32> -> vector<2x128xf32>
      %c0_28 = arith.constant 0 : index
      %c0_29 = arith.constant 0 : index
      %49 = vector.load %arg11[%c0_28, %c0_29] : memref<1x128xf32, #tpu.memory_space<vmem>>, vector<1x128xf32>
      %50 = vector.broadcast %49 : vector<1x128xf32> to vector<2x128xf32>
      %51 = arith.addf %48, %50 : vector<2x128xf32>
      %c0_30 = arith.constant 0 : index
      %c0_31 = arith.constant 0 : index
      %52 = vector.load %arg12[%c0_30, %c0_31] : memref<2x128xf32, #tpu.memory_space<vmem>>, vector<2x128xf32>
      tpu.vector_store %arg12[%c0_30, %c0_31], %51 {strides = array<i32>} : memref<2x128xf32, #tpu.memory_space<vmem>>, vector<2x128xf32>,
    } else {
    }
    return
  }
  func.func @transform_0(%arg0: i32) -> (i32, i32) {
    %c0_i32 = arith.constant 0 : i32
    %c0_i32_0 = arith.constant 0 : i32
    %c0_i32_1 = arith.constant 0 : i32
    return %c0_i32, %c0_i32_0 : i32, i32
  }
  func.func @transform_1(%arg0: i32) -> (i32, i32) {
    %c0_i32 = arith.constant 0 : i32
    %c0_i32_0 = arith.constant 0 : i32
    %c0_i32_1 = arith.constant 0 : i32
    return %c0_i32, %c0_i32_0 : i32, i32
  }
  func.func @transform_2(%arg0: i32) -> (i32, i32) {
    %c0_i32 = arith.constant 0 : i32
    %c0_i32_0 = arith.constant 0 : i32
    %c0_i32_1 = arith.constant 0 : i32
    return %c0_i32, %c0_i32_0 : i32, i32
  }
  func.func @transform_3(%arg0: i32) -> (i32, i32) {
    %c0_i32 = arith.constant 0 : i32
    %c0_i32_0 = arith.constant 0 : i32
    %c0_i32_1 = arith.constant 0 : i32
    return %c0_i32, %c0_i32_0 : i32, i32
  }
  func.func @transform_4(%arg0: i32) -> (i32, i32) {
    %c0_i32 = arith.constant 0 : i32
    %c0_i32_0 = arith.constant 0 : i32
    %c0_i32_1 = arith.constant 0 : i32
    return %c0_i32, %c0_i32_0 : i32, i32
  }
  func.func @transform_5(%arg0: i32) -> (i32, i32) {
    %c0_i32 = arith.constant 0 : i32
    %c0_i32_0 = arith.constant 0 : i32
    %c0_i32_1 = arith.constant 0 : i32
    return %c0_i32, %c0_i32_0 : i32, i32
  }
  func.func @transform_6(%arg0: i32) -> (i32, i32) {
    %c0_i32 = arith.constant 0 : i32
    %c0_i32_0 = arith.constant 0 : i32
    return %arg0, %c0_i32 : i32, i32
  }
  func.func @transform_7(%arg0: i32) -> (i32, i32) {
    %c0_i32 = arith.constant 0 : i32
    %c0_i32_0 = arith.constant 0 : i32
    %c0_i32_1 = arith.constant 0 : i32
    return %c0_i32, %c0_i32_0 : i32, i32
  }
  func.func @transform_8(%arg0: i32) -> (i32, i32) {
    %c0_i32 = arith.constant 0 : i32
    %c0_i32_0 = arith.constant 0 : i32
    %c0_i32_1 = arith.constant 0 : i32
    return %c0_i32, %c0_i32_0 : i32, i32
  }
  func.func @transform_9(%arg0: i32) -> (i32, i32) {
    %c0_i32 = arith.constant 0 : i32
    %c0_i32_0 = arith.constant 0 : i32
    %c0_i32_1 = arith.constant 0 : i32
    return %c0_i32, %c0_i32_0 : i32, i32
  }
  func.func @transform_10(%arg0: i32) -> (i32, i32) {
    %c0_i32 = arith.constant 0 : i32
    %c0_i32_0 = arith.constant 0 : i32
    %c0_i32_1 = arith.constant 0 : i32
    return %c0_i32, %c0_i32_0 : i32, i32
  }
  func.func @transform_11(%arg0: i32) -> (i32, i32) {
    %c0_i32 = arith.constant 0 : i32
    %c0_i32_0 = arith.constant 0 : i32
    %c0_i32_1 = arith.constant 0 : i32
    return %c0_i32, %c0_i32_0 : i32, i32
  }
}

</mosaic_0001>

<bundles_post_ra>
// kernel: deeplab_forward.1
= control target key start
LH: loop header
LB: loop body
LE: loop exit
PB: predicated region body
PF: predicated region fallthrough
CT: control target
= control target key end

     0   :  { %s18545_s0 = inlined_call_operand.vmem [shape: f32[128,4], index: 0, kind: input, shape index: {}]   ;;  %s18546_s1 = inlined_call_operand.hbm [shape: f32[4,512], index: 1, kind: input, shape index: {}]   ;;  %s18547_s2 = inlined_call_operand.hbm [shape: f32[1,512], index: 2, kind: input, shape index: {}]   ;;  %s18548_s3 = inlined_call_operand.hbm [shape: f32[2,76], index: 3, kind: input, shape index: {}]   ;;  %s18549_s4 = inlined_call_operand.hbm [shape: f32[76,512], index: 4, kind: input, shape index: {}]   ;;  %s18550_s5 = inlined_call_operand.hbm [shape: f32[1,512], index: 5, kind: input, shape index: {}]   ;;  %s18551_s6 = inlined_call_operand.hbm [shape: bf16[32768,512], index: 6, kind: input, shape index: {}]   ;;  %s18552_s7 = inlined_call_operand.hbm [shape: bf16[512,512], index: 7, kind: input, shape index: {}]   ;;  %s18553_s8 = inlined_call_operand.hbm [shape: f32[1,512], index: 8, kind: input, shape index: {}]   ;;  %s18554_s9 = inlined_call_operand.hbm [shape: f32[512,128], index: 9, kind: input, shape index: {}]   ;;  %s18555_s10 = inlined_call_operand.hbm [shape: f32[1,128], index: 10, kind: input, shape index: {}]   ;;  %s18556_s11 = inlined_call_operand.hbm [shape: f32[2,128], index: 11, kind: output, shape index: {}]  }
   0x1   :  { %18652 = sst [smem:[#allocation80_spill]] %s18545_s0 }
   0x2   :  { %18653 = sst [smem:[#allocation81_spill]] %s18547_s2 }
   0x3   :  { %18654 = sst [smem:[#allocation82_spill]] %s18549_s4 }
   0x4   :  { %18655 = sst [smem:[#allocation83_spill]] %s18556_s11 }
   0x5   :  { %16 = vsyncpa [#allocation5], 0 }
   0x6   :  { %17 = vsyncpa [#allocation8], 0 }
   0x7   :  { %18 = vsyncpa [#allocation11], 0 }
   0x8   :  { %19 = vsyncpa [#allocation14], 0 }
   0x9   :  { %21 = vsyncpa [#allocation14 + $0x1], 0 }
   0xa   :  { %22 = vsyncpa [#allocation17], 0 }
   0xb   :  { %23 = vsyncpa [#allocation20], 0 }
   0xc   :  { %24 = vsyncpa [#allocation6], 0  ;;  %s15924_s17 = smov 0   ;;  %s15926_s18 = smov 0  }
   0xd   :  { %s15928_s19 = smov 0   ;;  %s15930_s20 = smov 0  }
   0xe LB: > { %s15842_s21 = smov [#allocation7]   ;;  %s15945_s23 = sadd.s32 4294967295, %s15840_s20   ;;  %s15840_s20 = sphi %s15930_s20, %s18822_s20   ;;  %s15836_s19 = sphi %s15928_s19, %s18821_s19   ;;  %s15832_s18 = sphi %s15926_s18, %s18820_s18   ;;  %s15828_s17 = sphi %s15924_s17, %s18819_s17  }
   0xf   : > { %s319_s22 = sshll.u32 %s15842_s21, 4  ;;  %p11860_p0 = scmp.ge.s32.totalorder %s15840_s20, 1  ;;  %s320_s22 = int_to_ptr.vmem [resolvable:$true] %s319_s22 }
  0x10   : > { %p18557_p1 = scmp.eq.s32.totalorder %s15945_s23, 0  ;;  %p292_p2 = scmp.lt.s32.totalorder %s15840_s20, 9 }
  0x11   : > { %s15843_s25 = smov [#allocation10]   ;;  %s15844_s28 = smov [#allocation15]  }
  0x12   : > { %p15951_p4 = pnand %p11860_p0, %p292_p2  ;;  %s340_s26 = sshll.u32 %s15843_s25, 4  ;;  %s15957_s26 = int_to_ptr.vmem [resolvable:$true] %s340_s26 }
  0x13   : > { %s364_s29 = sshll.u32 %s15844_s28, 4  ;;  %s18659_s2 = sld [smem:[#allocation81_spill]]  ;;  %s15965_s29 = int_to_ptr.vmem [resolvable:$true] %s364_s29 }
  0x14   : > { %s18656_s24 = scalar_select %p15951_p4, 1, 0 }
  0x15   : > { %p13610_p5 = pneg %p15951_p4 }
  0x16   : > { %18657 = sst [smem:[#allocation30_spill]] %s18656_s24 }
  0x17   : > { %p15961_p6 = pnand %p13610_p5, %p18557_p1 }
  0x19   : > { %s15470_s13 = scalar_lea.hbm %s18659_s2, 64  ;;  %p15975_p8 = pneg %p15961_p6 }
  0x1a   : > { %p15471_p7 = scmp.ne.s32.totalorder %s18659_s2, %s15470_s13  ;;  %p15477_p11 = scmp.lt.u32.totalorder %s15470_s13, %s18659_s2 }
  0x1c   : > { %p15473_p9 = pnand %p15975_p8, %p15471_p7 }
  0x1e   : > { %p15474_p10 = pneg %p15473_p9 }
  0x20   : > { %p15479_p12 = pnand %p15477_p11, %p15474_p10 }
  0x22   : > { %15482 = shalt.err (!%p15479_p12)
}
  0x23   : > { %s15483_s28 = scalar_lea.vmem %s320_s22, 64  ;;  %p15491_p5 = scmp.lt.s32.totalorder %s320_s22, %s320_s22 }
  0x24   : > { %p15484_p13 = scmp.ne.s32.totalorder %s320_s22, %s15483_s28  ;;  %p15492_p3 = scmp.lt.s32.totalorder %s15483_s28, %s15483_s28 }
  0x26   : > { %p15486_p0 = pnand %p15484_p13, %p15975_p8  ;;  %p15493_p1 = por %p15492_p3, %p15491_p5 }
  0x28   : > { %p15487_p2 = pneg %p15486_p0 }
  0x2a   : > { %p15494_p4 = pnand %p15493_p1, %p15487_p2 }
  0x2c   : > { %15497 = shalt.err (!%p15494_p4)
}
  0x2d   : > { %13616 = dma.hbm_to_vmem [thread:$0]  (!%p15961_p6), %s18659_s2, 64, %s320_s22, [#allocation8]  }
  0x2e   : > { %s18661_s4 = sld [smem:[#allocation82_spill]] }
  0x34   : > { %s15498_s15 = scalar_lea.hbm %s18661_s4, 5120 }
  0x35   : > { %p15499_p7 = scmp.ne.s32.totalorder %s18661_s4, %s15498_s15  ;;  %p15505_p1 = scmp.lt.u32.totalorder %s15498_s15, %s18661_s4 }
  0x37   : > { %p15501_p9 = pnand %p15499_p7, %p15975_p8 }
  0x39   : > { %p15502_p3 = pneg %p15501_p9 }
  0x3b   : > { %p15507_p4 = pnand %p15505_p1, %p15502_p3 }
  0x3d   : > { %15510 = shalt.err (!%p15507_p4)
}
  0x3e   : > { %s15511_s22 = scalar_lea.vmem %s15957_s26, 5120  ;;  %p15519_p13 = scmp.lt.s32.totalorder %s15957_s26, %s15957_s26 }
  0x3f   : > { %p15512_p10 = scmp.ne.s32.totalorder %s15957_s26, %s15511_s22  ;;  %p15520_p0 = scmp.lt.s32.totalorder %s15511_s22, %s15511_s22 }
  0x41   : > { %p15514_p11 = pnand %p15512_p10, %p15975_p8  ;;  %p15521_p2 = por %p15520_p0, %p15519_p13 }
  0x43   : > { %p15515_p12 = pneg %p15514_p11 }
  0x45   : > { %p15522_p5 = pnand %p15521_p2, %p15515_p12 }
  0x47   : > { %15525 = shalt.err (!%p15522_p5)
}
  0x48   : > { %s15845_s30 = smov 512   ;;  %s15846_s11 = smov 32  }
  0x49   : > { %13622 = dma.hbm_to_vmem [thread:$0]  (!%p15961_p6), %s18661_s4, 5120, %s15957_s26, [#allocation11], %s15845_s30, %s15845_s30, %s15846_s11  }
  0x4a   : > { %s15526_s21 = scalar_lea.hbm %s18552_s7, 16384 }
  0x4b   : > { %p15527_p7 = scmp.ne.s32.totalorder %s18552_s7, %s15526_s21  ;;  %p15533_p1 = scmp.lt.u32.totalorder %s15526_s21, %s18552_s7 }
  0x4d   : > { %p15529_p9 = pnand %p15527_p7, %p15975_p8 }
  0x4f   : > { %p15530_p3 = pneg %p15529_p9 }
  0x51   : > { %p15535_p4 = pnand %p15533_p1, %p15530_p3 }
  0x53   : > { %15538 = shalt.err (!%p15535_p4)
}
  0x54   : > { %s15539_s26 = scalar_lea.vmem %s15965_s29, 16384  ;;  %p15547_p13 = scmp.lt.s32.totalorder %s15965_s29, %s15965_s29 }
  0x55   : > { %p15540_p10 = scmp.ne.s32.totalorder %s15965_s29, %s15539_s26  ;;  %p15548_p0 = scmp.lt.s32.totalorder %s15539_s26, %s15539_s26 }
  0x57   : > { %p15542_p11 = pnand %p15540_p10, %p15975_p8  ;;  %p15549_p2 = por %p15548_p0, %p15547_p13 }
  0x59   : > { %p15543_p12 = pneg %p15542_p11 }
  0x5b   : > { %p15550_p5 = pnand %p15549_p2, %p15543_p12 }
  0x5d   : > { %15553 = shalt.err (!%p15550_p5)
}
  0x5e   : > { %s15847_s30 = smov 256   ;;  %s15848_s2 = smov 16  }
  0x5f   : > { %13628 = dma.hbm_to_vmem [thread:$0]  (!%p15961_p6), %s18552_s7, 16384, %s15965_s29, [#allocation14], %s15847_s30, %s15847_s30, %s15848_s2  }
  0x60   : > { %s15849_s13 = smov [#allocation16]   ;;  %s15850_s15 = smov [#allocation4]  }
  0x61   : > { %s378_s14 = sshll.u32 %s15849_s13, 4  ;;  %s308_s21 = sshll.u32 %s15850_s15, 4  ;;  %s379_s14 = int_to_ptr.vmem [resolvable:$true] %s378_s14  ;;  %s309_s21 = int_to_ptr.vmem [resolvable:$true] %s308_s21 }
  0x62   : > { %s15554_s22 = scalar_lea.hbm %s18553_s8, 64 }
  0x63   : > { %p15555_p7 = scmp.ne.s32.totalorder %s18553_s8, %s15554_s22  ;;  %p15561_p1 = scmp.lt.u32.totalorder %s15554_s22, %s18553_s8 }
  0x65   : > { %p15557_p9 = pnand %p15555_p7, %p15975_p8 }
  0x67   : > { %p15558_p3 = pneg %p15557_p9 }
  0x69   : > { %p15563_p4 = pnand %p15561_p1, %p15558_p3 }
  0x6b   : > { %15566 = shalt.err (!%p15563_p4)
}
  0x6c   : > { %s15567_s29 = scalar_lea.vmem %s379_s14, 64  ;;  %p15575_p13 = scmp.lt.s32.totalorder %s379_s14, %s379_s14 }
  0x6d   : > { %p15568_p10 = scmp.ne.s32.totalorder %s379_s14, %s15567_s29  ;;  %p15576_p0 = scmp.lt.s32.totalorder %s15567_s29, %s15567_s29 }
  0x6f   : > { %p15570_p11 = pnand %p15568_p10, %p15975_p8  ;;  %p15577_p2 = por %p15576_p0, %p15575_p13 }
  0x71   : > { %p15571_p12 = pneg %p15570_p11 }
  0x73   : > { %p15578_p5 = pnand %p15577_p2, %p15571_p12 }
  0x75   : > { %15581 = shalt.err (!%p15578_p5)
}
  0x76   : > { %13631 = dma.hbm_to_vmem [thread:$0]  (!%p15961_p6), %s18553_s8, 64, %s379_s14, [#allocation17]  }
  0x77   : > { %s15582_s12 = scalar_lea.hbm %s18546_s1, 256 }
  0x78   : > { %p15583_p7 = scmp.ne.s32.totalorder %s18546_s1, %s15582_s12  ;;  %p15589_p1 = scmp.lt.u32.totalorder %s15582_s12, %s18546_s1 }
  0x7a   : > { %p15585_p9 = pnand %p15583_p7, %p15975_p8 }
  0x7c   : > { %p15586_p3 = pneg %p15585_p9 }
  0x7e   : > { %p15591_p4 = pnand %p15589_p1, %p15586_p3 }
  0x80   : > { %15594 = shalt.err (!%p15591_p4)
}
  0x81   : > { %s15595_s22 = scalar_lea.vmem %s309_s21, 256  ;;  %p15603_p13 = scmp.lt.s32.totalorder %s309_s21, %s309_s21 }
  0x82   : > { %p15596_p10 = scmp.ne.s32.totalorder %s309_s21, %s15595_s22  ;;  %p15604_p0 = scmp.lt.s32.totalorder %s15595_s22, %s15595_s22 }
  0x84   : > { %p15598_p11 = pnand %p15596_p10, %p15975_p8  ;;  %p15605_p2 = por %p15604_p0, %p15603_p13 }
  0x86   : > { %p15599_p12 = pneg %p15598_p11 }
  0x88   : > { %p15606_p5 = pnand %p15605_p2, %p15599_p12 }
  0x8a   : > { %15609 = shalt.err (!%p15606_p5)
}
  0x8b   : > { %13613 = dma.hbm_to_vmem [thread:$0]  (!%p15961_p6), %s18546_s1, 256, %s309_s21, [#allocation5]  }
  0x8c   : > { %s15851_s29 = smov [#allocation9]   ;;  %s15852_s11 = smov [#allocation12]  }
  0x8d   : > { %s330_s4 = sshll.u32 %s15851_s29, 4  ;;  %s354_s0 = sshll.u32 %s15852_s11, 4  ;;  %s331_s4 = int_to_ptr.vmem [resolvable:$true] %s330_s4  ;;  %s355_s0 = int_to_ptr.vmem [resolvable:$true] %s354_s0 }
  0x8e   : > { %s15610_s13 = scalar_lea.hbm %s18548_s3, 32 }
  0x8f   : > { %p15611_p7 = scmp.ne.s32.totalorder %s18548_s3, %s15610_s13  ;;  %p15617_p1 = scmp.lt.u32.totalorder %s15610_s13, %s18548_s3 }
  0x91   : > { %p15613_p9 = pnand %p15611_p7, %p15975_p8 }
  0x93   : > { %p15614_p3 = pneg %p15613_p9 }
  0x95   : > { %p15619_p4 = pnand %p15617_p1, %p15614_p3 }
  0x97   : > { %15622 = shalt.err (!%p15619_p4)
}
  0x98   : > { %s15623_s21 = scalar_lea.vmem %s331_s4, 32  ;;  %p15631_p13 = scmp.lt.s32.totalorder %s331_s4, %s331_s4 }
  0x99   : > { %p15624_p10 = scmp.ne.s32.totalorder %s331_s4, %s15623_s21  ;;  %p15632_p0 = scmp.lt.s32.totalorder %s15623_s21, %s15623_s21 }
  0x9b   : > { %p15626_p11 = pnand %p15624_p10, %p15975_p8  ;;  %p15633_p2 = por %p15632_p0, %p15631_p13 }
  0x9d   : > { %p15627_p12 = pneg %p15626_p11 }
  0x9f   : > { %p15634_p5 = pnand %p15633_p2, %p15627_p12 }
  0xa1   : > { %15637 = shalt.err (!%p15634_p5)
}
  0xa2   : > { %13619 = dma.hbm_to_vmem [thread:$0]  (!%p15961_p6), %s18548_s3, 32, %s331_s4, [#allocation8]  }
  0xa3   : > { %s15638_s24 = scalar_lea.hbm %s18550_s5, 64 }
  0xa4   : > { %p15639_p7 = scmp.ne.s32.totalorder %s18550_s5, %s15638_s24  ;;  %p15645_p1 = scmp.lt.u32.totalorder %s15638_s24, %s18550_s5 }
  0xa6   : > { %p15641_p9 = pnand %p15639_p7, %p15975_p8 }
  0xa8   : > { %p15642_p3 = pneg %p15641_p9 }
  0xaa   : > { %p15647_p4 = pnand %p15645_p1, %p15642_p3 }
  0xac   : > { %15650 = shalt.err (!%p15647_p4)
}
  0xad   : > { %s15651_s28 = scalar_lea.vmem %s355_s0, 64  ;;  %p15659_p13 = scmp.lt.s32.totalorder %s355_s0, %s355_s0 }
  0xae   : > { %p15652_p10 = scmp.ne.s32.totalorder %s355_s0, %s15651_s28  ;;  %p15660_p0 = scmp.lt.s32.totalorder %s15651_s28, %s15651_s28 }
  0xb0   : > { %p15654_p11 = pnand %p15652_p10, %p15975_p8  ;;  %p15661_p2 = por %p15660_p0, %p15659_p13 }
  0xb2   : > { %p15655_p12 = pneg %p15654_p11 }
  0xb4   : > { %p15662_p5 = pnand %p15661_p2, %p15655_p12 }
  0xb6   : > { %15665 = shalt.err (!%p15662_p5)
}
  0xb7   : > { %13625 = dma.hbm_to_vmem [thread:$0]  (!%p15961_p6), %s18550_s5, 64, %s355_s0, [#allocation11]  }
  0xb8   : > { %s15853_s21 = smov [#allocation18]   ;;  %s15666_s11 = scalar_lea.hbm %s18554_s9, 8192 }
  0xb9   : > { %s388_s14 = sshll.u32 %s15853_s21, 4  ;;  %p15667_p7 = scmp.ne.s32.totalorder %s18554_s9, %s15666_s11  ;;  %s389_s14 = int_to_ptr.vmem [resolvable:$true] %s388_s14 }
  0xba   : > { %p15673_p1 = scmp.lt.u32.totalorder %s15666_s11, %s18554_s9 }
  0xbb   : > { %p15669_p9 = pnand %p15667_p7, %p15975_p8 }
  0xbd   : > { %p15670_p3 = pneg %p15669_p9 }
  0xbf   : > { %p15675_p4 = pnand %p15673_p1, %p15670_p3 }
  0xc1   : > { %15678 = shalt.err (!%p15675_p4)
}
  0xc2   : > { %s15679_s0 = scalar_lea.vmem %s389_s14, 8192  ;;  %p15687_p13 = scmp.lt.s32.totalorder %s389_s14, %s389_s14 }
  0xc3   : > { %p15680_p10 = scmp.ne.s32.totalorder %s389_s14, %s15679_s0  ;;  %p15688_p0 = scmp.lt.s32.totalorder %s15679_s0, %s15679_s0 }
  0xc5   : > { %p15682_p11 = pnand %p15680_p10, %p15975_p8  ;;  %p15689_p2 = por %p15688_p0, %p15687_p13 }
  0xc7   : > { %p15683_p12 = pneg %p15682_p11 }
  0xc9   : > { %p15690_p5 = pnand %p15689_p2, %p15683_p12 }
  0xcb   : > { %15693 = shalt.err (!%p15690_p5)
}
  0xcc   : > { %s15854_s25 = smov 128   ;;  %s15855_s28 = smov 8  }
  0xcd   : > { %13634 = dma.hbm_to_vmem [thread:$0]  (!%p15961_p6), %s18554_s9, 8192, %s389_s14, [#allocation17], %s15854_s25, %s15854_s25, %s15855_s28  }
  0xce   : > { %s15856_s21 = smov [#allocation19]   ;;  %s15694_s24 = scalar_lea.hbm %s18555_s10, 16 }
  0xcf   : > { %s402_s26 = sshll.u32 %s15856_s21, 4  ;;  %p15695_p7 = scmp.ne.s32.totalorder %s18555_s10, %s15694_s24  ;;  %s403_s26 = int_to_ptr.vmem [resolvable:$true] %s402_s26 }
  0xd0   : > { %p15701_p1 = scmp.lt.u32.totalorder %s15694_s24, %s18555_s10 }
  0xd1   : > { %p15697_p9 = pnand %p15695_p7, %p15975_p8 }
  0xd3   : > { %p15698_p3 = pneg %p15697_p9 }
  0xd5   : > { %p15703_p4 = pnand %p15701_p1, %p15698_p3 }
  0xd7   : > { %15706 = shalt.err (!%p15703_p4)
}
  0xd8   : > { %s15707_s14 = scalar_lea.vmem %s403_s26, 16  ;;  %s15714_s25 = scalar_lea.vmem %s403_s26, 32 }
  0xd9   : > { %p15708_p10 = scmp.ne.s32.totalorder %s403_s26, %s15707_s14  ;;  %p15715_p13 = scmp.lt.s32.totalorder %s403_s26, %s403_s26 }
  0xda   : > { %p15716_p0 = scmp.lt.s32.totalorder %s15714_s25, %s15707_s14 }
  0xdb   : > { %p15710_p11 = pnand %p15708_p10, %p15975_p8 }
  0xdc   : > { %p15717_p2 = por %p15716_p0, %p15715_p13 }
  0xdd   : > { %p15711_p12 = pneg %p15710_p11 }
  0xdf   : > { %p15718_p5 = pnand %p15717_p2, %p15711_p12 }
  0xe1   : > { %15721 = shalt.err (!%p15718_p5)
}
  0xe2   : > { %13637 = dma.hbm_to_vmem [thread:$0]  (!%p15961_p6), %s18555_s10, 16, %s403_s26, [#allocation20]  }
  0xe3   : > { %s16149_s16 = sadd.s32 1, %s15840_s20   ;;  %s163_s22 = sadd.s32 1, %s15836_s19 }
  0xe4   : > { %s160_s27 = ssub.s32 %s15840_s20, %s16149_s16  ;;  %p170_p7 = scmp.ne.s32.totalorder %s15836_s19, %s15832_s18 }
  0xe5   : > { %p161_p8 = scmp.eq.s32.totalorder %s160_s27, 0  ;;  %p171_p9 = scmp.eq.s32.totalorder %s15840_s20, 0 }
  0xe6   : > { %p176_p3 = scmp.ne.s32.totalorder %s15832_s18, %s15828_s17  ;;  %p18662_p4 = scmp.eq.s32.totalorder %s15945_s23, 0 }
  0xe7   : > { %s16160_s21 = scalar_select %p161_p8, %s15836_s19, %s163_s22  }
  0xe8   : > { %p172_p1 = por %p171_p9, %p170_p7  ;;  %p16164_p10 = por %p18662_p4, %p176_p3 }
  0xe9   : > { %p13651_p11 = scmp.lt.s32.totalorder %s15840_s20, 8  ;;  %s413_s11 = sand.u32 1, %s15840_s20  }
  0xea   : > { %s415_s26 = sand.u32 1, %s15836_s19   ;;  %s13184_s12 = sshll.u32 %s15840_s20, 17 }
  0xeb   : > { %s11871_s24 = sshll.u32 %s415_s26, 13  ;;  %s16175_s0 = scalar_lea.hbm %s18551_s6, %s13184_s12 }
  0xec   : > { %s417_s17 = scalar_lea.vmem [#allocation13], %s11871_s24  ;;  %p16177_p6 = pnand %p13651_p11, %p172_p1 }
  0xed   : > { %s425_s14 = sshll.u32 %s417_s17, 4  ;;  %s16183_s20 = scalar_lea.sflag [#allocation14], %s413_s11  ;;  %s16181_s14 = int_to_ptr.vmem [resolvable:$true] %s425_s14 }
  0xee   : > { %s15722_s28 = scalar_lea.hbm %s16175_s0, 131072  ;;  %p15724_p13 = pneg %p16177_p6 }
  0xef   : > { %p15723_p12 = scmp.ne.s32.totalorder %s16175_s0, %s15722_s28  ;;  %s15727_s22 = scalar_lea.hbm %s18551_s6, 1048576 }
  0xf0   : > { %p15728_p5 = scmp.lt.u32.totalorder %s16175_s0, %s18551_s6  ;;  %p15729_p8 = scmp.lt.u32.totalorder %s15727_s22, %s15722_s28 }
  0xf1   : > { %p15725_p0 = pnand %p15724_p13, %p15723_p12  ;;  %p15731_p9 = scmp.lt.u32.totalorder %s15722_s28, %s16175_s0 }
  0xf2   : > { %p15730_p7 = por %p15729_p8, %p15728_p5 }
  0xf3   : > { %p15726_p2 = pneg %p15725_p0 }
  0xf4   : > { %p15732_p3 = por %p15731_p9, %p15730_p7 }
  0xf6   : > { %p15733_p1 = pnand %p15732_p3, %p15726_p2 }
  0xf8   : > { %15736 = shalt.err (!%p15733_p1)
}
  0xf9   : > { %s15737_s11 = scalar_lea.vmem %s16181_s14, 131072  ;;  %s15857_s12 = smov [#allocation13]  }
  0xfa   : > { %p15738_p4 = scmp.ne.s32.totalorder %s16181_s14, %s15737_s11  ;;  %s15742_s13 = sshll.u32 %s15857_s12, 4  ;;  %s15743_s13 = int_to_ptr.vmem [resolvable:$false] %s15742_s13 }
  0xfb   : > { %s15744_s15 = scalar_lea.vmem %s15743_s13, 262144  ;;  %p15745_p0 = scmp.lt.s32.totalorder %s16181_s14, %s15743_s13 }
  0xfc   : > { %p15740_p11 = pnand %p15738_p4, %p15724_p13  ;;  %p15746_p5 = scmp.lt.s32.totalorder %s15744_s15, %s15737_s11 }
  0xfe   : > { %p15741_p12 = pneg %p15740_p11  ;;  %p15747_p8 = por %p15746_p5, %p15745_p0 }
 0x100   : > { %p15748_p7 = pnand %p15747_p8, %p15741_p12 }
 0x102   : > { %15751 = shalt.err (!%p15748_p7)
}
 0x103   : > { %13641 = dma.hbm_to_vmem [thread:$0]  (!%p16177_p6), %s16175_s0, 131072, %s16181_s14, %s16183_s20, %s15847_s30, %s15847_s30, %s15848_s2  }
 0x104   : > { %s18665_s17 = sld [smem:[#allocation30_spill]] }
 0x10a   : > { %p18666_p13 = scmp.ne.s32.totalorder %s18665_s17, 0 }
 0x10b   : > { %p18667_p2 = scmp.eq.s32.totalorder (!%p18666_p13), %s15945_s23, 0 }
 0x10c   : > { %437 = sbr.rel (%p18666_p13) target bundleno = 3410 (0xd52), region = 64 }
 0x113   : > { %15795 = dma.done.wait (%p18667_p2), [#allocation5], 256   ;;  %p18668_p9 = pmov %p18667_p2 }
 0x114   : > { %p18669_p3 = pmov %p18667_p2 }
 0x115   : > { %15797 = vsyncadd (%p18668_p9), [#allocation5], 4294967040 }
 0x116   : > { %15799 = dma.done.wait (%p18669_p3), [#allocation8], 96   ;;  %p18670_p1 = pmov %p18667_p2 }
 0x118   : > { %15801 = vsyncadd (%p18670_p1), [#allocation8], 4294967200  ;;  %p18671_p4 = pmov %p18670_p1 }
 0x119   : > { %p18672_p6 = pmov %p18670_p1 }
 0x11a   : > { %15803 = dma.done.wait (%p18671_p4), [#allocation11], 5184  }
 0x11b   : > { %15805 = vsyncadd (%p18672_p6), [#allocation11], 4294962112  ;;  %s459_s30 = sand.u32 1, %s15945_s23   ;;  %s461_s2 = sand.u32 1, %s15832_s18  }
 0x11c   : > { %s11881_s0 = sshll.u32 %s461_s2, 13  ;;  %s460_s14 = scalar_lea.sflag [#allocation14], %s459_s30 }
 0x11d   : > { %s16230_s25 = scalar_lea.vmem [#allocation13], %s11881_s0 }
 0x11e   : > { %15807 = dma.done.wait (%p16164_p10), %s460_s14, 131072  }
 0x11f   : > { %15809 = vsyncadd (%p16164_p10), %s460_s14, 4294836224  ;;  %p18673_p11 = pmov %p18670_p1 }
 0x120   : > { %p18674_p12 = pmov %p18670_p1 }
 0x121   : > { %15811 = dma.done.wait (%p18673_p11), [#allocation14], 16384  }
 0x122   : > { %15813 = vsyncadd (%p18674_p12), [#allocation14], 4294950912  ;;  %p18675_p0 = pmov %p18670_p1 }
 0x124   : > { %15815 = dma.done.wait (%p18675_p0), [#allocation17], 8256   ;;  %p18676_p5 = pmov %p18675_p0 }
 0x125   : > { %p18677_p8 = pmov %p18675_p0 }
 0x126   : > { %15817 = vsyncadd (%p18676_p5), [#allocation17], 4294959040 }
 0x127   : > { %15819 = dma.done.wait (%p18677_p8), [#allocation20], 16   ;;  %p18678_p7 = pmov %p18675_p0 }
 0x128   : > { %p18679_p10 = scmp.ne.s32.totalorder %s15945_s23, 0 }
 0x129   : > { %15821 = vsyncadd (%p18678_p7), [#allocation20], 4294967280 }
 0x12a   : > { %517 = sbr.rel (%p18679_p10) target bundleno = 1894 (0x766), region = 108 }
 0x131   : > { %v534_v0 = vld [vmem:[#allocation4] sm:$0xff]  ;;  %vm611_vm0 = vcmask 1043456   ;;  %v535_v1 = vld [vmem:[#allocation4 + $0x8] sm:$0xff]  ;;  %v18562_v4 = vmov 0.0   ;;  %s18680_s28 = sld [smem:[#allocation80_spill]]  ;;  %vm562_vm1 = vcmask 31744   ;;  %v18564_v21 = vlaneseq }
 0x132   : > { %v560_v2 = vcombine.high %v534_v0, %v534_v0  ;;  %v561_v3 = vcombine.high %v535_v1, %v535_v1  ;;  %684 = vmatprep.mubr.f32.mxu0 %v18562_v4  ;;  %845 = vmatprep.mubr.f32.mxu1 %v18562_v4  ;;  %v536_v25 = vld [vmem:[#allocation7] sm:$0xf]  ;;  %vm1411_vm4 = vcmask 1041408   ;;  %vm1362_vm5 = vcmask 15360  }
 0x133   : > { %v16369_v22 = vshrl.u32 %v18564_v21, 7 }
 0x134   : > { %11887 = vmatprep.subr.msk.mxu0 %vm611_vm0, %v560_v2  ;;  %11905 = vmatprep.subr.msk.mxu1 %vm611_vm0, %v561_v3 }
 0x135   : > { %11888 = vmatpush1.msk.msra.mxu0 %vm611_vm0, %v534_v0  ;;  %11906 = vmatpush1.msk.msra.mxu1 %vm611_vm0, %v535_v1  ;;  %18681 = vst [vmem:[#allocation31_spill] sm:$0xff] %v16369_v22  ;;  %v16372_v23 = vsub.s32 2, %v16369_v22  ;;  %v16375_v24 = vsub.s32 3, %v16369_v22  ;;  %v16378_v26 = vsub.s32 1, %v16369_v22  ;;  %v16381_v27 = vsub.s32 0, %v16369_v22 }
 0x137   : > { %v518_v5 = vld [vmem:[%s18680_s28] sm:$0xff]  ;;  %v519_v6 = vld [vmem:[%s18680_s28 + $0x8] sm:$0xff]  ;;  %v520_v7 = vld [vmem:[%s18680_s28 + $0x10] sm:$0xff]  ;;  %18682 = vst [vmem:[#allocation32_spill] sm:$0xff] %v16372_v23  ;;  %v16384_v28 = vrot.slane %v536_v25, %v16372_v23  ;;  %v16387_v31 = vrot.slane %v536_v25, %v16375_v24  ;;  %v16390_v34 = vrot.slane %v536_v25, %v16378_v26  ;;  %v16393_v35 = vrot.slane %v536_v25, %v16381_v27 }
 0x138   : > { %11889 = vmatmul.mubr.msk.f32.vlgmr.msra.gmra.mrb[0].mxu0 %vm562_vm1, %v518_v5  ;;  %11907 = vmatmul.mubr.msk.f32.vlgmr.msra.gmra.mrb[0].mxu1 %vm562_vm1, %v518_v5  ;;  %v521_v8 = vld [vmem:[%s18680_s28 + $0x18] sm:$0xff]  ;;  %v522_v9 = vld [vmem:[%s18680_s28 + $0x20] sm:$0xff]  ;;  %v523_v10 = vld [vmem:[%s18680_s28 + $0x28] sm:$0xff]  ;;  %18683 = vst [vmem:[#allocation33_spill] sm:$0xff] %v16375_v24 }
 0x139   : > { %690 = vmatprep.mubr.f32.mxu0 %v18562_v4  ;;  %851 = vmatprep.mubr.f32.mxu1 %v18562_v4  ;;  %v524_v11 = vld [vmem:[%s18680_s28 + $0x30] sm:$0xff]  ;;  %v525_v12 = vld [vmem:[%s18680_s28 + $0x38] sm:$0xff]  ;;  %v526_v13 = vld [vmem:[%s18680_s28 + $0x40] sm:$0xff]  ;;  %18684 = vst [vmem:[#allocation34_spill] sm:$0xff] %v16378_v26 }
 0x13a   : > { %v527_v14 = vld [vmem:[%s18680_s28 + $0x48] sm:$0xff]  ;;  %v528_v15 = vld [vmem:[%s18680_s28 + $0x50] sm:$0xff]  ;;  %v529_v16 = vld [vmem:[%s18680_s28 + $0x58] sm:$0xff]  ;;  %18685 = vst [vmem:[#allocation35_spill] sm:$0xff] %v16381_v27 }
 0x13b   : > { %v530_v17 = vld [vmem:[%s18680_s28 + $0x60] sm:$0xff]  ;;  %v531_v18 = vld [vmem:[%s18680_s28 + $0x68] sm:$0xff]  ;;  %v532_v19 = vld [vmem:[%s18680_s28 + $0x70] sm:$0xff] }
 0x13c   : > { %11890 = vmatmul.mubr.msk.f32.gmra.mrb[2].mxu0 %vm562_vm1, %v519_v6  ;;  %11908 = vmatmul.mubr.msk.f32.gmra.mrb[2].mxu1 %vm562_vm1, %v519_v6  ;;  %v533_v20 = vld [vmem:[%s18680_s28 + $0x78] sm:$0xff] }
 0x13d   : > { %696 = vmatprep.mubr.f32.mxu0 %v18562_v4  ;;  %857 = vmatprep.mubr.f32.mxu1 %v18562_v4 }
 0x140   : > { %11891 = vmatmul.mubr.msk.f32.gmra.mrb[4].mxu0 %vm562_vm1, %v520_v7  ;;  %11909 = vmatmul.mubr.msk.f32.gmra.mrb[4].mxu1 %vm562_vm1, %v520_v7 }
 0x141   : > { %702 = vmatprep.mubr.f32.mxu0 %v18562_v4  ;;  %863 = vmatprep.mubr.f32.mxu1 %v18562_v4 }
 0x144   : > { %11892 = vmatmul.mubr.msk.f32.gmra.mrb[6].mxu0 %vm562_vm1, %v521_v8  ;;  %11910 = vmatmul.mubr.msk.f32.gmra.mrb[6].mxu1 %vm562_vm1, %v521_v8 }
 0x145   : > { %708 = vmatprep.mubr.f32.mxu0 %v18562_v4  ;;  %869 = vmatprep.mubr.f32.mxu1 %v18562_v4 }
 0x148   : > { %11893 = vmatmul.mubr.msk.f32.gmra.mrb[8].mxu0 %vm562_vm1, %v522_v9  ;;  %11911 = vmatmul.mubr.msk.f32.gmra.mrb[8].mxu1 %vm562_vm1, %v522_v9 }
 0x149   : > { %714 = vmatprep.mubr.f32.mxu0 %v18562_v4  ;;  %875 = vmatprep.mubr.f32.mxu1 %v18562_v4 }
 0x14c   : > { %11894 = vmatmul.mubr.msk.f32.gmra.mrb[10].mxu0 %vm562_vm1, %v523_v10  ;;  %11912 = vmatmul.mubr.msk.f32.gmra.mrb[10].mxu1 %vm562_vm1, %v523_v10 }
 0x14d   : > { %720 = vmatprep.mubr.f32.mxu0 %v18562_v4  ;;  %881 = vmatprep.mubr.f32.mxu1 %v18562_v4 }
 0x150   : > { %11895 = vmatmul.mubr.msk.f32.gmra.mrb[12].mxu0 %vm562_vm1, %v524_v11  ;;  %11913 = vmatmul.mubr.msk.f32.gmra.mrb[12].mxu1 %vm562_vm1, %v524_v11 }
 0x151   : > { %726 = vmatprep.mubr.f32.mxu0 %v18562_v4  ;;  %887 = vmatprep.mubr.f32.mxu1 %v18562_v4 }
 0x154   : > { %11896 = vmatmul.mubr.msk.f32.gmra.mrb[14].mxu0 %vm562_vm1, %v525_v12  ;;  %11914 = vmatmul.mubr.msk.f32.gmra.mrb[14].mxu1 %vm562_vm1, %v525_v12 }
 0x155   : > { %732 = vmatprep.mubr.f32.mxu0 %v18562_v4  ;;  %893 = vmatprep.mubr.f32.mxu1 %v18562_v4 }
 0x158   : > { %11897 = vmatmul.mubr.msk.f32.gmra.mrb[16].mxu0 %vm562_vm1, %v526_v13  ;;  %11915 = vmatmul.mubr.msk.f32.gmra.mrb[16].mxu1 %vm562_vm1, %v526_v13 }
 0x159   : > { %738 = vmatprep.mubr.f32.mxu0 %v18562_v4  ;;  %899 = vmatprep.mubr.f32.mxu1 %v18562_v4 }
 0x15c   : > { %11898 = vmatmul.mubr.msk.f32.gmra.mrb[18].mxu0 %vm562_vm1, %v527_v14  ;;  %11916 = vmatmul.mubr.msk.f32.gmra.mrb[18].mxu1 %vm562_vm1, %v527_v14 }
 0x15d   : > { %744 = vmatprep.mubr.f32.mxu0 %v18562_v4  ;;  %905 = vmatprep.mubr.f32.mxu1 %v18562_v4 }
 0x160   : > { %11899 = vmatmul.mubr.msk.f32.gmra.mrb[20].mxu0 %vm562_vm1, %v528_v15  ;;  %11917 = vmatmul.mubr.msk.f32.gmra.mrb[20].mxu1 %vm562_vm1, %v528_v15 }
 0x161   : > { %750 = vmatprep.mubr.f32.mxu0 %v18562_v4  ;;  %911 = vmatprep.mubr.f32.mxu1 %v18562_v4 }
 0x164   : > { %11900 = vmatmul.mubr.msk.f32.gmra.mrb[22].mxu0 %vm562_vm1, %v529_v16  ;;  %11918 = vmatmul.mubr.msk.f32.gmra.mrb[22].mxu1 %vm562_vm1, %v529_v16 }
 0x165   : > { %756 = vmatprep.mubr.f32.mxu0 %v18562_v4  ;;  %917 = vmatprep.mubr.f32.mxu1 %v18562_v4 }
 0x168   : > { %11901 = vmatmul.mubr.msk.f32.gmra.mrb[24].mxu0 %vm562_vm1, %v530_v17  ;;  %11919 = vmatmul.mubr.msk.f32.gmra.mrb[24].mxu1 %vm562_vm1, %v530_v17 }
 0x169   : > { %762 = vmatprep.mubr.f32.mxu0 %v18562_v4  ;;  %923 = vmatprep.mubr.f32.mxu1 %v18562_v4 }
 0x16c   : > { %11902 = vmatmul.mubr.msk.f32.gmra.mrb[26].mxu0 %vm562_vm1, %v531_v18  ;;  %11920 = vmatmul.mubr.msk.f32.gmra.mrb[26].mxu1 %vm562_vm1, %v531_v18 }
 0x16d   : > { %768 = vmatprep.mubr.f32.mxu0 %v18562_v4  ;;  %929 = vmatprep.mubr.f32.mxu1 %v18562_v4 }
 0x170   : > { %11903 = vmatmul.mubr.msk.f32.gmra.mrb[28].mxu0 %vm562_vm1, %v532_v19  ;;  %11921 = vmatmul.mubr.msk.f32.gmra.mrb[28].mxu1 %vm562_vm1, %v532_v19 }
 0x171   : > { %774 = vmatprep.mubr.f32.mxu0 %v18562_v4  ;;  %935 = vmatprep.mubr.f32.mxu1 %v18562_v4 }
 0x174   : > { %11904 = vmatmul.mubr.msk.f32.gmra.mrb[30].mxu0 %vm562_vm1, %v533_v20  ;;  %11922 = vmatmul.mubr.msk.f32.gmra.mrb[30].mxu1 %vm562_vm1, %v533_v20 }
 0x175   : > { %1280 = vmatprep.mubr.f32.mxu0 %v18562_v4  ;;  %1351 = vmatprep.mubr.f32.mxu1 %v18562_v4 }
 0x20b   : > { %v686_v29 = vpop.f32.mrb[0].mxu0  ;;  %v847_v30 = vpop.f32.mrb[0].mxu1 }
 0x20c   : > { %v688_v32 = vpop.f32.mrb[1].mxu0  ;;  %v849_v33 = vpop.f32.mrb[1].mxu1  ;;  %v16396_v36 = vadd.f32 %v847_v30, %v16384_v28  ;;  %v16417_v47 = vadd.f32 %v686_v29, %v16393_v35 }
 0x20d   : > { %v16399_v38 = vadd.f32 %v849_v33, %v16387_v31  ;;  %v16408_v44 = vadd.f32 %v688_v32, %v16390_v34 }
 0x20f   : > { %v692_v37 = vpop.f32.mrb[2].mxu0  ;;  %v853_v39 = vpop.f32.mrb[2].mxu1 }
 0x210   : > { %v16402_v40 = vadd.f32 %v692_v37, %v16393_v35  ;;  %v694_v41 = vpop.f32.mrb[3].mxu0  ;;  %v16405_v42 = vadd.f32 %v853_v39, %v16384_v28  ;;  %v855_v43 = vpop.f32.mrb[3].mxu1 }
 0x211   : > { %v16411_v45 = vadd.f32 %v694_v41, %v16390_v34  ;;  %v16414_v46 = vadd.f32 %v855_v43, %v16387_v31 }
 0x212   : > { %v13290_v48 = vpack.c.bf16 %v16405_v42, %v16396_v36  ;;  %v13258_v53 = vpack.c.bf16 %v16402_v40, %v16417_v47 }
 0x213   : > { %v13256_v49 = vpack.c.bf16 %v16411_v45, %v16408_v44  ;;  %v698_v50 = vpop.f32.mrb[4].mxu0  ;;  %v13288_v51 = vpack.c.bf16 %v16414_v46, %v16399_v38  ;;  %v859_v52 = vpop.f32.mrb[4].mxu1 }
 0x214   : > { %v700_v54 = vpop.f32.mrb[5].mxu0  ;;  %v861_v55 = vpop.f32.mrb[5].mxu1  ;;  %v16428_v56 = vadd.f32 %v859_v52, %v16384_v28  ;;  %v16449_v3 = vadd.f32 %v698_v50, %v16393_v35 }
 0x215   : > { %13257 = vmatprep.subr.bf16.mxu0 %v13256_v49  ;;  %13289 = vmatprep.subr.bf16.mxu1 %v13288_v51  ;;  %v16431_v58 = vadd.f32 %v861_v55, %v16387_v31  ;;  %v16440_v0 = vadd.f32 %v700_v54, %v16390_v34 }
 0x216   : > { %13259 = vmatpush1.bf16.msra.mxu0 %v13258_v53  ;;  %13291 = vmatpush1.bf16.msra.mxu1 %v13290_v48 }
 0x217   : > { %v704_v57 = vpop.f32.mrb[6].mxu0  ;;  %v865_v59 = vpop.f32.mrb[6].mxu1 }
 0x218   : > { %v16434_v60 = vadd.f32 %v704_v57, %v16393_v35  ;;  %v706_v61 = vpop.f32.mrb[7].mxu0  ;;  %v16437_v62 = vadd.f32 %v865_v59, %v16384_v28  ;;  %v867_v63 = vpop.f32.mrb[7].mxu1 }
 0x219   : > { %v16443_v1 = vadd.f32 %v706_v61, %v16390_v34  ;;  %v16446_v2 = vadd.f32 %v867_v63, %v16387_v31 }
 0x21a   : > { %v13294_v5 = vpack.c.bf16 %v16437_v62, %v16428_v56  ;;  %v13262_v10 = vpack.c.bf16 %v16434_v60, %v16449_v3 }
 0x21b   : > { %v13260_v6 = vpack.c.bf16 %v16443_v1, %v16440_v0  ;;  %v710_v7 = vpop.f32.mrb[8].mxu0  ;;  %v13292_v8 = vpack.c.bf16 %v16446_v2, %v16431_v58  ;;  %v871_v9 = vpop.f32.mrb[8].mxu1 }
 0x21c   : > { %v712_v11 = vpop.f32.mrb[9].mxu0  ;;  %v873_v12 = vpop.f32.mrb[9].mxu1  ;;  %v16460_v13 = vadd.f32 %v871_v9, %v16384_v28  ;;  %v16481_v32 = vadd.f32 %v710_v7, %v16393_v35 }
 0x21d   : > { %13261 = vmatprep.subr.bf16.mxu0 %v13260_v6  ;;  %13293 = vmatprep.subr.bf16.mxu1 %v13292_v8  ;;  %v16463_v15 = vadd.f32 %v873_v12, %v16387_v31  ;;  %v16472_v25 = vadd.f32 %v712_v11, %v16390_v34 }
 0x21e   : > { %13263 = vmatpush1.bf16.msra.mxu0 %v13262_v10  ;;  %13295 = vmatpush1.bf16.msra.mxu1 %v13294_v5 }
 0x21f   : > { %v716_v14 = vpop.f32.mrb[10].mxu0  ;;  %v877_v16 = vpop.f32.mrb[10].mxu1 }
 0x220   : > { %v16466_v17 = vadd.f32 %v716_v14, %v16393_v35  ;;  %v718_v18 = vpop.f32.mrb[11].mxu0  ;;  %v16469_v19 = vadd.f32 %v877_v16, %v16384_v28  ;;  %v879_v20 = vpop.f32.mrb[11].mxu1 }
 0x221   : > { %v16475_v29 = vadd.f32 %v718_v18, %v16390_v34  ;;  %v16478_v30 = vadd.f32 %v879_v20, %v16387_v31 }
 0x222   : > { %v13298_v33 = vpack.c.bf16 %v16469_v19, %v16460_v13  ;;  %v13266_v48 = vpack.c.bf16 %v16466_v17, %v16481_v32 }
 0x223   : > { %v13264_v37 = vpack.c.bf16 %v16475_v29, %v16472_v25  ;;  %v722_v39 = vpop.f32.mrb[12].mxu0  ;;  %v13296_v41 = vpack.c.bf16 %v16478_v30, %v16463_v15  ;;  %v883_v43 = vpop.f32.mrb[12].mxu1 }
 0x224   : > { %v724_v49 = vpop.f32.mrb[13].mxu0  ;;  %v885_v50 = vpop.f32.mrb[13].mxu1  ;;  %v16492_v51 = vadd.f32 %v883_v43, %v16384_v28  ;;  %v16513_v7 = vadd.f32 %v722_v39, %v16393_v35 }
 0x225   : > { %13265 = vmatprep.subr.bf16.mxu0 %v13264_v37  ;;  %13297 = vmatprep.subr.bf16.mxu1 %v13296_v41  ;;  %v16495_v53 = vadd.f32 %v885_v50, %v16387_v31  ;;  %v16504_v63 = vadd.f32 %v724_v49, %v16390_v34 }
 0x226   : > { %13267 = vmatpush1.bf16.msra.mxu0 %v13266_v48  ;;  %13299 = vmatpush1.bf16.msra.mxu1 %v13298_v33 }
 0x227   : > { %v728_v52 = vpop.f32.mrb[14].mxu0  ;;  %v889_v54 = vpop.f32.mrb[14].mxu1 }
 0x228   : > { %v16498_v55 = vadd.f32 %v728_v52, %v16393_v35  ;;  %v730_v57 = vpop.f32.mrb[15].mxu0  ;;  %v16501_v59 = vadd.f32 %v889_v54, %v16384_v28  ;;  %v891_v61 = vpop.f32.mrb[15].mxu1 }
 0x229   : > { %v16507_v5 = vadd.f32 %v730_v57, %v16390_v34  ;;  %v16510_v6 = vadd.f32 %v891_v61, %v16387_v31 }
 0x22a   : > { %v13302_v8 = vpack.c.bf16 %v16501_v59, %v16492_v51  ;;  %v13270_v14 = vpack.c.bf16 %v16498_v55, %v16513_v7 }
 0x22b   : > { %v13268_v9 = vpack.c.bf16 %v16507_v5, %v16504_v63  ;;  %v734_v10 = vpop.f32.mrb[16].mxu0  ;;  %v13300_v11 = vpack.c.bf16 %v16510_v6, %v16495_v53  ;;  %v895_v12 = vpop.f32.mrb[16].mxu1 }
 0x22c   : > { %v736_v16 = vpop.f32.mrb[17].mxu0  ;;  %v897_v18 = vpop.f32.mrb[17].mxu1  ;;  %v16524_v20 = vadd.f32 %v895_v12, %v16384_v28  ;;  %v16545_v57 = vadd.f32 %v734_v10, %v16393_v35 }
 0x22d   : > { %13269 = vmatprep.subr.bf16.mxu0 %v13268_v9  ;;  %13301 = vmatprep.subr.bf16.mxu1 %v13300_v11  ;;  %v16527_v37 = vadd.f32 %v897_v18, %v16387_v31  ;;  %v16536_v50 = vadd.f32 %v736_v16, %v16390_v34 }
 0x22e   : > { %13271 = vmatpush1.bf16.msra.mxu0 %v13270_v14  ;;  %13303 = vmatpush1.bf16.msra.mxu1 %v13302_v8 }
 0x22f   : > { %v740_v33 = vpop.f32.mrb[18].mxu0  ;;  %v901_v39 = vpop.f32.mrb[18].mxu1 }
 0x230   : > { %v16530_v41 = vadd.f32 %v740_v33, %v16393_v35  ;;  %v742_v43 = vpop.f32.mrb[19].mxu0  ;;  %v16533_v48 = vadd.f32 %v901_v39, %v16384_v28  ;;  %v903_v49 = vpop.f32.mrb[19].mxu1 }
 0x231   : > { %v16539_v52 = vadd.f32 %v742_v43, %v16390_v34  ;;  %v16542_v54 = vadd.f32 %v903_v49, %v16387_v31 }
 0x232   : > { %v13306_v61 = vpack.c.bf16 %v16533_v48, %v16524_v20  ;;  %v13274_v14 = vpack.c.bf16 %v16530_v41, %v16545_v57 }
 0x233   : > { %v13272_v8 = vpack.c.bf16 %v16539_v52, %v16536_v50  ;;  %v746_v9 = vpop.f32.mrb[20].mxu0  ;;  %v13304_v11 = vpack.c.bf16 %v16542_v54, %v16527_v37  ;;  %v907_v12 = vpop.f32.mrb[20].mxu1 }
 0x234   : > { %v748_v16 = vpop.f32.mrb[21].mxu0  ;;  %v909_v18 = vpop.f32.mrb[21].mxu1  ;;  %v16556_v10 = vadd.f32 %v907_v12, %v16384_v28  ;;  %v16577_v12 = vadd.f32 %v746_v9, %v16393_v35 }
 0x235   : > { %13273 = vmatprep.subr.bf16.mxu0 %v13272_v8  ;;  %13305 = vmatprep.subr.bf16.mxu1 %v13304_v11  ;;  %v16559_v39 = vadd.f32 %v909_v18, %v16387_v31  ;;  %v16568_v8 = vadd.f32 %v748_v16, %v16390_v34 }
 0x236   : > { %13275 = vmatpush1.bf16.msra.mxu0 %v13274_v14  ;;  %18686 = vst [vmem:[#allocation36_spill] sm:$0xff] %v16556_v10  ;;  %13307 = vmatpush1.bf16.msra.mxu1 %v13306_v61 }
 0x237   : > { %v752_v33 = vpop.f32.mrb[22].mxu0  ;;  %18687 = vst [vmem:[#allocation37_spill] sm:$0xff] %v16559_v39  ;;  %v913_v43 = vpop.f32.mrb[22].mxu1 }
 0x238   : > { %v16562_v49 = vadd.f32 %v752_v33, %v16393_v35  ;;  %v754_v4 = vpop.f32.mrb[23].mxu0  ;;  %v16565_v21 = vadd.f32 %v913_v43, %v16384_v28  ;;  %v915_v24 = vpop.f32.mrb[23].mxu1 }
 0x239   : > { %v16571_v11 = vadd.f32 %v754_v4, %v16390_v34  ;;  %v16574_v61 = vadd.f32 %v915_v24, %v16387_v31 }
 0x23a   : > { %18688 = vst [vmem:[#allocation38_spill] sm:$0xff] %v16562_v49  ;;  %18689 = vst [vmem:[#allocation39_spill] sm:$0xff] %v16565_v21  ;;  %v13310_v14 = vpack.c.bf16 %v16565_v21, %v16556_v10  ;;  %v13278_v4 = vpack.c.bf16 %v16562_v49, %v16577_v12 }
 0x23b   : > { %18690 = vst [vmem:[#allocation40_spill] sm:$0xff] %v16571_v11  ;;  %18691 = vst [vmem:[#allocation41_spill] sm:$0xff] %v16574_v61  ;;  %v13276_v18 = vpack.c.bf16 %v16571_v11, %v16568_v8  ;;  %v758_v33 = vpop.f32.mrb[24].mxu0  ;;  %v13308_v16 = vpack.c.bf16 %v16574_v61, %v16559_v39  ;;  %v919_v43 = vpop.f32.mrb[24].mxu1 }
 0x23c   : > { %v760_v23 = vpop.f32.mrb[25].mxu0  ;;  %v921_v24 = vpop.f32.mrb[25].mxu1  ;;  %v16588_v9 = vadd.f32 %v919_v43, %v16384_v28  ;;  %v16609_v43 = vadd.f32 %v758_v33, %v16393_v35 }
 0x23d   : > { %13277 = vmatprep.subr.bf16.mxu0 %v13276_v18  ;;  %13309 = vmatprep.subr.bf16.mxu1 %v13308_v16  ;;  %v16591_v27 = vadd.f32 %v921_v24, %v16387_v31  ;;  %v16600_v18 = vadd.f32 %v760_v23, %v16390_v34 }
 0x23e   : > { %13279 = vmatpush1.bf16.msra.mxu0 %v13278_v4  ;;  %18692 = vst [vmem:[#allocation42_spill] sm:$0xff] %v16588_v9  ;;  %13311 = vmatpush1.bf16.msra.mxu1 %v13310_v14 }
 0x23f   : > { %v764_v26 = vpop.f32.mrb[26].mxu0  ;;  %18693 = vst [vmem:[#allocation43_spill] sm:$0xff] %v16591_v27  ;;  %v925_v11 = vpop.f32.mrb[26].mxu1  ;;  %18696 = vst [vmem:[#allocation46_spill] sm:$0xff] %v16600_v18 }
 0x240   : > { %v16594_v61 = vadd.f32 %v764_v26, %v16393_v35  ;;  %v766_v21 = vpop.f32.mrb[27].mxu0  ;;  %v16597_v49 = vadd.f32 %v925_v11, %v16384_v28  ;;  %v927_v10 = vpop.f32.mrb[27].mxu1 }
 0x241   : > { %v16603_v16 = vadd.f32 %v766_v21, %v16390_v34  ;;  %v16606_v14 = vadd.f32 %v927_v10, %v16387_v31 }
 0x242   : > { %18694 = vst [vmem:[#allocation44_spill] sm:$0xff] %v16594_v61  ;;  %18695 = vst [vmem:[#allocation45_spill] sm:$0xff] %v16597_v49  ;;  %v13314_v26 = vpack.c.bf16 %v16597_v49, %v16588_v9  ;;  %v13282_v21 = vpack.c.bf16 %v16594_v61, %v16609_v43  ;;  %v18699_v49 = vlaneseq }
 0x243   : > { %18697 = vst [vmem:[#allocation47_spill] sm:$0xff] %v16603_v16  ;;  %18698 = vst [vmem:[#allocation48_spill] sm:$0xff] %v16606_v14  ;;  %v13280_v11 = vpack.c.bf16 %v16603_v16, %v16600_v18  ;;  %v770_v4 = vpop.f32.mrb[28].mxu0  ;;  %v13312_v23 = vpack.c.bf16 %v16606_v14, %v16591_v27  ;;  %v931_v24 = vpop.f32.mrb[28].mxu1 }
 0x244   : > { %v772_v39 = vpop.f32.mrb[29].mxu0  ;;  %v933_v10 = vpop.f32.mrb[29].mxu1  ;;  %v16620_v33 = vadd.f32 %v931_v24, %v16384_v28  ;;  %v16623_v9 = vand.u32 127, %v18699_v49 }
 0x245   : > { %13281 = vmatprep.subr.bf16.mxu0 %v13280_v11  ;;  %13313 = vmatprep.subr.bf16.mxu1 %v13312_v23  ;;  %v16626_v16 = vadd.f32 %v933_v10, %v16387_v31  ;;  %v16635_v24 = vadd.f32 %v772_v39, %v16390_v34  ;;  %v980_v10 = vand.u32 1, %v16369_v22 }
 0x246   : > { %13283 = vmatpush1.bf16.msra.mxu0 %v13282_v21  ;;  %13315 = vmatpush1.bf16.msra.mxu1 %v13314_v26  ;;  %v16644_v21 = vadd.f32 %v770_v4, %v16393_v35  ;;  %v18706_v4 = vmov 0.0  }
 0x247   : > { %v776_v14 = vpop.f32.mrb[30].mxu0  ;;  %v937_v27 = vpop.f32.mrb[30].mxu1  ;;  %vm1168_vm3 = vcmp.eq.s32.totalorder %v980_v10, %v16623_v9 }
 0x248   : > { %v16629_v18 = vadd.f32 %v776_v14, %v16393_v35  ;;  %v16632_v61 = vadd.f32 %v937_v27, %v16384_v28  ;;  %v778_v11 = vpop.f32.mrb[31].mxu0  ;;  %v939_v23 = vpop.f32.mrb[31].mxu1  ;;  %v948_v27 = vand.u32 1, %v16623_v9  ;;  %v18587_v35 = vmov 1.0  }
 0x249   : > { %v16638_v26 = vadd.f32 %v778_v11, %v16390_v34  ;;  %v16641_v49 = vadd.f32 %v939_v23, %v16387_v31  ;;  %v18703_v31 = vmov 0  ;;  %v961_v11 = vadd.s32 8, %v16369_v22 }
 0x24a   : > { %18700 = vst [vmem:[#allocation49_spill] sm:$0xff] %v16632_v61  ;;  %v13318_v14 = vpack.c.bf16 %v16632_v61, %v16620_v33  ;;  %v13286_v34 = vpack.c.bf16 %v16629_v18, %v16644_v21  ;;  %vm16656_vm2 = vcmp.eq.s32.totalorder %v948_v27, %v16369_v22  ;;  %v16673_v61 = vsel %vm1168_vm3, 1.0, %v18706_v4 }
 0x24b   : > { %18701 = vst [vmem:[#allocation50_spill] sm:$0xff] %v16638_v26  ;;  %18702 = vst [vmem:[#allocation51_spill] sm:$0xff] %v16641_v49  ;;  %v13284_v28 = vpack.c.bf16 %v16638_v26, %v16635_v24  ;;  %v13316_v39 = vpack.c.bf16 %v16641_v49, %v16626_v16  ;;  %v18704_v31 = vsel %vm16656_vm2, 4294967295, %v18703_v31  ;;  %v987_v27 = vand.u32 1, %v961_v11 }
 0x24c   : > { %18705 = vst [vmem:[#allocation52_spill] sm:$0xff] %v18704_v31  ;;  %v963_v11 = vadd.s32 24, %v16369_v22 }
 0x24d   : > { %13285 = vmatprep.subr.bf16.mxu0 %v13284_v28  ;;  %13317 = vmatprep.subr.bf16.mxu1 %v13316_v39  ;;  %v962_v28 = vadd.s32 16, %v16369_v22  ;;  %vm1169_vm6 = vcmp.eq.s32.totalorder %v987_v27, %v16623_v9 }
 0x24e   : > { %13287 = vmatpush1.bf16.msra.mxu0 %v13286_v34  ;;  %13319 = vmatpush1.bf16.msra.mxu1 %v13318_v14 }
 0x24f   : > { %v994_v10 = vand.u32 1, %v962_v28 }
 0x251   : > { %11940 = vmatmul.mubr.msk.f32.vlgmr.msra.gmra.mrb[32].mxu0 %vm16656_vm2, %v18587_v35  ;;  %11941 = vmatmul.mubr.msk.f32.vlgmr.msra.gmra.mrb[32].mxu1 %vm16656_vm2, %v18587_v35  ;;  %vm1170_vm7 = vcmp.eq.s32.totalorder %v994_v10, %v16623_v9 }
 0x252   : > { %1488 = vmatprep.mubr.f32.mxu0 %v18706_v4  ;;  %1649 = vmatprep.mubr.f32.mxu1 %v18706_v4 }
 0x324   : > { %v1282_v23 = vpop.f32.mrb[32].mxu0  ;;  %v1353_v14 = vpop.f32.mrb[32].mxu1 }
 0x325   : > { %v1360_v39 = vmul.f32 0.015625, %v1353_v14  ;;  %v1284_v34 = vpop.f32.mrb[33].mxu0  ;;  %v1355_v49 = vpop.f32.mrb[33].mxu1  ;;  %v1358_v26 = vmul.f32 0.015625, %v1282_v23  ;;  %v965_v14 = vadd.s32 40, %v16369_v22 }
 0x326   : > { %v1359_v35 = vmul.f32 0.015625, %v1284_v34  ;;  %v1361_v31 = vmul.f32 0.015625, %v1355_v49  ;;  %v16688_v49 = vsel %vm1169_vm6, 1.0, %v18706_v4 }
 0x327   : > { %18707 = vst [vmem:[#allocation53_spill] sm:$0xff] %v16688_v49  ;;  %v1015_v28 = vand.u32 1, %v965_v14 }
 0x328   : > { %11942 = vmatprep.subr.msk.mxu0 %vm1411_vm4, %v1359_v35  ;;  %11960 = vmatprep.subr.msk.mxu1 %vm1411_vm4, %v1361_v31  ;;  %v1001_v31 = vand.u32 1, %v963_v11  ;;  %v16699_v35 = vsel %vm1170_vm7, 1.0, %v18706_v4  ;;  %v967_v11 = vadd.s32 56, %v16369_v22 }
 0x329   : > { %11943 = vmatpush1.msk.msra.mxu0 %vm1411_vm4, %v1358_v26  ;;  %11961 = vmatpush1.msk.msra.mxu1 %vm1411_vm4, %v1360_v39  ;;  %v964_v26 = vadd.s32 32, %v16369_v22  ;;  %18708 = vst [vmem:[#allocation54_spill] sm:$0xff] %v16699_v35  ;;  %v966_v39 = vadd.s32 48, %v16369_v22  ;;  %vm1173_vm10 = vcmp.eq.s32.totalorder %v1015_v28, %v16623_v9 }
 0x32a   : > { %11944 = vmatmul.mubr.msk.f32.vlgmr.msra.gmra.mrb[34].mxu0 %vm1362_vm5, %v16673_v61  ;;  %11962 = vmatmul.mubr.msk.f32.vlgmr.msra.gmra.mrb[34].mxu1 %vm1362_vm5, %v16673_v61  ;;  %vm1171_vm8 = vcmp.eq.s32.totalorder %v1001_v31, %v16623_v9  ;;  %v16732_v31 = vsel %vm1173_vm10, 1.0, %v18706_v4 }
 0x32b   : > { %1494 = vmatprep.mubr.f32.mxu0 %v18706_v4  ;;  %1655 = vmatprep.mubr.f32.mxu1 %v18706_v4  ;;  %v1008_v23 = vand.u32 1, %v964_v26  ;;  %v16710_v27 = vsel %vm1171_vm8, 1.0, %v18706_v4  ;;  %v1022_v10 = vand.u32 1, %v966_v39  ;;  %18711 = vst [vmem:[#allocation57_spill] sm:$0xff] %v16732_v31  ;;  %v1029_v26 = vand.u32 1, %v967_v11 }
 0x32c   : > { %18709 = vst [vmem:[#allocation55_spill] sm:$0xff] %v16710_v27  ;;  %v969_v39 = vadd.s32 72, %v16369_v22 }
 0x32d   : > { %vm1172_vm9 = vcmp.eq.s32.totalorder %v1008_v23, %v16623_v9  ;;  %vm1174_vm11 = vcmp.eq.s32.totalorder %v1022_v10, %v16623_v9  ;;  %v968_v23 = vadd.s32 64, %v16369_v22  ;;  %vm1175_vm12 = vcmp.eq.s32.totalorder %v1029_v26, %v16623_v9 }
 0x32e   : > { %11945 = vmatmul.mubr.msk.f32.gmra.mrb[36].mxu0 %vm1362_vm5, %v16688_v49  ;;  %11963 = vmatmul.mubr.msk.f32.gmra.mrb[36].mxu1 %vm1362_vm5, %v16688_v49  ;;  %v16721_v34 = vsel %vm1172_vm9, 1.0, %v18706_v4  ;;  %v16743_v14 = vsel %vm1174_vm11, 1.0, %v18706_v4  ;;  %v16754_v10 = vsel %vm1175_vm12, 1.0, %v18706_v4  ;;  %v1043_v11 = vand.u32 1, %v969_v39 }
 0x32f   : > { %1500 = vmatprep.mubr.f32.mxu0 %v18706_v4  ;;  %1661 = vmatprep.mubr.f32.mxu1 %v18706_v4  ;;  %18710 = vst [vmem:[#allocation56_spill] sm:$0xff] %v16721_v34  ;;  %18712 = vst [vmem:[#allocation58_spill] sm:$0xff] %v16743_v14  ;;  %v1036_v28 = vand.u32 1, %v968_v23  ;;  %v970_v26 = vadd.s32 80, %v16369_v22 }
 0x330   : > { %18713 = vst [vmem:[#allocation59_spill] sm:$0xff] %v16754_v10  ;;  %vm1177_vm14 = vcmp.eq.s32.totalorder %v1043_v11, %v16623_v9  ;;  %v972_v11 = vadd.s32 96, %v16369_v22 }
 0x331   : > { %vm1176_vm13 = vcmp.eq.s32.totalorder %v1036_v28, %v16623_v9  ;;  %v971_v28 = vadd.s32 88, %v16369_v22  ;;  %v16776_v39 = vsel %vm1177_vm14, 1.0, %v18706_v4 }
 0x332   : > { %11946 = vmatmul.mubr.msk.f32.gmra.mrb[38].mxu0 %vm1362_vm5, %v16699_v35  ;;  %11964 = vmatmul.mubr.msk.f32.gmra.mrb[38].mxu1 %vm1362_vm5, %v16699_v35  ;;  %v16765_v23 = vsel %vm1176_vm13, 1.0, %v18706_v4  ;;  %18715 = vst [vmem:[#allocation61_spill] sm:$0xff] %v16776_v39 }
 0x333   : > { %1506 = vmatprep.mubr.f32.mxu0 %v18706_v4  ;;  %1667 = vmatprep.mubr.f32.mxu1 %v18706_v4  ;;  %18714 = vst [vmem:[#allocation60_spill] sm:$0xff] %v16765_v23 }
 0x336   : > { %11947 = vmatmul.mubr.msk.f32.gmra.mrb[40].mxu0 %vm1362_vm5, %v16710_v27  ;;  %11965 = vmatmul.mubr.msk.f32.gmra.mrb[40].mxu1 %vm1362_vm5, %v16710_v27 }
 0x337   : > { %1512 = vmatprep.mubr.f32.mxu0 %v18706_v4  ;;  %1673 = vmatprep.mubr.f32.mxu1 %v18706_v4 }
 0x33a   : > { %11948 = vmatmul.mubr.msk.f32.gmra.mrb[42].mxu0 %vm1362_vm5, %v16721_v34  ;;  %11966 = vmatmul.mubr.msk.f32.gmra.mrb[42].mxu1 %vm1362_vm5, %v16721_v34 }
 0x33b   : > { %1518 = vmatprep.mubr.f32.mxu0 %v18706_v4  ;;  %1679 = vmatprep.mubr.f32.mxu1 %v18706_v4 }
 0x33e   : > { %11949 = vmatmul.mubr.msk.f32.gmra.mrb[44].mxu0 %vm1362_vm5, %v16732_v31  ;;  %11967 = vmatmul.mubr.msk.f32.gmra.mrb[44].mxu1 %vm1362_vm5, %v16732_v31 }
 0x33f   : > { %1524 = vmatprep.mubr.f32.mxu0 %v18706_v4  ;;  %1685 = vmatprep.mubr.f32.mxu1 %v18706_v4 }
 0x342   : > { %11950 = vmatmul.mubr.msk.f32.gmra.mrb[46].mxu0 %vm1362_vm5, %v16743_v14  ;;  %11968 = vmatmul.mubr.msk.f32.gmra.mrb[46].mxu1 %vm1362_vm5, %v16743_v14  ;;  %v1050_v14 = vand.u32 1, %v970_v26 }
 0x343   : > { %1530 = vmatprep.mubr.f32.mxu0 %v18706_v4  ;;  %1691 = vmatprep.mubr.f32.mxu1 %v18706_v4 }
 0x344   : > { %vm1178_vm15 = vcmp.eq.s32.totalorder %v1050_v14, %v16623_v9  ;;  %v973_v14 = vadd.s32 104, %v16369_v22 }
 0x345   : > { %v16787_v26 = vsel %vm1178_vm15, 1.0, %v18706_v4 }
 0x346   : > { %11951 = vmatmul.mubr.msk.f32.gmra.mrb[48].mxu0 %vm1362_vm5, %v16754_v10  ;;  %11969 = vmatmul.mubr.msk.f32.gmra.mrb[48].mxu1 %vm1362_vm5, %v16754_v10  ;;  %v1057_v10 = vand.u32 1, %v971_v28  ;;  %18716 = vst [vmem:[#allocation62_spill] sm:$0xff] %v16787_v26 }
 0x347   : > { %1536 = vmatprep.mubr.f32.mxu0 %v18706_v4  ;;  %1697 = vmatprep.mubr.f32.mxu1 %v18706_v4 }
 0x348   : > { %vm1179_vm1 = vcmp.eq.s32.totalorder %v1057_v10, %v16623_v9  ;;  %v974_v10 = vadd.s32 112, %v16369_v22 }
 0x349   : > { %v16798_v28 = vsel %vm1179_vm1, 1.0, %v18706_v4 }
 0x34a   : > { %11952 = vmatmul.mubr.msk.f32.gmra.mrb[50].mxu0 %vm1362_vm5, %v16765_v23  ;;  %11970 = vmatmul.mubr.msk.f32.gmra.mrb[50].mxu1 %vm1362_vm5, %v16765_v23  ;;  %v1064_v23 = vand.u32 1, %v972_v11  ;;  %18717 = vst [vmem:[#allocation63_spill] sm:$0xff] %v16798_v28 }
 0x34b   : > { %1542 = vmatprep.mubr.f32.mxu0 %v18706_v4  ;;  %1703 = vmatprep.mubr.f32.mxu1 %v18706_v4 }
 0x34c   : > { %vm1180_vm3 = vcmp.eq.s32.totalorder %v1064_v23, %v16623_v9  ;;  %v975_v23 = vadd.s32 120, %v16369_v22 }
 0x34d   : > { %v16809_v11 = vsel %vm1180_vm3, 1.0, %v18706_v4 }
 0x34e   : > { %11953 = vmatmul.mubr.msk.f32.gmra.mrb[52].mxu0 %vm1362_vm5, %v16776_v39  ;;  %11971 = vmatmul.mubr.msk.f32.gmra.mrb[52].mxu1 %vm1362_vm5, %v16776_v39  ;;  %v1071_v39 = vand.u32 1, %v973_v14  ;;  %18718 = vst [vmem:[#allocation64_spill] sm:$0xff] %v16809_v11 }
 0x34f   : > { %1548 = vmatprep.mubr.f32.mxu0 %v18706_v4  ;;  %1709 = vmatprep.mubr.f32.mxu1 %v18706_v4 }
 0x350   : > { %vm1181_vm6 = vcmp.eq.s32.totalorder %v1071_v39, %v16623_v9 }
 0x351   : > { %v16820_v14 = vsel %vm1181_vm6, 1.0, %v18706_v4 }
 0x352   : > { %11954 = vmatmul.mubr.msk.f32.gmra.mrb[54].mxu0 %vm1362_vm5, %v16787_v26  ;;  %11972 = vmatmul.mubr.msk.f32.gmra.mrb[54].mxu1 %vm1362_vm5, %v16787_v26  ;;  %v1078_v26 = vand.u32 1, %v974_v10  ;;  %18719 = vst [vmem:[#allocation65_spill] sm:$0xff] %v16820_v14 }
 0x353   : > { %1554 = vmatprep.mubr.f32.mxu0 %v18706_v4  ;;  %1715 = vmatprep.mubr.f32.mxu1 %v18706_v4 }
 0x354   : > { %vm1182_vm7 = vcmp.eq.s32.totalorder %v1078_v26, %v16623_v9 }
 0x355   : > { %v16830_v39 = vsel %vm1182_vm7, 1.0, %v18706_v4 }
 0x356   : > { %11955 = vmatmul.mubr.msk.f32.gmra.mrb[56].mxu0 %vm1362_vm5, %v16798_v28  ;;  %11973 = vmatmul.mubr.msk.f32.gmra.mrb[56].mxu1 %vm1362_vm5, %v16798_v28  ;;  %v1085_v28 = vand.u32 1, %v975_v23  ;;  %18720 = vst [vmem:[#allocation66_spill] sm:$0xff] %v16830_v39 }
 0x357   : > { %1560 = vmatprep.mubr.f32.mxu0 %v18706_v4  ;;  %1721 = vmatprep.mubr.f32.mxu1 %v18706_v4 }
 0x358   : > { %vm1183_vm8 = vcmp.eq.s32.totalorder %v1085_v28, %v16623_v9 }
 0x359   : > { %v16840_v26 = vsel %vm1183_vm8, 1.0, %v18706_v4 }
 0x35a   : > { %11956 = vmatmul.mubr.msk.f32.gmra.mrb[58].mxu0 %vm1362_vm5, %v16809_v11  ;;  %11974 = vmatmul.mubr.msk.f32.gmra.mrb[58].mxu1 %vm1362_vm5, %v16809_v11  ;;  %18721 = vst [vmem:[#allocation67_spill] sm:$0xff] %v16840_v26 }
 0x35b   : > { %1566 = vmatprep.mubr.f32.mxu0 %v18706_v4  ;;  %1727 = vmatprep.mubr.f32.mxu1 %v18706_v4 }
 0x35e   : > { %11957 = vmatmul.mubr.msk.f32.gmra.mrb[60].mxu0 %vm1362_vm5, %v16820_v14  ;;  %11975 = vmatmul.mubr.msk.f32.gmra.mrb[60].mxu1 %vm1362_vm5, %v16820_v14 }
 0x35f   : > { %1572 = vmatprep.mubr.f32.mxu0 %v18706_v4  ;;  %1733 = vmatprep.mubr.f32.mxu1 %v18706_v4 }
 0x362   : > { %11958 = vmatmul.mubr.msk.f32.gmra.mrb[62].mxu0 %vm1362_vm5, %v16830_v39  ;;  %11976 = vmatmul.mubr.msk.f32.gmra.mrb[62].mxu1 %vm1362_vm5, %v16830_v39 }
 0x363   : > { %1578 = vmatprep.mubr.f32.mxu0 %v18706_v4  ;;  %1739 = vmatprep.mubr.f32.mxu1 %v18706_v4 }
 0x366   : > { %11959 = vmatmul.mubr.msk.f32.gmra.mrb[64].mxu0 %vm1362_vm5, %v16840_v26  ;;  %11977 = vmatmul.mubr.msk.f32.gmra.mrb[64].mxu1 %vm1362_vm5, %v16840_v26 }
 0x367   : > { %1938 = vmatprep.mubr.f32.mxu0 %v18706_v4  ;;  %2009 = vmatprep.mubr.f32.mxu1 %v18706_v4 }
 0x3fd   : > { %v1490_v9 = vpop.f32.mrb[34].mxu0  ;;  %v1651_v28 = vpop.f32.mrb[34].mxu1 }
 0x3fe   : > { %v1492_v10 = vpop.f32.mrb[35].mxu0  ;;  %v1653_v23 = vpop.f32.mrb[35].mxu1  ;;  %v16855_v31 = vsub.f32 %v16417_v47, %v1490_v9  ;;  %v16858_v26 = vsub.f32 %v16396_v36, %v1651_v28 }
 0x3ff   : > { %v16849_v22 = vsub.f32 %v16408_v44, %v1492_v10  ;;  %v16852_v39 = vsub.f32 %v16399_v38, %v1653_v23 }
 0x400   : > { %18724 = vst [vmem:[#allocation70_spill] sm:$0xff] %v16855_v31  ;;  %18725 = vst [vmem:[#allocation71_spill] sm:$0xff] %v16858_v26  ;;  %v1812_v9 = vmul.f32 %v16858_v26, %v16858_v26 }
 0x401   : > { %18722 = vst [vmem:[#allocation68_spill] sm:$0xff] %v16849_v22  ;;  %18723 = vst [vmem:[#allocation69_spill] sm:$0xff] %v16852_v39  ;;  %v1496_v14 = vpop.f32.mrb[36].mxu0  ;;  %v1657_v11 = vpop.f32.mrb[36].mxu1 }
 0x402   : > { %v16861_v34 = vsub.f32 %v16402_v40, %v1496_v14  ;;  %v16864_v27 = vsub.f32 %v16405_v42, %v1657_v11  ;;  %v1498_v35 = vpop.f32.mrb[37].mxu0  ;;  %v1659_v44 = vpop.f32.mrb[37].mxu1  ;;  %v1811_v40 = vmul.f32 %v16849_v22, %v16849_v22  ;;  %v1813_v42 = vmul.f32 %v16852_v39, %v16852_v39 }
 0x403   : > { %v16867_v10 = vsub.f32 %v16411_v45, %v1498_v35  ;;  %v16870_v38 = vsub.f32 %v16414_v46, %v1659_v44  ;;  %v1810_v14 = vmul.f32 %v16855_v31, %v16855_v31 }
 0x404   : > { %18726 = vst [vmem:[#allocation72_spill] sm:$0xff] %v16861_v34  ;;  %18727 = vst [vmem:[#allocation73_spill] sm:$0xff] %v16864_v27  ;;  %v1814_v47 = vmul.f32 %v16861_v34, %v16861_v34  ;;  %v1816_v36 = vmul.f32 %v16864_v27, %v16864_v27 }
 0x405   : > { %18728 = vst [vmem:[#allocation74_spill] sm:$0xff] %v16867_v10  ;;  %18729 = vst [vmem:[#allocation75_spill] sm:$0xff] %v16870_v38  ;;  %v1815_v11 = vmul.f32 %v16867_v10, %v16867_v10  ;;  %v1817_v45 = vmul.f32 %v16870_v38, %v16870_v38  ;;  %v1502_v46 = vpop.f32.mrb[38].mxu0  ;;  %v1663_v35 = vpop.f32.mrb[38].mxu1 }
 0x406   : > { %v1504_v28 = vpop.f32.mrb[39].mxu0  ;;  %v1665_v23 = vpop.f32.mrb[39].mxu1  ;;  %v13322_v34 = vpack.c.bf16 %v1814_v47, %v1810_v14  ;;  %v13354_v39 = vpack.c.bf16 %v1816_v36, %v1812_v9  ;;  %v16889_v22 = vsub.f32 %v16449_v3, %v1502_v46  ;;  %v16898_v26 = vsub.f32 %v16428_v56, %v1663_v35 }
 0x407   : > { %v13320_v44 = vpack.c.bf16 %v1815_v11, %v1811_v40  ;;  %v13352_v27 = vpack.c.bf16 %v1817_v45, %v1813_v42  ;;  %v16892_v10 = vsub.f32 %v16440_v0, %v1504_v28  ;;  %v16895_v38 = vsub.f32 %v16431_v58, %v1665_v23 }
 0x409   : > { %v1508_v49 = vpop.f32.mrb[40].mxu0  ;;  %v1669_v31 = vpop.f32.mrb[40].mxu1  ;;  %13321 = vmatprep.subr.bf16.mxu0 %v13320_v44  ;;  %13353 = vmatprep.subr.bf16.mxu1 %v13352_v27 }
 0x40a   : > { %v16901_v40 = vsub.f32 %v16434_v60, %v1508_v49  ;;  %v16904_v47 = vsub.f32 %v16437_v62, %v1669_v31  ;;  %v1510_v3 = vpop.f32.mrb[41].mxu0  ;;  %v1671_v36 = vpop.f32.mrb[41].mxu1  ;;  %13323 = vmatpush1.bf16.msra.mxu0 %v13322_v34  ;;  %13355 = vmatpush1.bf16.msra.mxu1 %v13354_v39  ;;  %v1819_v62 = vmul.f32 %v16892_v10, %v16892_v10 }
 0x40b   : > { %v16907_v58 = vsub.f32 %v16443_v1, %v1510_v3  ;;  %v16910_v0 = vsub.f32 %v16446_v2, %v1671_v36  ;;  %v1821_v49 = vmul.f32 %v16895_v38, %v16895_v38  ;;  %v1818_v31 = vmul.f32 %v16889_v22, %v16889_v22 }
 0x40c   : > { %v1822_v56 = vmul.f32 %v16901_v40, %v16901_v40  ;;  %v1824_v60 = vmul.f32 %v16904_v47, %v16904_v47  ;;  %v1820_v39 = vmul.f32 %v16898_v26, %v16898_v26 }
 0x40d   : > { %v1823_v27 = vmul.f32 %v16907_v58, %v16907_v58  ;;  %v1825_v1 = vmul.f32 %v16910_v0, %v16910_v0  ;;  %v1514_v2 = vpop.f32.mrb[42].mxu0  ;;  %v1675_v34 = vpop.f32.mrb[42].mxu1 }
 0x40e   : > { %v1516_v42 = vpop.f32.mrb[43].mxu0  ;;  %v1677_v11 = vpop.f32.mrb[43].mxu1  ;;  %v13326_v35 = vpack.c.bf16 %v1822_v56, %v1818_v31  ;;  %v13358_v14 = vpack.c.bf16 %v1824_v60, %v1820_v39  ;;  %v16929_v9 = vsub.f32 %v16481_v32, %v1514_v2  ;;  %v16938_v36 = vsub.f32 %v16460_v13, %v1675_v34 }
 0x40f   : > { %v13324_v45 = vpack.c.bf16 %v1823_v27, %v1819_v62  ;;  %v13356_v46 = vpack.c.bf16 %v1825_v1, %v1821_v49  ;;  %v16932_v28 = vsub.f32 %v16472_v25, %v1516_v42  ;;  %v16935_v23 = vsub.f32 %v16463_v15, %v1677_v11 }
 0x410   : > { %v1826_v2 = vmul.f32 %v16929_v9, %v16929_v9  ;;  %v1828_v34 = vmul.f32 %v16938_v36, %v16938_v36 }
 0x411   : > { %v1520_v44 = vpop.f32.mrb[44].mxu0  ;;  %v1681_v3 = vpop.f32.mrb[44].mxu1  ;;  %13325 = vmatprep.subr.bf16.mxu0 %v13324_v45  ;;  %13357 = vmatprep.subr.bf16.mxu1 %v13356_v46  ;;  %v1829_v49 = vmul.f32 %v16935_v23, %v16935_v23 }
 0x412   : > { %v16941_v62 = vsub.f32 %v16466_v17, %v1520_v44  ;;  %v16944_v56 = vsub.f32 %v16469_v19, %v1681_v3  ;;  %v1522_v32 = vpop.f32.mrb[45].mxu0  ;;  %v1683_v60 = vpop.f32.mrb[45].mxu1  ;;  %13327 = vmatpush1.bf16.msra.mxu0 %v13326_v35  ;;  %13359 = vmatpush1.bf16.msra.mxu1 %v13358_v14  ;;  %v1827_v19 = vmul.f32 %v16932_v28, %v16932_v28 }
 0x413   : > { %v16947_v15 = vsub.f32 %v16475_v29, %v1522_v32  ;;  %v16950_v25 = vsub.f32 %v16478_v30, %v1683_v60 }
 0x414   : > { %v1830_v13 = vmul.f32 %v16941_v62, %v16941_v62  ;;  %v1832_v17 = vmul.f32 %v16944_v56, %v16944_v56 }
 0x415   : > { %v1831_v27 = vmul.f32 %v16947_v15, %v16947_v15  ;;  %v1833_v29 = vmul.f32 %v16950_v25, %v16950_v25  ;;  %v1526_v30 = vpop.f32.mrb[46].mxu0  ;;  %v1687_v1 = vpop.f32.mrb[46].mxu1 }
 0x416   : > { %v1528_v31 = vpop.f32.mrb[47].mxu0  ;;  %v1689_v39 = vpop.f32.mrb[47].mxu1  ;;  %v13330_v45 = vpack.c.bf16 %v1830_v13, %v1826_v2  ;;  %v13362_v46 = vpack.c.bf16 %v1832_v17, %v1828_v34  ;;  %v16969_v35 = vsub.f32 %v16513_v7, %v1526_v30  ;;  %v16978_v60 = vsub.f32 %v16492_v51, %v1687_v1 }
 0x417   : > { %v13328_v42 = vpack.c.bf16 %v1831_v27, %v1827_v19  ;;  %v13360_v11 = vpack.c.bf16 %v1833_v29, %v1829_v49  ;;  %v16972_v14 = vsub.f32 %v16504_v63, %v1528_v31  ;;  %v16975_v44 = vsub.f32 %v16495_v53, %v1689_v39 }
 0x418   : > { %v1834_v30 = vmul.f32 %v16969_v35, %v16969_v35  ;;  %v1836_v1 = vmul.f32 %v16978_v60, %v16978_v60 }
 0x419   : > { %v1532_v3 = vpop.f32.mrb[48].mxu0  ;;  %v1693_v32 = vpop.f32.mrb[48].mxu1  ;;  %13329 = vmatprep.subr.bf16.mxu0 %v13328_v42  ;;  %13361 = vmatprep.subr.bf16.mxu1 %v13360_v11  ;;  %v1837_v49 = vmul.f32 %v16975_v44, %v16975_v44 }
 0x41a   : > { %v16981_v19 = vsub.f32 %v16498_v55, %v1532_v3  ;;  %v16984_v13 = vsub.f32 %v16501_v59, %v1693_v32  ;;  %v1534_v7 = vpop.f32.mrb[49].mxu0  ;;  %v1695_v17 = vpop.f32.mrb[49].mxu1  ;;  %13331 = vmatpush1.bf16.msra.mxu0 %v13330_v45  ;;  %13363 = vmatpush1.bf16.msra.mxu1 %v13362_v46  ;;  %v1835_v59 = vmul.f32 %v16972_v14, %v16972_v14 }
 0x41b   : > { %v16987_v53 = vsub.f32 %v16507_v5, %v1534_v7  ;;  %v16990_v63 = vsub.f32 %v16510_v6, %v1695_v17 }
 0x41c   : > { %v1838_v51 = vmul.f32 %v16981_v19, %v16981_v19  ;;  %v1840_v55 = vmul.f32 %v16984_v13, %v16984_v13 }
 0x41d   : > { %v1839_v27 = vmul.f32 %v16987_v53, %v16987_v53  ;;  %v1841_v5 = vmul.f32 %v16990_v63, %v16990_v63  ;;  %v1538_v6 = vpop.f32.mrb[50].mxu0  ;;  %v1699_v29 = vpop.f32.mrb[50].mxu1 }
 0x41e   : > { %v1540_v2 = vpop.f32.mrb[51].mxu0  ;;  %v1701_v34 = vpop.f32.mrb[51].mxu1  ;;  %v13334_v42 = vpack.c.bf16 %v1838_v51, %v1834_v30  ;;  %v13366_v11 = vpack.c.bf16 %v1840_v55, %v1836_v1  ;;  %v17009_v45 = vsub.f32 %v16545_v57, %v1538_v6  ;;  %v17018_v17 = vsub.f32 %v16524_v20, %v1699_v29 }
 0x41f   : > { %v13332_v31 = vpack.c.bf16 %v1839_v27, %v1835_v59  ;;  %v13364_v39 = vpack.c.bf16 %v1841_v5, %v1837_v49  ;;  %v17012_v46 = vsub.f32 %v16536_v50, %v1540_v2  ;;  %v17015_v3 = vsub.f32 %v16527_v37, %v1701_v34 }
 0x420   : > { %v1842_v6 = vmul.f32 %v17009_v45, %v17009_v45  ;;  %v1844_v29 = vmul.f32 %v17018_v17, %v17018_v17 }
 0x421   : > { %v1544_v32 = vpop.f32.mrb[52].mxu0  ;;  %v1705_v7 = vpop.f32.mrb[52].mxu1  ;;  %13333 = vmatprep.subr.bf16.mxu0 %v13332_v31  ;;  %13365 = vmatprep.subr.bf16.mxu1 %v13364_v39  ;;  %v1845_v49 = vmul.f32 %v17015_v3, %v17015_v3 }
 0x422   : > { %v17021_v59 = vsub.f32 %v16530_v41, %v1544_v32  ;;  %v17024_v51 = vsub.f32 %v16533_v48, %v1705_v7  ;;  %v1546_v57 = vpop.f32.mrb[53].mxu0  ;;  %v1707_v55 = vpop.f32.mrb[53].mxu1  ;;  %13335 = vmatpush1.bf16.msra.mxu0 %v13334_v42  ;;  %13367 = vmatpush1.bf16.msra.mxu1 %v13366_v11  ;;  %v1843_v48 = vmul.f32 %v17012_v46, %v17012_v46  ;;  %v18733_v32 = vld [vmem:[#allocation37_spill] sm:$0xff] }
 0x423   : > { %v17027_v37 = vsub.f32 %v16539_v52, %v1546_v57  ;;  %v17030_v50 = vsub.f32 %v16542_v54, %v1707_v55 }
 0x424   : > { %v1846_v20 = vmul.f32 %v17021_v59, %v17021_v59  ;;  %v1848_v41 = vmul.f32 %v17024_v51, %v17024_v51 }
 0x425   : > { %18730 = vst [vmem:[#allocation76_spill] sm:$0xff] %v17027_v37  ;;  %18731 = vst [vmem:[#allocation77_spill] sm:$0xff] %v17030_v50  ;;  %v1847_v27 = vmul.f32 %v17027_v37, %v17027_v37  ;;  %v1849_v52 = vmul.f32 %v17030_v50, %v17030_v50  ;;  %v1550_v54 = vpop.f32.mrb[54].mxu0  ;;  %v1711_v5 = vpop.f32.mrb[54].mxu1  ;;  %v18735_v50 = vld [vmem:[#allocation36_spill] sm:$0xff] }
 0x426   : > { %v1552_v30 = vpop.f32.mrb[55].mxu0  ;;  %v1713_v1 = vpop.f32.mrb[55].mxu1  ;;  %v13338_v31 = vpack.c.bf16 %v1846_v20, %v1842_v6  ;;  %v13370_v39 = vpack.c.bf16 %v1848_v41, %v1844_v29  ;;  %v17049_v42 = vsub.f32 %v16577_v12, %v1550_v54  ;;  %v17058_v37 = vsub.f32 %v18735_v50, %v1711_v5  ;;  %v18739_v20 = vld [vmem:[#allocation39_spill] sm:$0xff]  ;;  %v18743_v54 = vld [vmem:[#allocation41_spill] sm:$0xff] }
 0x427   : > { %v13336_v2 = vpack.c.bf16 %v1847_v27, %v1843_v48  ;;  %v13368_v34 = vpack.c.bf16 %v1849_v52, %v1845_v49  ;;  %v17052_v11 = vsub.f32 %v16568_v8, %v1552_v30  ;;  %v17055_v7 = vsub.f32 %v18733_v32, %v1713_v1  ;;  %v18737_v48 = vld [vmem:[#allocation38_spill] sm:$0xff]  ;;  %v18741_v8 = vld [vmem:[#allocation40_spill] sm:$0xff] }
 0x428   : > { %18736 = vst [vmem:[#allocation36_spill] sm:$0xff] %v17058_v37  ;;  %v1852_v32 = vmul.f32 %v17058_v37, %v17058_v37 }
 0x429   : > { %18732 = vst [vmem:[#allocation78_spill] sm:$0xff] %v17052_v11  ;;  %18734 = vst [vmem:[#allocation37_spill] sm:$0xff] %v17055_v7  ;;  %v1556_v57 = vpop.f32.mrb[56].mxu0  ;;  %v1717_v55 = vpop.f32.mrb[56].mxu1  ;;  %13337 = vmatprep.subr.bf16.mxu0 %v13336_v2  ;;  %13369 = vmatprep.subr.bf16.mxu1 %v13368_v34  ;;  %v1851_v29 = vmul.f32 %v17052_v11, %v17052_v11  ;;  %v1853_v30 = vmul.f32 %v17055_v7, %v17055_v7  ;;  %v18747_v11 = vld [vmem:[#allocation42_spill] sm:$0xff] }
 0x42a   : > { %v17061_v49 = vsub.f32 %v18737_v48, %v1556_v57  ;;  %v17064_v41 = vsub.f32 %v18739_v20, %v1717_v55  ;;  %v1558_v12 = vpop.f32.mrb[57].mxu0  ;;  %v1719_v27 = vpop.f32.mrb[57].mxu1  ;;  %13339 = vmatpush1.bf16.msra.mxu0 %v13338_v31  ;;  %13371 = vmatpush1.bf16.msra.mxu1 %v13370_v39  ;;  %v1850_v39 = vmul.f32 %v17049_v42, %v17049_v42 }
 0x42b   : > { %v17067_v52 = vsub.f32 %v18741_v8, %v1558_v12  ;;  %v17070_v6 = vsub.f32 %v18743_v54, %v1719_v27  ;;  %v18745_v54 = vld [vmem:[#allocation46_spill] sm:$0xff] }
 0x42c   : > { %18738 = vst [vmem:[#allocation38_spill] sm:$0xff] %v17061_v49  ;;  %18740 = vst [vmem:[#allocation39_spill] sm:$0xff] %v17064_v41  ;;  %v1854_v50 = vmul.f32 %v17061_v49, %v17061_v49  ;;  %v1856_v5 = vmul.f32 %v17064_v41, %v17064_v41 }
 0x42d   : > { %18742 = vst [vmem:[#allocation40_spill] sm:$0xff] %v17067_v52  ;;  %18744 = vst [vmem:[#allocation41_spill] sm:$0xff] %v17070_v6  ;;  %v1855_v1 = vmul.f32 %v17067_v52, %v17067_v52  ;;  %v1857_v2 = vmul.f32 %v17070_v6, %v17070_v6  ;;  %v1562_v34 = vpop.f32.mrb[58].mxu0  ;;  %v1723_v31 = vpop.f32.mrb[58].mxu1  ;;  %v18746_v6 = vld [vmem:[#allocation43_spill] sm:$0xff] }
 0x42e   : > { %v1564_v57 = vpop.f32.mrb[59].mxu0  ;;  %v1725_v55 = vpop.f32.mrb[59].mxu1  ;;  %v13342_v12 = vpack.c.bf16 %v1854_v50, %v1850_v39  ;;  %v13374_v27 = vpack.c.bf16 %v1856_v5, %v1852_v32  ;;  %v17089_v8 = vsub.f32 %v16609_v43, %v1562_v34  ;;  %v17098_v37 = vsub.f32 %v18747_v11, %v1723_v31  ;;  %v18750_v50 = vld [vmem:[#allocation45_spill] sm:$0xff]  ;;  %v18754_v34 = vld [vmem:[#allocation48_spill] sm:$0xff] }
 0x42f   : > { %v13340_v48 = vpack.c.bf16 %v1855_v1, %v1851_v29  ;;  %v13372_v20 = vpack.c.bf16 %v1857_v2, %v1853_v30  ;;  %v17092_v52 = vsub.f32 %v18745_v54, %v1564_v57  ;;  %v17095_v41 = vsub.f32 %v18746_v6, %v1725_v55  ;;  %v18748_v29 = vld [vmem:[#allocation44_spill] sm:$0xff]  ;;  %v18752_v2 = vld [vmem:[#allocation47_spill] sm:$0xff] }
 0x431   : > { %v1568_v49 = vpop.f32.mrb[60].mxu0  ;;  %v1729_v7 = vpop.f32.mrb[60].mxu1  ;;  %13341 = vmatprep.subr.bf16.mxu0 %v13340_v48  ;;  %13373 = vmatprep.subr.bf16.mxu1 %v13372_v20  ;;  %v1861_v31 = vmul.f32 %v17095_v41, %v17095_v41  ;;  %v1858_v20 = vmul.f32 %v17089_v8, %v17089_v8 }
 0x432   : > { %v17101_v30 = vsub.f32 %v18748_v29, %v1568_v49  ;;  %v17104_v5 = vsub.f32 %v18750_v50, %v1729_v7  ;;  %v1570_v43 = vpop.f32.mrb[61].mxu0  ;;  %v1731_v1 = vpop.f32.mrb[61].mxu1  ;;  %13343 = vmatpush1.bf16.msra.mxu0 %v13342_v12  ;;  %13375 = vmatpush1.bf16.msra.mxu1 %v13374_v27  ;;  %v1859_v7 = vmul.f32 %v17092_v52, %v17092_v52 }
 0x433   : > { %v17107_v6 = vsub.f32 %v18752_v2, %v1570_v43  ;;  %v17110_v39 = vsub.f32 %v18754_v34, %v1731_v1  ;;  %v1860_v12 = vmul.f32 %v17098_v37, %v17098_v37 }
 0x434   : > { %18749 = vst [vmem:[#allocation46_spill] sm:$0xff] %v17101_v30  ;;  %18751 = vst [vmem:[#allocation43_spill] sm:$0xff] %v17104_v5  ;;  %v1862_v11 = vmul.f32 %v17101_v30, %v17101_v30  ;;  %v1864_v49 = vmul.f32 %v17104_v5, %v17104_v5 }
 0x435   : > { %18753 = vst [vmem:[#allocation42_spill] sm:$0xff] %v17107_v6  ;;  %18755 = vst [vmem:[#allocation44_spill] sm:$0xff] %v17110_v39  ;;  %v1863_v32 = vmul.f32 %v17107_v6, %v17107_v6  ;;  %v1865_v57 = vmul.f32 %v17110_v39, %v17110_v39  ;;  %v1574_v55 = vpop.f32.mrb[62].mxu0  ;;  %v1735_v48 = vpop.f32.mrb[62].mxu1 }
 0x436   : > { %v1576_v27 = vpop.f32.mrb[63].mxu0  ;;  %v1737_v54 = vpop.f32.mrb[63].mxu1  ;;  %v13346_v43 = vpack.c.bf16 %v1862_v11, %v1858_v20  ;;  %v13378_v1 = vpack.c.bf16 %v1864_v49, %v1860_v12  ;;  %v17129_v2 = vsub.f32 %v16644_v21, %v1574_v55  ;;  %v17138_v30 = vsub.f32 %v16620_v33, %v1735_v48  ;;  %v18760_v11 = vld [vmem:[#allocation49_spill] sm:$0xff] }
 0x437   : > { %v13344_v29 = vpack.c.bf16 %v1863_v32, %v1859_v7  ;;  %v13376_v50 = vpack.c.bf16 %v1865_v57, %v1861_v31  ;;  %v17132_v34 = vsub.f32 %v16635_v24, %v1576_v27  ;;  %v17135_v39 = vsub.f32 %v16626_v16, %v1737_v54  ;;  %v18762_v24 = vld [vmem:[#allocation50_spill] sm:$0xff]  ;;  %v18764_v32 = vld [vmem:[#allocation51_spill] sm:$0xff] }
 0x438   : > { %18758 = vst [vmem:[#allocation48_spill] sm:$0xff] %v17138_v30  ;;  %v1866_v20 = vmul.f32 %v17129_v2, %v17129_v2  ;;  %v1868_v12 = vmul.f32 %v17138_v30, %v17138_v30 }
 0x439   : > { %18756 = vst [vmem:[#allocation45_spill] sm:$0xff] %v17132_v34  ;;  %18757 = vst [vmem:[#allocation47_spill] sm:$0xff] %v17135_v39  ;;  %v1580_v6 = vpop.f32.mrb[64].mxu0  ;;  %v1741_v5 = vpop.f32.mrb[64].mxu1  ;;  %13345 = vmatprep.subr.bf16.mxu0 %v13344_v29  ;;  %13377 = vmatprep.subr.bf16.mxu1 %v13376_v50 }
 0x43a   : > { %v17141_v7 = vsub.f32 %v16629_v18, %v1580_v6  ;;  %v17144_v49 = vsub.f32 %v18760_v11, %v1741_v5  ;;  %v1582_v21 = vpop.f32.mrb[65].mxu0  ;;  %v1743_v31 = vpop.f32.mrb[65].mxu1  ;;  %13347 = vmatpush1.bf16.msra.mxu0 %v13346_v43  ;;  %13379 = vmatpush1.bf16.msra.mxu1 %v13378_v1  ;;  %v1867_v5 = vmul.f32 %v17132_v34, %v17132_v34  ;;  %v18766_v43 = vmov 1.0   ;;  %v2558_v1 = vld [vmem:[#allocation10 + $0x18] sm:$0xff] }
 0x43b   : > { %v17147_v16 = vsub.f32 %v18762_v24, %v1582_v21  ;;  %v17150_v57 = vsub.f32 %v18764_v32, %v1743_v31  ;;  %v1869_v6 = vmul.f32 %v17135_v39, %v17135_v39 }
 0x43c   : > { %18759 = vst [vmem:[#allocation79_spill] sm:$0xff] %v17141_v7  ;;  %18761 = vst [vmem:[#allocation49_spill] sm:$0xff] %v17144_v49  ;;  %v1870_v33 = vmul.f32 %v17141_v7, %v17141_v7  ;;  %v1872_v18 = vmul.f32 %v17144_v49, %v17144_v49  ;;  %v2570_v49 = vld [vmem:[#allocation10 + $0x78] sm:$0xff]  ;;  %v18792_v7 = vld [vmem:[#allocation75_spill] sm:$0xff] }
 0x43d   : > { %18763 = vst [vmem:[#allocation50_spill] sm:$0xff] %v17147_v16  ;;  %18765 = vst [vmem:[#allocation51_spill] sm:$0xff] %v17150_v57  ;;  %v1871_v55 = vmul.f32 %v17147_v16, %v17147_v16  ;;  %v1873_v48 = vmul.f32 %v17150_v57, %v17150_v57  ;;  %v2564_v57 = vld [vmem:[#allocation10 + $0x48] sm:$0xff]  ;;  %v2566_v16 = vld [vmem:[#allocation10 + $0x58] sm:$0xff] }
 0x43e   : > { %v13350_v29 = vpack.c.bf16 %v1870_v33, %v1866_v20  ;;  %v13382_v50 = vpack.c.bf16 %v1872_v18, %v1868_v12 }
 0x43f   : > { %v13348_v27 = vpack.c.bf16 %v1871_v55, %v1867_v5  ;;  %v13380_v54 = vpack.c.bf16 %v1873_v48, %v1869_v6 }
 0x441   : > { %13349 = vmatprep.subr.bf16.mxu0 %v13348_v27  ;;  %13381 = vmatprep.subr.bf16.mxu1 %v13380_v54  ;;  %v2556_v27 = vld [vmem:[#allocation10 + $0x8] sm:$0xff] }
 0x442   : > { %13351 = vmatpush1.bf16.msra.mxu0 %v13350_v29  ;;  %13383 = vmatpush1.bf16.msra.mxu1 %v13382_v50  ;;  %v2560_v54 = vld [vmem:[#allocation10 + $0x28] sm:$0xff]  ;;  %v2555_v29 = vld [vmem:[#allocation10] sm:$0xff] }
 0x445   : > { %11978 = vmatmul.mubr.msk.f32.vlgmr.msra.gmra.mrb[66].mxu0 %vm16656_vm2, %v18766_v43  ;;  %11979 = vmatmul.mubr.msk.f32.vlgmr.msra.gmra.mrb[66].mxu1 %vm16656_vm2, %v18766_v43  ;;  %v2559_v43 = vld [vmem:[#allocation10 + $0x20] sm:$0xff]  ;;  %vm15860_vm2 = vmmov 1  }
 0x446   : > { %2104 = vmatprep.mubr.f32.mxu0 %v18706_v4  ;;  %2265 = vmatprep.mubr.f32.mxu1 %v18706_v4 }
 0x518   : > { %v1940_v11 = vpop.f32.mrb[66].mxu0  ;;  %v2011_v21 = vpop.f32.mrb[66].mxu1 }
 0x519   : > { %v2016_v31 = vmul.f32 0.015625, %v1940_v11  ;;  %v2018_v24 = vmul.f32 0.015625, %v2011_v21  ;;  %v1942_v32 = vpop.f32.mrb[67].mxu0  ;;  %v2013_v33 = vpop.f32.mrb[67].mxu1  ;;  %v2562_v11 = vld [vmem:[#allocation10 + $0x38] sm:$0xff] }
 0x51a   : > { %v2017_v18 = vmul.f32 0.015625, %v1942_v32  ;;  %v2019_v5 = vmul.f32 0.015625, %v2013_v33  ;;  %v2568_v32 = vld [vmem:[#allocation10 + $0x68] sm:$0xff] }
 0x51b   : > { %v2020_v6 = vadd.f32 1e-05, %v2016_v31  ;;  %v2022_v55 = vadd.f32 1e-05, %v2018_v24  ;;  %v13384_v31 = vpack.c.bf16 %v2560_v54, %v2556_v27  ;;  %v13386_v24 = vpack.c.bf16 %v2559_v43, %v2555_v29  ;;  %v2576_v27 = vld [vmem:[#allocation10 + $0xa8] sm:$0xff] }
 0x51c   : > { %v2021_v48 = vadd.f32 1e-05, %v2017_v18  ;;  %v2023_v20 = vadd.f32 1e-05, %v2019_v5  ;;  %v2563_v18 = vld [vmem:[#allocation10 + $0x40] sm:$0xff]  ;;  %v13406_v5 = vpack.c.bf16 %v2562_v11, %v2558_v1  ;;  %v13410_v43 = vpack.c.bf16 %v2570_v49, %v2566_v16  ;;  %v2569_v1 = vld [vmem:[#allocation10 + $0x70] sm:$0xff] }
 0x51d   : > { %13910 = vrsqrt.f32 %v2020_v6  ;;  %v2557_v6 = vld [vmem:[#allocation10 + $0x10] sm:$0xff]  ;;  %v18768_v11 = vld [vmem:[#allocation53_spill] sm:$0xff] }
 0x51e   : > { %13912 = vrsqrt.f32 %v2022_v55  ;;  %v2561_v55 = vld [vmem:[#allocation10 + $0x30] sm:$0xff] }
 0x51f   : > { %13914 = vrsqrt.f32 %v2021_v48  ;;  %v13388_v48 = vpack.c.bf16 %v2568_v32, %v2564_v57  ;;  %v13408_v54 = vpack.c.bf16 %v2561_v55, %v2557_v6  ;;  %v2565_v57 = vld [vmem:[#allocation10 + $0x50] sm:$0xff]  ;;  %v2574_v32 = vld [vmem:[#allocation10 + $0x98] sm:$0xff] }
 0x520   : > { %13916 = vrsqrt.f32 %v2023_v20  ;;  %v2567_v20 = vld [vmem:[#allocation10 + $0x60] sm:$0xff]  ;;  %v13412_v49 = vpack.c.bf16 %v2569_v1, %v2565_v57  ;;  %v2573_v6 = vld [vmem:[#allocation10 + $0x90] sm:$0xff] }
 0x521   : > { %v13390_v29 = vpack.c.bf16 %v2567_v20, %v2563_v18  ;;  %v2579_v18 = vld [vmem:[#allocation10 + $0xc0] sm:$0xff]  ;;  %v2577_v55 = vld [vmem:[#allocation10 + $0xb0] sm:$0xff] }
 0x522   : > { %v2587_v57 = vld [vmem:[#allocation10 + $0x100] sm:$0xff] }
 0x527   : > { %v13911_v12 = vpop.eup %13910 }
 0x528   : > { %v13913_v50 = vpop.eup %13912 }
 0x529   : > { %v13915_v21 = vpop.eup %13914 }
 0x52a   : > { %v13917_v33 = vpop.eup %13916  ;;  %11980 = vmatprep.subr.msk.mxu0 %vm1411_vm4, %v13915_v21  ;;  %v2575_v21 = vld [vmem:[#allocation10 + $0xa0] sm:$0xff] }
 0x52b   : > { %11998 = vmatprep.subr.msk.mxu1 %vm1411_vm4, %v13917_v33  ;;  %11981 = vmatpush1.msk.msra.mxu0 %vm1411_vm4, %v13911_v12  ;;  %v2572_v12 = vld [vmem:[#allocation10 + $0x88] sm:$0xff]  ;;  %v2578_v33 = vld [vmem:[#allocation10 + $0xb8] sm:$0xff] }
 0x52c   : > { %11999 = vmatpush1.msk.msra.mxu1 %vm1411_vm4, %v13913_v50  ;;  %11982 = vmatmul.mubr.msk.f32.vlgmr.msra.gmra.mrb[68].mxu0 %vm1362_vm5, %v16673_v61  ;;  %v2571_v50 = vld [vmem:[#allocation10 + $0x80] sm:$0xff]  ;;  %vm17204_vm4 = vmpackc.low %vm611_vm0, %vm15860_vm2  ;;  %vm2617_vm0 = vcmask 621568  }
 0x52d   : > { %12000 = vmatmul.mubr.msk.f32.vlgmr.msra.gmra.mrb[68].mxu1 %vm1362_vm5, %v16673_v61  ;;  %2110 = vmatprep.mubr.f32.mxu0 %v18706_v4  ;;  %v13392_v61 = vpack.c.bf16 %v2576_v27, %v2572_v12  ;;  %v13394_v16 = vpack.c.bf16 %v2575_v21, %v2571_v50  ;;  %v2583_v12 = vld [vmem:[#allocation10 + $0xe0] sm:$0xff]  ;;  %v2582_v27 = vld [vmem:[#allocation10 + $0xd8] sm:$0xff]  ;;  %v13416_v50 = vpack.c.bf16 %v2577_v55, %v2573_v6  ;;  %v2585_v21 = vld [vmem:[#allocation10 + $0xf0] sm:$0xff] }
 0x52e   : > { %2271 = vmatprep.mubr.f32.mxu1 %v18706_v4  ;;  %13385 = vmatprep.subr.bf16.mxu0 %v13384_v31  ;;  %v2580_v31 = vld [vmem:[#allocation10 + $0xc8] sm:$0xff]  ;;  %v2589_v6 = vld [vmem:[#allocation10 + $0x110] sm:$0xff] }
 0x52f   : > { %13387 = vmatpush1.bf16.msra.mxu0 %v13386_v24  ;;  %13407 = vmatprep.subr.bf16.mxu1 %v13406_v5  ;;  %v2584_v24 = vld [vmem:[#allocation10 + $0xe8] sm:$0xff]  ;;  %v13414_v5 = vpack.c.bf16 %v2578_v33, %v2574_v32  ;;  %v2593_v55 = vld [vmem:[#allocation10 + $0x130] sm:$0xf] }
 0x530   : > { %11983 = vmatmul.mubr.msk.f32.gmra.mrb[70].mxu0 %vm1362_vm5, %v18768_v11  ;;  %13389 = vmatprep.subr.bf16.mxu0 %v13388_v48  ;;  %v18769_v48 = vld [vmem:[#allocation54_spill] sm:$0xff]  ;;  %v13396_v20 = vpack.c.bf16 %v2584_v24, %v2580_v31  ;;  %v18770_v32 = vld [vmem:[#allocation55_spill] sm:$0xff]  ;;  %v2591_v31 = vld [vmem:[#allocation10 + $0x120] sm:$0xf] }
 0x531   : > { %12001 = vmatmul.mubr.msk.f32.gmra.mrb[70].mxu1 %vm1362_vm5, %v18768_v11  ;;  %2116 = vmatprep.mubr.f32.mxu0 %v18706_v4  ;;  %v2586_v11 = vld [vmem:[#allocation10 + $0xf8] sm:$0xff] }
 0x532   : > { %2277 = vmatprep.mubr.f32.mxu1 %v18706_v4  ;;  %13409 = vmatpush1.bf16.msra.mxu1 %v13408_v54  ;;  %v2588_v54 = vld [vmem:[#allocation10 + $0x108] sm:$0xff]  ;;  %v13418_v1 = vpack.c.bf16 %v2586_v11, %v2582_v27  ;;  %v2590_v24 = vld [vmem:[#allocation10 + $0x118] sm:$0xff] }
 0x533   : > { %13391 = vmatpush1.bf16.msra.mxu0 %v13390_v29  ;;  %13411 = vmatprep.subr.bf16.mxu1 %v13410_v43  ;;  %v2592_v29 = vld [vmem:[#allocation10 + $0x128] sm:$0xf]  ;;  %v13398_v43 = vpack.c.bf16 %v2583_v12, %v2579_v18  ;;  %v13403_v18 = vpack.c.bf16 %v2591_v31, %v2587_v57  ;;  %v13425_v12 = vpack.c.bf16 %v2593_v55, %v2589_v6  ;;  %v18774_v27 = vld [vmem:[#allocation57_spill] sm:$0xff]  ;;  %v18780_v57 = vld [vmem:[#allocation63_spill] sm:$0xff] }
 0x534   : > { %11984 = vmatmul.mubr.msk.f32.gmra.mrb[72].mxu0 %vm1362_vm5, %v18769_v48  ;;  %13393 = vmatprep.subr.bf16.mxu0 %v13392_v61  ;;  %v2581_v61 = vld [vmem:[#allocation10 + $0xd0] sm:$0xff]  ;;  %v13400_v33 = vpack.c.bf16 %v2592_v29, %v2588_v54  ;;  %v18775_v11 = vld [vmem:[#allocation58_spill] sm:$0xff]  ;;  %v13727_v6 = vld [vmem:[#allocation15 + $0x28] ss:$16 sps:$4 sm:$0xff]  }
 0x535   : > { %12002 = vmatmul.mubr.msk.f32.gmra.mrb[72].mxu1 %vm1362_vm5, %v18769_v48  ;;  %2122 = vmatprep.mubr.f32.mxu0 %v18706_v4  ;;  %v2594_v48 = vld [vmem:[#allocation10 + $0x138] sm:$0xf]  ;;  %v18776_v54 = vld [vmem:[#allocation59_spill] sm:$0xff] }
 0x536   : > { %2283 = vmatprep.mubr.f32.mxu1 %v18706_v4  ;;  %13413 = vmatpush1.bf16.msra.mxu1 %v13412_v49  ;;  %v18777_v29 = vld [vmem:[#allocation60_spill] sm:$0xff]  ;;  %v13721_v49 = vld [vmem:[#allocation15 + $0x8] ss:$16 sps:$4 sm:$0xff]  }
 0x537   : > { %13395 = vmatpush1.bf16.msra.mxu0 %v13394_v16  ;;  %13415 = vmatprep.subr.bf16.mxu1 %v13414_v5  ;;  %v13420_v16 = vpack.c.bf16 %v2585_v21, %v2581_v61  ;;  %v13422_v5 = vpack.c.bf16 %v2594_v48, %v2590_v24  ;;  %v18782_v61 = vld [vmem:[#allocation65_spill] sm:$0xff]  ;;  %v18783_v21 = vld [vmem:[#allocation66_spill] sm:$0xff] }
 0x538   : > { %11985 = vmatmul.mubr.msk.f32.gmra.mrb[74].mxu0 %vm1362_vm5, %v18770_v32  ;;  %13397 = vmatprep.subr.bf16.mxu0 %v13396_v20  ;;  %v18773_v20 = vld [vmem:[#allocation56_spill] sm:$0xff]  ;;  %v13723_v24 = vld [vmem:[#allocation15 + $0xc] ss:$16 sps:$4 sm:$0xff]  }
 0x539   : > { %12003 = vmatmul.mubr.msk.f32.gmra.mrb[74].mxu1 %vm1362_vm5, %v18770_v32  ;;  %2128 = vmatprep.mubr.f32.mxu0 %v18706_v4  ;;  %v18784_v32 = vld [vmem:[#allocation67_spill] sm:$0xff]  ;;  %v13720_v31 = vld [vmem:[#allocation15 + $0x4] ss:$16 sps:$4 sm:$0xff]   ;;  %v13718_v48 = vld [vmem:[#allocation15] ss:$16 sps:$4 sm:$0xff]  }
 0x53a   : > { %2289 = vmatprep.mubr.f32.mxu1 %v18706_v4  ;;  %13417 = vmatpush1.bf16.msra.mxu1 %v13416_v50  ;;  %v18778_v50 = vld [vmem:[#allocation61_spill] sm:$0xff]  ;;  %v13732_v55 = vld [vmem:[#allocation15 + $0x44] ss:$16 sps:$4 sm:$0xff]  }
 0x53b   : > { %13399 = vmatpush1.bf16.msra.mxu0 %v13398_v43  ;;  %13419 = vmatprep.subr.bf16.mxu1 %v13418_v1  ;;  %v18779_v43 = vld [vmem:[#allocation62_spill] sm:$0xff]  ;;  %v18781_v1 = vld [vmem:[#allocation64_spill] sm:$0xff] }
 0x53c   : > { %11986 = vmatmul.mubr.msk.f32.gmra.mrb[76].mxu0 %vm1362_vm5, %v18773_v20  ;;  %13402 = vmatprep.subr.msk.bf16.mxu0 %vm17204_vm4, %v13400_v33  ;;  %v2554_v33 = vld [vmem:[#allocation9] sm:$0x3] }
 0x53d   : > { %12004 = vmatmul.mubr.msk.f32.gmra.mrb[76].mxu1 %vm1362_vm5, %v18773_v20  ;;  %2134 = vmatprep.mubr.f32.mxu0 %v18706_v4  ;;  %v13730_v20 = vld [vmem:[#allocation15 + $0x40] ss:$16 sps:$4 sm:$0xff]  }
 0x53e   : > { %2295 = vmatprep.mubr.f32.mxu1 %v18706_v4  ;;  %13421 = vmatpush1.bf16.msra.mxu1 %v13420_v16  ;;  %v13726_v16 = vld [vmem:[#allocation15 + $0x24] ss:$16 sps:$4 sm:$0xff]  }
 0x53f   : > { %13405 = vmatpush1.bf16.msk.msra.mxu0 %vm17204_vm4, %v13403_v18  ;;  %13424 = vmatprep.subr.msk.bf16.mxu1 %vm17204_vm4, %v13422_v5  ;;  %v13729_v18 = vld [vmem:[#allocation15 + $0x2c] ss:$16 sps:$4 sm:$0xff]   ;;  %v13724_v5 = vld [vmem:[#allocation15 + $0x20] ss:$16 sps:$4 sm:$0xff]  }
 0x540   : > { %11987 = vmatmul.mubr.msk.f32.gmra.mrb[78].mxu0 %vm1362_vm5, %v18774_v27  ;;  %3573 = vmatprep.subr.bf16.mxu0 %v13720_v31  ;;  %v13756_v31 = vld [vmem:[#allocation15 + $0xc4] ss:$16 sps:$4 sm:$0xff]  }
 0x541   : > { %12005 = vmatmul.mubr.msk.f32.gmra.mrb[78].mxu1 %vm1362_vm5, %v18774_v27  ;;  %2140 = vmatprep.mubr.f32.mxu0 %v18706_v4  ;;  %v13738_v27 = vld [vmem:[#allocation15 + $0x64] ss:$16 sps:$4 sm:$0xff]  }
 0x542   : > { %2301 = vmatprep.mubr.f32.mxu1 %v18706_v4  ;;  %13427 = vmatpush1.bf16.msk.msra.mxu1 %vm17204_vm4, %v13425_v12  ;;  %v13733_v12 = vld [vmem:[#allocation15 + $0x48] ss:$16 sps:$4 sm:$0xff]  }
 0x543   : > { %3655 = vmatprep.subr.bf16.mxu1 %v13723_v24  ;;  %v13759_v24 = vld [vmem:[#allocation15 + $0xcc] ss:$16 sps:$4 sm:$0xff]  }
 0x544   : > { %11988 = vmatmul.mubr.msk.f32.gmra.mrb[80].mxu0 %vm1362_vm5, %v18775_v11 }
 0x545   : > { %12006 = vmatmul.mubr.msk.f32.gmra.mrb[80].mxu1 %vm1362_vm5, %v18775_v11  ;;  %2146 = vmatprep.mubr.f32.mxu0 %v18706_v4  ;;  %v13741_v11 = vld [vmem:[#allocation15 + $0x6c] ss:$16 sps:$4 sm:$0xff]  }
 0x546   : > { %2307 = vmatprep.mubr.f32.mxu1 %v18706_v4 }
 0x548   : > { %11989 = vmatmul.mubr.msk.f32.gmra.mrb[82].mxu0 %vm1362_vm5, %v18776_v54 }
 0x549   : > { %12007 = vmatmul.mubr.msk.f32.gmra.mrb[82].mxu1 %vm1362_vm5, %v18776_v54  ;;  %2152 = vmatprep.mubr.f32.mxu0 %v18706_v4  ;;  %v13736_v54 = vld [vmem:[#allocation15 + $0x60] ss:$16 sps:$4 sm:$0xff]  }
 0x54a   : > { %2313 = vmatprep.mubr.f32.mxu1 %v18706_v4 }
 0x54c   : > { %11990 = vmatmul.mubr.msk.f32.gmra.mrb[84].mxu0 %vm1362_vm5, %v18777_v29 }
 0x54d   : > { %12008 = vmatmul.mubr.msk.f32.gmra.mrb[84].mxu1 %vm1362_vm5, %v18777_v29  ;;  %2158 = vmatprep.mubr.f32.mxu0 %v18706_v4  ;;  %v13739_v29 = vld [vmem:[#allocation15 + $0x68] ss:$16 sps:$4 sm:$0xff]  }
 0x54e   : > { %2319 = vmatprep.mubr.f32.mxu1 %v18706_v4 }
 0x550   : > { %11991 = vmatmul.mubr.msk.f32.gmra.mrb[86].mxu0 %vm1362_vm5, %v18778_v50 }
 0x551   : > { %12009 = vmatmul.mubr.msk.f32.gmra.mrb[86].mxu1 %vm1362_vm5, %v18778_v50  ;;  %2164 = vmatprep.mubr.f32.mxu0 %v18706_v4  ;;  %v13744_v50 = vld [vmem:[#allocation15 + $0x84] ss:$16 sps:$4 sm:$0xff]  }
 0x552   : > { %2325 = vmatprep.mubr.f32.mxu1 %v18706_v4 }
 0x554   : > { %11992 = vmatmul.mubr.msk.f32.gmra.mrb[88].mxu0 %vm1362_vm5, %v18779_v43 }
 0x555   : > { %12010 = vmatmul.mubr.msk.f32.gmra.mrb[88].mxu1 %vm1362_vm5, %v18779_v43  ;;  %2170 = vmatprep.mubr.f32.mxu0 %v18706_v4  ;;  %v13747_v43 = vld [vmem:[#allocation15 + $0x8c] ss:$16 sps:$4 sm:$0xff]  }
 0x556   : > { %2331 = vmatprep.mubr.f32.mxu1 %v18706_v4 }
 0x558   : > { %11993 = vmatmul.mubr.msk.f32.gmra.mrb[90].mxu0 %vm1362_vm5, %v18780_v57 }
 0x559   : > { %12011 = vmatmul.mubr.msk.f32.gmra.mrb[90].mxu1 %vm1362_vm5, %v18780_v57  ;;  %2176 = vmatprep.mubr.f32.mxu0 %v18706_v4  ;;  %v13742_v57 = vld [vmem:[#allocation15 + $0x80] ss:$16 sps:$4 sm:$0xff]  }
 0x55a   : > { %2337 = vmatprep.mubr.f32.mxu1 %v18706_v4 }
 0x55c   : > { %11994 = vmatmul.mubr.msk.f32.gmra.mrb[92].mxu0 %vm1362_vm5, %v18781_v1 }
 0x55d   : > { %12012 = vmatmul.mubr.msk.f32.gmra.mrb[92].mxu1 %vm1362_vm5, %v18781_v1  ;;  %2182 = vmatprep.mubr.f32.mxu0 %v18706_v4  ;;  %v13745_v1 = vld [vmem:[#allocation15 + $0x88] ss:$16 sps:$4 sm:$0xff]  }
 0x55e   : > { %2343 = vmatprep.mubr.f32.mxu1 %v18706_v4 }
 0x560   : > { %11995 = vmatmul.mubr.msk.f32.gmra.mrb[94].mxu0 %vm1362_vm5, %v18782_v61 }
 0x561   : > { %12013 = vmatmul.mubr.msk.f32.gmra.mrb[94].mxu1 %vm1362_vm5, %v18782_v61  ;;  %2188 = vmatprep.mubr.f32.mxu0 %v18706_v4  ;;  %v13750_v61 = vld [vmem:[#allocation15 + $0xa4] ss:$16 sps:$4 sm:$0xff]  }
 0x562   : > { %2349 = vmatprep.mubr.f32.mxu1 %v18706_v4 }
 0x564   : > { %11996 = vmatmul.mubr.msk.f32.gmra.mrb[96].mxu0 %vm1362_vm5, %v18783_v21 }
 0x565   : > { %12014 = vmatmul.mubr.msk.f32.gmra.mrb[96].mxu1 %vm1362_vm5, %v18783_v21  ;;  %2194 = vmatprep.mubr.f32.mxu0 %v18706_v4  ;;  %v13753_v21 = vld [vmem:[#allocation15 + $0xac] ss:$16 sps:$4 sm:$0xff]  }
 0x566   : > { %2355 = vmatprep.mubr.f32.mxu1 %v18706_v4 }
 0x568   : > { %11997 = vmatmul.mubr.msk.f32.gmra.mrb[98].mxu0 %vm1362_vm5, %v18784_v32 }
 0x569   : > { %12015 = vmatmul.mubr.msk.f32.gmra.mrb[98].mxu1 %vm1362_vm5, %v18784_v32  ;;  %2697 = vmatprep.mubr.f32.mxu0 %v18706_v4  ;;  %v13748_v32 = vld [vmem:[#allocation15 + $0xa0] ss:$16 sps:$4 sm:$0xff]  }
 0x56a   : > { %2768 = vmatprep.mubr.f32.mxu1 %v18706_v4  ;;  %v13735_v4 = vld [vmem:[#allocation15 + $0x4c] ss:$16 sps:$4 sm:$0xff]  }
 0x56c   : > { %12018 = vmatmul.mubr.msk.f32.vlgmr.msra.gmra.mrb[100].mxu0 %vm2617_vm0, %v2554_v33 }
 0x56d   : > { %12021 = vmatmul.mubr.msk.f32.vlgmr.msra.gmra.mrb[100].mxu1 %vm2617_vm0, %v2554_v33  ;;  %3574 = vmatpush1.bf16.msra.mxu0 %v13718_v48  ;;  %v13751_v33 = vld [vmem:[#allocation15 + $0xa8] ss:$16 sps:$4 sm:$0xff]   ;;  %v13754_v48 = vld [vmem:[#allocation15 + $0xc0] ss:$16 sps:$4 sm:$0xff]  }
 0x56e   : > { %3656 = vmatpush1.bf16.msra.mxu1 %v13721_v49  ;;  %3575 = vmatprep.subr.bf16.mxu0 %v13726_v16  ;;  %v13757_v49 = vld [vmem:[#allocation15 + $0xc8] ss:$16 sps:$4 sm:$0xff]   ;;  %v13762_v16 = vld [vmem:[#allocation15 + $0xe4] ss:$16 sps:$4 sm:$0xff]  }
 0x56f   : > { %3657 = vmatprep.subr.bf16.mxu1 %v13729_v18  ;;  %v13765_v18 = vld [vmem:[#allocation15 + $0xec] ss:$16 sps:$4 sm:$0xff]  }
 0x571   : > { %3576 = vmatpush1.bf16.msra.mxu0 %v13724_v5  ;;  %v13760_v5 = vld [vmem:[#allocation15 + $0xe0] ss:$16 sps:$4 sm:$0xff]  }
 0x572   : > { %3658 = vmatpush1.bf16.msra.mxu1 %v13727_v6  ;;  %3577 = vmatprep.subr.bf16.mxu0 %v13732_v55  ;;  %v13763_v6 = vld [vmem:[#allocation15 + $0xe8] ss:$16 sps:$4 sm:$0xff]   ;;  %v13768_v55 = vld [vmem:[#allocation15 + $0x104] ss:$16 sps:$4 sm:$0xff]  }
 0x573   : > { %3659 = vmatprep.subr.bf16.mxu1 %v13735_v4  ;;  %v13771_v4 = vld [vmem:[#allocation15 + $0x10c] ss:$16 sps:$4 sm:$0xff]  }
 0x575   : > { %3578 = vmatpush1.bf16.msra.mxu0 %v13730_v20  ;;  %v13766_v20 = vld [vmem:[#allocation15 + $0x100] ss:$16 sps:$4 sm:$0xff]  }
 0x576   : > { %3660 = vmatpush1.bf16.msra.mxu1 %v13733_v12  ;;  %3579 = vmatprep.subr.bf16.mxu0 %v13738_v27  ;;  %v13769_v12 = vld [vmem:[#allocation15 + $0x108] ss:$16 sps:$4 sm:$0xff]   ;;  %v13774_v27 = vld [vmem:[#allocation15 + $0x124] ss:$16 sps:$4 sm:$0xff]  }
 0x577   : > { %3661 = vmatprep.subr.bf16.mxu1 %v13741_v11  ;;  %v13777_v11 = vld [vmem:[#allocation15 + $0x12c] ss:$16 sps:$4 sm:$0xff]  }
 0x579   : > { %3580 = vmatpush1.bf16.msra.mxu0 %v13736_v54  ;;  %v13772_v54 = vld [vmem:[#allocation15 + $0x120] ss:$16 sps:$4 sm:$0xff]  }
 0x57a   : > { %3662 = vmatpush1.bf16.msra.mxu1 %v13739_v29  ;;  %3581 = vmatprep.subr.bf16.mxu0 %v13744_v50  ;;  %v13775_v29 = vld [vmem:[#allocation15 + $0x128] ss:$16 sps:$4 sm:$0xff]   ;;  %v13780_v50 = vld [vmem:[#allocation15 + $0x144] ss:$16 sps:$4 sm:$0xff]  }
 0x57b   : > { %3663 = vmatprep.subr.bf16.mxu1 %v13747_v43  ;;  %v13783_v43 = vld [vmem:[#allocation15 + $0x14c] ss:$16 sps:$4 sm:$0xff]  }
 0x57d   : > { %3582 = vmatpush1.bf16.msra.mxu0 %v13742_v57  ;;  %v13778_v57 = vld [vmem:[#allocation15 + $0x140] ss:$16 sps:$4 sm:$0xff]  }
 0x57e   : > { %3664 = vmatpush1.bf16.msra.mxu1 %v13745_v1  ;;  %3583 = vmatprep.subr.bf16.mxu0 %v13750_v61  ;;  %v13781_v1 = vld [vmem:[#allocation15 + $0x148] ss:$16 sps:$4 sm:$0xff]   ;;  %v13786_v61 = vld [vmem:[#allocation15 + $0x164] ss:$16 sps:$4 sm:$0xff]  }
 0x57f   : > { %3665 = vmatprep.subr.bf16.mxu1 %v13753_v21  ;;  %v13789_v21 = vld [vmem:[#allocation15 + $0x16c] ss:$16 sps:$4 sm:$0xff]  }
 0x581   : > { %3584 = vmatpush1.bf16.msra.mxu0 %v13748_v32  ;;  %v13784_v32 = vld [vmem:[#allocation15 + $0x160] ss:$16 sps:$4 sm:$0xff]  }
 0x582   : > { %3666 = vmatpush1.bf16.msra.mxu1 %v13751_v33  ;;  %3585 = vmatprep.subr.bf16.mxu0 %v13756_v31  ;;  %v13787_v33 = vld [vmem:[#allocation15 + $0x168] ss:$16 sps:$4 sm:$0xff]   ;;  %v13792_v31 = vld [vmem:[#allocation15 + $0x184] ss:$16 sps:$4 sm:$0xff]  }
 0x583   : > { %3667 = vmatprep.subr.bf16.mxu1 %v13759_v24  ;;  %v13795_v24 = vld [vmem:[#allocation15 + $0x18c] ss:$16 sps:$4 sm:$0xff]  }
 0x585   : > { %3586 = vmatpush1.bf16.msra.mxu0 %v13754_v48  ;;  %v13790_v48 = vld [vmem:[#allocation15 + $0x180] ss:$16 sps:$4 sm:$0xff]  }
 0x586   : > { %3668 = vmatpush1.bf16.msra.mxu1 %v13757_v49  ;;  %3587 = vmatprep.subr.bf16.mxu0 %v13762_v16  ;;  %v13793_v49 = vld [vmem:[#allocation15 + $0x188] ss:$16 sps:$4 sm:$0xff]   ;;  %v13798_v16 = vld [vmem:[#allocation15 + $0x1a4] ss:$16 sps:$4 sm:$0xff]  }
 0x587   : > { %3669 = vmatprep.subr.bf16.mxu1 %v13765_v18  ;;  %v13801_v18 = vld [vmem:[#allocation15 + $0x1ac] ss:$16 sps:$4 sm:$0xff]  }
 0x589   : > { %3588 = vmatpush1.bf16.msra.mxu0 %v13760_v5  ;;  %v13796_v5 = vld [vmem:[#allocation15 + $0x1a0] ss:$16 sps:$4 sm:$0xff]  }
 0x58a   : > { %3670 = vmatpush1.bf16.msra.mxu1 %v13763_v6  ;;  %3589 = vmatprep.subr.bf16.mxu0 %v13768_v55  ;;  %v13799_v6 = vld [vmem:[#allocation15 + $0x1a8] ss:$16 sps:$4 sm:$0xff]   ;;  %v13804_v55 = vld [vmem:[#allocation15 + $0x1c4] ss:$16 sps:$4 sm:$0xff]  }
 0x58b   : > { %3671 = vmatprep.subr.bf16.mxu1 %v13771_v4  ;;  %v13807_v4 = vld [vmem:[#allocation15 + $0x1cc] ss:$16 sps:$4 sm:$0xff]  }
 0x58d   : > { %3590 = vmatpush1.bf16.msra.mxu0 %v13766_v20  ;;  %v13802_v20 = vld [vmem:[#allocation15 + $0x1c0] ss:$16 sps:$4 sm:$0xff]  }
 0x58e   : > { %3672 = vmatpush1.bf16.msra.mxu1 %v13769_v12  ;;  %3591 = vmatprep.subr.bf16.mxu0 %v13774_v27  ;;  %v13805_v12 = vld [vmem:[#allocation15 + $0x1c8] ss:$16 sps:$4 sm:$0xff]   ;;  %v13810_v27 = vld [vmem:[#allocation15 + $0x1e4] ss:$16 sps:$4 sm:$0xff]  }
 0x58f   : > { %3673 = vmatprep.subr.bf16.mxu1 %v13777_v11  ;;  %v13813_v11 = vld [vmem:[#allocation15 + $0x1ec] ss:$16 sps:$4 sm:$0xff]  }
 0x591   : > { %3592 = vmatpush1.bf16.msra.mxu0 %v13772_v54  ;;  %v13808_v54 = vld [vmem:[#allocation15 + $0x1e0] ss:$16 sps:$4 sm:$0xff]  }
 0x592   : > { %3674 = vmatpush1.bf16.msra.mxu1 %v13775_v29  ;;  %3593 = vmatprep.subr.bf16.mxu0 %v13780_v50  ;;  %v13811_v29 = vld [vmem:[#allocation15 + $0x1e8] ss:$16 sps:$4 sm:$0xff]   ;;  %v13816_v50 = vld [vmem:[#allocation15 + $0x204] ss:$16 sps:$4 sm:$0xff]  }
 0x593   : > { %3675 = vmatprep.subr.bf16.mxu1 %v13783_v43  ;;  %v13819_v43 = vld [vmem:[#allocation15 + $0x20c] ss:$16 sps:$4 sm:$0xff]  }
 0x595   : > { %3594 = vmatpush1.bf16.msra.mxu0 %v13778_v57 }
 0x596   : > { %3676 = vmatpush1.bf16.msra.mxu1 %v13781_v1  ;;  %3595 = vmatprep.subr.bf16.mxu0 %v13786_v61 }
 0x597   : > { %3677 = vmatprep.subr.bf16.mxu1 %v13789_v21 }
 0x599   : > { %3596 = vmatpush1.bf16.msra.mxu0 %v13784_v32  ;;  %v18785_v32 = vld [vmem:[#allocation70_spill] sm:$0xff] }
 0x59a   : > { %3678 = vmatpush1.bf16.msra.mxu1 %v13787_v33  ;;  %3597 = vmatprep.subr.bf16.mxu0 %v13792_v31  ;;  %v18786_v31 = vld [vmem:[#allocation71_spill] sm:$0xff] }
 0x59b   : > { %3679 = vmatprep.subr.bf16.mxu1 %v13795_v24 }
 0x59d   : > { %3598 = vmatpush1.bf16.msra.mxu0 %v13790_v48  ;;  %v18787_v48 = vld [vmem:[#allocation68_spill] sm:$0xff] }
 0x59e   : > { %3680 = vmatpush1.bf16.msra.mxu1 %v13793_v49  ;;  %3599 = vmatprep.subr.bf16.mxu0 %v13798_v16 }
 0x59f   : > { %3681 = vmatprep.subr.bf16.mxu1 %v13801_v18  ;;  %v18788_v18 = vld [vmem:[#allocation69_spill] sm:$0xff] }
 0x5a1   : > { %3600 = vmatpush1.bf16.msra.mxu0 %v13796_v5 }
 0x5a2   : > { %3682 = vmatpush1.bf16.msra.mxu1 %v13799_v6  ;;  %3601 = vmatprep.subr.bf16.mxu0 %v13804_v55  ;;  %v18789_v6 = vld [vmem:[#allocation72_spill] sm:$0xff] }
 0x5a3   : > { %3683 = vmatprep.subr.bf16.mxu1 %v13807_v4 }
 0x5a5   : > { %3602 = vmatpush1.bf16.msra.mxu0 %v13802_v20 }
 0x5a6   : > { %3684 = vmatpush1.bf16.msra.mxu1 %v13805_v12  ;;  %3603 = vmatprep.subr.bf16.mxu0 %v13810_v27  ;;  %v18790_v12 = vld [vmem:[#allocation73_spill] sm:$0xff] }
 0x5a7   : > { %3685 = vmatprep.subr.bf16.mxu1 %v13813_v11  ;;  %v18791_v11 = vld [vmem:[#allocation74_spill] sm:$0xff] }
 0x5a9   : > { %3604 = vmatpush1.bf16.msra.mxu0 %v13808_v54 }
 0x5aa   : > { %3686 = vmatpush1.bf16.msra.mxu1 %v13811_v29  ;;  %3614 = vmatprep.subr.bf16.mxu0 %v13816_v50 }
 0x5ab   : > { %3696 = vmatprep.subr.bf16.mxu1 %v13819_v43 }
 0x5ff   : > { %v2106_v57 = vpop.f32.mrb[68].mxu0 }
 0x600   : > { %v2267_v1 = vpop.f32.mrb[68].mxu1  ;;  %v2108_v61 = vpop.f32.mrb[69].mxu0  ;;  %v2362_v33 = vmul.f32 %v2106_v57, %v18785_v32 }
 0x601   : > { %v2269_v21 = vpop.f32.mrb[69].mxu1  ;;  %v2364_v24 = vmul.f32 %v2267_v1, %v18786_v31  ;;  %v2363_v49 = vmul.f32 %v2108_v61, %v18787_v48 }
 0x602   : > { %v2365_v5 = vmul.f32 %v2269_v21, %v18788_v18  ;;  %v2426_v50 = vmax.f32 %v2362_v33, 0.0 }
 0x603   : > { %v2112_v16 = vpop.f32.mrb[70].mxu0  ;;  %v2428_v32 = vmax.f32 %v2364_v24, 0.0  ;;  %v2427_v1 = vmax.f32 %v2363_v49, 0.0 }
 0x604   : > { %v2366_v55 = vmul.f32 %v2112_v16, %v18789_v6  ;;  %v2273_v4 = vpop.f32.mrb[70].mxu1  ;;  %v2114_v20 = vpop.f32.mrb[71].mxu0  ;;  %v2429_v39 = vmax.f32 %v2365_v5, 0.0 }
 0x605   : > { %v2368_v27 = vmul.f32 %v2273_v4, %v18790_v12  ;;  %v2367_v54 = vmul.f32 %v2114_v20, %v18791_v11  ;;  %v2275_v29 = vpop.f32.mrb[71].mxu1 }
 0x606   : > { %v2430_v43 = vmax.f32 %v2366_v55, 0.0  ;;  %v2369_v57 = vmul.f32 %v2275_v29, %v18792_v7 }
 0x607   : > { %v2432_v31 = vmax.f32 %v2368_v27, 0.0  ;;  %v2431_v61 = vmax.f32 %v2367_v54, 0.0  ;;  %v2118_v48 = vpop.f32.mrb[72].mxu0 }
 0x608   : > { %v2490_v21 = vpack.c.bf16 %v2430_v43, %v2426_v50  ;;  %v2433_v18 = vmax.f32 %v2369_v57, 0.0  ;;  %v2279_v16 = vpop.f32.mrb[72].mxu1  ;;  %v2120_v6 = vpop.f32.mrb[73].mxu0  ;;  %v2370_v33 = vmul.f32 %v2118_v48, %v16889_v22 }
 0x609   : > { %v2492_v34 = vpack.c.bf16 %v2432_v31, %v2428_v32  ;;  %v2491_v30 = vpack.c.bf16 %v2431_v61, %v2427_v1  ;;  %v2281_v4 = vpop.f32.mrb[73].mxu1  ;;  %v2372_v7 = vmul.f32 %v2279_v16, %v16898_v26  ;;  %v2371_v24 = vmul.f32 %v2120_v6, %v16892_v10 }
 0x60a   : > { %2522 = vst [vmem:[#allocation2] sm:$0xff] %v2490_v21  ;;  %v2493_v20 = vpack.c.bf16 %v2433_v18, %v2429_v39  ;;  %v2373_v5 = vmul.f32 %v2281_v4, %v16895_v38  ;;  %v2434_v22 = vmax.f32 %v2370_v33, 0.0 }
 0x60b   : > { %2524 = vst [vmem:[#allocation2 + $0x10] sm:$0xff] %v2492_v34  ;;  %2523 = vst [vmem:[#allocation2 + $0x8] sm:$0xff] %v2491_v30  ;;  %v2124_v49 = vpop.f32.mrb[74].mxu0  ;;  %v2436_v26 = vmax.f32 %v2372_v7, 0.0  ;;  %v2435_v29 = vmax.f32 %v2371_v24, 0.0 }
 0x60c   : > { %2525 = vst [vmem:[#allocation2 + $0x18] sm:$0xff] %v2493_v20  ;;  %v2374_v55 = vmul.f32 %v2124_v49, %v16901_v40  ;;  %v2285_v12 = vpop.f32.mrb[74].mxu1  ;;  %v2126_v27 = vpop.f32.mrb[75].mxu0  ;;  %v2437_v57 = vmax.f32 %v2373_v5, 0.0 }
 0x60d   : > { %v2376_v11 = vmul.f32 %v2285_v12, %v16904_v47  ;;  %v2375_v39 = vmul.f32 %v2126_v27, %v16907_v58  ;;  %v2287_v54 = vpop.f32.mrb[75].mxu1 }
 0x60e   : > { %v2438_v34 = vmax.f32 %v2374_v55, 0.0  ;;  %v2377_v30 = vmul.f32 %v2287_v54, %v16910_v0 }
 0x60f   : > { %v2440_v10 = vmax.f32 %v2376_v11, 0.0  ;;  %v2439_v50 = vmax.f32 %v2375_v39, 0.0  ;;  %v2130_v43 = vpop.f32.mrb[76].mxu0 }
 0x610   : > { %v2494_v38 = vpack.c.bf16 %v2438_v34, %v2434_v22  ;;  %v2441_v32 = vmax.f32 %v2377_v30, 0.0  ;;  %v2291_v40 = vpop.f32.mrb[76].mxu1  ;;  %v2132_v1 = vpop.f32.mrb[77].mxu0  ;;  %v2378_v48 = vmul.f32 %v2130_v43, %v16929_v9 }
 0x611   : > { %v2496_v31 = vpack.c.bf16 %v2440_v10, %v2436_v26  ;;  %v2495_v61 = vpack.c.bf16 %v2439_v50, %v2435_v29  ;;  %v2293_v47 = vpop.f32.mrb[77].mxu1  ;;  %v2380_v0 = vmul.f32 %v2291_v40, %v16938_v36  ;;  %v2379_v21 = vmul.f32 %v2132_v1, %v16932_v28 }
 0x612   : > { %2526 = vst [vmem:[#allocation2 + $0x20] sm:$0xff] %v2494_v38  ;;  %v2497_v58 = vpack.c.bf16 %v2441_v32, %v2437_v57  ;;  %v2381_v16 = vmul.f32 %v2293_v47, %v16935_v23  ;;  %v2442_v9 = vmax.f32 %v2378_v48, 0.0 }
 0x613   : > { %2528 = vst [vmem:[#allocation2 + $0x30] sm:$0xff] %v2496_v31  ;;  %2527 = vst [vmem:[#allocation2 + $0x28] sm:$0xff] %v2495_v61  ;;  %v2136_v18 = vpop.f32.mrb[78].mxu0  ;;  %v2444_v36 = vmax.f32 %v2380_v0, 0.0  ;;  %v2443_v55 = vmax.f32 %v2379_v21, 0.0 }
 0x614   : > { %2529 = vst [vmem:[#allocation2 + $0x38] sm:$0xff] %v2497_v58  ;;  %v2382_v6 = vmul.f32 %v2136_v18, %v16941_v62  ;;  %v2297_v4 = vpop.f32.mrb[78].mxu1  ;;  %v2138_v20 = vpop.f32.mrb[79].mxu0  ;;  %v2445_v11 = vmax.f32 %v2381_v16, 0.0 }
 0x615   : > { %v2384_v33 = vmul.f32 %v2297_v4, %v16944_v56  ;;  %v2383_v7 = vmul.f32 %v2138_v20, %v16947_v15  ;;  %v2299_v24 = vpop.f32.mrb[79].mxu1 }
 0x616   : > { %v2446_v49 = vmax.f32 %v2382_v6, 0.0  ;;  %v2385_v5 = vmul.f32 %v2299_v24, %v16950_v25 }
 0x617   : > { %v2448_v28 = vmax.f32 %v2384_v33, 0.0  ;;  %v2447_v12 = vmax.f32 %v2383_v7, 0.0  ;;  %v2142_v27 = vpop.f32.mrb[80].mxu0 }
 0x618   : > { %v2498_v23 = vpack.c.bf16 %v2446_v49, %v2442_v9  ;;  %v2449_v39 = vmax.f32 %v2385_v5, 0.0  ;;  %v2303_v62 = vpop.f32.mrb[80].mxu1  ;;  %v2144_v54 = vpop.f32.mrb[81].mxu0  ;;  %v2386_v30 = vmul.f32 %v2142_v27, %v16969_v35  ;;  %v18793_v5 = vld [vmem:[#allocation76_spill] sm:$0xff] }
 0x619   : > { %v2500_v22 = vpack.c.bf16 %v2448_v28, %v2444_v36  ;;  %v2499_v34 = vpack.c.bf16 %v2447_v12, %v2443_v55  ;;  %v2305_v56 = vpop.f32.mrb[81].mxu1  ;;  %v2388_v25 = vmul.f32 %v2303_v62, %v16978_v60  ;;  %v2387_v26 = vmul.f32 %v2144_v54, %v16972_v14  ;;  %v18794_v12 = vld [vmem:[#allocation77_spill] sm:$0xff] }
 0x61a   : > { %2530 = vst [vmem:[#allocation2 + $0x40] sm:$0xff] %v2498_v23  ;;  %v2501_v15 = vpack.c.bf16 %v2449_v39, %v2445_v11  ;;  %v2389_v10 = vmul.f32 %v2305_v56, %v16975_v44  ;;  %v2450_v35 = vmax.f32 %v2386_v30, 0.0 }
 0x61b   : > { %2532 = vst [vmem:[#allocation2 + $0x50] sm:$0xff] %v2500_v22  ;;  %2531 = vst [vmem:[#allocation2 + $0x48] sm:$0xff] %v2499_v34  ;;  %v2148_v29 = vpop.f32.mrb[82].mxu0  ;;  %v2452_v60 = vmax.f32 %v2388_v25, 0.0  ;;  %v2451_v61 = vmax.f32 %v2387_v26, 0.0  ;;  %v18795_v25 = vld [vmem:[#allocation36_spill] sm:$0xff] }
 0x61c   : > { %2533 = vst [vmem:[#allocation2 + $0x58] sm:$0xff] %v2501_v15  ;;  %v2390_v50 = vmul.f32 %v2148_v29, %v16981_v19  ;;  %v2309_v43 = vpop.f32.mrb[82].mxu1  ;;  %v2150_v57 = vpop.f32.mrb[83].mxu0  ;;  %v2453_v48 = vmax.f32 %v2389_v10, 0.0  ;;  %v18796_v29 = vld [vmem:[#allocation78_spill] sm:$0xff] }
 0x61d   : > { %v2392_v38 = vmul.f32 %v2309_v43, %v16984_v13  ;;  %v2391_v32 = vmul.f32 %v2150_v57, %v16987_v53  ;;  %v2311_v40 = vpop.f32.mrb[83].mxu1  ;;  %v18797_v43 = vld [vmem:[#allocation37_spill] sm:$0xff] }
 0x61e   : > { %v2454_v1 = vmax.f32 %v2390_v50, 0.0  ;;  %v2393_v31 = vmul.f32 %v2311_v40, %v16990_v63 }
 0x61f   : > { %v2456_v14 = vmax.f32 %v2392_v38, 0.0  ;;  %v2455_v47 = vmax.f32 %v2391_v32, 0.0  ;;  %v2154_v58 = vpop.f32.mrb[84].mxu0  ;;  %v18798_v38 = vld [vmem:[#allocation38_spill] sm:$0xff] }
 0x620   : > { %v2502_v44 = vpack.c.bf16 %v2454_v1, %v2450_v35  ;;  %v2457_v0 = vmax.f32 %v2393_v31, 0.0  ;;  %v2315_v19 = vpop.f32.mrb[84].mxu1  ;;  %v2156_v21 = vpop.f32.mrb[85].mxu0  ;;  %v2394_v6 = vmul.f32 %v2154_v58, %v17009_v45  ;;  %v18799_v1 = vld [vmem:[#allocation39_spill] sm:$0xff]  ;;  %v18801_v58 = vld [vmem:[#allocation41_spill] sm:$0xff] }
 0x621   : > { %v2504_v18 = vpack.c.bf16 %v2456_v14, %v2452_v60  ;;  %v2503_v16 = vpack.c.bf16 %v2455_v47, %v2451_v61  ;;  %v2317_v13 = vpop.f32.mrb[85].mxu1  ;;  %v2396_v63 = vmul.f32 %v2315_v19, %v17018_v17  ;;  %v2395_v4 = vmul.f32 %v2156_v21, %v17012_v46  ;;  %v18800_v60 = vld [vmem:[#allocation40_spill] sm:$0xff] }
 0x622   : > { %2534 = vst [vmem:[#allocation2 + $0x60] sm:$0xff] %v2502_v44  ;;  %v2505_v53 = vpack.c.bf16 %v2457_v0, %v2453_v48  ;;  %v2397_v33 = vmul.f32 %v2317_v13, %v17015_v3  ;;  %v2458_v45 = vmax.f32 %v2394_v6, 0.0 }
 0x623   : > { %2536 = vst [vmem:[#allocation2 + $0x70] sm:$0xff] %v2504_v18  ;;  %2535 = vst [vmem:[#allocation2 + $0x68] sm:$0xff] %v2503_v16  ;;  %v2160_v20 = vpop.f32.mrb[86].mxu0  ;;  %v2460_v17 = vmax.f32 %v2396_v63, 0.0  ;;  %v2459_v11 = vmax.f32 %v2395_v4, 0.0 }
 0x624   : > { %2537 = vst [vmem:[#allocation2 + $0x78] sm:$0xff] %v2505_v53  ;;  %v2398_v7 = vmul.f32 %v2160_v20, %v17021_v59  ;;  %v2321_v24 = vpop.f32.mrb[86].mxu1  ;;  %v2162_v9 = vpop.f32.mrb[87].mxu0  ;;  %v2461_v62 = vmax.f32 %v2397_v33, 0.0 }
 0x625   : > { %v2400_v49 = vmul.f32 %v2321_v24, %v17024_v51  ;;  %v2399_v36 = vmul.f32 %v2162_v9, %v18793_v5  ;;  %v2323_v55 = vpop.f32.mrb[87].mxu1 }
 0x626   : > { %v2462_v28 = vmax.f32 %v2398_v7, 0.0  ;;  %v2401_v27 = vmul.f32 %v2323_v55, %v18794_v12  ;;  %v18802_v55 = vld [vmem:[#allocation46_spill] sm:$0xff] }
 0x627   : > { %v2464_v46 = vmax.f32 %v2400_v49, 0.0  ;;  %v2463_v23 = vmax.f32 %v2399_v36, 0.0  ;;  %v2166_v39 = vpop.f32.mrb[88].mxu0 }
 0x628   : > { %v2506_v3 = vpack.c.bf16 %v2462_v28, %v2458_v45  ;;  %v2465_v54 = vmax.f32 %v2401_v27, 0.0  ;;  %v2327_v59 = vpop.f32.mrb[88].mxu1  ;;  %v2168_v22 = vpop.f32.mrb[89].mxu0  ;;  %v2402_v30 = vmul.f32 %v2166_v39, %v17049_v42  ;;  %v18803_v27 = vld [vmem:[#allocation43_spill] sm:$0xff] }
 0x629   : > { %v2508_v34 = vpack.c.bf16 %v2464_v46, %v2460_v17  ;;  %v2507_v56 = vpack.c.bf16 %v2463_v23, %v2459_v11  ;;  %v2329_v51 = vpop.f32.mrb[89].mxu1  ;;  %v2404_v26 = vmul.f32 %v2327_v59, %v18795_v25  ;;  %v2403_v10 = vmul.f32 %v2168_v22, %v18796_v29  ;;  %v18804_v11 = vld [vmem:[#allocation42_spill] sm:$0xff]  ;;  %v2595_v29 = vld [vmem:[#allocation12] sm:$0xf] }
 0x62a   : > { %2538 = vst [vmem:[#allocation2 + $0x80] sm:$0xff] %v2506_v3  ;;  %v2509_v15 = vpack.c.bf16 %v2465_v54, %v2461_v62  ;;  %v2405_v57 = vmul.f32 %v2329_v51, %v18797_v43  ;;  %v2466_v42 = vmax.f32 %v2402_v30, 0.0  ;;  %v18805_v62 = vld [vmem:[#allocation44_spill] sm:$0xff] }
 0x62b   : > { %2540 = vst [vmem:[#allocation2 + $0x90] sm:$0xff] %v2508_v34  ;;  %2539 = vst [vmem:[#allocation2 + $0x88] sm:$0xff] %v2507_v56  ;;  %v2172_v50 = vpop.f32.mrb[90].mxu0  ;;  %v2468_v44 = vmax.f32 %v2404_v26, 0.0  ;;  %v2467_v0 = vmax.f32 %v2403_v10, 0.0  ;;  %v18806_v43 = vld [vmem:[#allocation48_spill] sm:$0xff] }
 0x62c   : > { %2541 = vst [vmem:[#allocation2 + $0x98] sm:$0xff] %v2509_v15  ;;  %v2406_v32 = vmul.f32 %v2172_v50, %v18798_v38  ;;  %v2333_v40 = vpop.f32.mrb[90].mxu1  ;;  %v2174_v35 = vpop.f32.mrb[91].mxu0  ;;  %v2469_v16 = vmax.f32 %v2405_v57, 0.0  ;;  %v18807_v38 = vld [vmem:[#allocation45_spill] sm:$0xff] }
 0x62d   : > { %v2408_v31 = vmul.f32 %v2333_v40, %v18799_v1  ;;  %v2407_v61 = vmul.f32 %v2174_v35, %v18800_v60  ;;  %v2335_v14 = vpop.f32.mrb[91].mxu1  ;;  %v18808_v35 = vld [vmem:[#allocation47_spill] sm:$0xff] }
 0x62e   : > { %v2470_v47 = vmax.f32 %v2406_v32, 0.0  ;;  %v2409_v48 = vmul.f32 %v2335_v14, %v18801_v58  ;;  %v18811_v58 = vld [vmem:[#allocation49_spill] sm:$0xff] }
 0x62f   : > { %v2472_v19 = vmax.f32 %v2408_v31, 0.0  ;;  %v2471_v21 = vmax.f32 %v2407_v61, 0.0  ;;  %v2178_v18 = vpop.f32.mrb[92].mxu0  ;;  %v18809_v31 = vld [vmem:[#allocation79_spill] sm:$0xff] }
 0x630   : > { %v2510_v13 = vpack.c.bf16 %v2470_v47, %v2466_v42  ;;  %v2473_v53 = vmax.f32 %v2409_v48, 0.0  ;;  %v2339_v6 = vpop.f32.mrb[92].mxu1  ;;  %v2180_v63 = vpop.f32.mrb[93].mxu0  ;;  %v2410_v24 = vmul.f32 %v2178_v18, %v17089_v8  ;;  %v18810_v42 = vld [vmem:[#allocation35_spill] sm:$0xff]  ;;  %v18814_v18 = vld [vmem:[#allocation32_spill] sm:$0xff] }
 0x631   : > { %v2512_v4 = vpack.c.bf16 %v2472_v19, %v2468_v44  ;;  %v2511_v20 = vpack.c.bf16 %v2471_v21, %v2467_v0  ;;  %v2341_v33 = vpop.f32.mrb[93].mxu1  ;;  %v2412_v9 = vmul.f32 %v2339_v6, %v17098_v37  ;;  %v2411_v49 = vmul.f32 %v2180_v63, %v17092_v52  ;;  %v18812_v44 = vld [vmem:[#allocation50_spill] sm:$0xff]  ;;  %v18815_v6 = vld [vmem:[#allocation51_spill] sm:$0xff] }
 0x632   : > { %2542 = vst [vmem:[#allocation2 + $0xa0] sm:$0xff] %v2510_v13  ;;  %v2513_v7 = vpack.c.bf16 %v2473_v53, %v2469_v16  ;;  %v2413_v36 = vmul.f32 %v2341_v33, %v17095_v41  ;;  %v2474_v8 = vmax.f32 %v2410_v24, 0.0  ;;  %v2600_v47 = vrot.slane %v2595_v29, %v18810_v42  ;;  %v18813_v19 = vld [vmem:[#allocation34_spill] sm:$0xff] }
 0x633   : > { %2544 = vst [vmem:[#allocation2 + $0xb0] sm:$0xff] %v2512_v4  ;;  %2543 = vst [vmem:[#allocation2 + $0xa8] sm:$0xff] %v2511_v20  ;;  %v2184_v5 = vpop.f32.mrb[94].mxu0  ;;  %v2476_v37 = vmax.f32 %v2412_v9, 0.0  ;;  %v2475_v54 = vmax.f32 %v2411_v49, 0.0  ;;  %v2604_v21 = vrot.slane %v2595_v29, %v18813_v19  ;;  %v2608_v16 = vrot.slane %v2595_v29, %v18814_v18  ;;  %v18816_v4 = vld [vmem:[#allocation33_spill] sm:$0xff] }
 0x634   : > { %2545 = vst [vmem:[#allocation2 + $0xb8] sm:$0xff] %v2513_v7  ;;  %v2414_v45 = vmul.f32 %v2184_v5, %v18802_v55  ;;  %v2345_v28 = vpop.f32.mrb[94].mxu1  ;;  %v2186_v12 = vpop.f32.mrb[95].mxu0  ;;  %v2477_v34 = vmax.f32 %v2413_v36, 0.0  ;;  %v2612_v20 = vrot.slane %v2595_v29, %v18816_v4  ;;  %v13829_v29 = vld [vmem:[#allocation15 + $0x248] ss:$16 sps:$4 sm:$0xff]  }
 0x635   : > { %v2416_v17 = vmul.f32 %v2345_v28, %v18803_v27  ;;  %v2415_v46 = vmul.f32 %v2186_v12, %v18804_v11  ;;  %v2347_v23 = vpop.f32.mrb[95].mxu1 }
 0x636   : > { %v2478_v39 = vmax.f32 %v2414_v45, 0.0  ;;  %v2417_v3 = vmul.f32 %v2347_v23, %v18805_v62 }
 0x637   : > { %v2480_v52 = vmax.f32 %v2416_v17, 0.0  ;;  %v2479_v59 = vmax.f32 %v2415_v46, 0.0  ;;  %v2190_v22 = vpop.f32.mrb[96].mxu0 }
 0x638   : > { %v2514_v41 = vpack.c.bf16 %v2478_v39, %v2474_v8  ;;  %v2481_v56 = vmax.f32 %v2417_v3, 0.0  ;;  %v2351_v51 = vpop.f32.mrb[96].mxu1  ;;  %v2192_v15 = vpop.f32.mrb[97].mxu0  ;;  %v2418_v50 = vmul.f32 %v2190_v22, %v17129_v2 }
 0x639   : > { %v2516_v30 = vpack.c.bf16 %v2480_v52, %v2476_v37  ;;  %v2515_v25 = vpack.c.bf16 %v2479_v59, %v2475_v54  ;;  %v2353_v26 = vpop.f32.mrb[97].mxu1  ;;  %v2420_v57 = vmul.f32 %v2351_v51, %v18806_v43  ;;  %v2419_v32 = vmul.f32 %v2192_v15, %v18807_v38  ;;  %v13814_v52 = vld [vmem:[#allocation15 + $0x200] ss:$16 sps:$4 sm:$0xff]   ;;  %v13817_v59 = vld [vmem:[#allocation15 + $0x208] ss:$16 sps:$4 sm:$0xff]  }
 0x63a   : > { %2546 = vst [vmem:[#allocation2 + $0xc0] sm:$0xff] %v2514_v41  ;;  %v2517_v10 = vpack.c.bf16 %v2481_v56, %v2477_v34  ;;  %v2421_v1 = vmul.f32 %v2353_v26, %v18808_v35  ;;  %v2482_v13 = vmax.f32 %v2418_v50, 0.0  ;;  %v13822_v34 = vld [vmem:[#allocation15 + $0x224] ss:$16 sps:$4 sm:$0xff]   ;;  %v13825_v41 = vld [vmem:[#allocation15 + $0x22c] ss:$16 sps:$4 sm:$0xff]  }
 0x63b   : > { %2548 = vst [vmem:[#allocation2 + $0xd0] sm:$0xff] %v2516_v30  ;;  %2547 = vst [vmem:[#allocation2 + $0xc8] sm:$0xff] %v2515_v25  ;;  %v2196_v40 = vpop.f32.mrb[98].mxu0  ;;  %v2484_v33 = vmax.f32 %v2420_v57, 0.0  ;;  %v2483_v7 = vmax.f32 %v2419_v32, 0.0 }
 0x63c   : > { %2549 = vst [vmem:[#allocation2 + $0xd8] sm:$0xff] %v2517_v10  ;;  %v2422_v60 = vmul.f32 %v2196_v40, %v18809_v31  ;;  %v2357_v61 = vpop.f32.mrb[98].mxu1  ;;  %v2198_v14 = vpop.f32.mrb[99].mxu0  ;;  %v2485_v5 = vmax.f32 %v2421_v1, 0.0  ;;  %v13820_v51 = vld [vmem:[#allocation15 + $0x220] ss:$16 sps:$4 sm:$0xff]  }
 0x63d   : > { %v2424_v48 = vmul.f32 %v2357_v61, %v18811_v58  ;;  %v2423_v2 = vmul.f32 %v2198_v14, %v18812_v44  ;;  %v2359_v0 = vpop.f32.mrb[99].mxu1  ;;  %v13823_v15 = vld [vmem:[#allocation15 + $0x228] ss:$16 sps:$4 sm:$0xff]   ;;  %v13828_v30 = vld [vmem:[#allocation15 + $0x244] ss:$16 sps:$4 sm:$0xff]  }
 0x63e   : > { %v2486_v53 = vmax.f32 %v2422_v60, 0.0  ;;  %v2425_v63 = vmul.f32 %v2359_v0, %v18815_v6  ;;  %v13831_v25 = vld [vmem:[#allocation15 + $0x24c] ss:$16 sps:$4 sm:$0xff]   ;;  %v13826_v26 = vld [vmem:[#allocation15 + $0x240] ss:$16 sps:$4 sm:$0xff]  }
 0x63f   : > { %v2488_v24 = vmax.f32 %v2424_v48, 0.0  ;;  %v2487_v9 = vmax.f32 %v2423_v2, 0.0  ;;  %v2699_v49 = vpop.f32.mrb[100].mxu0  ;;  %v13834_v10 = vld [vmem:[#allocation15 + $0x264] ss:$16 sps:$4 sm:$0xff]  }
 0x640   : > { %v2518_v36 = vpack.c.bf16 %v2486_v53, %v2482_v13  ;;  %v2489_v55 = vmax.f32 %v2425_v63, 0.0  ;;  %v2700_v45 = vadd.f32 %v2699_v49, %v2600_v47  ;;  %v2701_v28 = vpop.f32.mrb[101].mxu0  ;;  %v2770_v12 = vpop.f32.mrb[100].mxu1  ;;  %v13837_v50 = vld [vmem:[#allocation15 + $0x26c] ss:$16 sps:$4 sm:$0xff]  }
 0x641   : > { %v2520_v27 = vpack.c.bf16 %v2488_v24, %v2484_v33  ;;  %v2519_v17 = vpack.c.bf16 %v2487_v9, %v2483_v7  ;;  %v2702_v11 = vadd.f32 %v2701_v28, %v2604_v21  ;;  %v17357_v46 = vadd.f32 %v2770_v12, %v2608_v16  ;;  %v2772_v23 = vpop.f32.mrb[101].mxu1  ;;  %v13832_v43 = vld [vmem:[#allocation15 + $0x260] ss:$16 sps:$4 sm:$0xff]   ;;  %v13835_v57 = vld [vmem:[#allocation15 + $0x268] ss:$16 sps:$4 sm:$0xff]  }
 0x642   : > { %2550 = vst [vmem:[#allocation2 + $0xe0] sm:$0xff] %v2518_v36  ;;  %v2521_v8 = vpack.c.bf16 %v2489_v55, %v2485_v5  ;;  %v2775_v39 = vmax.f32 %v2700_v45, 0.0  ;;  %v2773_v62 = vadd.f32 %v2772_v23, %v2612_v20  ;;  %v13840_v38 = vld [vmem:[#allocation15 + $0x284] ss:$16 sps:$4 sm:$0xff]   ;;  %v13843_v32 = vld [vmem:[#allocation15 + $0x28c] ss:$16 sps:$4 sm:$0xff]  }
 0x643   : > { %2552 = vst [vmem:[#allocation2 + $0xf0] sm:$0xff] %v2520_v27  ;;  %2551 = vst [vmem:[#allocation2 + $0xe8] sm:$0xff] %v2519_v17  ;;  %v2776_v3 = vmax.f32 %v2702_v11, 0.0  ;;  %v13838_v40 = vld [vmem:[#allocation15 + $0x280] ss:$16 sps:$4 sm:$0xff]  }
 0x644   : > { %2553 = vst [vmem:[#allocation2 + $0xf8] sm:$0xff] %v2521_v8  ;;  %v2778_v37 = vmax.f32 %v2773_v62, 0.0  ;;  %v2779_v22 = vpack.c.bf16 %v2775_v39, %v2775_v39  ;;  %v13841_v35 = vld [vmem:[#allocation15 + $0x288] ss:$16 sps:$4 sm:$0xff]   ;;  %v13846_v1 = vld [vmem:[#allocation15 + $0x2a4] ss:$16 sps:$4 sm:$0xff]  }
 0x645   : > { %v2780_v54 = vpack.c.bf16 %v2776_v3, %v2776_v3  ;;  %v13849_v31 = vld [vmem:[#allocation15 + $0x2ac] ss:$16 sps:$4 sm:$0xff]   ;;  %v13844_v60 = vld [vmem:[#allocation15 + $0x2a0] ss:$16 sps:$4 sm:$0xff]   ;;  %v13847_v61 = vld [vmem:[#allocation15 + $0x2a8] ss:$16 sps:$4 sm:$0xff]  }
 0x646   : > { %v2782_v56 = vpack.c.bf16 %v2778_v37, %v2778_v37  ;;  %v13852_v14 = vld [vmem:[#allocation15 + $0x2c4] ss:$16 sps:$4 sm:$0xff]   ;;  %v13855_v47 = vld [vmem:[#allocation15 + $0x2cc] ss:$16 sps:$4 sm:$0xff]   ;;  %v13850_v58 = vld [vmem:[#allocation15 + $0x2c0] ss:$16 sps:$4 sm:$0xff]  }
 0x647   : > { %3605 = vmatprep.mubr.bf16.mxu0 %v2780_v54  ;;  %3687 = vmatprep.mubr.bf16.mxu1 %v2780_v54  ;;  %v13853_v48 = vld [vmem:[#allocation15 + $0x2c8] ss:$16 sps:$4 sm:$0xff]   ;;  %v13858_v44 = vld [vmem:[#allocation15 + $0x2e4] ss:$16 sps:$4 sm:$0xff]   ;;  %v13861_v2 = vld [vmem:[#allocation15 + $0x2ec] ss:$16 sps:$4 sm:$0xff]  }
 0x648   : > { %3606 = vmatmul.mubr.bf16.vlgmr.msra.gmra.mrb[104].mxu0 %v2779_v22  ;;  %3688 = vmatmul.mubr.bf16.vlgmr.msra.gmra.mrb[104].mxu1 %v2779_v22  ;;  %v13856_v0 = vld [vmem:[#allocation15 + $0x2e0] ss:$16 sps:$4 sm:$0xff]   ;;  %v13859_v21 = vld [vmem:[#allocation15 + $0x2e8] ss:$16 sps:$4 sm:$0xff]   ;;  %v13864_v16 = vld [vmem:[#allocation15 + $0x304] ss:$16 sps:$4 sm:$0xff]  }
 0x649   : > { %3615 = vmatpush1.bf16.msra.mxu0 %v13814_v52  ;;  %3697 = vmatpush1.bf16.msra.mxu1 %v13817_v59  ;;  %v13867_v13 = vld [vmem:[#allocation15 + $0x30c] ss:$16 sps:$4 sm:$0xff]   ;;  %v13862_v53 = vld [vmem:[#allocation15 + $0x300] ss:$16 sps:$4 sm:$0xff]   ;;  %v13865_v6 = vld [vmem:[#allocation15 + $0x308] ss:$16 sps:$4 sm:$0xff]  }
 0x64a   : > { %3616 = vmatprep.subr.bf16.mxu0 %v13822_v34  ;;  %3698 = vmatprep.subr.bf16.mxu1 %v13825_v41  ;;  %v13870_v63 = vld [vmem:[#allocation15 + $0x324] ss:$16 sps:$4 sm:$0xff]   ;;  %v13873_v20 = vld [vmem:[#allocation15 + $0x32c] ss:$16 sps:$4 sm:$0xff]   ;;  %v13868_v33 = vld [vmem:[#allocation15 + $0x320] ss:$16 sps:$4 sm:$0xff]  }
 0x64b   : > { %3646 = vmatprep.mubr.bf16.mxu0 %v2782_v56  ;;  %3728 = vmatprep.mubr.bf16.mxu1 %v2782_v56  ;;  %v13871_v7 = vld [vmem:[#allocation15 + $0x328] ss:$16 sps:$4 sm:$0xff]   ;;  %v13876_v24 = vld [vmem:[#allocation15 + $0x344] ss:$16 sps:$4 sm:$0xff]   ;;  %v13879_v9 = vld [vmem:[#allocation15 + $0x34c] ss:$16 sps:$4 sm:$0xff]  }
 0x64c   : > { %v13874_v49 = vld [vmem:[#allocation15 + $0x340] ss:$16 sps:$4 sm:$0xff]   ;;  %v13877_v5 = vld [vmem:[#allocation15 + $0x348] ss:$16 sps:$4 sm:$0xff]   ;;  %v13882_v36 = vld [vmem:[#allocation15 + $0x364] ss:$16 sps:$4 sm:$0xff]  }
 0x64d   : > { %3617 = vmatpush1.bf16.msra.mxu0 %v13820_v51  ;;  %3699 = vmatpush1.bf16.msra.mxu1 %v13823_v15  ;;  %v13885_v55 = vld [vmem:[#allocation15 + $0x36c] ss:$16 sps:$4 sm:$0xff]   ;;  %v13880_v45 = vld [vmem:[#allocation15 + $0x360] ss:$16 sps:$4 sm:$0xff]   ;;  %v13883_v28 = vld [vmem:[#allocation15 + $0x368] ss:$16 sps:$4 sm:$0xff]  }
 0x64e   : > { %3618 = vmatprep.subr.bf16.mxu0 %v13828_v30  ;;  %3700 = vmatprep.subr.bf16.mxu1 %v13831_v25  ;;  %v13888_v12 = vld [vmem:[#allocation15 + $0x384] ss:$16 sps:$4 sm:$0xff]   ;;  %v13891_v27 = vld [vmem:[#allocation15 + $0x38c] ss:$16 sps:$4 sm:$0xff]   ;;  %v13886_v17 = vld [vmem:[#allocation15 + $0x380] ss:$16 sps:$4 sm:$0xff]  }
 0x64f   : > { %v13889_v11 = vld [vmem:[#allocation15 + $0x388] ss:$16 sps:$4 sm:$0xff]   ;;  %v13894_v23 = vld [vmem:[#allocation15 + $0x3a4] ss:$16 sps:$4 sm:$0xff]   ;;  %v13897_v8 = vld [vmem:[#allocation15 + $0x3ac] ss:$16 sps:$4 sm:$0xff]  }
 0x650   : > { %v13892_v39 = vld [vmem:[#allocation15 + $0x3a0] ss:$16 sps:$4 sm:$0xff]   ;;  %v13895_v62 = vld [vmem:[#allocation15 + $0x3a8] ss:$16 sps:$4 sm:$0xff]   ;;  %v13900_v3 = vld [vmem:[#allocation15 + $0x3c4] ss:$16 sps:$4 sm:$0xff]  }
 0x651   : > { %3619 = vmatpush1.bf16.msra.mxu0 %v13826_v26  ;;  %3701 = vmatpush1.bf16.msra.mxu1 %v13829_v29  ;;  %v13903_v37 = vld [vmem:[#allocation15 + $0x3cc] ss:$16 sps:$4 sm:$0xff]   ;;  %v13898_v54 = vld [vmem:[#allocation15 + $0x3c0] ss:$16 sps:$4 sm:$0xff]   ;;  %v13901_v52 = vld [vmem:[#allocation15 + $0x3c8] ss:$16 sps:$4 sm:$0xff]  }
 0x652   : > { %3620 = vmatprep.subr.bf16.mxu0 %v13834_v10  ;;  %3702 = vmatprep.subr.bf16.mxu1 %v13837_v50  ;;  %v13906_v59 = vld [vmem:[#allocation15 + $0x3e4] ss:$16 sps:$4 sm:$0xff]   ;;  %v13909_v22 = vld [vmem:[#allocation15 + $0x3ec] ss:$16 sps:$4 sm:$0xff]   ;;  %v13904_v34 = vld [vmem:[#allocation15 + $0x3e0] ss:$16 sps:$4 sm:$0xff]  }
 0x653   : > { %v13907_v41 = vld [vmem:[#allocation15 + $0x3e8] ss:$16 sps:$4 sm:$0xff]   ;;  %v2777_v56 = vmax.f32 %v17357_v46, 0.0  ;;  %v2911_v15 = vld [vmem:[#allocation16] sm:$0xf] }
 0x654   : > { %v15861_v30 = vmov 1983009808   ;;  %v2916_v26 = vrot.slane %v2911_v15, %v18810_v42  ;;  %v2924_v29 = vrot.slane %v2911_v15, %v18814_v18  ;;  %v2920_v10 = vrot.slane %v2911_v15, %v18813_v19 }
 0x655   : > { %3621 = vmatpush1.bf16.msra.mxu0 %v13832_v43  ;;  %3703 = vmatpush1.bf16.msra.mxu1 %v13835_v57  ;;  %v2781_v51 = vpack.c.bf16 %v2777_v56, %v2777_v56  ;;  %v3744_v25 = vunpack.c.l.s4 %v15861_v30  ;;  %v2928_v43 = vrot.slane %v2911_v15, %v18816_v4 }
 0x656   : > { %3622 = vmatprep.subr.bf16.mxu0 %v13840_v38  ;;  %3704 = vmatprep.subr.bf16.mxu1 %v13843_v32 }
 0x657   : > { %v3745_v50 = vunpack.c.0.s8 %v3744_v25 }
 0x659   : > { %3623 = vmatpush1.bf16.msra.mxu0 %v13838_v40  ;;  %3705 = vmatpush1.bf16.msra.mxu1 %v13841_v35 }
 0x65a   : > { %3624 = vmatprep.subr.bf16.mxu0 %v13846_v1  ;;  %3706 = vmatprep.subr.bf16.mxu1 %v13849_v31  ;;  %v18817_v31 = vld [vmem:[#allocation31_spill] sm:$0xff] }
 0x65d   : > { %3625 = vmatpush1.bf16.msra.mxu0 %v13844_v60  ;;  %3707 = vmatpush1.bf16.msra.mxu1 %v13847_v61  ;;  %v3748_v60 = vsub.s32 %v3745_v50, %v18817_v31 }
 0x65e   : > { %3626 = vmatprep.subr.bf16.mxu0 %v13852_v14  ;;  %3708 = vmatprep.subr.bf16.mxu1 %v13855_v47 }
 0x661   : > { %3627 = vmatpush1.bf16.msra.mxu0 %v13850_v58  ;;  %3709 = vmatpush1.bf16.msra.mxu1 %v13853_v48 }
 0x662   : > { %3628 = vmatprep.subr.bf16.mxu0 %v13858_v44  ;;  %3710 = vmatprep.subr.bf16.mxu1 %v13861_v2 }
 0x665   : > { %3629 = vmatpush1.bf16.msra.mxu0 %v13856_v0  ;;  %3711 = vmatpush1.bf16.msra.mxu1 %v13859_v21 }
 0x666   : > { %3630 = vmatprep.subr.bf16.mxu0 %v13864_v16  ;;  %3712 = vmatprep.subr.bf16.mxu1 %v13867_v13 }
 0x669   : > { %3631 = vmatpush1.bf16.msra.mxu0 %v13862_v53  ;;  %3713 = vmatpush1.bf16.msra.mxu1 %v13865_v6 }
 0x66a   : > { %3632 = vmatprep.subr.bf16.mxu0 %v13870_v63  ;;  %3714 = vmatprep.subr.bf16.mxu1 %v13873_v20 }
 0x66d   : > { %3633 = vmatpush1.bf16.msra.mxu0 %v13868_v33  ;;  %3715 = vmatpush1.bf16.msra.mxu1 %v13871_v7 }
 0x66e   : > { %3634 = vmatprep.subr.bf16.mxu0 %v13876_v24  ;;  %3716 = vmatprep.subr.bf16.mxu1 %v13879_v9 }
 0x671   : > { %3635 = vmatpush1.bf16.msra.mxu0 %v13874_v49  ;;  %3717 = vmatpush1.bf16.msra.mxu1 %v13877_v5 }
 0x672   : > { %3636 = vmatprep.subr.bf16.mxu0 %v13882_v36  ;;  %3718 = vmatprep.subr.bf16.mxu1 %v13885_v55 }
 0x675   : > { %3637 = vmatpush1.bf16.msra.mxu0 %v13880_v45  ;;  %3719 = vmatpush1.bf16.msra.mxu1 %v13883_v28 }
 0x676   : > { %3638 = vmatprep.subr.bf16.mxu0 %v13888_v12  ;;  %3720 = vmatprep.subr.bf16.mxu1 %v13891_v27 }
 0x679   : > { %3639 = vmatpush1.bf16.msra.mxu0 %v13886_v17  ;;  %3721 = vmatpush1.bf16.msra.mxu1 %v13889_v11 }
 0x67a   : > { %3640 = vmatprep.subr.bf16.mxu0 %v13894_v23  ;;  %3722 = vmatprep.subr.bf16.mxu1 %v13897_v8 }
 0x67d   : > { %3641 = vmatpush1.bf16.msra.mxu0 %v13892_v39  ;;  %3723 = vmatpush1.bf16.msra.mxu1 %v13895_v62 }
 0x67e   : > { %3642 = vmatprep.subr.bf16.mxu0 %v13900_v3  ;;  %3724 = vmatprep.subr.bf16.mxu1 %v13903_v37 }
 0x681   : > { %3643 = vmatpush1.bf16.msra.mxu0 %v13898_v54  ;;  %3725 = vmatpush1.bf16.msra.mxu1 %v13901_v52 }
 0x682   : > { %3644 = vmatprep.subr.bf16.mxu0 %v13906_v59  ;;  %3726 = vmatprep.subr.bf16.mxu1 %v13909_v22 }
 0x685   : > { %3645 = vmatpush1.bf16.msra.mxu0 %v13904_v34  ;;  %3727 = vmatpush1.bf16.msra.mxu1 %v13907_v41 }
 0x688   : > { %3647 = vmatmul.mubr.bf16.vlgmr.msra.gmra.mrb[104].mxu0 %v2781_v51  ;;  %3729 = vmatmul.mubr.bf16.vlgmr.msra.gmra.mrb[104].mxu1 %v2781_v51 }
 0x75b   : > { %v3648_v46 = vpop.f32.mrb[104].mxu0  ;;  %v3730_v57 = vpop.f32.mrb[104].mxu1 }
 0x75c   : > { %v13492_v38 = vadd.f32 %v3648_v46, %v2916_v26  ;;  %v13494_v32 = vadd.f32 %v3730_v57, %v2924_v29  ;;  %v3650_v40 = vpop.f32.mrb[105].mxu0  ;;  %v3732_v35 = vpop.f32.mrb[105].mxu1 }
 0x75d   : > { %v13493_v1 = vadd.f32 %v3650_v40, %v2920_v10  ;;  %v13495_v61 = vadd.f32 %v3732_v35, %v2928_v43  ;;  %v3652_v14 = vpop.f32.mrb[106].mxu0  ;;  %v3734_v47 = vpop.f32.mrb[106].mxu1 }
 0x75e   : > { %v3653_v42 = vpop.f32.mrb[107].mxu0  ;;  %v3735_v58 = vpop.f32.mrb[107].mxu1 }
 0x75f   : > { %v3741_v18 = vcombine.low %v13492_v38, %v13493_v1  ;;  %v3742_v48 = vcombine.low %v13494_v32, %v13495_v61 }
 0x761   : > { %v3749_v19 = vrot.slane %v3741_v18, %v3748_v60  ;;  %v3756_v44 = vrot.slane %v3742_v48, %v3748_v60 }
 0x763   : > { %v3757_v2 = vcombine.low %v3749_v19, %v3756_v44 }
 0x765   : > { %3759 = vst [vmem:[#allocation3] sm:$0xff] %v3757_v2 }
 0x766 PF: > { %v13918_v4 = vld [vmem:[%s16230_s25 + $0x4] ss:$16 sps:$4 sm:$0xff]   ;;  %v13920_v0 = vld [vmem:[%s16230_s25 + $0xc] ss:$16 sps:$4 sm:$0xff]   ;;  %v13922_v21 = vld [vmem:[%s16230_s25] ss:$16 sps:$4 sm:$0xff]  }
 0x767   : > { %4539 = vmatprep.subr.bf16.mxu0 %v13918_v4  ;;  %v13923_v16 = vld [vmem:[%s16230_s25 + $0x8] ss:$16 sps:$4 sm:$0xff]   ;;  %4621 = vmatprep.subr.bf16.mxu1 %v13920_v0  ;;  %v13924_v13 = vld [vmem:[%s16230_s25 + $0x24] ss:$16 sps:$4 sm:$0xff]   ;;  %v13926_v53 = vld [vmem:[%s16230_s25 + $0x2c] ss:$16 sps:$4 sm:$0xff]  }
 0x768   : > { %4540 = vmatpush1.bf16.msra.mxu0 %v13922_v21  ;;  %4622 = vmatpush1.bf16.msra.mxu1 %v13923_v16  ;;  %v13928_v6 = vld [vmem:[%s16230_s25 + $0x20] ss:$16 sps:$4 sm:$0xff]   ;;  %v13929_v63 = vld [vmem:[%s16230_s25 + $0x28] ss:$16 sps:$4 sm:$0xff]   ;;  %v13930_v20 = vld [vmem:[%s16230_s25 + $0x44] ss:$16 sps:$4 sm:$0xff]  }
 0x769   : > { %4541 = vmatprep.subr.bf16.mxu0 %v13924_v13  ;;  %4623 = vmatprep.subr.bf16.mxu1 %v13926_v53  ;;  %v13932_v33 = vld [vmem:[%s16230_s25 + $0x4c] ss:$16 sps:$4 sm:$0xff]   ;;  %v13934_v7 = vld [vmem:[%s16230_s25 + $0x40] ss:$16 sps:$4 sm:$0xff]   ;;  %v13935_v24 = vld [vmem:[%s16230_s25 + $0x48] ss:$16 sps:$4 sm:$0xff]  }
 0x76a   : > { %v13936_v9 = vld [vmem:[%s16230_s25 + $0x64] ss:$16 sps:$4 sm:$0xff]   ;;  %v13938_v49 = vld [vmem:[%s16230_s25 + $0x6c] ss:$16 sps:$4 sm:$0xff]   ;;  %v13940_v5 = vld [vmem:[%s16230_s25 + $0x60] ss:$16 sps:$4 sm:$0xff]  }
 0x76b   : > { %v13941_v36 = vld [vmem:[%s16230_s25 + $0x68] ss:$16 sps:$4 sm:$0xff]   ;;  %v13942_v55 = vld [vmem:[%s16230_s25 + $0x84] ss:$16 sps:$4 sm:$0xff]   ;;  %v13944_v45 = vld [vmem:[%s16230_s25 + $0x8c] ss:$16 sps:$4 sm:$0xff]  }
 0x76c   : > { %4542 = vmatpush1.bf16.msra.mxu0 %v13928_v6  ;;  %4624 = vmatpush1.bf16.msra.mxu1 %v13929_v63  ;;  %v13946_v28 = vld [vmem:[%s16230_s25 + $0x80] ss:$16 sps:$4 sm:$0xff]   ;;  %v13947_v12 = vld [vmem:[%s16230_s25 + $0x88] ss:$16 sps:$4 sm:$0xff]   ;;  %v13948_v27 = vld [vmem:[%s16230_s25 + $0xa4] ss:$16 sps:$4 sm:$0xff]  }
 0x76d   : > { %4543 = vmatprep.subr.bf16.mxu0 %v13930_v20  ;;  %4625 = vmatprep.subr.bf16.mxu1 %v13932_v33  ;;  %v13950_v17 = vld [vmem:[%s16230_s25 + $0xac] ss:$16 sps:$4 sm:$0xff]   ;;  %v13952_v11 = vld [vmem:[%s16230_s25 + $0xa0] ss:$16 sps:$4 sm:$0xff]   ;;  %v13953_v23 = vld [vmem:[%s16230_s25 + $0xa8] ss:$16 sps:$4 sm:$0xff]  }
 0x76e   : > { %v13954_v8 = vld [vmem:[%s16230_s25 + $0xc4] ss:$16 sps:$4 sm:$0xff]   ;;  %v13956_v39 = vld [vmem:[%s16230_s25 + $0xcc] ss:$16 sps:$4 sm:$0xff]   ;;  %v13958_v62 = vld [vmem:[%s16230_s25 + $0xc0] ss:$16 sps:$4 sm:$0xff]  }
 0x76f   : > { %v13959_v3 = vld [vmem:[%s16230_s25 + $0xc8] ss:$16 sps:$4 sm:$0xff]   ;;  %v13960_v37 = vld [vmem:[%s16230_s25 + $0xe4] ss:$16 sps:$4 sm:$0xff]   ;;  %v13962_v54 = vld [vmem:[%s16230_s25 + $0xec] ss:$16 sps:$4 sm:$0xff]  }
 0x770   : > { %4544 = vmatpush1.bf16.msra.mxu0 %v13934_v7  ;;  %4626 = vmatpush1.bf16.msra.mxu1 %v13935_v24  ;;  %v13964_v52 = vld [vmem:[%s16230_s25 + $0xe0] ss:$16 sps:$4 sm:$0xff]   ;;  %v13965_v59 = vld [vmem:[%s16230_s25 + $0xe8] ss:$16 sps:$4 sm:$0xff]   ;;  %v13966_v22 = vld [vmem:[%s16230_s25 + $0x104] ss:$16 sps:$4 sm:$0xff]  }
 0x771   : > { %4545 = vmatprep.subr.bf16.mxu0 %v13936_v9  ;;  %4627 = vmatprep.subr.bf16.mxu1 %v13938_v49  ;;  %v13968_v34 = vld [vmem:[%s16230_s25 + $0x10c] ss:$16 sps:$4 sm:$0xff]   ;;  %s12150_s29 = sshll.u32 %s15945_s23, 4  ;;  %v13970_v41 = vld [vmem:[%s16230_s25 + $0x100] ss:$16 sps:$4 sm:$0xff]   ;;  %p13177_p13 = scmp.ne.s32.totalorder %s15945_s23, 7 }
 0x772   : > { %v13971_v56 = vld [vmem:[%s16230_s25 + $0x108] ss:$16 sps:$4 sm:$0xff]   ;;  %v13972_v51 = vld [vmem:[%s16230_s25 + $0x124] ss:$16 sps:$4 sm:$0xff]   ;;  %v13974_v15 = vld [vmem:[%s16230_s25 + $0x12c] ss:$16 sps:$4 sm:$0xff]  }
 0x773   : > { %s3761_s20 = sshra.s32 %s12150_s29, 4  ;;  %v13976_v30 = vld [vmem:[%s16230_s25 + $0x120] ss:$16 sps:$4 sm:$0xff]   ;;  %v13977_v25 = vld [vmem:[%s16230_s25 + $0x128] ss:$16 sps:$4 sm:$0xff]  }
 0x774   : > { %4546 = vmatpush1.bf16.msra.mxu0 %v13940_v5  ;;  %4628 = vmatpush1.bf16.msra.mxu1 %v13941_v36  ;;  %v13978_v26 = vld [vmem:[%s16230_s25 + $0x144] ss:$16 sps:$4 sm:$0xff]   ;;  %s13185_s4 = sshll.u32 %s3761_s20, 5  ;;  %v13980_v29 = vld [vmem:[%s16230_s25 + $0x14c] ss:$16 sps:$4 sm:$0xff]  }
 0x775   : > { %4547 = vmatprep.subr.bf16.mxu0 %v13942_v55  ;;  %4629 = vmatprep.subr.bf16.mxu1 %v13944_v45  ;;  %v13982_v10 = vld [vmem:[%s16230_s25 + $0x140] ss:$16 sps:$4 sm:$0xff]   ;;  %v13983_v50 = vld [vmem:[%s16230_s25 + $0x148] ss:$16 sps:$4 sm:$0xff]   ;;  %v13984_v43 = vld [vmem:[%s16230_s25 + $0x164] ss:$16 sps:$4 sm:$0xff]  }
 0x776   : > { %v13986_v46 = vld [vmem:[%s16230_s25 + $0x16c] ss:$16 sps:$4 sm:$0xff]   ;;  %s17412_s27 = scalar_lea.vmem [#allocation2], %s13185_s4  ;;  %v13988_v38 = vld [vmem:[%s16230_s25 + $0x160] ss:$16 sps:$4 sm:$0xff]  }
 0x777   : > { %v17415_v57 = vld [vmem:[%s17412_s27 + $0x8] sm:$0xff]  ;;  %v13994_v1 = vld [vmem:[%s16230_s25 + $0x180] ss:$16 sps:$4 sm:$0xff]  }
 0x778   : > { %4548 = vmatpush1.bf16.msra.mxu0 %v13946_v28  ;;  %4630 = vmatpush1.bf16.msra.mxu1 %v13947_v12  ;;  %v13989_v32 = vld [vmem:[%s16230_s25 + $0x168] ss:$16 sps:$4 sm:$0xff]   ;;  %v13990_v40 = vld [vmem:[%s16230_s25 + $0x184] ss:$16 sps:$4 sm:$0xff]   ;;  %v13992_v35 = vld [vmem:[%s16230_s25 + $0x18c] ss:$16 sps:$4 sm:$0xff]  }
 0x779   : > { %4549 = vmatprep.subr.bf16.mxu0 %v13948_v27  ;;  %4631 = vmatprep.subr.bf16.mxu1 %v13950_v17  ;;  %v13995_v31 = vld [vmem:[%s16230_s25 + $0x188] ss:$16 sps:$4 sm:$0xff]   ;;  %v13996_v60 = vld [vmem:[%s16230_s25 + $0x1a4] ss:$16 sps:$4 sm:$0xff]   ;;  %v13998_v61 = vld [vmem:[%s16230_s25 + $0x1ac] ss:$16 sps:$4 sm:$0xff]  }
 0x77a   : > { %4571 = vmatprep.mubr.bf16.mxu0 %v17415_v57  ;;  %4653 = vmatprep.mubr.bf16.mxu1 %v17415_v57  ;;  %v14000_v14 = vld [vmem:[%s16230_s25 + $0x1a0] ss:$16 sps:$4 sm:$0xff]   ;;  %v14001_v47 = vld [vmem:[%s16230_s25 + $0x1a8] ss:$16 sps:$4 sm:$0xff]   ;;  %v14002_v42 = vld [vmem:[%s16230_s25 + $0x1c4] ss:$16 sps:$4 sm:$0xff]  }
 0x77b   : > { %v14004_v58 = vld [vmem:[%s16230_s25 + $0x1cc] ss:$16 sps:$4 sm:$0xff]   ;;  %v14006_v18 = vld [vmem:[%s16230_s25 + $0x1c0] ss:$16 sps:$4 sm:$0xff]   ;;  %v14007_v48 = vld [vmem:[%s16230_s25 + $0x1c8] ss:$16 sps:$4 sm:$0xff]  }
 0x77c   : > { %4550 = vmatpush1.bf16.msra.mxu0 %v13952_v11  ;;  %4632 = vmatpush1.bf16.msra.mxu1 %v13953_v23  ;;  %v14008_v19 = vld [vmem:[%s16230_s25 + $0x1e4] ss:$16 sps:$4 sm:$0xff]   ;;  %v14010_v44 = vld [vmem:[%s16230_s25 + $0x1ec] ss:$16 sps:$4 sm:$0xff]   ;;  %v14012_v2 = vld [vmem:[%s16230_s25 + $0x1e0] ss:$16 sps:$4 sm:$0xff]  }
 0x77d   : > { %4551 = vmatprep.subr.bf16.mxu0 %v13954_v8  ;;  %4633 = vmatprep.subr.bf16.mxu1 %v13956_v39  ;;  %v14013_v4 = vld [vmem:[%s16230_s25 + $0x1e8] ss:$16 sps:$4 sm:$0xff]   ;;  %v14016_v0 = vld [vmem:[%s16230_s25 + $0x204] ss:$16 sps:$4 sm:$0xff]   ;;  %v14019_v21 = vld [vmem:[%s16230_s25 + $0x20c] ss:$16 sps:$4 sm:$0xff]  }
 0x77e   : > { %v14014_v16 = vld [vmem:[%s16230_s25 + $0x200] ss:$16 sps:$4 sm:$0xff]   ;;  %v14017_v13 = vld [vmem:[%s16230_s25 + $0x208] ss:$16 sps:$4 sm:$0xff]   ;;  %v14022_v6 = vld [vmem:[%s16230_s25 + $0x224] ss:$16 sps:$4 sm:$0xff]  }
 0x77f   : > { %v17442_v53 = vld [vmem:[%s17412_s27] sm:$0xff]  ;;  %v14023_v33 = vld [vmem:[%s16230_s25 + $0x228] ss:$16 sps:$4 sm:$0xff]  }
 0x780   : > { %4552 = vmatpush1.bf16.msra.mxu0 %v13958_v62  ;;  %4634 = vmatpush1.bf16.msra.mxu1 %v13959_v3  ;;  %v14025_v63 = vld [vmem:[%s16230_s25 + $0x22c] ss:$16 sps:$4 sm:$0xff]   ;;  %v14020_v20 = vld [vmem:[%s16230_s25 + $0x220] ss:$16 sps:$4 sm:$0xff]   ;;  %v14028_v7 = vld [vmem:[%s16230_s25 + $0x244] ss:$16 sps:$4 sm:$0xff]  }
 0x781   : > { %4553 = vmatprep.subr.bf16.mxu0 %v13960_v37  ;;  %4635 = vmatprep.subr.bf16.mxu1 %v13962_v54  ;;  %v14031_v24 = vld [vmem:[%s16230_s25 + $0x24c] ss:$16 sps:$4 sm:$0xff]   ;;  %v14026_v9 = vld [vmem:[%s16230_s25 + $0x240] ss:$16 sps:$4 sm:$0xff]   ;;  %v14029_v49 = vld [vmem:[%s16230_s25 + $0x248] ss:$16 sps:$4 sm:$0xff]  }
 0x782   : > { %v14034_v5 = vld [vmem:[%s16230_s25 + $0x264] ss:$16 sps:$4 sm:$0xff]   ;;  %v14037_v36 = vld [vmem:[%s16230_s25 + $0x26c] ss:$16 sps:$4 sm:$0xff]   ;;  %v14032_v55 = vld [vmem:[%s16230_s25 + $0x260] ss:$16 sps:$4 sm:$0xff]  }
 0x783   : > { %v14035_v45 = vld [vmem:[%s16230_s25 + $0x268] ss:$16 sps:$4 sm:$0xff]   ;;  %v14040_v28 = vld [vmem:[%s16230_s25 + $0x284] ss:$16 sps:$4 sm:$0xff]   ;;  %v14043_v12 = vld [vmem:[%s16230_s25 + $0x28c] ss:$16 sps:$4 sm:$0xff]  }
 0x784   : > { %4554 = vmatpush1.bf16.msra.mxu0 %v13964_v52  ;;  %4636 = vmatpush1.bf16.msra.mxu1 %v13965_v59  ;;  %v14038_v27 = vld [vmem:[%s16230_s25 + $0x280] ss:$16 sps:$4 sm:$0xff]   ;;  %v14041_v17 = vld [vmem:[%s16230_s25 + $0x288] ss:$16 sps:$4 sm:$0xff]   ;;  %v14046_v11 = vld [vmem:[%s16230_s25 + $0x2a4] ss:$16 sps:$4 sm:$0xff]  }
 0x785   : > { %4555 = vmatprep.subr.bf16.mxu0 %v13966_v22  ;;  %4637 = vmatprep.subr.bf16.mxu1 %v13968_v34  ;;  %v14049_v23 = vld [vmem:[%s16230_s25 + $0x2ac] ss:$16 sps:$4 sm:$0xff]   ;;  %v14044_v8 = vld [vmem:[%s16230_s25 + $0x2a0] ss:$16 sps:$4 sm:$0xff]   ;;  %v14047_v39 = vld [vmem:[%s16230_s25 + $0x2a8] ss:$16 sps:$4 sm:$0xff]  }
 0x786   : > { %v14052_v62 = vld [vmem:[%s16230_s25 + $0x2c4] ss:$16 sps:$4 sm:$0xff]   ;;  %v14055_v3 = vld [vmem:[%s16230_s25 + $0x2cc] ss:$16 sps:$4 sm:$0xff]   ;;  %v14050_v54 = vld [vmem:[%s16230_s25 + $0x2c0] ss:$16 sps:$4 sm:$0xff]  }
 0x787   : > { %v17469_v37 = vld [vmem:[%s17412_s27 + $0x18] sm:$0xff]  ;;  %v14056_v34 = vld [vmem:[%s16230_s25 + $0x2e0] ss:$16 sps:$4 sm:$0xff]  }
 0x788   : > { %4556 = vmatpush1.bf16.msra.mxu0 %v13970_v41  ;;  %4638 = vmatpush1.bf16.msra.mxu1 %v13971_v56  ;;  %v14053_v52 = vld [vmem:[%s16230_s25 + $0x2c8] ss:$16 sps:$4 sm:$0xff]   ;;  %v14058_v59 = vld [vmem:[%s16230_s25 + $0x2e4] ss:$16 sps:$4 sm:$0xff]   ;;  %v14061_v22 = vld [vmem:[%s16230_s25 + $0x2ec] ss:$16 sps:$4 sm:$0xff]  }
 0x789   : > { %4557 = vmatprep.subr.bf16.mxu0 %v13972_v51  ;;  %4639 = vmatprep.subr.bf16.mxu1 %v13974_v15  ;;  %v14059_v41 = vld [vmem:[%s16230_s25 + $0x2e8] ss:$16 sps:$4 sm:$0xff]   ;;  %v14064_v56 = vld [vmem:[%s16230_s25 + $0x304] ss:$16 sps:$4 sm:$0xff]   ;;  %v14067_v51 = vld [vmem:[%s16230_s25 + $0x30c] ss:$16 sps:$4 sm:$0xff]  }
 0x78a   : > { %v14062_v15 = vld [vmem:[%s16230_s25 + $0x300] ss:$16 sps:$4 sm:$0xff]  }
 0x78c   : > { %4558 = vmatpush1.bf16.msra.mxu0 %v13976_v30  ;;  %4640 = vmatpush1.bf16.msra.mxu1 %v13977_v25  ;;  %v14065_v30 = vld [vmem:[%s16230_s25 + $0x308] ss:$16 sps:$4 sm:$0xff]   ;;  %v14070_v25 = vld [vmem:[%s16230_s25 + $0x324] ss:$16 sps:$4 sm:$0xff]  }
 0x78d   : > { %4559 = vmatprep.subr.bf16.mxu0 %v13978_v26  ;;  %4641 = vmatprep.subr.bf16.mxu1 %v13980_v29  ;;  %v14073_v26 = vld [vmem:[%s16230_s25 + $0x32c] ss:$16 sps:$4 sm:$0xff]   ;;  %v14068_v29 = vld [vmem:[%s16230_s25 + $0x320] ss:$16 sps:$4 sm:$0xff]  }
 0x790   : > { %4560 = vmatpush1.bf16.msra.mxu0 %v13982_v10  ;;  %4642 = vmatpush1.bf16.msra.mxu1 %v13983_v50  ;;  %v14071_v10 = vld [vmem:[%s16230_s25 + $0x328] ss:$16 sps:$4 sm:$0xff]   ;;  %v14076_v50 = vld [vmem:[%s16230_s25 + $0x344] ss:$16 sps:$4 sm:$0xff]  }
 0x791   : > { %4561 = vmatprep.subr.bf16.mxu0 %v13984_v43  ;;  %4643 = vmatprep.subr.bf16.mxu1 %v13986_v46  ;;  %v14079_v43 = vld [vmem:[%s16230_s25 + $0x34c] ss:$16 sps:$4 sm:$0xff]   ;;  %v14074_v46 = vld [vmem:[%s16230_s25 + $0x340] ss:$16 sps:$4 sm:$0xff]  }
 0x794   : > { %4562 = vmatpush1.bf16.msra.mxu0 %v13988_v38  ;;  %4644 = vmatpush1.bf16.msra.mxu1 %v13989_v32  ;;  %v14077_v38 = vld [vmem:[%s16230_s25 + $0x348] ss:$16 sps:$4 sm:$0xff]   ;;  %v14082_v32 = vld [vmem:[%s16230_s25 + $0x364] ss:$16 sps:$4 sm:$0xff]  }
 0x795   : > { %4563 = vmatprep.subr.bf16.mxu0 %v13990_v40  ;;  %4645 = vmatprep.subr.bf16.mxu1 %v13992_v35  ;;  %v14085_v40 = vld [vmem:[%s16230_s25 + $0x36c] ss:$16 sps:$4 sm:$0xff]   ;;  %v14080_v35 = vld [vmem:[%s16230_s25 + $0x360] ss:$16 sps:$4 sm:$0xff]  }
 0x798   : > { %4564 = vmatpush1.bf16.msra.mxu0 %v13994_v1  ;;  %4646 = vmatpush1.bf16.msra.mxu1 %v13995_v31  ;;  %v14083_v1 = vld [vmem:[%s16230_s25 + $0x368] ss:$16 sps:$4 sm:$0xff]   ;;  %v14088_v31 = vld [vmem:[%s16230_s25 + $0x384] ss:$16 sps:$4 sm:$0xff]  }
 0x799   : > { %4565 = vmatprep.subr.bf16.mxu0 %v13996_v60  ;;  %4647 = vmatprep.subr.bf16.mxu1 %v13998_v61  ;;  %v14091_v60 = vld [vmem:[%s16230_s25 + $0x38c] ss:$16 sps:$4 sm:$0xff]   ;;  %v14086_v61 = vld [vmem:[%s16230_s25 + $0x380] ss:$16 sps:$4 sm:$0xff]  }
 0x79c   : > { %4566 = vmatpush1.bf16.msra.mxu0 %v14000_v14  ;;  %4648 = vmatpush1.bf16.msra.mxu1 %v14001_v47  ;;  %v14089_v14 = vld [vmem:[%s16230_s25 + $0x388] ss:$16 sps:$4 sm:$0xff]   ;;  %v14094_v47 = vld [vmem:[%s16230_s25 + $0x3a4] ss:$16 sps:$4 sm:$0xff]  }
 0x79d   : > { %4567 = vmatprep.subr.bf16.mxu0 %v14002_v42  ;;  %4649 = vmatprep.subr.bf16.mxu1 %v14004_v58  ;;  %v14097_v42 = vld [vmem:[%s16230_s25 + $0x3ac] ss:$16 sps:$4 sm:$0xff]   ;;  %v14092_v58 = vld [vmem:[%s16230_s25 + $0x3a0] ss:$16 sps:$4 sm:$0xff]  }
 0x7a0   : > { %4568 = vmatpush1.bf16.msra.mxu0 %v14006_v18  ;;  %4650 = vmatpush1.bf16.msra.mxu1 %v14007_v48  ;;  %v14095_v18 = vld [vmem:[%s16230_s25 + $0x3a8] ss:$16 sps:$4 sm:$0xff]   ;;  %v14100_v48 = vld [vmem:[%s16230_s25 + $0x3c4] ss:$16 sps:$4 sm:$0xff]  }
 0x7a1   : > { %4569 = vmatprep.subr.bf16.mxu0 %v14008_v19  ;;  %4651 = vmatprep.subr.bf16.mxu1 %v14010_v44  ;;  %v14103_v19 = vld [vmem:[%s16230_s25 + $0x3cc] ss:$16 sps:$4 sm:$0xff]   ;;  %v14098_v44 = vld [vmem:[%s16230_s25 + $0x3c0] ss:$16 sps:$4 sm:$0xff]  }
 0x7a4   : > { %4570 = vmatpush1.bf16.msra.mxu0 %v14012_v2  ;;  %4652 = vmatpush1.bf16.msra.mxu1 %v14013_v4  ;;  %v14101_v2 = vld [vmem:[%s16230_s25 + $0x3c8] ss:$16 sps:$4 sm:$0xff]   ;;  %v14106_v4 = vld [vmem:[%s16230_s25 + $0x3e4] ss:$16 sps:$4 sm:$0xff]  }
 0x7a5   : > { %4580 = vmatprep.subr.bf16.mxu0 %v14016_v0  ;;  %4662 = vmatprep.subr.bf16.mxu1 %v14019_v21  ;;  %v14109_v0 = vld [vmem:[%s16230_s25 + $0x3ec] ss:$16 sps:$4 sm:$0xff]   ;;  %v14104_v21 = vld [vmem:[%s16230_s25 + $0x3e0] ss:$16 sps:$4 sm:$0xff]  }
 0x7a7   : > { %4572 = vmatmul.mubr.bf16.vlgmr.msra.gmra.mrb[0].mxu0 %v17442_v53  ;;  %4654 = vmatmul.mubr.bf16.vlgmr.msra.gmra.mrb[0].mxu1 %v17442_v53 }
 0x7a8   : > { %4581 = vmatpush1.bf16.msra.mxu0 %v14014_v16  ;;  %4663 = vmatpush1.bf16.msra.mxu1 %v14017_v13  ;;  %v14107_v16 = vld [vmem:[%s16230_s25 + $0x3e8] ss:$16 sps:$4 sm:$0xff]   ;;  %v14112_v13 = vld [vmem:[%s16230_s25 + $0x404] ss:$16 sps:$4 sm:$0xff]  }
 0x7a9   : > { %4582 = vmatprep.subr.bf16.mxu0 %v14022_v6  ;;  %4664 = vmatprep.subr.bf16.mxu1 %v14025_v63  ;;  %v14115_v6 = vld [vmem:[%s16230_s25 + $0x40c] ss:$16 sps:$4 sm:$0xff]  }
 0x7aa   : > { %4612 = vmatprep.mubr.bf16.mxu0 %v17469_v37  ;;  %4694 = vmatprep.mubr.bf16.mxu1 %v17469_v37  ;;  %v17514_v63 = vld [vmem:[%s17412_s27 + $0x10] sm:$0xff] }
 0x7ac   : > { %4583 = vmatpush1.bf16.msra.mxu0 %v14020_v20  ;;  %4665 = vmatpush1.bf16.msra.mxu1 %v14023_v33  ;;  %v14110_v20 = vld [vmem:[%s16230_s25 + $0x400] ss:$16 sps:$4 sm:$0xff]   ;;  %v14113_v33 = vld [vmem:[%s16230_s25 + $0x408] ss:$16 sps:$4 sm:$0xff]  }
 0x7ad   : > { %4584 = vmatprep.subr.bf16.mxu0 %v14028_v7  ;;  %4666 = vmatprep.subr.bf16.mxu1 %v14031_v24  ;;  %v14118_v7 = vld [vmem:[%s16230_s25 + $0x424] ss:$16 sps:$4 sm:$0xff]   ;;  %v14121_v24 = vld [vmem:[%s16230_s25 + $0x42c] ss:$16 sps:$4 sm:$0xff]  }
 0x7b0   : > { %4585 = vmatpush1.bf16.msra.mxu0 %v14026_v9  ;;  %4667 = vmatpush1.bf16.msra.mxu1 %v14029_v49  ;;  %v4859_v9 = vrot.slane %v17415_v57, 1  ;;  %v14116_v49 = vld [vmem:[%s16230_s25 + $0x420] ss:$16 sps:$4 sm:$0xff]  }
 0x7b1   : > { %4586 = vmatprep.subr.bf16.mxu0 %v14034_v5  ;;  %4668 = vmatprep.subr.bf16.mxu1 %v14037_v36  ;;  %v14119_v5 = vld [vmem:[%s16230_s25 + $0x428] ss:$16 sps:$4 sm:$0xff]   ;;  %v14124_v36 = vld [vmem:[%s16230_s25 + $0x444] ss:$16 sps:$4 sm:$0xff]   ;;  %v14122_v57 = vld [vmem:[%s16230_s25 + $0x440] ss:$16 sps:$4 sm:$0xff]  }
 0x7b4   : > { %4587 = vmatpush1.bf16.msra.mxu0 %v14032_v55  ;;  %4669 = vmatpush1.bf16.msra.mxu1 %v14035_v45  ;;  %v14127_v55 = vld [vmem:[%s16230_s25 + $0x44c] ss:$16 sps:$4 sm:$0xff]   ;;  %v14125_v45 = vld [vmem:[%s16230_s25 + $0x448] ss:$16 sps:$4 sm:$0xff]  }
 0x7b5   : > { %4588 = vmatprep.subr.bf16.mxu0 %v14040_v28  ;;  %4670 = vmatprep.subr.bf16.mxu1 %v14043_v12  ;;  %v14130_v28 = vld [vmem:[%s16230_s25 + $0x464] ss:$16 sps:$4 sm:$0xff]   ;;  %v14133_v12 = vld [vmem:[%s16230_s25 + $0x46c] ss:$16 sps:$4 sm:$0xff]  }
 0x7b8   : > { %4589 = vmatpush1.bf16.msra.mxu0 %v14038_v27  ;;  %4671 = vmatpush1.bf16.msra.mxu1 %v14041_v17  ;;  %v14128_v27 = vld [vmem:[%s16230_s25 + $0x460] ss:$16 sps:$4 sm:$0xff]   ;;  %v14131_v17 = vld [vmem:[%s16230_s25 + $0x468] ss:$16 sps:$4 sm:$0xff]  }
 0x7b9   : > { %4590 = vmatprep.subr.bf16.mxu0 %v14046_v11  ;;  %4672 = vmatprep.subr.bf16.mxu1 %v14049_v23  ;;  %v14136_v11 = vld [vmem:[%s16230_s25 + $0x484] ss:$16 sps:$4 sm:$0xff]   ;;  %v14139_v23 = vld [vmem:[%s16230_s25 + $0x48c] ss:$16 sps:$4 sm:$0xff]  }
 0x7bc   : > { %4591 = vmatpush1.bf16.msra.mxu0 %v14044_v8  ;;  %4673 = vmatpush1.bf16.msra.mxu1 %v14047_v39  ;;  %v14134_v8 = vld [vmem:[%s16230_s25 + $0x480] ss:$16 sps:$4 sm:$0xff]   ;;  %v14137_v39 = vld [vmem:[%s16230_s25 + $0x488] ss:$16 sps:$4 sm:$0xff]  }
 0x7bd   : > { %4592 = vmatprep.subr.bf16.mxu0 %v14052_v62  ;;  %4674 = vmatprep.subr.bf16.mxu1 %v14055_v3  ;;  %v14142_v62 = vld [vmem:[%s16230_s25 + $0x4a4] ss:$16 sps:$4 sm:$0xff]   ;;  %v14145_v3 = vld [vmem:[%s16230_s25 + $0x4ac] ss:$16 sps:$4 sm:$0xff]  }
 0x7c0   : > { %4593 = vmatpush1.bf16.msra.mxu0 %v14050_v54  ;;  %4675 = vmatpush1.bf16.msra.mxu1 %v14053_v52  ;;  %v14140_v54 = vld [vmem:[%s16230_s25 + $0x4a0] ss:$16 sps:$4 sm:$0xff]   ;;  %v14143_v52 = vld [vmem:[%s16230_s25 + $0x4a8] ss:$16 sps:$4 sm:$0xff]  }
 0x7c1   : > { %4594 = vmatprep.subr.bf16.mxu0 %v14058_v59  ;;  %4676 = vmatprep.subr.bf16.mxu1 %v14061_v22  ;;  %v14148_v59 = vld [vmem:[%s16230_s25 + $0x4c4] ss:$16 sps:$4 sm:$0xff]   ;;  %v14151_v22 = vld [vmem:[%s16230_s25 + $0x4cc] ss:$16 sps:$4 sm:$0xff]  }
 0x7c4   : > { %4595 = vmatpush1.bf16.msra.mxu0 %v14056_v34  ;;  %4677 = vmatpush1.bf16.msra.mxu1 %v14059_v41  ;;  %v14146_v34 = vld [vmem:[%s16230_s25 + $0x4c0] ss:$16 sps:$4 sm:$0xff]   ;;  %v14149_v41 = vld [vmem:[%s16230_s25 + $0x4c8] ss:$16 sps:$4 sm:$0xff]  }
 0x7c5   : > { %4596 = vmatprep.subr.bf16.mxu0 %v14064_v56  ;;  %4678 = vmatprep.subr.bf16.mxu1 %v14067_v51  ;;  %v14154_v56 = vld [vmem:[%s16230_s25 + $0x4e4] ss:$16 sps:$4 sm:$0xff]   ;;  %v14157_v51 = vld [vmem:[%s16230_s25 + $0x4ec] ss:$16 sps:$4 sm:$0xff]  }
 0x7c8   : > { %4597 = vmatpush1.bf16.msra.mxu0 %v14062_v15  ;;  %4679 = vmatpush1.bf16.msra.mxu1 %v14065_v30  ;;  %v14152_v15 = vld [vmem:[%s16230_s25 + $0x4e0] ss:$16 sps:$4 sm:$0xff]   ;;  %v14155_v30 = vld [vmem:[%s16230_s25 + $0x4e8] ss:$16 sps:$4 sm:$0xff]  }
 0x7c9   : > { %4598 = vmatprep.subr.bf16.mxu0 %v14070_v25  ;;  %4680 = vmatprep.subr.bf16.mxu1 %v14073_v26  ;;  %v14160_v25 = vld [vmem:[%s16230_s25 + $0x504] ss:$16 sps:$4 sm:$0xff]   ;;  %v14163_v26 = vld [vmem:[%s16230_s25 + $0x50c] ss:$16 sps:$4 sm:$0xff]  }
 0x7cc   : > { %4599 = vmatpush1.bf16.msra.mxu0 %v14068_v29  ;;  %4681 = vmatpush1.bf16.msra.mxu1 %v14071_v10  ;;  %v14158_v29 = vld [vmem:[%s16230_s25 + $0x500] ss:$16 sps:$4 sm:$0xff]   ;;  %v14161_v10 = vld [vmem:[%s16230_s25 + $0x508] ss:$16 sps:$4 sm:$0xff]  }
 0x7cd   : > { %4600 = vmatprep.subr.bf16.mxu0 %v14076_v50  ;;  %4682 = vmatprep.subr.bf16.mxu1 %v14079_v43  ;;  %v14166_v50 = vld [vmem:[%s16230_s25 + $0x524] ss:$16 sps:$4 sm:$0xff]   ;;  %v14169_v43 = vld [vmem:[%s16230_s25 + $0x52c] ss:$16 sps:$4 sm:$0xff]  }
 0x7d0   : > { %4601 = vmatpush1.bf16.msra.mxu0 %v14074_v46  ;;  %4683 = vmatpush1.bf16.msra.mxu1 %v14077_v38  ;;  %v14164_v46 = vld [vmem:[%s16230_s25 + $0x520] ss:$16 sps:$4 sm:$0xff]   ;;  %v14167_v38 = vld [vmem:[%s16230_s25 + $0x528] ss:$16 sps:$4 sm:$0xff]  }
 0x7d1   : > { %4602 = vmatprep.subr.bf16.mxu0 %v14082_v32  ;;  %4684 = vmatprep.subr.bf16.mxu1 %v14085_v40  ;;  %v14172_v32 = vld [vmem:[%s16230_s25 + $0x544] ss:$16 sps:$4 sm:$0xff]   ;;  %v14175_v40 = vld [vmem:[%s16230_s25 + $0x54c] ss:$16 sps:$4 sm:$0xff]  }
 0x7d4   : > { %4603 = vmatpush1.bf16.msra.mxu0 %v14080_v35  ;;  %4685 = vmatpush1.bf16.msra.mxu1 %v14083_v1  ;;  %v14170_v35 = vld [vmem:[%s16230_s25 + $0x540] ss:$16 sps:$4 sm:$0xff]   ;;  %v14173_v1 = vld [vmem:[%s16230_s25 + $0x548] ss:$16 sps:$4 sm:$0xff]  }
 0x7d5   : > { %4604 = vmatprep.subr.bf16.mxu0 %v14088_v31  ;;  %4686 = vmatprep.subr.bf16.mxu1 %v14091_v60  ;;  %v14178_v31 = vld [vmem:[%s16230_s25 + $0x564] ss:$16 sps:$4 sm:$0xff]   ;;  %v14181_v60 = vld [vmem:[%s16230_s25 + $0x56c] ss:$16 sps:$4 sm:$0xff]  }
 0x7d8   : > { %4605 = vmatpush1.bf16.msra.mxu0 %v14086_v61  ;;  %4687 = vmatpush1.bf16.msra.mxu1 %v14089_v14  ;;  %v14176_v61 = vld [vmem:[%s16230_s25 + $0x560] ss:$16 sps:$4 sm:$0xff]   ;;  %v14179_v14 = vld [vmem:[%s16230_s25 + $0x568] ss:$16 sps:$4 sm:$0xff]  }
 0x7d9   : > { %4606 = vmatprep.subr.bf16.mxu0 %v14094_v47  ;;  %4688 = vmatprep.subr.bf16.mxu1 %v14097_v42  ;;  %v14184_v47 = vld [vmem:[%s16230_s25 + $0x584] ss:$16 sps:$4 sm:$0xff]   ;;  %v14187_v42 = vld [vmem:[%s16230_s25 + $0x58c] ss:$16 sps:$4 sm:$0xff]  }
 0x7dc   : > { %4607 = vmatpush1.bf16.msra.mxu0 %v14092_v58  ;;  %4689 = vmatpush1.bf16.msra.mxu1 %v14095_v18  ;;  %v14182_v58 = vld [vmem:[%s16230_s25 + $0x580] ss:$16 sps:$4 sm:$0xff]   ;;  %v14185_v18 = vld [vmem:[%s16230_s25 + $0x588] ss:$16 sps:$4 sm:$0xff]  }
 0x7dd   : > { %4608 = vmatprep.subr.bf16.mxu0 %v14100_v48  ;;  %4690 = vmatprep.subr.bf16.mxu1 %v14103_v19  ;;  %v14190_v48 = vld [vmem:[%s16230_s25 + $0x5a4] ss:$16 sps:$4 sm:$0xff]   ;;  %v14193_v19 = vld [vmem:[%s16230_s25 + $0x5ac] ss:$16 sps:$4 sm:$0xff]  }
 0x7e0   : > { %4609 = vmatpush1.bf16.msra.mxu0 %v14098_v44  ;;  %4691 = vmatpush1.bf16.msra.mxu1 %v14101_v2  ;;  %v14188_v44 = vld [vmem:[%s16230_s25 + $0x5a0] ss:$16 sps:$4 sm:$0xff]   ;;  %v14191_v2 = vld [vmem:[%s16230_s25 + $0x5a8] ss:$16 sps:$4 sm:$0xff]  }
 0x7e1   : > { %4610 = vmatprep.subr.bf16.mxu0 %v14106_v4  ;;  %4692 = vmatprep.subr.bf16.mxu1 %v14109_v0  ;;  %v14196_v4 = vld [vmem:[%s16230_s25 + $0x5c4] ss:$16 sps:$4 sm:$0xff]   ;;  %v14199_v0 = vld [vmem:[%s16230_s25 + $0x5cc] ss:$16 sps:$4 sm:$0xff]  }
 0x7e4   : > { %4611 = vmatpush1.bf16.msra.mxu0 %v14104_v21  ;;  %4693 = vmatpush1.bf16.msra.mxu1 %v14107_v16  ;;  %v14194_v21 = vld [vmem:[%s16230_s25 + $0x5c0] ss:$16 sps:$4 sm:$0xff]   ;;  %v14197_v16 = vld [vmem:[%s16230_s25 + $0x5c8] ss:$16 sps:$4 sm:$0xff]  }
 0x7e5   : > { %5506 = vmatprep.subr.bf16.mxu0 %v14112_v13  ;;  %5588 = vmatprep.subr.bf16.mxu1 %v14115_v6  ;;  %v14202_v13 = vld [vmem:[%s16230_s25 + $0x5e4] ss:$16 sps:$4 sm:$0xff]   ;;  %v14205_v6 = vld [vmem:[%s16230_s25 + $0x5ec] ss:$16 sps:$4 sm:$0xff]  }
 0x7e7   : > { %4613 = vmatmul.mubr.bf16.vlgmr.msra.gmra.mrb[0].mxu0 %v17514_v63  ;;  %4695 = vmatmul.mubr.bf16.vlgmr.msra.gmra.mrb[0].mxu1 %v17514_v63 }
 0x7e8   : > { %5507 = vmatpush1.bf16.msra.mxu0 %v14110_v20  ;;  %5589 = vmatpush1.bf16.msra.mxu1 %v14113_v33  ;;  %v14200_v20 = vld [vmem:[%s16230_s25 + $0x5e0] ss:$16 sps:$4 sm:$0xff]   ;;  %v14203_v33 = vld [vmem:[%s16230_s25 + $0x5e8] ss:$16 sps:$4 sm:$0xff]  }
 0x7e9   : > { %5508 = vmatprep.subr.bf16.mxu0 %v14118_v7  ;;  %5590 = vmatprep.subr.bf16.mxu1 %v14121_v24  ;;  %v14208_v7 = vld [vmem:[%s16230_s25 + $0x604] ss:$16 sps:$4 sm:$0xff]   ;;  %v14211_v24 = vld [vmem:[%s16230_s25 + $0x60c] ss:$16 sps:$4 sm:$0xff]  }
 0x7ea   : > { %5538 = vmatprep.mubr.bf16.mxu0 %v4859_v9  ;;  %5620 = vmatprep.mubr.bf16.mxu1 %v4859_v9  ;;  %v14206_v9 = vld [vmem:[%s16230_s25 + $0x600] ss:$16 sps:$4 sm:$0xff]  }
 0x7ec   : > { %5509 = vmatpush1.bf16.msra.mxu0 %v14116_v49  ;;  %5591 = vmatpush1.bf16.msra.mxu1 %v14119_v5  ;;  %v14209_v49 = vld [vmem:[%s16230_s25 + $0x608] ss:$16 sps:$4 sm:$0xff]   ;;  %v4858_v5 = vrot.slane %v17442_v53, 1  ;;  %v14220_v53 = vld [vmem:[%s16230_s25 + $0x644] ss:$16 sps:$4 sm:$0xff]  }
 0x7ed   : > { %5510 = vmatprep.subr.bf16.mxu0 %v14124_v36  ;;  %5592 = vmatprep.subr.bf16.mxu1 %v14127_v55  ;;  %v14214_v36 = vld [vmem:[%s16230_s25 + $0x624] ss:$16 sps:$4 sm:$0xff]   ;;  %v14217_v55 = vld [vmem:[%s16230_s25 + $0x62c] ss:$16 sps:$4 sm:$0xff]  }
 0x7f0   : > { %5511 = vmatpush1.bf16.msra.mxu0 %v14122_v57  ;;  %5593 = vmatpush1.bf16.msra.mxu1 %v14125_v45  ;;  %v4861_v57 = vrot.slane %v17469_v37, 1  ;;  %v14212_v45 = vld [vmem:[%s16230_s25 + $0x620] ss:$16 sps:$4 sm:$0xff]   ;;  %v14221_v37 = vld [vmem:[%s16230_s25 + $0x648] ss:$16 sps:$4 sm:$0xff]  }
 0x7f1   : > { %5512 = vmatprep.subr.bf16.mxu0 %v14130_v28  ;;  %5594 = vmatprep.subr.bf16.mxu1 %v14133_v12  ;;  %v14215_v28 = vld [vmem:[%s16230_s25 + $0x628] ss:$16 sps:$4 sm:$0xff]   ;;  %v14223_v12 = vld [vmem:[%s16230_s25 + $0x64c] ss:$16 sps:$4 sm:$0xff]  }
 0x7f4   : > { %5513 = vmatpush1.bf16.msra.mxu0 %v14128_v27  ;;  %5595 = vmatpush1.bf16.msra.mxu1 %v14131_v17  ;;  %v14218_v27 = vld [vmem:[%s16230_s25 + $0x640] ss:$16 sps:$4 sm:$0xff]   ;;  %v14226_v17 = vld [vmem:[%s16230_s25 + $0x664] ss:$16 sps:$4 sm:$0xff]  }
 0x7f5   : > { %5514 = vmatprep.subr.bf16.mxu0 %v14136_v11  ;;  %5596 = vmatprep.subr.bf16.mxu1 %v14139_v23  ;;  %v14229_v11 = vld [vmem:[%s16230_s25 + $0x66c] ss:$16 sps:$4 sm:$0xff]   ;;  %v14224_v23 = vld [vmem:[%s16230_s25 + $0x660] ss:$16 sps:$4 sm:$0xff]  }
 0x7f8   : > { %5515 = vmatpush1.bf16.msra.mxu0 %v14134_v8  ;;  %5597 = vmatpush1.bf16.msra.mxu1 %v14137_v39  ;;  %v14227_v8 = vld [vmem:[%s16230_s25 + $0x668] ss:$16 sps:$4 sm:$0xff]   ;;  %v14232_v39 = vld [vmem:[%s16230_s25 + $0x684] ss:$16 sps:$4 sm:$0xff]  }
 0x7f9   : > { %5516 = vmatprep.subr.bf16.mxu0 %v14142_v62  ;;  %5598 = vmatprep.subr.bf16.mxu1 %v14145_v3  ;;  %v14235_v62 = vld [vmem:[%s16230_s25 + $0x68c] ss:$16 sps:$4 sm:$0xff]   ;;  %v14230_v3 = vld [vmem:[%s16230_s25 + $0x680] ss:$16 sps:$4 sm:$0xff]  }
 0x7fc   : > { %5517 = vmatpush1.bf16.msra.mxu0 %v14140_v54  ;;  %5599 = vmatpush1.bf16.msra.mxu1 %v14143_v52  ;;  %v14233_v54 = vld [vmem:[%s16230_s25 + $0x688] ss:$16 sps:$4 sm:$0xff]   ;;  %v14238_v52 = vld [vmem:[%s16230_s25 + $0x6a4] ss:$16 sps:$4 sm:$0xff]  }
 0x7fd   : > { %5518 = vmatprep.subr.bf16.mxu0 %v14148_v59  ;;  %5600 = vmatprep.subr.bf16.mxu1 %v14151_v22  ;;  %v14241_v59 = vld [vmem:[%s16230_s25 + $0x6ac] ss:$16 sps:$4 sm:$0xff]   ;;  %v14236_v22 = vld [vmem:[%s16230_s25 + $0x6a0] ss:$16 sps:$4 sm:$0xff]  }
 0x800   : > { %5519 = vmatpush1.bf16.msra.mxu0 %v14146_v34  ;;  %5601 = vmatpush1.bf16.msra.mxu1 %v14149_v41  ;;  %v14239_v34 = vld [vmem:[%s16230_s25 + $0x6a8] ss:$16 sps:$4 sm:$0xff]   ;;  %v14244_v41 = vld [vmem:[%s16230_s25 + $0x6c4] ss:$16 sps:$4 sm:$0xff]  }
 0x801   : > { %5520 = vmatprep.subr.bf16.mxu0 %v14154_v56  ;;  %5602 = vmatprep.subr.bf16.mxu1 %v14157_v51  ;;  %v14247_v56 = vld [vmem:[%s16230_s25 + $0x6cc] ss:$16 sps:$4 sm:$0xff]   ;;  %v14242_v51 = vld [vmem:[%s16230_s25 + $0x6c0] ss:$16 sps:$4 sm:$0xff]  }
 0x804   : > { %5521 = vmatpush1.bf16.msra.mxu0 %v14152_v15  ;;  %5603 = vmatpush1.bf16.msra.mxu1 %v14155_v30  ;;  %v14245_v15 = vld [vmem:[%s16230_s25 + $0x6c8] ss:$16 sps:$4 sm:$0xff]   ;;  %v14250_v30 = vld [vmem:[%s16230_s25 + $0x6e4] ss:$16 sps:$4 sm:$0xff]  }
 0x805   : > { %5522 = vmatprep.subr.bf16.mxu0 %v14160_v25  ;;  %5604 = vmatprep.subr.bf16.mxu1 %v14163_v26  ;;  %v14253_v25 = vld [vmem:[%s16230_s25 + $0x6ec] ss:$16 sps:$4 sm:$0xff]   ;;  %v14248_v26 = vld [vmem:[%s16230_s25 + $0x6e0] ss:$16 sps:$4 sm:$0xff]  }
 0x808   : > { %5523 = vmatpush1.bf16.msra.mxu0 %v14158_v29  ;;  %5605 = vmatpush1.bf16.msra.mxu1 %v14161_v10  ;;  %v14251_v29 = vld [vmem:[%s16230_s25 + $0x6e8] ss:$16 sps:$4 sm:$0xff]   ;;  %v14256_v10 = vld [vmem:[%s16230_s25 + $0x704] ss:$16 sps:$4 sm:$0xff]  }
 0x809   : > { %5524 = vmatprep.subr.bf16.mxu0 %v14166_v50  ;;  %5606 = vmatprep.subr.bf16.mxu1 %v14169_v43  ;;  %v14259_v50 = vld [vmem:[%s16230_s25 + $0x70c] ss:$16 sps:$4 sm:$0xff]   ;;  %v14254_v43 = vld [vmem:[%s16230_s25 + $0x700] ss:$16 sps:$4 sm:$0xff]  }
 0x80c   : > { %5525 = vmatpush1.bf16.msra.mxu0 %v14164_v46  ;;  %5607 = vmatpush1.bf16.msra.mxu1 %v14167_v38  ;;  %v14257_v46 = vld [vmem:[%s16230_s25 + $0x708] ss:$16 sps:$4 sm:$0xff]   ;;  %v14262_v38 = vld [vmem:[%s16230_s25 + $0x724] ss:$16 sps:$4 sm:$0xff]  }
 0x80d   : > { %5526 = vmatprep.subr.bf16.mxu0 %v14172_v32  ;;  %5608 = vmatprep.subr.bf16.mxu1 %v14175_v40  ;;  %v14265_v32 = vld [vmem:[%s16230_s25 + $0x72c] ss:$16 sps:$4 sm:$0xff]   ;;  %v14260_v40 = vld [vmem:[%s16230_s25 + $0x720] ss:$16 sps:$4 sm:$0xff]  }
 0x810   : > { %5527 = vmatpush1.bf16.msra.mxu0 %v14170_v35  ;;  %5609 = vmatpush1.bf16.msra.mxu1 %v14173_v1  ;;  %v14263_v35 = vld [vmem:[%s16230_s25 + $0x728] ss:$16 sps:$4 sm:$0xff]   ;;  %v14268_v1 = vld [vmem:[%s16230_s25 + $0x744] ss:$16 sps:$4 sm:$0xff]  }
 0x811   : > { %5528 = vmatprep.subr.bf16.mxu0 %v14178_v31  ;;  %5610 = vmatprep.subr.bf16.mxu1 %v14181_v60  ;;  %v14271_v31 = vld [vmem:[%s16230_s25 + $0x74c] ss:$16 sps:$4 sm:$0xff]   ;;  %v14266_v60 = vld [vmem:[%s16230_s25 + $0x740] ss:$16 sps:$4 sm:$0xff]  }
 0x814   : > { %5529 = vmatpush1.bf16.msra.mxu0 %v14176_v61  ;;  %5611 = vmatpush1.bf16.msra.mxu1 %v14179_v14  ;;  %v14269_v61 = vld [vmem:[%s16230_s25 + $0x748] ss:$16 sps:$4 sm:$0xff]   ;;  %v14274_v14 = vld [vmem:[%s16230_s25 + $0x764] ss:$16 sps:$4 sm:$0xff]  }
 0x815   : > { %5530 = vmatprep.subr.bf16.mxu0 %v14184_v47  ;;  %5612 = vmatprep.subr.bf16.mxu1 %v14187_v42  ;;  %v14277_v47 = vld [vmem:[%s16230_s25 + $0x76c] ss:$16 sps:$4 sm:$0xff]   ;;  %v14272_v42 = vld [vmem:[%s16230_s25 + $0x760] ss:$16 sps:$4 sm:$0xff]  }
 0x818   : > { %5531 = vmatpush1.bf16.msra.mxu0 %v14182_v58  ;;  %5613 = vmatpush1.bf16.msra.mxu1 %v14185_v18  ;;  %v14275_v58 = vld [vmem:[%s16230_s25 + $0x768] ss:$16 sps:$4 sm:$0xff]   ;;  %v14280_v18 = vld [vmem:[%s16230_s25 + $0x784] ss:$16 sps:$4 sm:$0xff]  }
 0x819   : > { %5532 = vmatprep.subr.bf16.mxu0 %v14190_v48  ;;  %5614 = vmatprep.subr.bf16.mxu1 %v14193_v19  ;;  %v14283_v48 = vld [vmem:[%s16230_s25 + $0x78c] ss:$16 sps:$4 sm:$0xff]   ;;  %v14278_v19 = vld [vmem:[%s16230_s25 + $0x780] ss:$16 sps:$4 sm:$0xff]  }
 0x81c   : > { %5533 = vmatpush1.bf16.msra.mxu0 %v14188_v44  ;;  %5615 = vmatpush1.bf16.msra.mxu1 %v14191_v2  ;;  %v14281_v44 = vld [vmem:[%s16230_s25 + $0x788] ss:$16 sps:$4 sm:$0xff]   ;;  %v14286_v2 = vld [vmem:[%s16230_s25 + $0x7a4] ss:$16 sps:$4 sm:$0xff]  }
 0x81d   : > { %5534 = vmatprep.subr.bf16.mxu0 %v14196_v4  ;;  %5616 = vmatprep.subr.bf16.mxu1 %v14199_v0  ;;  %v14289_v4 = vld [vmem:[%s16230_s25 + $0x7ac] ss:$16 sps:$4 sm:$0xff]   ;;  %v14284_v0 = vld [vmem:[%s16230_s25 + $0x7a0] ss:$16 sps:$4 sm:$0xff]  }
 0x820   : > { %5535 = vmatpush1.bf16.msra.mxu0 %v14194_v21  ;;  %5617 = vmatpush1.bf16.msra.mxu1 %v14197_v16  ;;  %v14287_v21 = vld [vmem:[%s16230_s25 + $0x7a8] ss:$16 sps:$4 sm:$0xff]   ;;  %v14292_v16 = vld [vmem:[%s16230_s25 + $0x7c4] ss:$16 sps:$4 sm:$0xff]  }
 0x821   : > { %5536 = vmatprep.subr.bf16.mxu0 %v14202_v13  ;;  %5618 = vmatprep.subr.bf16.mxu1 %v14205_v6  ;;  %v14295_v13 = vld [vmem:[%s16230_s25 + $0x7cc] ss:$16 sps:$4 sm:$0xff]   ;;  %v14290_v6 = vld [vmem:[%s16230_s25 + $0x7c0] ss:$16 sps:$4 sm:$0xff]  }
 0x824   : > { %5537 = vmatpush1.bf16.msra.mxu0 %v14200_v20  ;;  %5619 = vmatpush1.bf16.msra.mxu1 %v14203_v33  ;;  %v14293_v20 = vld [vmem:[%s16230_s25 + $0x7c8] ss:$16 sps:$4 sm:$0xff]   ;;  %v14298_v33 = vld [vmem:[%s16230_s25 + $0x7e4] ss:$16 sps:$4 sm:$0xff]  }
 0x825   : > { %5547 = vmatprep.subr.bf16.mxu0 %v14208_v7  ;;  %5629 = vmatprep.subr.bf16.mxu1 %v14211_v24  ;;  %v14301_v7 = vld [vmem:[%s16230_s25 + $0x7ec] ss:$16 sps:$4 sm:$0xff]   ;;  %v14296_v24 = vld [vmem:[%s16230_s25 + $0x7e0] ss:$16 sps:$4 sm:$0xff]  }
 0x827   : > { %5539 = vmatmul.mubr.bf16.vlgmr.msra.gmra.mrb[4].mxu0 %v4858_v5  ;;  %5621 = vmatmul.mubr.bf16.vlgmr.msra.gmra.mrb[4].mxu1 %v4858_v5  ;;  %v14307_v5 = vld [vmem:[%s16230_s25 + $0x80c] ss:$16 sps:$4 sm:$0xff]  }
 0x828   : > { %5548 = vmatpush1.bf16.msra.mxu0 %v14206_v9  ;;  %5630 = vmatpush1.bf16.msra.mxu1 %v14209_v49  ;;  %v14299_v9 = vld [vmem:[%s16230_s25 + $0x7e8] ss:$16 sps:$4 sm:$0xff]   ;;  %v14304_v49 = vld [vmem:[%s16230_s25 + $0x804] ss:$16 sps:$4 sm:$0xff]  }
 0x829   : > { %5549 = vmatprep.subr.bf16.mxu0 %v14214_v36  ;;  %5631 = vmatprep.subr.bf16.mxu1 %v14217_v55  ;;  %v4860_v36 = vrot.slane %v17514_v63, 1  ;;  %v14302_v55 = vld [vmem:[%s16230_s25 + $0x800] ss:$16 sps:$4 sm:$0xff]   ;;  %v14311_v63 = vld [vmem:[%s16230_s25 + $0x828] ss:$16 sps:$4 sm:$0xff]  }
 0x82a   : > { %5579 = vmatprep.mubr.bf16.mxu0 %v4861_v57  ;;  %5661 = vmatprep.mubr.bf16.mxu1 %v4861_v57  ;;  %v14305_v57 = vld [vmem:[%s16230_s25 + $0x808] ss:$16 sps:$4 sm:$0xff]  }
 0x82c   : > { %5550 = vmatpush1.bf16.msra.mxu0 %v14212_v45  ;;  %5632 = vmatpush1.bf16.msra.mxu1 %v14215_v28  ;;  %v14310_v45 = vld [vmem:[%s16230_s25 + $0x824] ss:$16 sps:$4 sm:$0xff]   ;;  %v14313_v28 = vld [vmem:[%s16230_s25 + $0x82c] ss:$16 sps:$4 sm:$0xff]  }
 0x82d   : > { %5551 = vmatprep.subr.bf16.mxu0 %v14220_v53  ;;  %5633 = vmatprep.subr.bf16.mxu1 %v14223_v12  ;;  %v15454_v53 = vld [vmem:[%s17412_s27 + $0x8] sm:$0xff] }
 0x82e   : > { %v5822_v12 = vrot.slane %v15454_v53, 2  ;;  %v14398_v53 = vld [vmem:[%s16230_s25 + $0xa00] ss:$16 sps:$4 sm:$0xff]  }
 0x830   : > { %5552 = vmatpush1.bf16.msra.mxu0 %v14218_v27  ;;  %5634 = vmatpush1.bf16.msra.mxu1 %v14221_v37  ;;  %v14308_v27 = vld [vmem:[%s16230_s25 + $0x820] ss:$16 sps:$4 sm:$0xff]   ;;  %v14316_v37 = vld [vmem:[%s16230_s25 + $0x844] ss:$16 sps:$4 sm:$0xff]  }
 0x831   : > { %5553 = vmatprep.subr.bf16.mxu0 %v14226_v17  ;;  %5635 = vmatprep.subr.bf16.mxu1 %v14229_v11  ;;  %v14319_v17 = vld [vmem:[%s16230_s25 + $0x84c] ss:$16 sps:$4 sm:$0xff]   ;;  %v14314_v11 = vld [vmem:[%s16230_s25 + $0x840] ss:$16 sps:$4 sm:$0xff]  }
 0x834   : > { %5554 = vmatpush1.bf16.msra.mxu0 %v14224_v23  ;;  %5636 = vmatpush1.bf16.msra.mxu1 %v14227_v8  ;;  %v14317_v23 = vld [vmem:[%s16230_s25 + $0x848] ss:$16 sps:$4 sm:$0xff]   ;;  %v14322_v8 = vld [vmem:[%s16230_s25 + $0x864] ss:$16 sps:$4 sm:$0xff]  }
 0x835   : > { %5555 = vmatprep.subr.bf16.mxu0 %v14232_v39  ;;  %5637 = vmatprep.subr.bf16.mxu1 %v14235_v62  ;;  %v14325_v39 = vld [vmem:[%s16230_s25 + $0x86c] ss:$16 sps:$4 sm:$0xff]   ;;  %v14320_v62 = vld [vmem:[%s16230_s25 + $0x860] ss:$16 sps:$4 sm:$0xff]  }
 0x838   : > { %5556 = vmatpush1.bf16.msra.mxu0 %v14230_v3  ;;  %5638 = vmatpush1.bf16.msra.mxu1 %v14233_v54  ;;  %v14323_v3 = vld [vmem:[%s16230_s25 + $0x868] ss:$16 sps:$4 sm:$0xff]   ;;  %v14328_v54 = vld [vmem:[%s16230_s25 + $0x884] ss:$16 sps:$4 sm:$0xff]  }
 0x839   : > { %5557 = vmatprep.subr.bf16.mxu0 %v14238_v52  ;;  %5639 = vmatprep.subr.bf16.mxu1 %v14241_v59  ;;  %v14331_v52 = vld [vmem:[%s16230_s25 + $0x88c] ss:$16 sps:$4 sm:$0xff]   ;;  %v14326_v59 = vld [vmem:[%s16230_s25 + $0x880] ss:$16 sps:$4 sm:$0xff]  }
 0x83c   : > { %5558 = vmatpush1.bf16.msra.mxu0 %v14236_v22  ;;  %5640 = vmatpush1.bf16.msra.mxu1 %v14239_v34  ;;  %v14329_v22 = vld [vmem:[%s16230_s25 + $0x888] ss:$16 sps:$4 sm:$0xff]   ;;  %v14334_v34 = vld [vmem:[%s16230_s25 + $0x8a4] ss:$16 sps:$4 sm:$0xff]  }
 0x83d   : > { %5559 = vmatprep.subr.bf16.mxu0 %v14244_v41  ;;  %5641 = vmatprep.subr.bf16.mxu1 %v14247_v56  ;;  %v14337_v41 = vld [vmem:[%s16230_s25 + $0x8ac] ss:$16 sps:$4 sm:$0xff]   ;;  %v14332_v56 = vld [vmem:[%s16230_s25 + $0x8a0] ss:$16 sps:$4 sm:$0xff]  }
 0x840   : > { %5560 = vmatpush1.bf16.msra.mxu0 %v14242_v51  ;;  %5642 = vmatpush1.bf16.msra.mxu1 %v14245_v15  ;;  %v14335_v51 = vld [vmem:[%s16230_s25 + $0x8a8] ss:$16 sps:$4 sm:$0xff]   ;;  %v14340_v15 = vld [vmem:[%s16230_s25 + $0x8c4] ss:$16 sps:$4 sm:$0xff]  }
 0x841   : > { %5561 = vmatprep.subr.bf16.mxu0 %v14250_v30  ;;  %5643 = vmatprep.subr.bf16.mxu1 %v14253_v25  ;;  %v14343_v30 = vld [vmem:[%s16230_s25 + $0x8cc] ss:$16 sps:$4 sm:$0xff]   ;;  %v14338_v25 = vld [vmem:[%s16230_s25 + $0x8c0] ss:$16 sps:$4 sm:$0xff]  }
 0x844   : > { %5562 = vmatpush1.bf16.msra.mxu0 %v14248_v26  ;;  %5644 = vmatpush1.bf16.msra.mxu1 %v14251_v29  ;;  %v14341_v26 = vld [vmem:[%s16230_s25 + $0x8c8] ss:$16 sps:$4 sm:$0xff]   ;;  %v14346_v29 = vld [vmem:[%s16230_s25 + $0x8e4] ss:$16 sps:$4 sm:$0xff]  }
 0x845   : > { %5563 = vmatprep.subr.bf16.mxu0 %v14256_v10  ;;  %5645 = vmatprep.subr.bf16.mxu1 %v14259_v50  ;;  %v14349_v10 = vld [vmem:[%s16230_s25 + $0x8ec] ss:$16 sps:$4 sm:$0xff]   ;;  %v14344_v50 = vld [vmem:[%s16230_s25 + $0x8e0] ss:$16 sps:$4 sm:$0xff]  }
 0x848   : > { %5564 = vmatpush1.bf16.msra.mxu0 %v14254_v43  ;;  %5646 = vmatpush1.bf16.msra.mxu1 %v14257_v46  ;;  %v14347_v43 = vld [vmem:[%s16230_s25 + $0x8e8] ss:$16 sps:$4 sm:$0xff]   ;;  %v14352_v46 = vld [vmem:[%s16230_s25 + $0x904] ss:$16 sps:$4 sm:$0xff]  }
 0x849   : > { %5565 = vmatprep.subr.bf16.mxu0 %v14262_v38  ;;  %5647 = vmatprep.subr.bf16.mxu1 %v14265_v32  ;;  %v14355_v38 = vld [vmem:[%s16230_s25 + $0x90c] ss:$16 sps:$4 sm:$0xff]   ;;  %v14350_v32 = vld [vmem:[%s16230_s25 + $0x900] ss:$16 sps:$4 sm:$0xff]  }
 0x84c   : > { %5566 = vmatpush1.bf16.msra.mxu0 %v14260_v40  ;;  %5648 = vmatpush1.bf16.msra.mxu1 %v14263_v35  ;;  %v14353_v40 = vld [vmem:[%s16230_s25 + $0x908] ss:$16 sps:$4 sm:$0xff]   ;;  %v14358_v35 = vld [vmem:[%s16230_s25 + $0x924] ss:$16 sps:$4 sm:$0xff]  }
 0x84d   : > { %5567 = vmatprep.subr.bf16.mxu0 %v14268_v1  ;;  %5649 = vmatprep.subr.bf16.mxu1 %v14271_v31  ;;  %v14361_v1 = vld [vmem:[%s16230_s25 + $0x92c] ss:$16 sps:$4 sm:$0xff]   ;;  %v14356_v31 = vld [vmem:[%s16230_s25 + $0x920] ss:$16 sps:$4 sm:$0xff]  }
 0x850   : > { %5568 = vmatpush1.bf16.msra.mxu0 %v14266_v60  ;;  %5650 = vmatpush1.bf16.msra.mxu1 %v14269_v61  ;;  %v14359_v60 = vld [vmem:[%s16230_s25 + $0x928] ss:$16 sps:$4 sm:$0xff]   ;;  %v14364_v61 = vld [vmem:[%s16230_s25 + $0x944] ss:$16 sps:$4 sm:$0xff]  }
 0x851   : > { %5569 = vmatprep.subr.bf16.mxu0 %v14274_v14  ;;  %5651 = vmatprep.subr.bf16.mxu1 %v14277_v47  ;;  %v14367_v14 = vld [vmem:[%s16230_s25 + $0x94c] ss:$16 sps:$4 sm:$0xff]   ;;  %v14362_v47 = vld [vmem:[%s16230_s25 + $0x940] ss:$16 sps:$4 sm:$0xff]  }
 0x854   : > { %5570 = vmatpush1.bf16.msra.mxu0 %v14272_v42  ;;  %5652 = vmatpush1.bf16.msra.mxu1 %v14275_v58  ;;  %v14365_v42 = vld [vmem:[%s16230_s25 + $0x948] ss:$16 sps:$4 sm:$0xff]   ;;  %v14370_v58 = vld [vmem:[%s16230_s25 + $0x964] ss:$16 sps:$4 sm:$0xff]  }
 0x855   : > { %5571 = vmatprep.subr.bf16.mxu0 %v14280_v18  ;;  %5653 = vmatprep.subr.bf16.mxu1 %v14283_v48  ;;  %v14373_v18 = vld [vmem:[%s16230_s25 + $0x96c] ss:$16 sps:$4 sm:$0xff]   ;;  %v14368_v48 = vld [vmem:[%s16230_s25 + $0x960] ss:$16 sps:$4 sm:$0xff]  }
 0x858   : > { %5572 = vmatpush1.bf16.msra.mxu0 %v14278_v19  ;;  %5654 = vmatpush1.bf16.msra.mxu1 %v14281_v44  ;;  %v14371_v19 = vld [vmem:[%s16230_s25 + $0x968] ss:$16 sps:$4 sm:$0xff]   ;;  %v14376_v44 = vld [vmem:[%s16230_s25 + $0x984] ss:$16 sps:$4 sm:$0xff]  }
 0x859   : > { %5573 = vmatprep.subr.bf16.mxu0 %v14286_v2  ;;  %5655 = vmatprep.subr.bf16.mxu1 %v14289_v4  ;;  %v14379_v2 = vld [vmem:[%s16230_s25 + $0x98c] ss:$16 sps:$4 sm:$0xff]   ;;  %v14374_v4 = vld [vmem:[%s16230_s25 + $0x980] ss:$16 sps:$4 sm:$0xff]  }
 0x85c   : > { %5574 = vmatpush1.bf16.msra.mxu0 %v14284_v0  ;;  %5656 = vmatpush1.bf16.msra.mxu1 %v14287_v21  ;;  %v14377_v0 = vld [vmem:[%s16230_s25 + $0x988] ss:$16 sps:$4 sm:$0xff]   ;;  %v14382_v21 = vld [vmem:[%s16230_s25 + $0x9a4] ss:$16 sps:$4 sm:$0xff]  }
 0x85d   : > { %5575 = vmatprep.subr.bf16.mxu0 %v14292_v16  ;;  %5657 = vmatprep.subr.bf16.mxu1 %v14295_v13  ;;  %v14385_v16 = vld [vmem:[%s16230_s25 + $0x9ac] ss:$16 sps:$4 sm:$0xff]   ;;  %v14380_v13 = vld [vmem:[%s16230_s25 + $0x9a0] ss:$16 sps:$4 sm:$0xff]  }
 0x860   : > { %5576 = vmatpush1.bf16.msra.mxu0 %v14290_v6  ;;  %5658 = vmatpush1.bf16.msra.mxu1 %v14293_v20  ;;  %v14383_v6 = vld [vmem:[%s16230_s25 + $0x9a8] ss:$16 sps:$4 sm:$0xff]   ;;  %v14388_v20 = vld [vmem:[%s16230_s25 + $0x9c4] ss:$16 sps:$4 sm:$0xff]  }
 0x861   : > { %5577 = vmatprep.subr.bf16.mxu0 %v14298_v33  ;;  %5659 = vmatprep.subr.bf16.mxu1 %v14301_v7  ;;  %v14391_v33 = vld [vmem:[%s16230_s25 + $0x9cc] ss:$16 sps:$4 sm:$0xff]   ;;  %v14386_v7 = vld [vmem:[%s16230_s25 + $0x9c0] ss:$16 sps:$4 sm:$0xff]  }
 0x864   : > { %5578 = vmatpush1.bf16.msra.mxu0 %v14296_v24  ;;  %5660 = vmatpush1.bf16.msra.mxu1 %v14299_v9  ;;  %v14389_v24 = vld [vmem:[%s16230_s25 + $0x9c8] ss:$16 sps:$4 sm:$0xff]   ;;  %v14394_v9 = vld [vmem:[%s16230_s25 + $0x9e4] ss:$16 sps:$4 sm:$0xff]  }
 0x865   : > { %6469 = vmatprep.subr.bf16.mxu0 %v14304_v49  ;;  %6551 = vmatprep.subr.bf16.mxu1 %v14307_v5  ;;  %v14397_v49 = vld [vmem:[%s16230_s25 + $0x9ec] ss:$16 sps:$4 sm:$0xff]   ;;  %v14392_v5 = vld [vmem:[%s16230_s25 + $0x9e0] ss:$16 sps:$4 sm:$0xff]  }
 0x867   : > { %5580 = vmatmul.mubr.bf16.vlgmr.msra.gmra.mrb[4].mxu0 %v4860_v36  ;;  %5662 = vmatmul.mubr.bf16.vlgmr.msra.gmra.mrb[4].mxu1 %v4860_v36  ;;  %v14395_v36 = vld [vmem:[%s16230_s25 + $0x9e8] ss:$16 sps:$4 sm:$0xff]  }
 0x868   : > { %6470 = vmatpush1.bf16.msra.mxu0 %v14302_v55  ;;  %6552 = vmatpush1.bf16.msra.mxu1 %v14305_v57  ;;  %v14400_v55 = vld [vmem:[%s16230_s25 + $0xa04] ss:$16 sps:$4 sm:$0xff]   ;;  %v14403_v57 = vld [vmem:[%s16230_s25 + $0xa0c] ss:$16 sps:$4 sm:$0xff]  }
 0x869   : > { %6471 = vmatprep.subr.bf16.mxu0 %v14310_v45  ;;  %6553 = vmatprep.subr.bf16.mxu1 %v14313_v28  ;;  %v15455_v45 = vld [vmem:[%s17412_s27] sm:$0xff] }
 0x86a   : > { %6501 = vmatprep.mubr.bf16.mxu0 %v5822_v12  ;;  %6583 = vmatprep.mubr.bf16.mxu1 %v5822_v12  ;;  %v5821_v28 = vrot.slane %v15455_v45, 2  ;;  %v14401_v12 = vld [vmem:[%s16230_s25 + $0xa08] ss:$16 sps:$4 sm:$0xff]  }
 0x86b   : > { %v14461_v45 = vld [vmem:[%s16230_s25 + $0xb48] ss:$16 sps:$4 sm:$0xff]  }
 0x86c   : > { %6472 = vmatpush1.bf16.msra.mxu0 %v14308_v27  ;;  %6554 = vmatpush1.bf16.msra.mxu1 %v14311_v63  ;;  %v14406_v27 = vld [vmem:[%s16230_s25 + $0xa24] ss:$16 sps:$4 sm:$0xff]   ;;  %v14409_v63 = vld [vmem:[%s16230_s25 + $0xa2c] ss:$16 sps:$4 sm:$0xff]  }
 0x86d   : > { %6473 = vmatprep.subr.bf16.mxu0 %v14316_v37  ;;  %6555 = vmatprep.subr.bf16.mxu1 %v14319_v17  ;;  %v15456_v37 = vld [vmem:[%s17412_s27 + $0x18] sm:$0xff] }
 0x86e   : > { %v5824_v17 = vrot.slane %v15456_v37, 2  ;;  %v14475_v37 = vld [vmem:[%s16230_s25 + $0xb8c] ss:$16 sps:$4 sm:$0xff]  }
 0x870   : > { %6474 = vmatpush1.bf16.msra.mxu0 %v14314_v11  ;;  %6556 = vmatpush1.bf16.msra.mxu1 %v14317_v23  ;;  %v14404_v11 = vld [vmem:[%s16230_s25 + $0xa20] ss:$16 sps:$4 sm:$0xff]   ;;  %v14407_v23 = vld [vmem:[%s16230_s25 + $0xa28] ss:$16 sps:$4 sm:$0xff]  }
 0x871   : > { %6475 = vmatprep.subr.bf16.mxu0 %v14322_v8  ;;  %6557 = vmatprep.subr.bf16.mxu1 %v14325_v39  ;;  %v14412_v8 = vld [vmem:[%s16230_s25 + $0xa44] ss:$16 sps:$4 sm:$0xff]   ;;  %v14415_v39 = vld [vmem:[%s16230_s25 + $0xa4c] ss:$16 sps:$4 sm:$0xff]  }
 0x874   : > { %6476 = vmatpush1.bf16.msra.mxu0 %v14320_v62  ;;  %6558 = vmatpush1.bf16.msra.mxu1 %v14323_v3  ;;  %v14410_v62 = vld [vmem:[%s16230_s25 + $0xa40] ss:$16 sps:$4 sm:$0xff]   ;;  %v14413_v3 = vld [vmem:[%s16230_s25 + $0xa48] ss:$16 sps:$4 sm:$0xff]  }
 0x875   : > { %6477 = vmatprep.subr.bf16.mxu0 %v14328_v54  ;;  %6559 = vmatprep.subr.bf16.mxu1 %v14331_v52  ;;  %v14418_v54 = vld [vmem:[%s16230_s25 + $0xa64] ss:$16 sps:$4 sm:$0xff]   ;;  %v14421_v52 = vld [vmem:[%s16230_s25 + $0xa6c] ss:$16 sps:$4 sm:$0xff]  }
 0x878   : > { %6478 = vmatpush1.bf16.msra.mxu0 %v14326_v59  ;;  %6560 = vmatpush1.bf16.msra.mxu1 %v14329_v22  ;;  %v14416_v59 = vld [vmem:[%s16230_s25 + $0xa60] ss:$16 sps:$4 sm:$0xff]   ;;  %v14419_v22 = vld [vmem:[%s16230_s25 + $0xa68] ss:$16 sps:$4 sm:$0xff]  }
 0x879   : > { %6479 = vmatprep.subr.bf16.mxu0 %v14334_v34  ;;  %6561 = vmatprep.subr.bf16.mxu1 %v14337_v41  ;;  %v14424_v34 = vld [vmem:[%s16230_s25 + $0xa84] ss:$16 sps:$4 sm:$0xff]   ;;  %v14427_v41 = vld [vmem:[%s16230_s25 + $0xa8c] ss:$16 sps:$4 sm:$0xff]  }
 0x87c   : > { %6480 = vmatpush1.bf16.msra.mxu0 %v14332_v56  ;;  %6562 = vmatpush1.bf16.msra.mxu1 %v14335_v51  ;;  %v15862_v56 = vmov 1983009808  }
 0x87d   : > { %6481 = vmatprep.subr.bf16.mxu0 %v14340_v15  ;;  %6563 = vmatprep.subr.bf16.mxu1 %v14343_v30  ;;  %v4710_v51 = vunpack.c.l.s4 %v15862_v56  ;;  %v4712_v15 = vlaneseq  ;;  %v14422_v30 = vld [vmem:[%s16230_s25 + $0xa80] ss:$16 sps:$4 sm:$0xff]   ;;  %v14491_v56 = vld [vmem:[%s16230_s25 + $0xbe8] ss:$16 sps:$4 sm:$0xff]  }
 0x880   : > { %6482 = vmatpush1.bf16.msra.mxu0 %v14338_v25  ;;  %6564 = vmatpush1.bf16.msra.mxu1 %v14341_v26  ;;  %v14425_v25 = vld [vmem:[%s16230_s25 + $0xa88] ss:$16 sps:$4 sm:$0xff]   ;;  %v14430_v26 = vld [vmem:[%s16230_s25 + $0xaa4] ss:$16 sps:$4 sm:$0xff]  }
 0x881   : > { %6483 = vmatprep.subr.bf16.mxu0 %v14346_v29  ;;  %6565 = vmatprep.subr.bf16.mxu1 %v14349_v10  ;;  %v14433_v29 = vld [vmem:[%s16230_s25 + $0xaac] ss:$16 sps:$4 sm:$0xff]   ;;  %v4711_v10 = vunpack.c.0.s8 %v4710_v51  ;;  %v14496_v51 = vld [vmem:[%s16230_s25 + $0xc04] ss:$16 sps:$4 sm:$0xff]  }
 0x884   : > { %6484 = vmatpush1.bf16.msra.mxu0 %v14344_v50  ;;  %6566 = vmatpush1.bf16.msra.mxu1 %v14347_v43  ;;  %v4713_v50 = vshrl.u32 %v4712_v15, 7  ;;  %v14428_v43 = vld [vmem:[%s16230_s25 + $0xaa0] ss:$16 sps:$4 sm:$0xff]   ;;  %v14499_v15 = vld [vmem:[%s16230_s25 + $0xc0c] ss:$16 sps:$4 sm:$0xff]  }
 0x885   : > { %6485 = vmatprep.subr.bf16.mxu0 %v14352_v46  ;;  %6567 = vmatprep.subr.bf16.mxu1 %v14355_v38  ;;  %v14431_v46 = vld [vmem:[%s16230_s25 + $0xaa8] ss:$16 sps:$4 sm:$0xff]   ;;  %v14436_v38 = vld [vmem:[%s16230_s25 + $0xac4] ss:$16 sps:$4 sm:$0xff]  }
 0x888   : > { %6486 = vmatpush1.bf16.msra.mxu0 %v14350_v32  ;;  %6568 = vmatpush1.bf16.msra.mxu1 %v14353_v40  ;;  %v14439_v32 = vld [vmem:[%s16230_s25 + $0xacc] ss:$16 sps:$4 sm:$0xff]  }
 0x889   : > { %6487 = vmatprep.subr.bf16.mxu0 %v14358_v35  ;;  %6569 = vmatprep.subr.bf16.mxu1 %v14361_v1  ;;  %v17741_v1 = vsub.s32 %v4711_v10, %v4713_v50  ;;  %v14502_v10 = vld [vmem:[%s16230_s25 + $0xc24] ss:$16 sps:$4 sm:$0xff]   ;;  %v14505_v50 = vld [vmem:[%s16230_s25 + $0xc2c] ss:$16 sps:$4 sm:$0xff]  }
 0x88c   : > { %6488 = vmatpush1.bf16.msra.mxu0 %v14356_v31  ;;  %6570 = vmatpush1.bf16.msra.mxu1 %v14359_v60  ;;  %v14434_v31 = vld [vmem:[%s16230_s25 + $0xac0] ss:$16 sps:$4 sm:$0xff]   ;;  %v14437_v60 = vld [vmem:[%s16230_s25 + $0xac8] ss:$16 sps:$4 sm:$0xff]  }
 0x88d   : > { %6489 = vmatprep.subr.bf16.mxu0 %v14364_v61  ;;  %6571 = vmatprep.subr.bf16.mxu1 %v14367_v14 }
 0x890   : > { %6490 = vmatpush1.bf16.msra.mxu0 %v14362_v47  ;;  %6572 = vmatpush1.bf16.msra.mxu1 %v14365_v42 }
 0x891   : > { %6491 = vmatprep.subr.bf16.mxu0 %v14370_v58  ;;  %6573 = vmatprep.subr.bf16.mxu1 %v14373_v18 }
 0x894   : > { %6492 = vmatpush1.bf16.msra.mxu0 %v14368_v48  ;;  %6574 = vmatpush1.bf16.msra.mxu1 %v14371_v19 }
 0x895   : > { %6493 = vmatprep.subr.bf16.mxu0 %v14376_v44  ;;  %6575 = vmatprep.subr.bf16.mxu1 %v14379_v2  ;;  %v14442_v44 = vld [vmem:[%s16230_s25 + $0xae4] ss:$16 sps:$4 sm:$0xff]   ;;  %v14445_v2 = vld [vmem:[%s16230_s25 + $0xaec] ss:$16 sps:$4 sm:$0xff]  }
 0x898   : > { %6494 = vmatpush1.bf16.msra.mxu0 %v14374_v4  ;;  %6576 = vmatpush1.bf16.msra.mxu1 %v14377_v0 }
 0x899   : > { %6495 = vmatprep.subr.bf16.mxu0 %v14382_v21  ;;  %6577 = vmatprep.subr.bf16.mxu1 %v14385_v16  ;;  %v14440_v21 = vld [vmem:[%s16230_s25 + $0xae0] ss:$16 sps:$4 sm:$0xff]   ;;  %v14443_v16 = vld [vmem:[%s16230_s25 + $0xae8] ss:$16 sps:$4 sm:$0xff]  }
 0x89c   : > { %6496 = vmatpush1.bf16.msra.mxu0 %v14380_v13  ;;  %6578 = vmatpush1.bf16.msra.mxu1 %v14383_v6  ;;  %v14448_v6 = vld [vmem:[%s16230_s25 + $0xb04] ss:$16 sps:$4 sm:$0xff]  }
 0x89d   : > { %6497 = vmatprep.subr.bf16.mxu0 %v14388_v20  ;;  %6579 = vmatprep.subr.bf16.mxu1 %v14391_v33  ;;  %v14451_v20 = vld [vmem:[%s16230_s25 + $0xb0c] ss:$16 sps:$4 sm:$0xff]   ;;  %v14446_v33 = vld [vmem:[%s16230_s25 + $0xb00] ss:$16 sps:$4 sm:$0xff]  }
 0x8a0   : > { %6498 = vmatpush1.bf16.msra.mxu0 %v14386_v7  ;;  %6580 = vmatpush1.bf16.msra.mxu1 %v14389_v24  ;;  %v14449_v7 = vld [vmem:[%s16230_s25 + $0xb08] ss:$16 sps:$4 sm:$0xff]   ;;  %v14454_v24 = vld [vmem:[%s16230_s25 + $0xb24] ss:$16 sps:$4 sm:$0xff]  }
 0x8a1   : > { %6499 = vmatprep.subr.bf16.mxu0 %v14394_v9  ;;  %6581 = vmatprep.subr.bf16.mxu1 %v14397_v49  ;;  %v14457_v9 = vld [vmem:[%s16230_s25 + $0xb2c] ss:$16 sps:$4 sm:$0xff]   ;;  %v14452_v49 = vld [vmem:[%s16230_s25 + $0xb20] ss:$16 sps:$4 sm:$0xff]  }
 0x8a4   : > { %6500 = vmatpush1.bf16.msra.mxu0 %v14392_v5  ;;  %6582 = vmatpush1.bf16.msra.mxu1 %v14395_v36  ;;  %v14455_v5 = vld [vmem:[%s16230_s25 + $0xb28] ss:$16 sps:$4 sm:$0xff]   ;;  %v14460_v36 = vld [vmem:[%s16230_s25 + $0xb44] ss:$16 sps:$4 sm:$0xff]  }
 0x8a5   : > { %6510 = vmatprep.subr.bf16.mxu0 %v14400_v55  ;;  %6592 = vmatprep.subr.bf16.mxu1 %v14403_v57  ;;  %v14463_v55 = vld [vmem:[%s16230_s25 + $0xb4c] ss:$16 sps:$4 sm:$0xff]   ;;  %v14458_v57 = vld [vmem:[%s16230_s25 + $0xb40] ss:$16 sps:$4 sm:$0xff]  }
 0x8a7   : > { %6502 = vmatmul.mubr.bf16.vlgmr.msra.gmra.mrb[8].mxu0 %v5821_v28  ;;  %6584 = vmatmul.mubr.bf16.vlgmr.msra.gmra.mrb[8].mxu1 %v5821_v28  ;;  %v14466_v28 = vld [vmem:[%s16230_s25 + $0xb64] ss:$16 sps:$4 sm:$0xff]  }
 0x8a8   : > { %6511 = vmatpush1.bf16.msra.mxu0 %v14398_v53  ;;  %6593 = vmatpush1.bf16.msra.mxu1 %v14401_v12  ;;  %v14469_v53 = vld [vmem:[%s16230_s25 + $0xb6c] ss:$16 sps:$4 sm:$0xff]   ;;  %v14464_v12 = vld [vmem:[%s16230_s25 + $0xb60] ss:$16 sps:$4 sm:$0xff]  }
 0x8a9   : > { %6512 = vmatprep.subr.bf16.mxu0 %v14406_v27  ;;  %6594 = vmatprep.subr.bf16.mxu1 %v14409_v63  ;;  %v14467_v27 = vld [vmem:[%s16230_s25 + $0xb68] ss:$16 sps:$4 sm:$0xff]   ;;  %v14472_v63 = vld [vmem:[%s16230_s25 + $0xb84] ss:$16 sps:$4 sm:$0xff]  }
 0x8aa   : > { %6542 = vmatprep.mubr.bf16.mxu0 %v5824_v17  ;;  %6624 = vmatprep.mubr.bf16.mxu1 %v5824_v17  ;;  %v14470_v17 = vld [vmem:[%s16230_s25 + $0xb80] ss:$16 sps:$4 sm:$0xff]  }
 0x8ac   : > { %6513 = vmatpush1.bf16.msra.mxu0 %v14404_v11  ;;  %6595 = vmatpush1.bf16.msra.mxu1 %v14407_v23  ;;  %v14473_v11 = vld [vmem:[%s16230_s25 + $0xb88] ss:$16 sps:$4 sm:$0xff]   ;;  %v14478_v23 = vld [vmem:[%s16230_s25 + $0xba4] ss:$16 sps:$4 sm:$0xff]  }
 0x8ad   : > { %6514 = vmatprep.subr.bf16.mxu0 %v14412_v8  ;;  %6596 = vmatprep.subr.bf16.mxu1 %v14415_v39  ;;  %v14481_v8 = vld [vmem:[%s16230_s25 + $0xbac] ss:$16 sps:$4 sm:$0xff]   ;;  %v14476_v39 = vld [vmem:[%s16230_s25 + $0xba0] ss:$16 sps:$4 sm:$0xff]  }
 0x8b0   : > { %6515 = vmatpush1.bf16.msra.mxu0 %v14410_v62  ;;  %6597 = vmatpush1.bf16.msra.mxu1 %v14413_v3  ;;  %v14479_v62 = vld [vmem:[%s16230_s25 + $0xba8] ss:$16 sps:$4 sm:$0xff]   ;;  %v14484_v3 = vld [vmem:[%s16230_s25 + $0xbc4] ss:$16 sps:$4 sm:$0xff]  }
 0x8b1   : > { %6516 = vmatprep.subr.bf16.mxu0 %v14418_v54  ;;  %6598 = vmatprep.subr.bf16.mxu1 %v14421_v52  ;;  %v14487_v54 = vld [vmem:[%s16230_s25 + $0xbcc] ss:$16 sps:$4 sm:$0xff]   ;;  %v14482_v52 = vld [vmem:[%s16230_s25 + $0xbc0] ss:$16 sps:$4 sm:$0xff]  }
 0x8b4   : > { %6517 = vmatpush1.bf16.msra.mxu0 %v14416_v59  ;;  %6599 = vmatpush1.bf16.msra.mxu1 %v14419_v22  ;;  %v14485_v59 = vld [vmem:[%s16230_s25 + $0xbc8] ss:$16 sps:$4 sm:$0xff]   ;;  %v14490_v22 = vld [vmem:[%s16230_s25 + $0xbe4] ss:$16 sps:$4 sm:$0xff]  }
 0x8b5   : > { %6518 = vmatprep.subr.bf16.mxu0 %v14424_v34  ;;  %6600 = vmatprep.subr.bf16.mxu1 %v14427_v41  ;;  %v14493_v34 = vld [vmem:[%s16230_s25 + $0xbec] ss:$16 sps:$4 sm:$0xff]   ;;  %v14488_v41 = vld [vmem:[%s16230_s25 + $0xbe0] ss:$16 sps:$4 sm:$0xff]  }
 0x8b8   : > { %6519 = vmatpush1.bf16.msra.mxu0 %v14422_v30  ;;  %6601 = vmatpush1.bf16.msra.mxu1 %v14425_v25  ;;  %v14494_v30 = vld [vmem:[%s16230_s25 + $0xc00] ss:$16 sps:$4 sm:$0xff]   ;;  %v14497_v25 = vld [vmem:[%s16230_s25 + $0xc08] ss:$16 sps:$4 sm:$0xff]  }
 0x8b9   : > { %6520 = vmatprep.subr.bf16.mxu0 %v14430_v26  ;;  %6602 = vmatprep.subr.bf16.mxu1 %v14433_v29  ;;  %v15457_v26 = vld [vmem:[%s17412_s27 + $0x10] sm:$0xff] }
 0x8ba   : > { %v4614_v40 = vpop.f32.mrb[0].mxu0  ;;  %v4696_v35 = vpop.f32.mrb[0].mxu1  ;;  %v5823_v29 = vrot.slane %v15457_v26, 2  ;;  %v14586_v26 = vld [vmem:[%s16230_s25 + $0xde4] ss:$16 sps:$4 sm:$0xff]  }
 0x8bb   : > { %v4616_v61 = vpop.f32.mrb[1].mxu0  ;;  %v4698_v14 = vpop.f32.mrb[1].mxu1 }
 0x8bc   : > { %v4707_v47 = vcombine.low %v4614_v40, %v4616_v61  ;;  %v4708_v42 = vcombine.low %v4696_v35, %v4698_v14  ;;  %v4618_v58 = vpop.f32.mrb[2].mxu0  ;;  %v4700_v18 = vpop.f32.mrb[2].mxu1  ;;  %6521 = vmatpush1.bf16.msra.mxu0 %v14428_v43  ;;  %6603 = vmatpush1.bf16.msra.mxu1 %v14431_v46  ;;  %v15458_v43 = vld [vmem:[%s17412_s27 + $0x8] sm:$0xff] }
 0x8bd   : > { %v4619_v48 = vpop.f32.mrb[3].mxu0  ;;  %v4701_v19 = vpop.f32.mrb[3].mxu1  ;;  %6522 = vmatprep.subr.bf16.mxu0 %v14436_v38  ;;  %6604 = vmatprep.subr.bf16.mxu1 %v14439_v32  ;;  %v6785_v46 = vrot.slane %v15458_v43, 3  ;;  %v14500_v38 = vld [vmem:[%s16230_s25 + $0xc20] ss:$16 sps:$4 sm:$0xff]  }
 0x8be   : > { %v17748_v4 = vrot.slane %v4707_v47, %v17741_v1  ;;  %v17751_v0 = vrot.slane %v4708_v42, %v17741_v1  ;;  %v14503_v32 = vld [vmem:[%s16230_s25 + $0xc28] ss:$16 sps:$4 sm:$0xff]   ;;  %v14508_v40 = vld [vmem:[%s16230_s25 + $0xc44] ss:$16 sps:$4 sm:$0xff]   ;;  %v14511_v35 = vld [vmem:[%s16230_s25 + $0xc4c] ss:$16 sps:$4 sm:$0xff]  }
 0x8bf   : > { %v14514_v61 = vld [vmem:[%s16230_s25 + $0xc64] ss:$16 sps:$4 sm:$0xff]   ;;  %v14517_v14 = vld [vmem:[%s16230_s25 + $0xc6c] ss:$16 sps:$4 sm:$0xff]   ;;  %v14512_v47 = vld [vmem:[%s16230_s25 + $0xc60] ss:$16 sps:$4 sm:$0xff]  }
 0x8c0   : > { %v4723_v13 = vcombine.low %v17748_v4, %v17751_v0  ;;  %6523 = vmatpush1.bf16.msra.mxu0 %v14434_v31  ;;  %6605 = vmatpush1.bf16.msra.mxu1 %v14437_v60  ;;  %v14506_v31 = vld [vmem:[%s16230_s25 + $0xc40] ss:$16 sps:$4 sm:$0xff]   ;;  %v14509_v60 = vld [vmem:[%s16230_s25 + $0xc48] ss:$16 sps:$4 sm:$0xff]   ;;  %v14520_v58 = vld [vmem:[%s16230_s25 + $0xc84] ss:$16 sps:$4 sm:$0xff]  }
 0x8c1   : > { %6524 = vmatprep.subr.bf16.mxu0 %v14442_v44  ;;  %6606 = vmatprep.subr.bf16.mxu1 %v14445_v2  ;;  %v14515_v42 = vld [vmem:[%s16230_s25 + $0xc68] ss:$16 sps:$4 sm:$0xff]   ;;  %v14523_v18 = vld [vmem:[%s16230_s25 + $0xc8c] ss:$16 sps:$4 sm:$0xff]   ;;  %v14518_v48 = vld [vmem:[%s16230_s25 + $0xc80] ss:$16 sps:$4 sm:$0xff]  }
 0x8c2   : > { %v14521_v19 = vld [vmem:[%s16230_s25 + $0xc88] ss:$16 sps:$4 sm:$0xff]   ;;  %v14526_v44 = vld [vmem:[%s16230_s25 + $0xca4] ss:$16 sps:$4 sm:$0xff]   ;;  %v14529_v2 = vld [vmem:[%s16230_s25 + $0xcac] ss:$16 sps:$4 sm:$0xff]  }
 0x8c3   : > { %v14592_v43 = vld [vmem:[%s16230_s25 + $0xe04] ss:$16 sps:$4 sm:$0xff]   ;;  %v14641_v4 = vld [vmem:[%s16230_s25 + $0xf08] ss:$16 sps:$4 sm:$0xff]  }
 0x8c4   : > { %6525 = vmatpush1.bf16.msra.mxu0 %v14440_v21  ;;  %6607 = vmatpush1.bf16.msra.mxu1 %v14443_v16  ;;  %v14524_v21 = vld [vmem:[%s16230_s25 + $0xca0] ss:$16 sps:$4 sm:$0xff]   ;;  %v14527_v16 = vld [vmem:[%s16230_s25 + $0xca8] ss:$16 sps:$4 sm:$0xff]   ;;  %v14646_v0 = vld [vmem:[%s16230_s25 + $0xf24] ss:$16 sps:$4 sm:$0xff]  }
 0x8c5   : > { %6526 = vmatprep.subr.bf16.mxu0 %v14448_v6  ;;  %6608 = vmatprep.subr.bf16.mxu1 %v14451_v20  ;;  %v14532_v6 = vld [vmem:[%s16230_s25 + $0xcc4] ss:$16 sps:$4 sm:$0xff]   ;;  %v14535_v20 = vld [vmem:[%s16230_s25 + $0xccc] ss:$16 sps:$4 sm:$0xff]  }
 0x8c8   : > { %6527 = vmatpush1.bf16.msra.mxu0 %v14446_v33  ;;  %6609 = vmatpush1.bf16.msra.mxu1 %v14449_v7  ;;  %v14530_v33 = vld [vmem:[%s16230_s25 + $0xcc0] ss:$16 sps:$4 sm:$0xff]   ;;  %v14533_v7 = vld [vmem:[%s16230_s25 + $0xcc8] ss:$16 sps:$4 sm:$0xff]  }
 0x8c9   : > { %6528 = vmatprep.subr.bf16.mxu0 %v14454_v24  ;;  %6610 = vmatprep.subr.bf16.mxu1 %v14457_v9  ;;  %v14538_v24 = vld [vmem:[%s16230_s25 + $0xce4] ss:$16 sps:$4 sm:$0xff]   ;;  %v14541_v9 = vld [vmem:[%s16230_s25 + $0xcec] ss:$16 sps:$4 sm:$0xff]  }
 0x8cc   : > { %6529 = vmatpush1.bf16.msra.mxu0 %v14452_v49  ;;  %6611 = vmatpush1.bf16.msra.mxu1 %v14455_v5  ;;  %v14536_v49 = vld [vmem:[%s16230_s25 + $0xce0] ss:$16 sps:$4 sm:$0xff]   ;;  %v14539_v5 = vld [vmem:[%s16230_s25 + $0xce8] ss:$16 sps:$4 sm:$0xff]  }
 0x8cd   : > { %6530 = vmatprep.subr.bf16.mxu0 %v14460_v36  ;;  %6612 = vmatprep.subr.bf16.mxu1 %v14463_v55  ;;  %v14544_v36 = vld [vmem:[%s16230_s25 + $0xd04] ss:$16 sps:$4 sm:$0xff]   ;;  %v14547_v55 = vld [vmem:[%s16230_s25 + $0xd0c] ss:$16 sps:$4 sm:$0xff]  }
 0x8d0   : > { %6531 = vmatpush1.bf16.msra.mxu0 %v14458_v57  ;;  %6613 = vmatpush1.bf16.msra.mxu1 %v14461_v45  ;;  %v14542_v57 = vld [vmem:[%s16230_s25 + $0xd00] ss:$16 sps:$4 sm:$0xff]   ;;  %v14545_v45 = vld [vmem:[%s16230_s25 + $0xd08] ss:$16 sps:$4 sm:$0xff]  }
 0x8d1   : > { %6532 = vmatprep.subr.bf16.mxu0 %v14466_v28  ;;  %6614 = vmatprep.subr.bf16.mxu1 %v14469_v53  ;;  %v14550_v28 = vld [vmem:[%s16230_s25 + $0xd24] ss:$16 sps:$4 sm:$0xff]   ;;  %v14553_v53 = vld [vmem:[%s16230_s25 + $0xd2c] ss:$16 sps:$4 sm:$0xff]  }
 0x8d4   : > { %6533 = vmatpush1.bf16.msra.mxu0 %v14464_v12  ;;  %6615 = vmatpush1.bf16.msra.mxu1 %v14467_v27  ;;  %v14548_v12 = vld [vmem:[%s16230_s25 + $0xd20] ss:$16 sps:$4 sm:$0xff]   ;;  %v14551_v27 = vld [vmem:[%s16230_s25 + $0xd28] ss:$16 sps:$4 sm:$0xff]  }
 0x8d5   : > { %6534 = vmatprep.subr.bf16.mxu0 %v14472_v63  ;;  %6616 = vmatprep.subr.bf16.mxu1 %v14475_v37  ;;  %v14556_v63 = vld [vmem:[%s16230_s25 + $0xd44] ss:$16 sps:$4 sm:$0xff]   ;;  %v14559_v37 = vld [vmem:[%s16230_s25 + $0xd4c] ss:$16 sps:$4 sm:$0xff]  }
 0x8d8   : > { %6535 = vmatpush1.bf16.msra.mxu0 %v14470_v17  ;;  %6617 = vmatpush1.bf16.msra.mxu1 %v14473_v11  ;;  %v14554_v17 = vld [vmem:[%s16230_s25 + $0xd40] ss:$16 sps:$4 sm:$0xff]   ;;  %v14557_v11 = vld [vmem:[%s16230_s25 + $0xd48] ss:$16 sps:$4 sm:$0xff]  }
 0x8d9   : > { %6536 = vmatprep.subr.bf16.mxu0 %v14478_v23  ;;  %6618 = vmatprep.subr.bf16.mxu1 %v14481_v8  ;;  %v14562_v23 = vld [vmem:[%s16230_s25 + $0xd64] ss:$16 sps:$4 sm:$0xff]   ;;  %v14565_v8 = vld [vmem:[%s16230_s25 + $0xd6c] ss:$16 sps:$4 sm:$0xff]  }
 0x8dc   : > { %6537 = vmatpush1.bf16.msra.mxu0 %v14476_v39  ;;  %6619 = vmatpush1.bf16.msra.mxu1 %v14479_v62  ;;  %v14560_v39 = vld [vmem:[%s16230_s25 + $0xd60] ss:$16 sps:$4 sm:$0xff]   ;;  %v14563_v62 = vld [vmem:[%s16230_s25 + $0xd68] ss:$16 sps:$4 sm:$0xff]  }
 0x8dd   : > { %6538 = vmatprep.subr.bf16.mxu0 %v14484_v3  ;;  %6620 = vmatprep.subr.bf16.mxu1 %v14487_v54  ;;  %v14568_v3 = vld [vmem:[%s16230_s25 + $0xd84] ss:$16 sps:$4 sm:$0xff]   ;;  %v14571_v54 = vld [vmem:[%s16230_s25 + $0xd8c] ss:$16 sps:$4 sm:$0xff]  }
 0x8e0   : > { %6539 = vmatpush1.bf16.msra.mxu0 %v14482_v52  ;;  %6621 = vmatpush1.bf16.msra.mxu1 %v14485_v59  ;;  %v14566_v52 = vld [vmem:[%s16230_s25 + $0xd80] ss:$16 sps:$4 sm:$0xff]   ;;  %v14569_v59 = vld [vmem:[%s16230_s25 + $0xd88] ss:$16 sps:$4 sm:$0xff]  }
 0x8e1   : > { %6540 = vmatprep.subr.bf16.mxu0 %v14490_v22  ;;  %6622 = vmatprep.subr.bf16.mxu1 %v14493_v34  ;;  %v14574_v22 = vld [vmem:[%s16230_s25 + $0xda4] ss:$16 sps:$4 sm:$0xff]   ;;  %v14577_v34 = vld [vmem:[%s16230_s25 + $0xdac] ss:$16 sps:$4 sm:$0xff]  }
 0x8e4   : > { %6541 = vmatpush1.bf16.msra.mxu0 %v14488_v41  ;;  %6623 = vmatpush1.bf16.msra.mxu1 %v14491_v56  ;;  %v14572_v41 = vld [vmem:[%s16230_s25 + $0xda0] ss:$16 sps:$4 sm:$0xff]   ;;  %v14575_v56 = vld [vmem:[%s16230_s25 + $0xda8] ss:$16 sps:$4 sm:$0xff]  }
 0x8e5   : > { %7432 = vmatprep.subr.bf16.mxu0 %v14496_v51  ;;  %7514 = vmatprep.subr.bf16.mxu1 %v14499_v15  ;;  %v14580_v51 = vld [vmem:[%s16230_s25 + $0xdc4] ss:$16 sps:$4 sm:$0xff]   ;;  %v14583_v15 = vld [vmem:[%s16230_s25 + $0xdcc] ss:$16 sps:$4 sm:$0xff]  }
 0x8e7   : > { %6543 = vmatmul.mubr.bf16.vlgmr.msra.gmra.mrb[8].mxu0 %v5823_v29  ;;  %6625 = vmatmul.mubr.bf16.vlgmr.msra.gmra.mrb[8].mxu1 %v5823_v29  ;;  %v14589_v29 = vld [vmem:[%s16230_s25 + $0xdec] ss:$16 sps:$4 sm:$0xff]  }
 0x8e8   : > { %7433 = vmatpush1.bf16.msra.mxu0 %v14494_v30  ;;  %7515 = vmatpush1.bf16.msra.mxu1 %v14497_v25  ;;  %v14578_v30 = vld [vmem:[%s16230_s25 + $0xdc0] ss:$16 sps:$4 sm:$0xff]   ;;  %v14581_v25 = vld [vmem:[%s16230_s25 + $0xdc8] ss:$16 sps:$4 sm:$0xff]  }
 0x8e9   : > { %7434 = vmatprep.subr.bf16.mxu0 %v14502_v10  ;;  %7516 = vmatprep.subr.bf16.mxu1 %v14505_v50  ;;  %v14584_v10 = vld [vmem:[%s16230_s25 + $0xde0] ss:$16 sps:$4 sm:$0xff]   ;;  %v14587_v50 = vld [vmem:[%s16230_s25 + $0xde8] ss:$16 sps:$4 sm:$0xff]  }
 0x8ea   : > { %7464 = vmatprep.mubr.bf16.mxu0 %v6785_v46  ;;  %7546 = vmatprep.mubr.bf16.mxu1 %v6785_v46  ;;  %v14595_v46 = vld [vmem:[%s16230_s25 + $0xe0c] ss:$16 sps:$4 sm:$0xff]  }
 0x8ec   : > { %7435 = vmatpush1.bf16.msra.mxu0 %v14500_v38  ;;  %7517 = vmatpush1.bf16.msra.mxu1 %v14503_v32  ;;  %v15459_v38 = vld [vmem:[%s17412_s27] sm:$0xff] }
 0x8ed   : > { %7436 = vmatprep.subr.bf16.mxu0 %v14508_v40  ;;  %7518 = vmatprep.subr.bf16.mxu1 %v14511_v35  ;;  %v6784_v32 = vrot.slane %v15459_v38, 3  ;;  %v14590_v40 = vld [vmem:[%s16230_s25 + $0xe00] ss:$16 sps:$4 sm:$0xff]   ;;  %v14593_v35 = vld [vmem:[%s16230_s25 + $0xe08] ss:$16 sps:$4 sm:$0xff]  }
 0x8ee   : > { %v14661_v38 = vld [vmem:[%s16230_s25 + $0xf6c] ss:$16 sps:$4 sm:$0xff]  }
 0x8f0   : > { %7437 = vmatpush1.bf16.msra.mxu0 %v14506_v31  ;;  %7519 = vmatpush1.bf16.msra.mxu1 %v14509_v60  ;;  %v14598_v31 = vld [vmem:[%s16230_s25 + $0xe24] ss:$16 sps:$4 sm:$0xff]   ;;  %v14601_v60 = vld [vmem:[%s16230_s25 + $0xe2c] ss:$16 sps:$4 sm:$0xff]  }
 0x8f1   : > { %7438 = vmatprep.subr.bf16.mxu0 %v14514_v61  ;;  %7520 = vmatprep.subr.bf16.mxu1 %v14517_v14  ;;  %v15460_v61 = vld [vmem:[%s17412_s27 + $0x18] sm:$0xff] }
 0x8f2   : > { %v6787_v14 = vrot.slane %v15460_v61, 3  ;;  %v14665_v61 = vld [vmem:[%s16230_s25 + $0xf88] ss:$16 sps:$4 sm:$0xff]  }
 0x8f4   : > { %7439 = vmatpush1.bf16.msra.mxu0 %v14512_v47  ;;  %7521 = vmatpush1.bf16.msra.mxu1 %v14515_v42  ;;  %v14596_v47 = vld [vmem:[%s16230_s25 + $0xe20] ss:$16 sps:$4 sm:$0xff]   ;;  %v14599_v42 = vld [vmem:[%s16230_s25 + $0xe28] ss:$16 sps:$4 sm:$0xff]  }
 0x8f5   : > { %7440 = vmatprep.subr.bf16.mxu0 %v14520_v58  ;;  %7522 = vmatprep.subr.bf16.mxu1 %v14523_v18  ;;  %v14604_v58 = vld [vmem:[%s16230_s25 + $0xe44] ss:$16 sps:$4 sm:$0xff]   ;;  %v14607_v18 = vld [vmem:[%s16230_s25 + $0xe4c] ss:$16 sps:$4 sm:$0xff]  }
 0x8f8   : > { %7441 = vmatpush1.bf16.msra.mxu0 %v14518_v48  ;;  %7523 = vmatpush1.bf16.msra.mxu1 %v14521_v19  ;;  %v14602_v48 = vld [vmem:[%s16230_s25 + $0xe40] ss:$16 sps:$4 sm:$0xff]   ;;  %v14605_v19 = vld [vmem:[%s16230_s25 + $0xe48] ss:$16 sps:$4 sm:$0xff]  }
 0x8f9   : > { %7442 = vmatprep.subr.bf16.mxu0 %v14526_v44  ;;  %7524 = vmatprep.subr.bf16.mxu1 %v14529_v2  ;;  %v14610_v44 = vld [vmem:[%s16230_s25 + $0xe64] ss:$16 sps:$4 sm:$0xff]   ;;  %v14613_v2 = vld [vmem:[%s16230_s25 + $0xe6c] ss:$16 sps:$4 sm:$0xff]  }
 0x8fc   : > { %7443 = vmatpush1.bf16.msra.mxu0 %v14524_v21  ;;  %7525 = vmatpush1.bf16.msra.mxu1 %v14527_v16  ;;  %v14608_v21 = vld [vmem:[%s16230_s25 + $0xe60] ss:$16 sps:$4 sm:$0xff]   ;;  %v14611_v16 = vld [vmem:[%s16230_s25 + $0xe68] ss:$16 sps:$4 sm:$0xff]  }
 0x8fd   : > { %7444 = vmatprep.subr.bf16.mxu0 %v14532_v6  ;;  %7526 = vmatprep.subr.bf16.mxu1 %v14535_v20  ;;  %v14616_v6 = vld [vmem:[%s16230_s25 + $0xe84] ss:$16 sps:$4 sm:$0xff]   ;;  %v14619_v20 = vld [vmem:[%s16230_s25 + $0xe8c] ss:$16 sps:$4 sm:$0xff]  }
 0x900   : > { %7445 = vmatpush1.bf16.msra.mxu0 %v14530_v33  ;;  %7527 = vmatpush1.bf16.msra.mxu1 %v14533_v7  ;;  %v14614_v33 = vld [vmem:[%s16230_s25 + $0xe80] ss:$16 sps:$4 sm:$0xff]   ;;  %v14617_v7 = vld [vmem:[%s16230_s25 + $0xe88] ss:$16 sps:$4 sm:$0xff]  }
 0x901   : > { %7446 = vmatprep.subr.bf16.mxu0 %v14538_v24  ;;  %7528 = vmatprep.subr.bf16.mxu1 %v14541_v9  ;;  %v14622_v24 = vld [vmem:[%s16230_s25 + $0xea4] ss:$16 sps:$4 sm:$0xff]   ;;  %v14625_v9 = vld [vmem:[%s16230_s25 + $0xeac] ss:$16 sps:$4 sm:$0xff]  }
 0x904   : > { %7447 = vmatpush1.bf16.msra.mxu0 %v14536_v49  ;;  %7529 = vmatpush1.bf16.msra.mxu1 %v14539_v5  ;;  %v14620_v49 = vld [vmem:[%s16230_s25 + $0xea0] ss:$16 sps:$4 sm:$0xff]   ;;  %v14623_v5 = vld [vmem:[%s16230_s25 + $0xea8] ss:$16 sps:$4 sm:$0xff]  }
 0x905   : > { %7448 = vmatprep.subr.bf16.mxu0 %v14544_v36  ;;  %7530 = vmatprep.subr.bf16.mxu1 %v14547_v55  ;;  %v14628_v36 = vld [vmem:[%s16230_s25 + $0xec4] ss:$16 sps:$4 sm:$0xff]   ;;  %v14631_v55 = vld [vmem:[%s16230_s25 + $0xecc] ss:$16 sps:$4 sm:$0xff]  }
 0x908   : > { %7449 = vmatpush1.bf16.msra.mxu0 %v14542_v57  ;;  %7531 = vmatpush1.bf16.msra.mxu1 %v14545_v45 }
 0x909   : > { %7450 = vmatprep.subr.bf16.mxu0 %v14550_v28  ;;  %7532 = vmatprep.subr.bf16.mxu1 %v14553_v53  ;;  %v14626_v28 = vld [vmem:[%s16230_s25 + $0xec0] ss:$16 sps:$4 sm:$0xff]   ;;  %v14629_v53 = vld [vmem:[%s16230_s25 + $0xec8] ss:$16 sps:$4 sm:$0xff]  }
 0x90c   : > { %7451 = vmatpush1.bf16.msra.mxu0 %v14548_v12  ;;  %7533 = vmatpush1.bf16.msra.mxu1 %v14551_v27  ;;  %v3770_v12 = vld [vmem:[#allocation3] sm:$0xff] }
 0x90d   : > { %7452 = vmatprep.subr.bf16.mxu0 %v14556_v63  ;;  %7534 = vmatprep.subr.bf16.mxu1 %v14559_v37 }
 0x910   : > { %7453 = vmatpush1.bf16.msra.mxu0 %v14554_v17  ;;  %7535 = vmatpush1.bf16.msra.mxu1 %v14557_v11 }
 0x911   : > { %7454 = vmatprep.subr.bf16.mxu0 %v14562_v23  ;;  %7536 = vmatprep.subr.bf16.mxu1 %v14565_v8 }
 0x914   : > { %7455 = vmatpush1.bf16.msra.mxu0 %v14560_v39  ;;  %7537 = vmatpush1.bf16.msra.mxu1 %v14563_v62  ;;  %v14634_v62 = vld [vmem:[%s16230_s25 + $0xee4] ss:$16 sps:$4 sm:$0xff]  }
 0x915   : > { %7456 = vmatprep.subr.bf16.mxu0 %v14568_v3  ;;  %7538 = vmatprep.subr.bf16.mxu1 %v14571_v54  ;;  %v14637_v3 = vld [vmem:[%s16230_s25 + $0xeec] ss:$16 sps:$4 sm:$0xff]  }
 0x918   : > { %7457 = vmatpush1.bf16.msra.mxu0 %v14566_v52  ;;  %7539 = vmatpush1.bf16.msra.mxu1 %v14569_v59  ;;  %v14632_v59 = vld [vmem:[%s16230_s25 + $0xee0] ss:$16 sps:$4 sm:$0xff]  }
 0x919   : > { %7458 = vmatprep.subr.bf16.mxu0 %v14574_v22  ;;  %7540 = vmatprep.subr.bf16.mxu1 %v14577_v34  ;;  %v14635_v22 = vld [vmem:[%s16230_s25 + $0xee8] ss:$16 sps:$4 sm:$0xff]   ;;  %v4725_v34 = vadd.f32 %v4723_v13, %v3770_v12  ;;  %v14649_v13 = vld [vmem:[%s16230_s25 + $0xf2c] ss:$16 sps:$4 sm:$0xff]  }
 0x91a   : > { %v14703_v12 = vld [vmem:[%s16230_s25 + $0x104c] ss:$16 sps:$4 sm:$0xff]  }
 0x91c   : > { %7459 = vmatpush1.bf16.msra.mxu0 %v14572_v41  ;;  %7541 = vmatpush1.bf16.msra.mxu1 %v14575_v56  ;;  %v14640_v56 = vld [vmem:[%s16230_s25 + $0xf04] ss:$16 sps:$4 sm:$0xff]  }
 0x91d   : > { %7460 = vmatprep.subr.bf16.mxu0 %v14580_v51  ;;  %7542 = vmatprep.subr.bf16.mxu1 %v14583_v15  ;;  %v14643_v51 = vld [vmem:[%s16230_s25 + $0xf0c] ss:$16 sps:$4 sm:$0xff]  }
 0x920   : > { %7461 = vmatpush1.bf16.msra.mxu0 %v14578_v30  ;;  %7543 = vmatpush1.bf16.msra.mxu1 %v14581_v25  ;;  %v14638_v30 = vld [vmem:[%s16230_s25 + $0xf00] ss:$16 sps:$4 sm:$0xff]  }
 0x921   : > { %7462 = vmatprep.subr.bf16.mxu0 %v14586_v26  ;;  %7544 = vmatprep.subr.bf16.mxu1 %v14589_v29  ;;  %v14644_v25 = vld [vmem:[%s16230_s25 + $0xf20] ss:$16 sps:$4 sm:$0xff]   ;;  %v14647_v26 = vld [vmem:[%s16230_s25 + $0xf28] ss:$16 sps:$4 sm:$0xff]   ;;  %v14652_v29 = vld [vmem:[%s16230_s25 + $0xf44] ss:$16 sps:$4 sm:$0xff]  }
 0x924   : > { %7463 = vmatpush1.bf16.msra.mxu0 %v14584_v10  ;;  %7545 = vmatpush1.bf16.msra.mxu1 %v14587_v50  ;;  %v14655_v10 = vld [vmem:[%s16230_s25 + $0xf4c] ss:$16 sps:$4 sm:$0xff]   ;;  %v14650_v50 = vld [vmem:[%s16230_s25 + $0xf40] ss:$16 sps:$4 sm:$0xff]  }
 0x925   : > { %7473 = vmatprep.subr.bf16.mxu0 %v14592_v43  ;;  %7555 = vmatprep.subr.bf16.mxu1 %v14595_v46  ;;  %v14653_v43 = vld [vmem:[%s16230_s25 + $0xf48] ss:$16 sps:$4 sm:$0xff]   ;;  %v14658_v46 = vld [vmem:[%s16230_s25 + $0xf64] ss:$16 sps:$4 sm:$0xff]  }
 0x927   : > { %7465 = vmatmul.mubr.bf16.vlgmr.msra.gmra.mrb[12].mxu0 %v6784_v32  ;;  %7547 = vmatmul.mubr.bf16.vlgmr.msra.gmra.mrb[12].mxu1 %v6784_v32  ;;  %v14656_v32 = vld [vmem:[%s16230_s25 + $0xf60] ss:$16 sps:$4 sm:$0xff]  }
 0x928   : > { %7474 = vmatpush1.bf16.msra.mxu0 %v14590_v40  ;;  %7556 = vmatpush1.bf16.msra.mxu1 %v14593_v35  ;;  %v14659_v40 = vld [vmem:[%s16230_s25 + $0xf68] ss:$16 sps:$4 sm:$0xff]   ;;  %v14664_v35 = vld [vmem:[%s16230_s25 + $0xf84] ss:$16 sps:$4 sm:$0xff]  }
 0x929   : > { %7475 = vmatprep.subr.bf16.mxu0 %v14598_v31  ;;  %7557 = vmatprep.subr.bf16.mxu1 %v14601_v60  ;;  %v14667_v31 = vld [vmem:[%s16230_s25 + $0xf8c] ss:$16 sps:$4 sm:$0xff]   ;;  %v14662_v60 = vld [vmem:[%s16230_s25 + $0xf80] ss:$16 sps:$4 sm:$0xff]  }
 0x92a   : > { %7505 = vmatprep.mubr.bf16.mxu0 %v6787_v14  ;;  %7587 = vmatprep.mubr.bf16.mxu1 %v6787_v14  ;;  %v14670_v14 = vld [vmem:[%s16230_s25 + $0xfa4] ss:$16 sps:$4 sm:$0xff]  }
 0x92c   : > { %7476 = vmatpush1.bf16.msra.mxu0 %v14596_v47  ;;  %7558 = vmatpush1.bf16.msra.mxu1 %v14599_v42  ;;  %v14673_v47 = vld [vmem:[%s16230_s25 + $0xfac] ss:$16 sps:$4 sm:$0xff]   ;;  %v14668_v42 = vld [vmem:[%s16230_s25 + $0xfa0] ss:$16 sps:$4 sm:$0xff]  }
 0x92d   : > { %7477 = vmatprep.subr.bf16.mxu0 %v14604_v58  ;;  %7559 = vmatprep.subr.bf16.mxu1 %v14607_v18  ;;  %v14671_v58 = vld [vmem:[%s16230_s25 + $0xfa8] ss:$16 sps:$4 sm:$0xff]   ;;  %v14676_v18 = vld [vmem:[%s16230_s25 + $0xfc4] ss:$16 sps:$4 sm:$0xff]  }
 0x930   : > { %7478 = vmatpush1.bf16.msra.mxu0 %v14602_v48  ;;  %7560 = vmatpush1.bf16.msra.mxu1 %v14605_v19  ;;  %v14679_v48 = vld [vmem:[%s16230_s25 + $0xfcc] ss:$16 sps:$4 sm:$0xff]   ;;  %v14674_v19 = vld [vmem:[%s16230_s25 + $0xfc0] ss:$16 sps:$4 sm:$0xff]  }
 0x931   : > { %7479 = vmatprep.subr.bf16.mxu0 %v14610_v44  ;;  %7561 = vmatprep.subr.bf16.mxu1 %v14613_v2  ;;  %v14677_v44 = vld [vmem:[%s16230_s25 + $0xfc8] ss:$16 sps:$4 sm:$0xff]   ;;  %v14682_v2 = vld [vmem:[%s16230_s25 + $0xfe4] ss:$16 sps:$4 sm:$0xff]  }
 0x934   : > { %7480 = vmatpush1.bf16.msra.mxu0 %v14608_v21  ;;  %7562 = vmatpush1.bf16.msra.mxu1 %v14611_v16  ;;  %v14685_v21 = vld [vmem:[%s16230_s25 + $0xfec] ss:$16 sps:$4 sm:$0xff]   ;;  %v14680_v16 = vld [vmem:[%s16230_s25 + $0xfe0] ss:$16 sps:$4 sm:$0xff]  }
 0x935   : > { %7481 = vmatprep.subr.bf16.mxu0 %v14616_v6  ;;  %7563 = vmatprep.subr.bf16.mxu1 %v14619_v20  ;;  %v14683_v6 = vld [vmem:[%s16230_s25 + $0xfe8] ss:$16 sps:$4 sm:$0xff]   ;;  %v14688_v20 = vld [vmem:[%s16230_s25 + $0x1004] ss:$16 sps:$4 sm:$0xff]  }
 0x938   : > { %7482 = vmatpush1.bf16.msra.mxu0 %v14614_v33  ;;  %7564 = vmatpush1.bf16.msra.mxu1 %v14617_v7  ;;  %v14691_v33 = vld [vmem:[%s16230_s25 + $0x100c] ss:$16 sps:$4 sm:$0xff]   ;;  %v14686_v7 = vld [vmem:[%s16230_s25 + $0x1000] ss:$16 sps:$4 sm:$0xff]  }
 0x939   : > { %7483 = vmatprep.subr.bf16.mxu0 %v14622_v24  ;;  %7565 = vmatprep.subr.bf16.mxu1 %v14625_v9  ;;  %v14689_v24 = vld [vmem:[%s16230_s25 + $0x1008] ss:$16 sps:$4 sm:$0xff]   ;;  %v17933_v9 = vld [vmem:[%s17412_s27 + $0x10] sm:$0xff] }
 0x93a   : > { %v5581_v57 = vpop.f32.mrb[4].mxu0  ;;  %v5663_v45 = vpop.f32.mrb[4].mxu1 }
 0x93b   : > { %v5583_v27 = vpop.f32.mrb[5].mxu0  ;;  %v5665_v63 = vpop.f32.mrb[5].mxu1 }
 0x93c   : > { %v5674_v37 = vcombine.low %v5581_v57, %v5583_v27  ;;  %v5675_v17 = vcombine.low %v5663_v45, %v5665_v63  ;;  %v5585_v11 = vpop.f32.mrb[6].mxu0  ;;  %v5667_v23 = vpop.f32.mrb[6].mxu1  ;;  %7484 = vmatpush1.bf16.msra.mxu0 %v14620_v49  ;;  %7566 = vmatpush1.bf16.msra.mxu1 %v14623_v5  ;;  %v6786_v49 = vrot.slane %v17933_v9, 3  ;;  %v14694_v5 = vld [vmem:[%s16230_s25 + $0x1024] ss:$16 sps:$4 sm:$0xff]  }
 0x93d   : > { %v5586_v8 = vpop.f32.mrb[7].mxu0  ;;  %v5668_v39 = vpop.f32.mrb[7].mxu1  ;;  %7485 = vmatprep.subr.bf16.mxu0 %v14628_v36  ;;  %7567 = vmatprep.subr.bf16.mxu1 %v14631_v55  ;;  %v14697_v36 = vld [vmem:[%s16230_s25 + $0x102c] ss:$16 sps:$4 sm:$0xff]   ;;  %v14692_v45 = vld [vmem:[%s16230_s25 + $0x1020] ss:$16 sps:$4 sm:$0xff]  }
 0x93e   : > { %v5682_v54 = vrot.slane %v5674_v37, %v17741_v1  ;;  %v5689_v52 = vrot.slane %v5675_v17, %v17741_v1  ;;  %v17939_v55 = vld [vmem:[%s17412_s27 + $0x8] sm:$0xff]  ;;  %v14698_v27 = vld [vmem:[%s16230_s25 + $0x1040] ss:$16 sps:$4 sm:$0xff]  }
 0x93f   : > { %v7748_v57 = vrot.slane %v17939_v55, 4  ;;  %v14701_v63 = vld [vmem:[%s16230_s25 + $0x1048] ss:$16 sps:$4 sm:$0xff]   ;;  %v14706_v37 = vld [vmem:[%s16230_s25 + $0x1064] ss:$16 sps:$4 sm:$0xff]  }
 0x940   : > { %v5690_v41 = vcombine.low %v5682_v54, %v5689_v52  ;;  %7486 = vmatpush1.bf16.msra.mxu0 %v14626_v28  ;;  %7568 = vmatpush1.bf16.msra.mxu1 %v14629_v53  ;;  %v14695_v28 = vld [vmem:[%s16230_s25 + $0x1028] ss:$16 sps:$4 sm:$0xff]   ;;  %v14700_v53 = vld [vmem:[%s16230_s25 + $0x1044] ss:$16 sps:$4 sm:$0xff]   ;;  %v14709_v17 = vld [vmem:[%s16230_s25 + $0x106c] ss:$16 sps:$4 sm:$0xff]  }
 0x941   : > { %7487 = vmatprep.subr.bf16.mxu0 %v14634_v62  ;;  %7569 = vmatprep.subr.bf16.mxu1 %v14637_v3  ;;  %v14704_v11 = vld [vmem:[%s16230_s25 + $0x1060] ss:$16 sps:$4 sm:$0xff]   ;;  %v14707_v23 = vld [vmem:[%s16230_s25 + $0x1068] ss:$16 sps:$4 sm:$0xff]   ;;  %v14712_v8 = vld [vmem:[%s16230_s25 + $0x1084] ss:$16 sps:$4 sm:$0xff]  }
 0x942   : > { %v17896_v15 = vadd.f32 %v5690_v41, %v4725_v34  ;;  %v14715_v39 = vld [vmem:[%s16230_s25 + $0x108c] ss:$16 sps:$4 sm:$0xff]   ;;  %v14710_v62 = vld [vmem:[%s16230_s25 + $0x1080] ss:$16 sps:$4 sm:$0xff]   ;;  %v14713_v3 = vld [vmem:[%s16230_s25 + $0x1088] ss:$16 sps:$4 sm:$0xff]  }
 0x943   : > { %v14718_v54 = vld [vmem:[%s16230_s25 + $0x10a4] ss:$16 sps:$4 sm:$0xff]   ;;  %v14721_v52 = vld [vmem:[%s16230_s25 + $0x10ac] ss:$16 sps:$4 sm:$0xff]  }
 0x944   : > { %7488 = vmatpush1.bf16.msra.mxu0 %v14632_v59  ;;  %7570 = vmatpush1.bf16.msra.mxu1 %v14635_v22  ;;  %v14716_v59 = vld [vmem:[%s16230_s25 + $0x10a0] ss:$16 sps:$4 sm:$0xff]   ;;  %v14719_v22 = vld [vmem:[%s16230_s25 + $0x10a8] ss:$16 sps:$4 sm:$0xff]   ;;  %v14724_v34 = vld [vmem:[%s16230_s25 + $0x10c4] ss:$16 sps:$4 sm:$0xff]  }
 0x945   : > { %7489 = vmatprep.subr.bf16.mxu0 %v14640_v56  ;;  %7571 = vmatprep.subr.bf16.mxu1 %v14643_v51  ;;  %v14727_v41 = vld [vmem:[%s16230_s25 + $0x10cc] ss:$16 sps:$4 sm:$0xff]   ;;  %v14722_v56 = vld [vmem:[%s16230_s25 + $0x10c0] ss:$16 sps:$4 sm:$0xff]   ;;  %v14725_v51 = vld [vmem:[%s16230_s25 + $0x10c8] ss:$16 sps:$4 sm:$0xff]  }
 0x948   : > { %7490 = vmatpush1.bf16.msra.mxu0 %v14638_v30  ;;  %7572 = vmatpush1.bf16.msra.mxu1 %v14641_v4  ;;  %v14730_v30 = vld [vmem:[%s16230_s25 + $0x10e4] ss:$16 sps:$4 sm:$0xff]   ;;  %v14733_v4 = vld [vmem:[%s16230_s25 + $0x10ec] ss:$16 sps:$4 sm:$0xff]  }
 0x949   : > { %7491 = vmatprep.subr.bf16.mxu0 %v14646_v0  ;;  %7573 = vmatprep.subr.bf16.mxu1 %v14649_v13  ;;  %v14728_v0 = vld [vmem:[%s16230_s25 + $0x10e0] ss:$16 sps:$4 sm:$0xff]   ;;  %v14731_v13 = vld [vmem:[%s16230_s25 + $0x10e8] ss:$16 sps:$4 sm:$0xff]  }
 0x94c   : > { %7492 = vmatpush1.bf16.msra.mxu0 %v14644_v25  ;;  %7574 = vmatpush1.bf16.msra.mxu1 %v14647_v26  ;;  %v14736_v25 = vld [vmem:[%s16230_s25 + $0x1104] ss:$16 sps:$4 sm:$0xff]   ;;  %v14739_v26 = vld [vmem:[%s16230_s25 + $0x110c] ss:$16 sps:$4 sm:$0xff]  }
 0x94d   : > { %7493 = vmatprep.subr.bf16.mxu0 %v14652_v29  ;;  %7575 = vmatprep.subr.bf16.mxu1 %v14655_v10  ;;  %v14734_v29 = vld [vmem:[%s16230_s25 + $0x1100] ss:$16 sps:$4 sm:$0xff]   ;;  %v14737_v10 = vld [vmem:[%s16230_s25 + $0x1108] ss:$16 sps:$4 sm:$0xff]  }
 0x950   : > { %7494 = vmatpush1.bf16.msra.mxu0 %v14650_v50  ;;  %7576 = vmatpush1.bf16.msra.mxu1 %v14653_v43  ;;  %v14742_v50 = vld [vmem:[%s16230_s25 + $0x1124] ss:$16 sps:$4 sm:$0xff]   ;;  %v14745_v43 = vld [vmem:[%s16230_s25 + $0x112c] ss:$16 sps:$4 sm:$0xff]  }
 0x951   : > { %7495 = vmatprep.subr.bf16.mxu0 %v14658_v46  ;;  %7577 = vmatprep.subr.bf16.mxu1 %v14661_v38  ;;  %v14740_v46 = vld [vmem:[%s16230_s25 + $0x1120] ss:$16 sps:$4 sm:$0xff]   ;;  %v14743_v38 = vld [vmem:[%s16230_s25 + $0x1128] ss:$16 sps:$4 sm:$0xff]  }
 0x954   : > { %7496 = vmatpush1.bf16.msra.mxu0 %v14656_v32  ;;  %7578 = vmatpush1.bf16.msra.mxu1 %v14659_v40  ;;  %v14748_v32 = vld [vmem:[%s16230_s25 + $0x1144] ss:$16 sps:$4 sm:$0xff]   ;;  %v14751_v40 = vld [vmem:[%s16230_s25 + $0x114c] ss:$16 sps:$4 sm:$0xff]  }
 0x955   : > { %7497 = vmatprep.subr.bf16.mxu0 %v14664_v35  ;;  %7579 = vmatprep.subr.bf16.mxu1 %v14667_v31  ;;  %v14746_v35 = vld [vmem:[%s16230_s25 + $0x1140] ss:$16 sps:$4 sm:$0xff]   ;;  %v14749_v31 = vld [vmem:[%s16230_s25 + $0x1148] ss:$16 sps:$4 sm:$0xff]  }
 0x958   : > { %7498 = vmatpush1.bf16.msra.mxu0 %v14662_v60  ;;  %7580 = vmatpush1.bf16.msra.mxu1 %v14665_v61  ;;  %v14754_v60 = vld [vmem:[%s16230_s25 + $0x1164] ss:$16 sps:$4 sm:$0xff]   ;;  %v14757_v61 = vld [vmem:[%s16230_s25 + $0x116c] ss:$16 sps:$4 sm:$0xff]  }
 0x959   : > { %7499 = vmatprep.subr.bf16.mxu0 %v14670_v14  ;;  %7581 = vmatprep.subr.bf16.mxu1 %v14673_v47  ;;  %v14752_v14 = vld [vmem:[%s16230_s25 + $0x1160] ss:$16 sps:$4 sm:$0xff]   ;;  %v14755_v47 = vld [vmem:[%s16230_s25 + $0x1168] ss:$16 sps:$4 sm:$0xff]  }
 0x95c   : > { %7500 = vmatpush1.bf16.msra.mxu0 %v14668_v42  ;;  %7582 = vmatpush1.bf16.msra.mxu1 %v14671_v58  ;;  %v14760_v42 = vld [vmem:[%s16230_s25 + $0x1184] ss:$16 sps:$4 sm:$0xff]   ;;  %v14763_v58 = vld [vmem:[%s16230_s25 + $0x118c] ss:$16 sps:$4 sm:$0xff]  }
 0x95d   : > { %7501 = vmatprep.subr.bf16.mxu0 %v14676_v18  ;;  %7583 = vmatprep.subr.bf16.mxu1 %v14679_v48  ;;  %v14758_v18 = vld [vmem:[%s16230_s25 + $0x1180] ss:$16 sps:$4 sm:$0xff]   ;;  %v14761_v48 = vld [vmem:[%s16230_s25 + $0x1188] ss:$16 sps:$4 sm:$0xff]  }
 0x960   : > { %7502 = vmatpush1.bf16.msra.mxu0 %v14674_v19  ;;  %7584 = vmatpush1.bf16.msra.mxu1 %v14677_v44  ;;  %v14766_v19 = vld [vmem:[%s16230_s25 + $0x11a4] ss:$16 sps:$4 sm:$0xff]   ;;  %v14769_v44 = vld [vmem:[%s16230_s25 + $0x11ac] ss:$16 sps:$4 sm:$0xff]  }
 0x961   : > { %7503 = vmatprep.subr.bf16.mxu0 %v14682_v2  ;;  %7585 = vmatprep.subr.bf16.mxu1 %v14685_v21  ;;  %v14764_v2 = vld [vmem:[%s16230_s25 + $0x11a0] ss:$16 sps:$4 sm:$0xff]   ;;  %v14767_v21 = vld [vmem:[%s16230_s25 + $0x11a8] ss:$16 sps:$4 sm:$0xff]  }
 0x964   : > { %7504 = vmatpush1.bf16.msra.mxu0 %v14680_v16  ;;  %7586 = vmatpush1.bf16.msra.mxu1 %v14683_v6  ;;  %v14772_v16 = vld [vmem:[%s16230_s25 + $0x11c4] ss:$16 sps:$4 sm:$0xff]   ;;  %v14775_v6 = vld [vmem:[%s16230_s25 + $0x11cc] ss:$16 sps:$4 sm:$0xff]  }
 0x965   : > { %8395 = vmatprep.subr.bf16.mxu0 %v14688_v20  ;;  %8477 = vmatprep.subr.bf16.mxu1 %v14691_v33  ;;  %v14770_v20 = vld [vmem:[%s16230_s25 + $0x11c0] ss:$16 sps:$4 sm:$0xff]   ;;  %v14773_v33 = vld [vmem:[%s16230_s25 + $0x11c8] ss:$16 sps:$4 sm:$0xff]  }
 0x967   : > { %7506 = vmatmul.mubr.bf16.vlgmr.msra.gmra.mrb[12].mxu0 %v6786_v49  ;;  %7588 = vmatmul.mubr.bf16.vlgmr.msra.gmra.mrb[12].mxu1 %v6786_v49  ;;  %v14776_v49 = vld [vmem:[%s16230_s25 + $0x11e0] ss:$16 sps:$4 sm:$0xff]  }
 0x968   : > { %8396 = vmatpush1.bf16.msra.mxu0 %v14686_v7  ;;  %8478 = vmatpush1.bf16.msra.mxu1 %v14689_v24  ;;  %v14778_v7 = vld [vmem:[%s16230_s25 + $0x11e4] ss:$16 sps:$4 sm:$0xff]   ;;  %v14781_v24 = vld [vmem:[%s16230_s25 + $0x11ec] ss:$16 sps:$4 sm:$0xff]  }
 0x969   : > { %8397 = vmatprep.subr.bf16.mxu0 %v14694_v5  ;;  %8479 = vmatprep.subr.bf16.mxu1 %v14697_v36  ;;  %v14779_v5 = vld [vmem:[%s16230_s25 + $0x11e8] ss:$16 sps:$4 sm:$0xff]   ;;  %v14784_v36 = vld [vmem:[%s16230_s25 + $0x1204] ss:$16 sps:$4 sm:$0xff]  }
 0x96a   : > { %8427 = vmatprep.mubr.bf16.mxu0 %v7748_v57  ;;  %8509 = vmatprep.mubr.bf16.mxu1 %v7748_v57  ;;  %v14787_v57 = vld [vmem:[%s16230_s25 + $0x120c] ss:$16 sps:$4 sm:$0xff]  }
 0x96c   : > { %8398 = vmatpush1.bf16.msra.mxu0 %v14692_v45  ;;  %8480 = vmatpush1.bf16.msra.mxu1 %v14695_v28  ;;  %v18003_v45 = vld [vmem:[%s17412_s27] sm:$0xff] }
 0x96d   : > { %8399 = vmatprep.subr.bf16.mxu0 %v14700_v53  ;;  %8481 = vmatprep.subr.bf16.mxu1 %v14703_v12  ;;  %v7747_v28 = vrot.slane %v18003_v45, 4  ;;  %v14782_v53 = vld [vmem:[%s16230_s25 + $0x1200] ss:$16 sps:$4 sm:$0xff]   ;;  %v14785_v12 = vld [vmem:[%s16230_s25 + $0x1208] ss:$16 sps:$4 sm:$0xff]  }
 0x970   : > { %8400 = vmatpush1.bf16.msra.mxu0 %v14698_v27  ;;  %8482 = vmatpush1.bf16.msra.mxu1 %v14701_v63  ;;  %v14790_v27 = vld [vmem:[%s16230_s25 + $0x1224] ss:$16 sps:$4 sm:$0xff]   ;;  %v14793_v63 = vld [vmem:[%s16230_s25 + $0x122c] ss:$16 sps:$4 sm:$0xff]  }
 0x971   : > { %8401 = vmatprep.subr.bf16.mxu0 %v14706_v37  ;;  %8483 = vmatprep.subr.bf16.mxu1 %v14709_v17  ;;  %v18011_v37 = vld [vmem:[%s17412_s27 + $0x18] sm:$0xff] }
 0x972   : > { %v7750_v17 = vrot.slane %v18011_v37, 4 }
 0x974   : > { %8402 = vmatpush1.bf16.msra.mxu0 %v14704_v11  ;;  %8484 = vmatpush1.bf16.msra.mxu1 %v14707_v23  ;;  %v14788_v11 = vld [vmem:[%s16230_s25 + $0x1220] ss:$16 sps:$4 sm:$0xff]   ;;  %v14791_v23 = vld [vmem:[%s16230_s25 + $0x1228] ss:$16 sps:$4 sm:$0xff]  }
 0x975   : > { %8403 = vmatprep.subr.bf16.mxu0 %v14712_v8  ;;  %8485 = vmatprep.subr.bf16.mxu1 %v14715_v39  ;;  %v14796_v8 = vld [vmem:[%s16230_s25 + $0x1244] ss:$16 sps:$4 sm:$0xff]   ;;  %v14799_v39 = vld [vmem:[%s16230_s25 + $0x124c] ss:$16 sps:$4 sm:$0xff]  }
 0x978   : > { %8404 = vmatpush1.bf16.msra.mxu0 %v14710_v62  ;;  %8486 = vmatpush1.bf16.msra.mxu1 %v14713_v3  ;;  %v14794_v62 = vld [vmem:[%s16230_s25 + $0x1240] ss:$16 sps:$4 sm:$0xff]   ;;  %v14797_v3 = vld [vmem:[%s16230_s25 + $0x1248] ss:$16 sps:$4 sm:$0xff]  }
 0x979   : > { %8405 = vmatprep.subr.bf16.mxu0 %v14718_v54  ;;  %8487 = vmatprep.subr.bf16.mxu1 %v14721_v52  ;;  %v14802_v54 = vld [vmem:[%s16230_s25 + $0x1264] ss:$16 sps:$4 sm:$0xff]   ;;  %v14805_v52 = vld [vmem:[%s16230_s25 + $0x126c] ss:$16 sps:$4 sm:$0xff]  }
 0x97c   : > { %8406 = vmatpush1.bf16.msra.mxu0 %v14716_v59  ;;  %8488 = vmatpush1.bf16.msra.mxu1 %v14719_v22  ;;  %v14800_v59 = vld [vmem:[%s16230_s25 + $0x1260] ss:$16 sps:$4 sm:$0xff]   ;;  %v14803_v22 = vld [vmem:[%s16230_s25 + $0x1268] ss:$16 sps:$4 sm:$0xff]  }
 0x97d   : > { %8407 = vmatprep.subr.bf16.mxu0 %v14724_v34  ;;  %8489 = vmatprep.subr.bf16.mxu1 %v14727_v41  ;;  %v14808_v34 = vld [vmem:[%s16230_s25 + $0x1284] ss:$16 sps:$4 sm:$0xff]   ;;  %v14811_v41 = vld [vmem:[%s16230_s25 + $0x128c] ss:$16 sps:$4 sm:$0xff]  }
 0x980   : > { %8408 = vmatpush1.bf16.msra.mxu0 %v14722_v56  ;;  %8490 = vmatpush1.bf16.msra.mxu1 %v14725_v51  ;;  %v14806_v56 = vld [vmem:[%s16230_s25 + $0x1280] ss:$16 sps:$4 sm:$0xff]   ;;  %v14809_v51 = vld [vmem:[%s16230_s25 + $0x1288] ss:$16 sps:$4 sm:$0xff]  }
 0x981   : > { %8409 = vmatprep.subr.bf16.mxu0 %v14730_v30  ;;  %8491 = vmatprep.subr.bf16.mxu1 %v14733_v4  ;;  %v14814_v30 = vld [vmem:[%s16230_s25 + $0x12a4] ss:$16 sps:$4 sm:$0xff]   ;;  %v14817_v4 = vld [vmem:[%s16230_s25 + $0x12ac] ss:$16 sps:$4 sm:$0xff]  }
 0x984   : > { %8410 = vmatpush1.bf16.msra.mxu0 %v14728_v0  ;;  %8492 = vmatpush1.bf16.msra.mxu1 %v14731_v13  ;;  %v14812_v0 = vld [vmem:[%s16230_s25 + $0x12a0] ss:$16 sps:$4 sm:$0xff]   ;;  %v14815_v13 = vld [vmem:[%s16230_s25 + $0x12a8] ss:$16 sps:$4 sm:$0xff]  }
 0x985   : > { %8411 = vmatprep.subr.bf16.mxu0 %v14736_v25  ;;  %8493 = vmatprep.subr.bf16.mxu1 %v14739_v26  ;;  %v14820_v25 = vld [vmem:[%s16230_s25 + $0x12c4] ss:$16 sps:$4 sm:$0xff]   ;;  %v14823_v26 = vld [vmem:[%s16230_s25 + $0x12cc] ss:$16 sps:$4 sm:$0xff]  }
 0x988   : > { %8412 = vmatpush1.bf16.msra.mxu0 %v14734_v29  ;;  %8494 = vmatpush1.bf16.msra.mxu1 %v14737_v10 }
 0x989   : > { %8413 = vmatprep.subr.bf16.mxu0 %v14742_v50  ;;  %8495 = vmatprep.subr.bf16.mxu1 %v14745_v43 }
 0x98c   : > { %8414 = vmatpush1.bf16.msra.mxu0 %v14740_v46  ;;  %8496 = vmatpush1.bf16.msra.mxu1 %v14743_v38 }
 0x98d   : > { %8415 = vmatprep.subr.bf16.mxu0 %v14748_v32  ;;  %8497 = vmatprep.subr.bf16.mxu1 %v14751_v40 }
 0x990   : > { %8416 = vmatpush1.bf16.msra.mxu0 %v14746_v35  ;;  %8498 = vmatpush1.bf16.msra.mxu1 %v14749_v31  ;;  %v14818_v35 = vld [vmem:[%s16230_s25 + $0x12c0] ss:$16 sps:$4 sm:$0xff]   ;;  %v14821_v31 = vld [vmem:[%s16230_s25 + $0x12c8] ss:$16 sps:$4 sm:$0xff]  }
 0x991   : > { %8417 = vmatprep.subr.bf16.mxu0 %v14754_v60  ;;  %8499 = vmatprep.subr.bf16.mxu1 %v14757_v61 }
 0x994   : > { %8418 = vmatpush1.bf16.msra.mxu0 %v14752_v14  ;;  %8500 = vmatpush1.bf16.msra.mxu1 %v14755_v47  ;;  %v14826_v14 = vld [vmem:[%s16230_s25 + $0x12e4] ss:$16 sps:$4 sm:$0xff]   ;;  %v14829_v47 = vld [vmem:[%s16230_s25 + $0x12ec] ss:$16 sps:$4 sm:$0xff]  }
 0x995   : > { %8419 = vmatprep.subr.bf16.mxu0 %v14760_v42  ;;  %8501 = vmatprep.subr.bf16.mxu1 %v14763_v58 }
 0x998   : > { %8420 = vmatpush1.bf16.msra.mxu0 %v14758_v18  ;;  %8502 = vmatpush1.bf16.msra.mxu1 %v14761_v48  ;;  %v14824_v48 = vld [vmem:[%s16230_s25 + $0x12e0] ss:$16 sps:$4 sm:$0xff]  }
 0x999   : > { %8421 = vmatprep.subr.bf16.mxu0 %v14766_v19  ;;  %8503 = vmatprep.subr.bf16.mxu1 %v14769_v44  ;;  %v14827_v19 = vld [vmem:[%s16230_s25 + $0x12e8] ss:$16 sps:$4 sm:$0xff]   ;;  %v14832_v44 = vld [vmem:[%s16230_s25 + $0x1304] ss:$16 sps:$4 sm:$0xff]  }
 0x99c   : > { %8422 = vmatpush1.bf16.msra.mxu0 %v14764_v2  ;;  %8504 = vmatpush1.bf16.msra.mxu1 %v14767_v21  ;;  %v14835_v2 = vld [vmem:[%s16230_s25 + $0x130c] ss:$16 sps:$4 sm:$0xff]  }
 0x99d   : > { %8423 = vmatprep.subr.bf16.mxu0 %v14772_v16  ;;  %8505 = vmatprep.subr.bf16.mxu1 %v14775_v6  ;;  %v14830_v16 = vld [vmem:[%s16230_s25 + $0x1300] ss:$16 sps:$4 sm:$0xff]   ;;  %v14833_v6 = vld [vmem:[%s16230_s25 + $0x1308] ss:$16 sps:$4 sm:$0xff]  }
 0x9a0   : > { %8424 = vmatpush1.bf16.msra.mxu0 %v14770_v20  ;;  %8506 = vmatpush1.bf16.msra.mxu1 %v14773_v33  ;;  %v14838_v20 = vld [vmem:[%s16230_s25 + $0x1324] ss:$16 sps:$4 sm:$0xff]   ;;  %v14841_v33 = vld [vmem:[%s16230_s25 + $0x132c] ss:$16 sps:$4 sm:$0xff]  }
 0x9a1   : > { %8425 = vmatprep.subr.bf16.mxu0 %v14778_v7  ;;  %8507 = vmatprep.subr.bf16.mxu1 %v14781_v24  ;;  %v14836_v7 = vld [vmem:[%s16230_s25 + $0x1320] ss:$16 sps:$4 sm:$0xff]   ;;  %v14839_v24 = vld [vmem:[%s16230_s25 + $0x1328] ss:$16 sps:$4 sm:$0xff]  }
 0x9a4   : > { %8426 = vmatpush1.bf16.msra.mxu0 %v14776_v49  ;;  %8508 = vmatpush1.bf16.msra.mxu1 %v14779_v5  ;;  %v14847_v49 = vld [vmem:[%s16230_s25 + $0x134c] ss:$16 sps:$4 sm:$0xff]   ;;  %v14842_v5 = vld [vmem:[%s16230_s25 + $0x1340] ss:$16 sps:$4 sm:$0xff]  }
 0x9a5   : > { %8436 = vmatprep.subr.bf16.mxu0 %v14784_v36  ;;  %8518 = vmatprep.subr.bf16.mxu1 %v14787_v57  ;;  %v14845_v36 = vld [vmem:[%s16230_s25 + $0x1348] ss:$16 sps:$4 sm:$0xff]   ;;  %v14850_v57 = vld [vmem:[%s16230_s25 + $0x1364] ss:$16 sps:$4 sm:$0xff]  }
 0x9a7   : > { %8428 = vmatmul.mubr.bf16.vlgmr.msra.gmra.mrb[16].mxu0 %v7747_v28  ;;  %8510 = vmatmul.mubr.bf16.vlgmr.msra.gmra.mrb[16].mxu1 %v7747_v28  ;;  %v14853_v28 = vld [vmem:[%s16230_s25 + $0x136c] ss:$16 sps:$4 sm:$0xff]  }
 0x9a8   : > { %8437 = vmatpush1.bf16.msra.mxu0 %v14782_v53  ;;  %8519 = vmatpush1.bf16.msra.mxu1 %v14785_v12  ;;  %v14848_v53 = vld [vmem:[%s16230_s25 + $0x1360] ss:$16 sps:$4 sm:$0xff]   ;;  %v14851_v12 = vld [vmem:[%s16230_s25 + $0x1368] ss:$16 sps:$4 sm:$0xff]  }
 0x9a9   : > { %8438 = vmatprep.subr.bf16.mxu0 %v14790_v27  ;;  %8520 = vmatprep.subr.bf16.mxu1 %v14793_v63  ;;  %v14856_v27 = vld [vmem:[%s16230_s25 + $0x1384] ss:$16 sps:$4 sm:$0xff]   ;;  %v14859_v63 = vld [vmem:[%s16230_s25 + $0x138c] ss:$16 sps:$4 sm:$0xff]  }
 0x9aa   : > { %8468 = vmatprep.mubr.bf16.mxu0 %v7750_v17  ;;  %8550 = vmatprep.mubr.bf16.mxu1 %v7750_v17  ;;  %v14854_v17 = vld [vmem:[%s16230_s25 + $0x1380] ss:$16 sps:$4 sm:$0xff]  }
 0x9ac   : > { %8439 = vmatpush1.bf16.msra.mxu0 %v14788_v11  ;;  %8521 = vmatpush1.bf16.msra.mxu1 %v14791_v23  ;;  %v14857_v11 = vld [vmem:[%s16230_s25 + $0x1388] ss:$16 sps:$4 sm:$0xff]   ;;  %v14862_v23 = vld [vmem:[%s16230_s25 + $0x13a4] ss:$16 sps:$4 sm:$0xff]  }
 0x9ad   : > { %8440 = vmatprep.subr.bf16.mxu0 %v14796_v8  ;;  %8522 = vmatprep.subr.bf16.mxu1 %v14799_v39  ;;  %v14865_v8 = vld [vmem:[%s16230_s25 + $0x13ac] ss:$16 sps:$4 sm:$0xff]   ;;  %v14860_v39 = vld [vmem:[%s16230_s25 + $0x13a0] ss:$16 sps:$4 sm:$0xff]  }
 0x9b0   : > { %8441 = vmatpush1.bf16.msra.mxu0 %v14794_v62  ;;  %8523 = vmatpush1.bf16.msra.mxu1 %v14797_v3  ;;  %v14863_v62 = vld [vmem:[%s16230_s25 + $0x13a8] ss:$16 sps:$4 sm:$0xff]   ;;  %v14868_v3 = vld [vmem:[%s16230_s25 + $0x13c4] ss:$16 sps:$4 sm:$0xff]  }
 0x9b1   : > { %8442 = vmatprep.subr.bf16.mxu0 %v14802_v54  ;;  %8524 = vmatprep.subr.bf16.mxu1 %v14805_v52  ;;  %v14871_v54 = vld [vmem:[%s16230_s25 + $0x13cc] ss:$16 sps:$4 sm:$0xff]   ;;  %v14866_v52 = vld [vmem:[%s16230_s25 + $0x13c0] ss:$16 sps:$4 sm:$0xff]  }
 0x9b4   : > { %8443 = vmatpush1.bf16.msra.mxu0 %v14800_v59  ;;  %8525 = vmatpush1.bf16.msra.mxu1 %v14803_v22  ;;  %v14869_v59 = vld [vmem:[%s16230_s25 + $0x13c8] ss:$16 sps:$4 sm:$0xff]   ;;  %v14874_v22 = vld [vmem:[%s16230_s25 + $0x13e4] ss:$16 sps:$4 sm:$0xff]  }
 0x9b5   : > { %8444 = vmatprep.subr.bf16.mxu0 %v14808_v34  ;;  %8526 = vmatprep.subr.bf16.mxu1 %v14811_v41  ;;  %v14877_v34 = vld [vmem:[%s16230_s25 + $0x13ec] ss:$16 sps:$4 sm:$0xff]   ;;  %v14872_v41 = vld [vmem:[%s16230_s25 + $0x13e0] ss:$16 sps:$4 sm:$0xff]  }
 0x9b8   : > { %8445 = vmatpush1.bf16.msra.mxu0 %v14806_v56  ;;  %8527 = vmatpush1.bf16.msra.mxu1 %v14809_v51  ;;  %v14875_v56 = vld [vmem:[%s16230_s25 + $0x13e8] ss:$16 sps:$4 sm:$0xff]   ;;  %v14880_v51 = vld [vmem:[%s16230_s25 + $0x1404] ss:$16 sps:$4 sm:$0xff]  }
 0x9b9   : > { %8446 = vmatprep.subr.bf16.mxu0 %v14814_v30  ;;  %8528 = vmatprep.subr.bf16.mxu1 %v14817_v4  ;;  %v14883_v30 = vld [vmem:[%s16230_s25 + $0x140c] ss:$16 sps:$4 sm:$0xff]   ;;  %v7749_v4 = vrot.slane %v17933_v9, 4  ;;  %v14884_v9 = vld [vmem:[%s16230_s25 + $0x1420] ss:$16 sps:$4 sm:$0xff]  }
 0x9ba   : > { %v6544_v29 = vpop.f32.mrb[8].mxu0  ;;  %v6626_v10 = vpop.f32.mrb[8].mxu1 }
 0x9bb   : > { %v6546_v50 = vpop.f32.mrb[9].mxu0  ;;  %v6628_v43 = vpop.f32.mrb[9].mxu1 }
 0x9bc   : > { %v6637_v46 = vcombine.low %v6544_v29, %v6546_v50  ;;  %v6638_v38 = vcombine.low %v6626_v10, %v6628_v43  ;;  %v6548_v32 = vpop.f32.mrb[10].mxu0  ;;  %v6630_v40 = vpop.f32.mrb[10].mxu1  ;;  %8447 = vmatpush1.bf16.msra.mxu0 %v14812_v0  ;;  %8529 = vmatpush1.bf16.msra.mxu1 %v14815_v13  ;;  %v14878_v0 = vld [vmem:[%s16230_s25 + $0x1400] ss:$16 sps:$4 sm:$0xff]   ;;  %v14881_v13 = vld [vmem:[%s16230_s25 + $0x1408] ss:$16 sps:$4 sm:$0xff]  }
 0x9bd   : > { %v6549_v60 = vpop.f32.mrb[11].mxu0  ;;  %v6631_v61 = vpop.f32.mrb[11].mxu1  ;;  %8448 = vmatprep.subr.bf16.mxu0 %v14820_v25  ;;  %8530 = vmatprep.subr.bf16.mxu1 %v14823_v26  ;;  %v14886_v25 = vld [vmem:[%s16230_s25 + $0x1424] ss:$16 sps:$4 sm:$0xff]   ;;  %v14889_v26 = vld [vmem:[%s16230_s25 + $0x142c] ss:$16 sps:$4 sm:$0xff]  }
 0x9be   : > { %v6645_v42 = vrot.slane %v6637_v46, %v17741_v1  ;;  %v6652_v58 = vrot.slane %v6638_v38, %v17741_v1  ;;  %v8711_v29 = vrot.slane %v17939_v55, 5  ;;  %v14887_v10 = vld [vmem:[%s16230_s25 + $0x1428] ss:$16 sps:$4 sm:$0xff]   ;;  %v14892_v50 = vld [vmem:[%s16230_s25 + $0x1444] ss:$16 sps:$4 sm:$0xff]  }
 0x9bf   : > { %v14895_v43 = vld [vmem:[%s16230_s25 + $0x144c] ss:$16 sps:$4 sm:$0xff]   ;;  %v14890_v55 = vld [vmem:[%s16230_s25 + $0x1440] ss:$16 sps:$4 sm:$0xff]   ;;  %v14893_v46 = vld [vmem:[%s16230_s25 + $0x1448] ss:$16 sps:$4 sm:$0xff]  }
 0x9c0   : > { %v6653_v18 = vcombine.low %v6645_v42, %v6652_v58  ;;  %8449 = vmatpush1.bf16.msra.mxu0 %v14818_v35  ;;  %8531 = vmatpush1.bf16.msra.mxu1 %v14821_v31  ;;  %v14898_v38 = vld [vmem:[%s16230_s25 + $0x1464] ss:$16 sps:$4 sm:$0xff]   ;;  %v14901_v32 = vld [vmem:[%s16230_s25 + $0x146c] ss:$16 sps:$4 sm:$0xff]   ;;  %v14896_v40 = vld [vmem:[%s16230_s25 + $0x1460] ss:$16 sps:$4 sm:$0xff]  }
 0x9c1   : > { %8450 = vmatprep.subr.bf16.mxu0 %v14826_v14  ;;  %8532 = vmatprep.subr.bf16.mxu1 %v14829_v47  ;;  %v14899_v35 = vld [vmem:[%s16230_s25 + $0x1468] ss:$16 sps:$4 sm:$0xff]   ;;  %v14904_v31 = vld [vmem:[%s16230_s25 + $0x1484] ss:$16 sps:$4 sm:$0xff]   ;;  %v14907_v60 = vld [vmem:[%s16230_s25 + $0x148c] ss:$16 sps:$4 sm:$0xff]  }
 0x9c2   : > { %v18045_v21 = vadd.f32 %v6653_v18, %v17896_v15  ;;  %v14844_v15 = vld [vmem:[%s16230_s25 + $0x1344] ss:$16 sps:$4 sm:$0xff]   ;;  %v14902_v61 = vld [vmem:[%s16230_s25 + $0x1480] ss:$16 sps:$4 sm:$0xff]   ;;  %v14905_v14 = vld [vmem:[%s16230_s25 + $0x1488] ss:$16 sps:$4 sm:$0xff]  }
 0x9c3   : > { %v14910_v47 = vld [vmem:[%s16230_s25 + $0x14a4] ss:$16 sps:$4 sm:$0xff]   ;;  %v14913_v42 = vld [vmem:[%s16230_s25 + $0x14ac] ss:$16 sps:$4 sm:$0xff]   ;;  %v14908_v58 = vld [vmem:[%s16230_s25 + $0x14a0] ss:$16 sps:$4 sm:$0xff]  }
 0x9c4   : > { %8451 = vmatpush1.bf16.msra.mxu0 %v14824_v48  ;;  %8533 = vmatpush1.bf16.msra.mxu1 %v14827_v19  ;;  %v14911_v18 = vld [vmem:[%s16230_s25 + $0x14a8] ss:$16 sps:$4 sm:$0xff]   ;;  %v14916_v48 = vld [vmem:[%s16230_s25 + $0x14c4] ss:$16 sps:$4 sm:$0xff]   ;;  %v14919_v19 = vld [vmem:[%s16230_s25 + $0x14cc] ss:$16 sps:$4 sm:$0xff]  }
 0x9c5   : > { %8452 = vmatprep.subr.bf16.mxu0 %v14832_v44  ;;  %8534 = vmatprep.subr.bf16.mxu1 %v14835_v2  ;;  %v14914_v44 = vld [vmem:[%s16230_s25 + $0x14c0] ss:$16 sps:$4 sm:$0xff]   ;;  %v14917_v2 = vld [vmem:[%s16230_s25 + $0x14c8] ss:$16 sps:$4 sm:$0xff]  }
 0x9c8   : > { %8453 = vmatpush1.bf16.msra.mxu0 %v14830_v16  ;;  %8535 = vmatpush1.bf16.msra.mxu1 %v14833_v6  ;;  %v14922_v16 = vld [vmem:[%s16230_s25 + $0x14e4] ss:$16 sps:$4 sm:$0xff]   ;;  %v14925_v6 = vld [vmem:[%s16230_s25 + $0x14ec] ss:$16 sps:$4 sm:$0xff]  }
 0x9c9   : > { %8454 = vmatprep.subr.bf16.mxu0 %v14838_v20  ;;  %8536 = vmatprep.subr.bf16.mxu1 %v14841_v33  ;;  %v14920_v20 = vld [vmem:[%s16230_s25 + $0x14e0] ss:$16 sps:$4 sm:$0xff]   ;;  %v14923_v33 = vld [vmem:[%s16230_s25 + $0x14e8] ss:$16 sps:$4 sm:$0xff]  }
 0x9cc   : > { %8455 = vmatpush1.bf16.msra.mxu0 %v14836_v7  ;;  %8537 = vmatpush1.bf16.msra.mxu1 %v14839_v24  ;;  %v14928_v7 = vld [vmem:[%s16230_s25 + $0x1504] ss:$16 sps:$4 sm:$0xff]   ;;  %v14931_v24 = vld [vmem:[%s16230_s25 + $0x150c] ss:$16 sps:$4 sm:$0xff]  }
 0x9cd   : > { %8456 = vmatprep.subr.bf16.mxu0 %v14844_v15  ;;  %8538 = vmatprep.subr.bf16.mxu1 %v14847_v49  ;;  %v14926_v15 = vld [vmem:[%s16230_s25 + $0x1500] ss:$16 sps:$4 sm:$0xff]   ;;  %v14929_v49 = vld [vmem:[%s16230_s25 + $0x1508] ss:$16 sps:$4 sm:$0xff]  }
 0x9d0   : > { %8457 = vmatpush1.bf16.msra.mxu0 %v14842_v5  ;;  %8539 = vmatpush1.bf16.msra.mxu1 %v14845_v36  ;;  %v14934_v5 = vld [vmem:[%s16230_s25 + $0x1524] ss:$16 sps:$4 sm:$0xff]   ;;  %v14937_v36 = vld [vmem:[%s16230_s25 + $0x152c] ss:$16 sps:$4 sm:$0xff]  }
 0x9d1   : > { %8458 = vmatprep.subr.bf16.mxu0 %v14850_v57  ;;  %8540 = vmatprep.subr.bf16.mxu1 %v14853_v28  ;;  %v14932_v57 = vld [vmem:[%s16230_s25 + $0x1520] ss:$16 sps:$4 sm:$0xff]   ;;  %v14935_v28 = vld [vmem:[%s16230_s25 + $0x1528] ss:$16 sps:$4 sm:$0xff]  }
 0x9d4   : > { %8459 = vmatpush1.bf16.msra.mxu0 %v14848_v53  ;;  %8541 = vmatpush1.bf16.msra.mxu1 %v14851_v12  ;;  %v14940_v53 = vld [vmem:[%s16230_s25 + $0x1544] ss:$16 sps:$4 sm:$0xff]   ;;  %v14943_v12 = vld [vmem:[%s16230_s25 + $0x154c] ss:$16 sps:$4 sm:$0xff]  }
 0x9d5   : > { %8460 = vmatprep.subr.bf16.mxu0 %v14856_v27  ;;  %8542 = vmatprep.subr.bf16.mxu1 %v14859_v63  ;;  %v14938_v27 = vld [vmem:[%s16230_s25 + $0x1540] ss:$16 sps:$4 sm:$0xff]   ;;  %v14941_v63 = vld [vmem:[%s16230_s25 + $0x1548] ss:$16 sps:$4 sm:$0xff]  }
 0x9d8   : > { %8461 = vmatpush1.bf16.msra.mxu0 %v14854_v17  ;;  %8543 = vmatpush1.bf16.msra.mxu1 %v14857_v11  ;;  %v14946_v17 = vld [vmem:[%s16230_s25 + $0x1564] ss:$16 sps:$4 sm:$0xff]   ;;  %v14949_v11 = vld [vmem:[%s16230_s25 + $0x156c] ss:$16 sps:$4 sm:$0xff]  }
 0x9d9   : > { %8462 = vmatprep.subr.bf16.mxu0 %v14862_v23  ;;  %8544 = vmatprep.subr.bf16.mxu1 %v14865_v8  ;;  %v14944_v23 = vld [vmem:[%s16230_s25 + $0x1560] ss:$16 sps:$4 sm:$0xff]   ;;  %v14947_v8 = vld [vmem:[%s16230_s25 + $0x1568] ss:$16 sps:$4 sm:$0xff]  }
 0x9dc   : > { %8463 = vmatpush1.bf16.msra.mxu0 %v14860_v39  ;;  %8545 = vmatpush1.bf16.msra.mxu1 %v14863_v62  ;;  %v14952_v39 = vld [vmem:[%s16230_s25 + $0x1584] ss:$16 sps:$4 sm:$0xff]   ;;  %v14955_v62 = vld [vmem:[%s16230_s25 + $0x158c] ss:$16 sps:$4 sm:$0xff]  }
 0x9dd   : > { %8464 = vmatprep.subr.bf16.mxu0 %v14868_v3  ;;  %8546 = vmatprep.subr.bf16.mxu1 %v14871_v54  ;;  %v14950_v3 = vld [vmem:[%s16230_s25 + $0x1580] ss:$16 sps:$4 sm:$0xff]   ;;  %v14953_v54 = vld [vmem:[%s16230_s25 + $0x1588] ss:$16 sps:$4 sm:$0xff]  }
 0x9e0   : > { %8465 = vmatpush1.bf16.msra.mxu0 %v14866_v52  ;;  %8547 = vmatpush1.bf16.msra.mxu1 %v14869_v59  ;;  %v14958_v52 = vld [vmem:[%s16230_s25 + $0x15a4] ss:$16 sps:$4 sm:$0xff]   ;;  %v14961_v59 = vld [vmem:[%s16230_s25 + $0x15ac] ss:$16 sps:$4 sm:$0xff]  }
 0x9e1   : > { %8466 = vmatprep.subr.bf16.mxu0 %v14874_v22  ;;  %8548 = vmatprep.subr.bf16.mxu1 %v14877_v34  ;;  %v14956_v22 = vld [vmem:[%s16230_s25 + $0x15a0] ss:$16 sps:$4 sm:$0xff]   ;;  %v14959_v34 = vld [vmem:[%s16230_s25 + $0x15a8] ss:$16 sps:$4 sm:$0xff]  }
 0x9e4   : > { %8467 = vmatpush1.bf16.msra.mxu0 %v14872_v41  ;;  %8549 = vmatpush1.bf16.msra.mxu1 %v14875_v56  ;;  %v14964_v41 = vld [vmem:[%s16230_s25 + $0x15c4] ss:$16 sps:$4 sm:$0xff]   ;;  %v14967_v56 = vld [vmem:[%s16230_s25 + $0x15cc] ss:$16 sps:$4 sm:$0xff]  }
 0x9e5   : > { %9358 = vmatprep.subr.bf16.mxu0 %v14880_v51  ;;  %9440 = vmatprep.subr.bf16.mxu1 %v14883_v30  ;;  %v14962_v51 = vld [vmem:[%s16230_s25 + $0x15c0] ss:$16 sps:$4 sm:$0xff]   ;;  %v14965_v30 = vld [vmem:[%s16230_s25 + $0x15c8] ss:$16 sps:$4 sm:$0xff]  }
 0x9e7   : > { %8469 = vmatmul.mubr.bf16.vlgmr.msra.gmra.mrb[16].mxu0 %v7749_v4  ;;  %8551 = vmatmul.mubr.bf16.vlgmr.msra.gmra.mrb[16].mxu1 %v7749_v4  ;;  %v14970_v4 = vld [vmem:[%s16230_s25 + $0x15e4] ss:$16 sps:$4 sm:$0xff]  }
 0x9e8   : > { %9359 = vmatpush1.bf16.msra.mxu0 %v14878_v0  ;;  %9441 = vmatpush1.bf16.msra.mxu1 %v14881_v13  ;;  %v14973_v0 = vld [vmem:[%s16230_s25 + $0x15ec] ss:$16 sps:$4 sm:$0xff]   ;;  %v14968_v13 = vld [vmem:[%s16230_s25 + $0x15e0] ss:$16 sps:$4 sm:$0xff]  }
 0x9e9   : > { %9360 = vmatprep.subr.bf16.mxu0 %v14886_v25  ;;  %9442 = vmatprep.subr.bf16.mxu1 %v14889_v26  ;;  %v14971_v25 = vld [vmem:[%s16230_s25 + $0x15e8] ss:$16 sps:$4 sm:$0xff]   ;;  %v14976_v26 = vld [vmem:[%s16230_s25 + $0x1604] ss:$16 sps:$4 sm:$0xff]  }
 0x9ea   : > { %9390 = vmatprep.mubr.bf16.mxu0 %v8711_v29  ;;  %9472 = vmatprep.mubr.bf16.mxu1 %v8711_v29  ;;  %v14979_v29 = vld [vmem:[%s16230_s25 + $0x160c] ss:$16 sps:$4 sm:$0xff]  }
 0x9ec   : > { %9361 = vmatpush1.bf16.msra.mxu0 %v14884_v9  ;;  %9443 = vmatpush1.bf16.msra.mxu1 %v14887_v10  ;;  %v8710_v9 = vrot.slane %v18003_v45, 5  ;;  %v14974_v10 = vld [vmem:[%s16230_s25 + $0x1600] ss:$16 sps:$4 sm:$0xff]  }
 0x9ed   : > { %9362 = vmatprep.subr.bf16.mxu0 %v14892_v50  ;;  %9444 = vmatprep.subr.bf16.mxu1 %v14895_v43  ;;  %v14977_v50 = vld [vmem:[%s16230_s25 + $0x1608] ss:$16 sps:$4 sm:$0xff]   ;;  %v14982_v43 = vld [vmem:[%s16230_s25 + $0x1624] ss:$16 sps:$4 sm:$0xff]   ;;  %v14980_v45 = vld [vmem:[%s16230_s25 + $0x1620] ss:$16 sps:$4 sm:$0xff]  }
 0x9f0   : > { %9363 = vmatpush1.bf16.msra.mxu0 %v14890_v55  ;;  %9445 = vmatpush1.bf16.msra.mxu1 %v14893_v46  ;;  %v14985_v55 = vld [vmem:[%s16230_s25 + $0x162c] ss:$16 sps:$4 sm:$0xff]   ;;  %v8713_v46 = vrot.slane %v18011_v37, 5  ;;  %v14986_v37 = vld [vmem:[%s16230_s25 + $0x1640] ss:$16 sps:$4 sm:$0xff]  }
 0x9f1   : > { %9364 = vmatprep.subr.bf16.mxu0 %v14898_v38  ;;  %9446 = vmatprep.subr.bf16.mxu1 %v14901_v32  ;;  %v14983_v38 = vld [vmem:[%s16230_s25 + $0x1628] ss:$16 sps:$4 sm:$0xff]   ;;  %v14988_v32 = vld [vmem:[%s16230_s25 + $0x1644] ss:$16 sps:$4 sm:$0xff]  }
 0x9f4   : > { %9365 = vmatpush1.bf16.msra.mxu0 %v14896_v40  ;;  %9447 = vmatpush1.bf16.msra.mxu1 %v14899_v35  ;;  %v14991_v40 = vld [vmem:[%s16230_s25 + $0x164c] ss:$16 sps:$4 sm:$0xff]   ;;  %v14989_v35 = vld [vmem:[%s16230_s25 + $0x1648] ss:$16 sps:$4 sm:$0xff]  }
 0x9f5   : > { %9366 = vmatprep.subr.bf16.mxu0 %v14904_v31  ;;  %9448 = vmatprep.subr.bf16.mxu1 %v14907_v60  ;;  %v14994_v31 = vld [vmem:[%s16230_s25 + $0x1664] ss:$16 sps:$4 sm:$0xff]   ;;  %v14997_v60 = vld [vmem:[%s16230_s25 + $0x166c] ss:$16 sps:$4 sm:$0xff]  }
 0x9f8   : > { %9367 = vmatpush1.bf16.msra.mxu0 %v14902_v61  ;;  %9449 = vmatpush1.bf16.msra.mxu1 %v14905_v14  ;;  %v14992_v61 = vld [vmem:[%s16230_s25 + $0x1660] ss:$16 sps:$4 sm:$0xff]   ;;  %v14995_v14 = vld [vmem:[%s16230_s25 + $0x1668] ss:$16 sps:$4 sm:$0xff]  }
 0x9f9   : > { %9368 = vmatprep.subr.bf16.mxu0 %v14910_v47  ;;  %9450 = vmatprep.subr.bf16.mxu1 %v14913_v42  ;;  %v15000_v47 = vld [vmem:[%s16230_s25 + $0x1684] ss:$16 sps:$4 sm:$0xff]   ;;  %v15003_v42 = vld [vmem:[%s16230_s25 + $0x168c] ss:$16 sps:$4 sm:$0xff]  }
 0x9fc   : > { %9369 = vmatpush1.bf16.msra.mxu0 %v14908_v58  ;;  %9451 = vmatpush1.bf16.msra.mxu1 %v14911_v18  ;;  %v14998_v58 = vld [vmem:[%s16230_s25 + $0x1680] ss:$16 sps:$4 sm:$0xff]   ;;  %v15001_v18 = vld [vmem:[%s16230_s25 + $0x1688] ss:$16 sps:$4 sm:$0xff]  }
 0x9fd   : > { %9370 = vmatprep.subr.bf16.mxu0 %v14916_v48  ;;  %9452 = vmatprep.subr.bf16.mxu1 %v14919_v19  ;;  %v15006_v48 = vld [vmem:[%s16230_s25 + $0x16a4] ss:$16 sps:$4 sm:$0xff]   ;;  %v15009_v19 = vld [vmem:[%s16230_s25 + $0x16ac] ss:$16 sps:$4 sm:$0xff]  }
 0xa00   : > { %9371 = vmatpush1.bf16.msra.mxu0 %v14914_v44  ;;  %9453 = vmatpush1.bf16.msra.mxu1 %v14917_v2  ;;  %v15004_v44 = vld [vmem:[%s16230_s25 + $0x16a0] ss:$16 sps:$4 sm:$0xff]   ;;  %v15007_v2 = vld [vmem:[%s16230_s25 + $0x16a8] ss:$16 sps:$4 sm:$0xff]  }
 0xa01   : > { %9372 = vmatprep.subr.bf16.mxu0 %v14922_v16  ;;  %9454 = vmatprep.subr.bf16.mxu1 %v14925_v6  ;;  %v15012_v16 = vld [vmem:[%s16230_s25 + $0x16c4] ss:$16 sps:$4 sm:$0xff]   ;;  %v15015_v6 = vld [vmem:[%s16230_s25 + $0x16cc] ss:$16 sps:$4 sm:$0xff]  }
 0xa04   : > { %9373 = vmatpush1.bf16.msra.mxu0 %v14920_v20  ;;  %9455 = vmatpush1.bf16.msra.mxu1 %v14923_v33 }
 0xa05   : > { %9374 = vmatprep.subr.bf16.mxu0 %v14928_v7  ;;  %9456 = vmatprep.subr.bf16.mxu1 %v14931_v24 }
 0xa08   : > { %9375 = vmatpush1.bf16.msra.mxu0 %v14926_v15  ;;  %9457 = vmatpush1.bf16.msra.mxu1 %v14929_v49 }
 0xa09   : > { %9376 = vmatprep.subr.bf16.mxu0 %v14934_v5  ;;  %9458 = vmatprep.subr.bf16.mxu1 %v14937_v36 }
 0xa0c   : > { %9377 = vmatpush1.bf16.msra.mxu0 %v14932_v57  ;;  %9459 = vmatpush1.bf16.msra.mxu1 %v14935_v28  ;;  %v15010_v57 = vld [vmem:[%s16230_s25 + $0x16c0] ss:$16 sps:$4 sm:$0xff]   ;;  %v15013_v28 = vld [vmem:[%s16230_s25 + $0x16c8] ss:$16 sps:$4 sm:$0xff]  }
 0xa0d   : > { %9378 = vmatprep.subr.bf16.mxu0 %v14940_v53  ;;  %9460 = vmatprep.subr.bf16.mxu1 %v14943_v12 }
 0xa10   : > { %9379 = vmatpush1.bf16.msra.mxu0 %v14938_v27  ;;  %9461 = vmatpush1.bf16.msra.mxu1 %v14941_v63  ;;  %v15018_v27 = vld [vmem:[%s16230_s25 + $0x16e4] ss:$16 sps:$4 sm:$0xff]   ;;  %v15021_v63 = vld [vmem:[%s16230_s25 + $0x16ec] ss:$16 sps:$4 sm:$0xff]  }
 0xa11   : > { %9380 = vmatprep.subr.bf16.mxu0 %v14946_v17  ;;  %9462 = vmatprep.subr.bf16.mxu1 %v14949_v11 }
 0xa14   : > { %9381 = vmatpush1.bf16.msra.mxu0 %v14944_v23  ;;  %9463 = vmatpush1.bf16.msra.mxu1 %v14947_v8  ;;  %v15016_v8 = vld [vmem:[%s16230_s25 + $0x16e0] ss:$16 sps:$4 sm:$0xff]  }
 0xa15   : > { %9382 = vmatprep.subr.bf16.mxu0 %v14952_v39  ;;  %9464 = vmatprep.subr.bf16.mxu1 %v14955_v62  ;;  %v15019_v39 = vld [vmem:[%s16230_s25 + $0x16e8] ss:$16 sps:$4 sm:$0xff]   ;;  %v15024_v62 = vld [vmem:[%s16230_s25 + $0x1704] ss:$16 sps:$4 sm:$0xff]  }
 0xa18   : > { %9383 = vmatpush1.bf16.msra.mxu0 %v14950_v3  ;;  %9465 = vmatpush1.bf16.msra.mxu1 %v14953_v54  ;;  %v15027_v3 = vld [vmem:[%s16230_s25 + $0x170c] ss:$16 sps:$4 sm:$0xff]  }
 0xa19   : > { %9384 = vmatprep.subr.bf16.mxu0 %v14958_v52  ;;  %9466 = vmatprep.subr.bf16.mxu1 %v14961_v59  ;;  %v15022_v52 = vld [vmem:[%s16230_s25 + $0x1700] ss:$16 sps:$4 sm:$0xff]   ;;  %v15025_v59 = vld [vmem:[%s16230_s25 + $0x1708] ss:$16 sps:$4 sm:$0xff]  }
 0xa1c   : > { %9385 = vmatpush1.bf16.msra.mxu0 %v14956_v22  ;;  %9467 = vmatpush1.bf16.msra.mxu1 %v14959_v34  ;;  %v15030_v22 = vld [vmem:[%s16230_s25 + $0x1724] ss:$16 sps:$4 sm:$0xff]   ;;  %v15033_v34 = vld [vmem:[%s16230_s25 + $0x172c] ss:$16 sps:$4 sm:$0xff]  }
 0xa1d   : > { %9386 = vmatprep.subr.bf16.mxu0 %v14964_v41  ;;  %9468 = vmatprep.subr.bf16.mxu1 %v14967_v56  ;;  %v15028_v41 = vld [vmem:[%s16230_s25 + $0x1720] ss:$16 sps:$4 sm:$0xff]   ;;  %v15031_v56 = vld [vmem:[%s16230_s25 + $0x1728] ss:$16 sps:$4 sm:$0xff]  }
 0xa20   : > { %9387 = vmatpush1.bf16.msra.mxu0 %v14962_v51  ;;  %9469 = vmatpush1.bf16.msra.mxu1 %v14965_v30  ;;  %v15039_v51 = vld [vmem:[%s16230_s25 + $0x174c] ss:$16 sps:$4 sm:$0xff]   ;;  %v15034_v30 = vld [vmem:[%s16230_s25 + $0x1740] ss:$16 sps:$4 sm:$0xff]  }
 0xa21   : > { %9388 = vmatprep.subr.bf16.mxu0 %v14970_v4  ;;  %9470 = vmatprep.subr.bf16.mxu1 %v14973_v0  ;;  %v15037_v4 = vld [vmem:[%s16230_s25 + $0x1748] ss:$16 sps:$4 sm:$0xff]   ;;  %v15042_v0 = vld [vmem:[%s16230_s25 + $0x1764] ss:$16 sps:$4 sm:$0xff]  }
 0xa24   : > { %9389 = vmatpush1.bf16.msra.mxu0 %v14968_v13  ;;  %9471 = vmatpush1.bf16.msra.mxu1 %v14971_v25  ;;  %v15045_v13 = vld [vmem:[%s16230_s25 + $0x176c] ss:$16 sps:$4 sm:$0xff]   ;;  %v15040_v25 = vld [vmem:[%s16230_s25 + $0x1760] ss:$16 sps:$4 sm:$0xff]  }
 0xa25   : > { %9399 = vmatprep.subr.bf16.mxu0 %v14976_v26  ;;  %9481 = vmatprep.subr.bf16.mxu1 %v14979_v29  ;;  %v15043_v26 = vld [vmem:[%s16230_s25 + $0x1768] ss:$16 sps:$4 sm:$0xff]   ;;  %v15048_v29 = vld [vmem:[%s16230_s25 + $0x1784] ss:$16 sps:$4 sm:$0xff]  }
 0xa27   : > { %9391 = vmatmul.mubr.bf16.vlgmr.msra.gmra.mrb[20].mxu0 %v8710_v9  ;;  %9473 = vmatmul.mubr.bf16.vlgmr.msra.gmra.mrb[20].mxu1 %v8710_v9  ;;  %v15051_v9 = vld [vmem:[%s16230_s25 + $0x178c] ss:$16 sps:$4 sm:$0xff]  }
 0xa28   : > { %9400 = vmatpush1.bf16.msra.mxu0 %v14974_v10  ;;  %9482 = vmatpush1.bf16.msra.mxu1 %v14977_v50  ;;  %v15046_v10 = vld [vmem:[%s16230_s25 + $0x1780] ss:$16 sps:$4 sm:$0xff]   ;;  %v15049_v50 = vld [vmem:[%s16230_s25 + $0x1788] ss:$16 sps:$4 sm:$0xff]  }
 0xa29   : > { %9401 = vmatprep.subr.bf16.mxu0 %v14982_v43  ;;  %9483 = vmatprep.subr.bf16.mxu1 %v14985_v55  ;;  %v15054_v43 = vld [vmem:[%s16230_s25 + $0x17a4] ss:$16 sps:$4 sm:$0xff]   ;;  %v15057_v55 = vld [vmem:[%s16230_s25 + $0x17ac] ss:$16 sps:$4 sm:$0xff]  }
 0xa2a   : > { %9431 = vmatprep.mubr.bf16.mxu0 %v8713_v46  ;;  %9513 = vmatprep.mubr.bf16.mxu1 %v8713_v46  ;;  %v15052_v46 = vld [vmem:[%s16230_s25 + $0x17a0] ss:$16 sps:$4 sm:$0xff]  }
 0xa2c   : > { %9402 = vmatpush1.bf16.msra.mxu0 %v14980_v45  ;;  %9484 = vmatpush1.bf16.msra.mxu1 %v14983_v38  ;;  %v15055_v45 = vld [vmem:[%s16230_s25 + $0x17a8] ss:$16 sps:$4 sm:$0xff]   ;;  %v15060_v38 = vld [vmem:[%s16230_s25 + $0x17c4] ss:$16 sps:$4 sm:$0xff]  }
 0xa2d   : > { %9403 = vmatprep.subr.bf16.mxu0 %v14988_v32  ;;  %9485 = vmatprep.subr.bf16.mxu1 %v14991_v40  ;;  %v15063_v32 = vld [vmem:[%s16230_s25 + $0x17cc] ss:$16 sps:$4 sm:$0xff]   ;;  %v15058_v40 = vld [vmem:[%s16230_s25 + $0x17c0] ss:$16 sps:$4 sm:$0xff]  }
 0xa30   : > { %9404 = vmatpush1.bf16.msra.mxu0 %v14986_v37  ;;  %9486 = vmatpush1.bf16.msra.mxu1 %v14989_v35  ;;  %v15061_v37 = vld [vmem:[%s16230_s25 + $0x17c8] ss:$16 sps:$4 sm:$0xff]   ;;  %v15066_v35 = vld [vmem:[%s16230_s25 + $0x17e4] ss:$16 sps:$4 sm:$0xff]  }
 0xa31   : > { %9405 = vmatprep.subr.bf16.mxu0 %v14994_v31  ;;  %9487 = vmatprep.subr.bf16.mxu1 %v14997_v60  ;;  %v15069_v31 = vld [vmem:[%s16230_s25 + $0x17ec] ss:$16 sps:$4 sm:$0xff]   ;;  %v15064_v60 = vld [vmem:[%s16230_s25 + $0x17e0] ss:$16 sps:$4 sm:$0xff]  }
 0xa34   : > { %9406 = vmatpush1.bf16.msra.mxu0 %v14992_v61  ;;  %9488 = vmatpush1.bf16.msra.mxu1 %v14995_v14  ;;  %v15067_v61 = vld [vmem:[%s16230_s25 + $0x17e8] ss:$16 sps:$4 sm:$0xff]   ;;  %v15072_v14 = vld [vmem:[%s16230_s25 + $0x1804] ss:$16 sps:$4 sm:$0xff]  }
 0xa35   : > { %9407 = vmatprep.subr.bf16.mxu0 %v15000_v47  ;;  %9489 = vmatprep.subr.bf16.mxu1 %v15003_v42  ;;  %v15075_v47 = vld [vmem:[%s16230_s25 + $0x180c] ss:$16 sps:$4 sm:$0xff]  }
 0xa36   : > { %v18217_v42 = vld [vmem:[%s17412_s27 + $0x10] sm:$0xff] }
 0xa38   : > { %9408 = vmatpush1.bf16.msra.mxu0 %v14998_v58  ;;  %9490 = vmatpush1.bf16.msra.mxu1 %v15001_v18  ;;  %v8712_v58 = vrot.slane %v18217_v42, 5  ;;  %v15070_v18 = vld [vmem:[%s16230_s25 + $0x1800] ss:$16 sps:$4 sm:$0xff]  }
 0xa39   : > { %9409 = vmatprep.subr.bf16.mxu0 %v15006_v48  ;;  %9491 = vmatprep.subr.bf16.mxu1 %v15009_v19  ;;  %v15073_v48 = vld [vmem:[%s16230_s25 + $0x1808] ss:$16 sps:$4 sm:$0xff]   ;;  %v15078_v19 = vld [vmem:[%s16230_s25 + $0x1824] ss:$16 sps:$4 sm:$0xff]  }
 0xa3a   : > { %v7507_v20 = vpop.f32.mrb[12].mxu0  ;;  %v7589_v33 = vpop.f32.mrb[12].mxu1 }
 0xa3b   : > { %v7509_v7 = vpop.f32.mrb[13].mxu0  ;;  %v7591_v24 = vpop.f32.mrb[13].mxu1 }
 0xa3c   : > { %v7600_v15 = vcombine.low %v7507_v20, %v7509_v7  ;;  %v7601_v49 = vcombine.low %v7589_v33, %v7591_v24  ;;  %v7511_v5 = vpop.f32.mrb[14].mxu0  ;;  %v7593_v36 = vpop.f32.mrb[14].mxu1  ;;  %9410 = vmatpush1.bf16.msra.mxu0 %v15004_v44  ;;  %9492 = vmatpush1.bf16.msra.mxu1 %v15007_v2  ;;  %v15081_v44 = vld [vmem:[%s16230_s25 + $0x182c] ss:$16 sps:$4 sm:$0xff]   ;;  %v15079_v20 = vld [vmem:[%s16230_s25 + $0x1828] ss:$16 sps:$4 sm:$0xff]  }
 0xa3d   : > { %v7512_v53 = vpop.f32.mrb[15].mxu0  ;;  %v7594_v12 = vpop.f32.mrb[15].mxu1  ;;  %9411 = vmatprep.subr.bf16.mxu0 %v15012_v16  ;;  %9493 = vmatprep.subr.bf16.mxu1 %v15015_v6  ;;  %v18225_v2 = vld [vmem:[%s17412_s27 + $0x8] sm:$0xff]  ;;  %v15076_v6 = vld [vmem:[%s16230_s25 + $0x1820] ss:$16 sps:$4 sm:$0xff]  }
 0xa3e   : > { %v7608_v17 = vrot.slane %v7600_v15, %v17741_v1  ;;  %v7615_v11 = vrot.slane %v7601_v49, %v17741_v1  ;;  %v9674_v16 = vrot.slane %v18225_v2, 6  ;;  %v15084_v33 = vld [vmem:[%s16230_s25 + $0x1844] ss:$16 sps:$4 sm:$0xff]   ;;  %v15087_v7 = vld [vmem:[%s16230_s25 + $0x184c] ss:$16 sps:$4 sm:$0xff]  }
 0xa3f   : > { %v15082_v24 = vld [vmem:[%s16230_s25 + $0x1840] ss:$16 sps:$4 sm:$0xff]   ;;  %v15085_v15 = vld [vmem:[%s16230_s25 + $0x1848] ss:$16 sps:$4 sm:$0xff]   ;;  %v15090_v49 = vld [vmem:[%s16230_s25 + $0x1864] ss:$16 sps:$4 sm:$0xff]  }
 0xa40   : > { %v7616_v23 = vcombine.low %v7608_v17, %v7615_v11  ;;  %9412 = vmatpush1.bf16.msra.mxu0 %v15010_v57  ;;  %9494 = vmatpush1.bf16.msra.mxu1 %v15013_v28  ;;  %v15093_v5 = vld [vmem:[%s16230_s25 + $0x186c] ss:$16 sps:$4 sm:$0xff]   ;;  %v15088_v36 = vld [vmem:[%s16230_s25 + $0x1860] ss:$16 sps:$4 sm:$0xff]   ;;  %v15091_v57 = vld [vmem:[%s16230_s25 + $0x1868] ss:$16 sps:$4 sm:$0xff]  }
 0xa41   : > { %9413 = vmatprep.subr.bf16.mxu0 %v15018_v27  ;;  %9495 = vmatprep.subr.bf16.mxu1 %v15021_v63  ;;  %v15096_v28 = vld [vmem:[%s16230_s25 + $0x1884] ss:$16 sps:$4 sm:$0xff]   ;;  %v15099_v53 = vld [vmem:[%s16230_s25 + $0x188c] ss:$16 sps:$4 sm:$0xff]   ;;  %v15094_v12 = vld [vmem:[%s16230_s25 + $0x1880] ss:$16 sps:$4 sm:$0xff]  }
 0xa42   : > { %v18182_v54 = vadd.f32 %v7616_v23, %v18045_v21  ;;  %v15036_v21 = vld [vmem:[%s16230_s25 + $0x1744] ss:$16 sps:$4 sm:$0xff]   ;;  %v15097_v27 = vld [vmem:[%s16230_s25 + $0x1888] ss:$16 sps:$4 sm:$0xff]   ;;  %v15105_v17 = vld [vmem:[%s16230_s25 + $0x18ac] ss:$16 sps:$4 sm:$0xff]  }
 0xa43   : > { %v15102_v63 = vld [vmem:[%s16230_s25 + $0x18a4] ss:$16 sps:$4 sm:$0xff]   ;;  %v15100_v11 = vld [vmem:[%s16230_s25 + $0x18a0] ss:$16 sps:$4 sm:$0xff]   ;;  %v15103_v23 = vld [vmem:[%s16230_s25 + $0x18a8] ss:$16 sps:$4 sm:$0xff]  }
 0xa44   : > { %9414 = vmatpush1.bf16.msra.mxu0 %v15016_v8  ;;  %9496 = vmatpush1.bf16.msra.mxu1 %v15019_v39  ;;  %v15108_v8 = vld [vmem:[%s16230_s25 + $0x18c4] ss:$16 sps:$4 sm:$0xff]   ;;  %v15111_v39 = vld [vmem:[%s16230_s25 + $0x18cc] ss:$16 sps:$4 sm:$0xff]  }
 0xa45   : > { %9415 = vmatprep.subr.bf16.mxu0 %v15024_v62  ;;  %9497 = vmatprep.subr.bf16.mxu1 %v15027_v3  ;;  %v15106_v62 = vld [vmem:[%s16230_s25 + $0x18c0] ss:$16 sps:$4 sm:$0xff]   ;;  %v15109_v3 = vld [vmem:[%s16230_s25 + $0x18c8] ss:$16 sps:$4 sm:$0xff]  }
 0xa48   : > { %9416 = vmatpush1.bf16.msra.mxu0 %v15022_v52  ;;  %9498 = vmatpush1.bf16.msra.mxu1 %v15025_v59  ;;  %v15114_v52 = vld [vmem:[%s16230_s25 + $0x18e4] ss:$16 sps:$4 sm:$0xff]   ;;  %v15117_v59 = vld [vmem:[%s16230_s25 + $0x18ec] ss:$16 sps:$4 sm:$0xff]  }
 0xa49   : > { %9417 = vmatprep.subr.bf16.mxu0 %v15030_v22  ;;  %9499 = vmatprep.subr.bf16.mxu1 %v15033_v34  ;;  %v15112_v22 = vld [vmem:[%s16230_s25 + $0x18e0] ss:$16 sps:$4 sm:$0xff]   ;;  %v15115_v34 = vld [vmem:[%s16230_s25 + $0x18e8] ss:$16 sps:$4 sm:$0xff]  }
 0xa4c   : > { %9418 = vmatpush1.bf16.msra.mxu0 %v15028_v41  ;;  %9500 = vmatpush1.bf16.msra.mxu1 %v15031_v56  ;;  %v15120_v41 = vld [vmem:[%s16230_s25 + $0x1904] ss:$16 sps:$4 sm:$0xff]   ;;  %v15123_v56 = vld [vmem:[%s16230_s25 + $0x190c] ss:$16 sps:$4 sm:$0xff]  }
 0xa4d   : > { %9419 = vmatprep.subr.bf16.mxu0 %v15036_v21  ;;  %9501 = vmatprep.subr.bf16.mxu1 %v15039_v51  ;;  %v15118_v21 = vld [vmem:[%s16230_s25 + $0x1900] ss:$16 sps:$4 sm:$0xff]   ;;  %v15121_v51 = vld [vmem:[%s16230_s25 + $0x1908] ss:$16 sps:$4 sm:$0xff]  }
 0xa50   : > { %9420 = vmatpush1.bf16.msra.mxu0 %v15034_v30  ;;  %9502 = vmatpush1.bf16.msra.mxu1 %v15037_v4  ;;  %v15126_v30 = vld [vmem:[%s16230_s25 + $0x1924] ss:$16 sps:$4 sm:$0xff]   ;;  %v15129_v4 = vld [vmem:[%s16230_s25 + $0x192c] ss:$16 sps:$4 sm:$0xff]  }
 0xa51   : > { %9421 = vmatprep.subr.bf16.mxu0 %v15042_v0  ;;  %9503 = vmatprep.subr.bf16.mxu1 %v15045_v13  ;;  %v15124_v0 = vld [vmem:[%s16230_s25 + $0x1920] ss:$16 sps:$4 sm:$0xff]   ;;  %v15127_v13 = vld [vmem:[%s16230_s25 + $0x1928] ss:$16 sps:$4 sm:$0xff]  }
 0xa54   : > { %9422 = vmatpush1.bf16.msra.mxu0 %v15040_v25  ;;  %9504 = vmatpush1.bf16.msra.mxu1 %v15043_v26  ;;  %v15132_v25 = vld [vmem:[%s16230_s25 + $0x1944] ss:$16 sps:$4 sm:$0xff]   ;;  %v15135_v26 = vld [vmem:[%s16230_s25 + $0x194c] ss:$16 sps:$4 sm:$0xff]  }
 0xa55   : > { %9423 = vmatprep.subr.bf16.mxu0 %v15048_v29  ;;  %9505 = vmatprep.subr.bf16.mxu1 %v15051_v9  ;;  %v15130_v29 = vld [vmem:[%s16230_s25 + $0x1940] ss:$16 sps:$4 sm:$0xff]   ;;  %v15133_v9 = vld [vmem:[%s16230_s25 + $0x1948] ss:$16 sps:$4 sm:$0xff]  }
 0xa58   : > { %9424 = vmatpush1.bf16.msra.mxu0 %v15046_v10  ;;  %9506 = vmatpush1.bf16.msra.mxu1 %v15049_v50  ;;  %v15138_v10 = vld [vmem:[%s16230_s25 + $0x1964] ss:$16 sps:$4 sm:$0xff]   ;;  %v15141_v50 = vld [vmem:[%s16230_s25 + $0x196c] ss:$16 sps:$4 sm:$0xff]  }
 0xa59   : > { %9425 = vmatprep.subr.bf16.mxu0 %v15054_v43  ;;  %9507 = vmatprep.subr.bf16.mxu1 %v15057_v55  ;;  %v15136_v43 = vld [vmem:[%s16230_s25 + $0x1960] ss:$16 sps:$4 sm:$0xff]   ;;  %v15139_v55 = vld [vmem:[%s16230_s25 + $0x1968] ss:$16 sps:$4 sm:$0xff]  }
 0xa5c   : > { %9426 = vmatpush1.bf16.msra.mxu0 %v15052_v46  ;;  %9508 = vmatpush1.bf16.msra.mxu1 %v15055_v45  ;;  %v15144_v46 = vld [vmem:[%s16230_s25 + $0x1984] ss:$16 sps:$4 sm:$0xff]   ;;  %v15147_v45 = vld [vmem:[%s16230_s25 + $0x198c] ss:$16 sps:$4 sm:$0xff]  }
 0xa5d   : > { %9427 = vmatprep.subr.bf16.mxu0 %v15060_v38  ;;  %9509 = vmatprep.subr.bf16.mxu1 %v15063_v32  ;;  %v15142_v38 = vld [vmem:[%s16230_s25 + $0x1980] ss:$16 sps:$4 sm:$0xff]   ;;  %v15145_v32 = vld [vmem:[%s16230_s25 + $0x1988] ss:$16 sps:$4 sm:$0xff]  }
 0xa60   : > { %9428 = vmatpush1.bf16.msra.mxu0 %v15058_v40  ;;  %9510 = vmatpush1.bf16.msra.mxu1 %v15061_v37  ;;  %v15150_v40 = vld [vmem:[%s16230_s25 + $0x19a4] ss:$16 sps:$4 sm:$0xff]   ;;  %v15153_v37 = vld [vmem:[%s16230_s25 + $0x19ac] ss:$16 sps:$4 sm:$0xff]  }
 0xa61   : > { %9429 = vmatprep.subr.bf16.mxu0 %v15066_v35  ;;  %9511 = vmatprep.subr.bf16.mxu1 %v15069_v31  ;;  %v15148_v35 = vld [vmem:[%s16230_s25 + $0x19a0] ss:$16 sps:$4 sm:$0xff]   ;;  %v15151_v31 = vld [vmem:[%s16230_s25 + $0x19a8] ss:$16 sps:$4 sm:$0xff]  }
 0xa64   : > { %9430 = vmatpush1.bf16.msra.mxu0 %v15064_v60  ;;  %9512 = vmatpush1.bf16.msra.mxu1 %v15067_v61  ;;  %v15156_v60 = vld [vmem:[%s16230_s25 + $0x19c4] ss:$16 sps:$4 sm:$0xff]   ;;  %v15159_v61 = vld [vmem:[%s16230_s25 + $0x19cc] ss:$16 sps:$4 sm:$0xff]  }
 0xa65   : > { %10321 = vmatprep.subr.bf16.mxu0 %v15072_v14  ;;  %10403 = vmatprep.subr.bf16.mxu1 %v15075_v47  ;;  %v15154_v14 = vld [vmem:[%s16230_s25 + $0x19c0] ss:$16 sps:$4 sm:$0xff]   ;;  %v15157_v47 = vld [vmem:[%s16230_s25 + $0x19c8] ss:$16 sps:$4 sm:$0xff]  }
 0xa67   : > { %9432 = vmatmul.mubr.bf16.vlgmr.msra.gmra.mrb[20].mxu0 %v8712_v58  ;;  %9514 = vmatmul.mubr.bf16.vlgmr.msra.gmra.mrb[20].mxu1 %v8712_v58  ;;  %v15162_v58 = vld [vmem:[%s16230_s25 + $0x19e4] ss:$16 sps:$4 sm:$0xff]  }
 0xa68   : > { %10322 = vmatpush1.bf16.msra.mxu0 %v15070_v18  ;;  %10404 = vmatpush1.bf16.msra.mxu1 %v15073_v48  ;;  %v15165_v18 = vld [vmem:[%s16230_s25 + $0x19ec] ss:$16 sps:$4 sm:$0xff]   ;;  %v15160_v48 = vld [vmem:[%s16230_s25 + $0x19e0] ss:$16 sps:$4 sm:$0xff]  }
 0xa69   : > { %10323 = vmatprep.subr.bf16.mxu0 %v15078_v19  ;;  %10405 = vmatprep.subr.bf16.mxu1 %v15081_v44  ;;  %v15163_v19 = vld [vmem:[%s16230_s25 + $0x19e8] ss:$16 sps:$4 sm:$0xff]   ;;  %v15168_v44 = vld [vmem:[%s16230_s25 + $0x1a04] ss:$16 sps:$4 sm:$0xff]  }
 0xa6a   : > { %10353 = vmatprep.mubr.bf16.mxu0 %v9674_v16  ;;  %10435 = vmatprep.mubr.bf16.mxu1 %v9674_v16  ;;  %v15171_v16 = vld [vmem:[%s16230_s25 + $0x1a0c] ss:$16 sps:$4 sm:$0xff]  }
 0xa6c   : > { %10324 = vmatpush1.bf16.msra.mxu0 %v15076_v6  ;;  %10406 = vmatpush1.bf16.msra.mxu1 %v15079_v20  ;;  %v18289_v6 = vld [vmem:[%s17412_s27] sm:$0xff] }
 0xa6d   : > { %10325 = vmatprep.subr.bf16.mxu0 %v15084_v33  ;;  %10407 = vmatprep.subr.bf16.mxu1 %v15087_v7  ;;  %v9673_v20 = vrot.slane %v18289_v6, 6  ;;  %v15166_v33 = vld [vmem:[%s16230_s25 + $0x1a00] ss:$16 sps:$4 sm:$0xff]   ;;  %v15169_v7 = vld [vmem:[%s16230_s25 + $0x1a08] ss:$16 sps:$4 sm:$0xff]  }
 0xa70   : > { %10326 = vmatpush1.bf16.msra.mxu0 %v15082_v24  ;;  %10408 = vmatpush1.bf16.msra.mxu1 %v15085_v15  ;;  %v15174_v24 = vld [vmem:[%s16230_s25 + $0x1a24] ss:$16 sps:$4 sm:$0xff]   ;;  %v15177_v15 = vld [vmem:[%s16230_s25 + $0x1a2c] ss:$16 sps:$4 sm:$0xff]  }
 0xa71   : > { %10327 = vmatprep.subr.bf16.mxu0 %v15090_v49  ;;  %10409 = vmatprep.subr.bf16.mxu1 %v15093_v5  ;;  %v18297_v49 = vld [vmem:[%s17412_s27 + $0x18] sm:$0xff] }
 0xa72   : > { %v9676_v5 = vrot.slane %v18297_v49, 6 }
 0xa74   : > { %10328 = vmatpush1.bf16.msra.mxu0 %v15088_v36  ;;  %10410 = vmatpush1.bf16.msra.mxu1 %v15091_v57  ;;  %v15172_v36 = vld [vmem:[%s16230_s25 + $0x1a20] ss:$16 sps:$4 sm:$0xff]   ;;  %v15175_v57 = vld [vmem:[%s16230_s25 + $0x1a28] ss:$16 sps:$4 sm:$0xff]  }
 0xa75   : > { %10329 = vmatprep.subr.bf16.mxu0 %v15096_v28  ;;  %10411 = vmatprep.subr.bf16.mxu1 %v15099_v53  ;;  %v15180_v28 = vld [vmem:[%s16230_s25 + $0x1a44] ss:$16 sps:$4 sm:$0xff]   ;;  %v15183_v53 = vld [vmem:[%s16230_s25 + $0x1a4c] ss:$16 sps:$4 sm:$0xff]  }
 0xa78   : > { %10330 = vmatpush1.bf16.msra.mxu0 %v15094_v12  ;;  %10412 = vmatpush1.bf16.msra.mxu1 %v15097_v27  ;;  %v15178_v12 = vld [vmem:[%s16230_s25 + $0x1a40] ss:$16 sps:$4 sm:$0xff]   ;;  %v15181_v27 = vld [vmem:[%s16230_s25 + $0x1a48] ss:$16 sps:$4 sm:$0xff]  }
 0xa79   : > { %10331 = vmatprep.subr.bf16.mxu0 %v15102_v63  ;;  %10413 = vmatprep.subr.bf16.mxu1 %v15105_v17  ;;  %v15186_v63 = vld [vmem:[%s16230_s25 + $0x1a64] ss:$16 sps:$4 sm:$0xff]   ;;  %v15189_v17 = vld [vmem:[%s16230_s25 + $0x1a6c] ss:$16 sps:$4 sm:$0xff]  }
 0xa7c   : > { %10332 = vmatpush1.bf16.msra.mxu0 %v15100_v11  ;;  %10414 = vmatpush1.bf16.msra.mxu1 %v15103_v23  ;;  %v15184_v11 = vld [vmem:[%s16230_s25 + $0x1a60] ss:$16 sps:$4 sm:$0xff]   ;;  %v15187_v23 = vld [vmem:[%s16230_s25 + $0x1a68] ss:$16 sps:$4 sm:$0xff]  }
 0xa7d   : > { %10333 = vmatprep.subr.bf16.mxu0 %v15108_v8  ;;  %10415 = vmatprep.subr.bf16.mxu1 %v15111_v39  ;;  %v15192_v8 = vld [vmem:[%s16230_s25 + $0x1a84] ss:$16 sps:$4 sm:$0xff]   ;;  %v15195_v39 = vld [vmem:[%s16230_s25 + $0x1a8c] ss:$16 sps:$4 sm:$0xff]  }
 0xa80   : > { %10334 = vmatpush1.bf16.msra.mxu0 %v15106_v62  ;;  %10416 = vmatpush1.bf16.msra.mxu1 %v15109_v3  ;;  %v15190_v62 = vld [vmem:[%s16230_s25 + $0x1a80] ss:$16 sps:$4 sm:$0xff]   ;;  %v15193_v3 = vld [vmem:[%s16230_s25 + $0x1a88] ss:$16 sps:$4 sm:$0xff]  }
 0xa81   : > { %10335 = vmatprep.subr.bf16.mxu0 %v15114_v52  ;;  %10417 = vmatprep.subr.bf16.mxu1 %v15117_v59  ;;  %v15198_v52 = vld [vmem:[%s16230_s25 + $0x1aa4] ss:$16 sps:$4 sm:$0xff]   ;;  %v15201_v59 = vld [vmem:[%s16230_s25 + $0x1aac] ss:$16 sps:$4 sm:$0xff]  }
 0xa84   : > { %10336 = vmatpush1.bf16.msra.mxu0 %v15112_v22  ;;  %10418 = vmatpush1.bf16.msra.mxu1 %v15115_v34  ;;  %v15196_v22 = vld [vmem:[%s16230_s25 + $0x1aa0] ss:$16 sps:$4 sm:$0xff]   ;;  %v15199_v34 = vld [vmem:[%s16230_s25 + $0x1aa8] ss:$16 sps:$4 sm:$0xff]  }
 0xa85   : > { %10337 = vmatprep.subr.bf16.mxu0 %v15120_v41  ;;  %10419 = vmatprep.subr.bf16.mxu1 %v15123_v56  ;;  %v15204_v41 = vld [vmem:[%s16230_s25 + $0x1ac4] ss:$16 sps:$4 sm:$0xff]   ;;  %v15207_v56 = vld [vmem:[%s16230_s25 + $0x1acc] ss:$16 sps:$4 sm:$0xff]  }
 0xa88   : > { %10338 = vmatpush1.bf16.msra.mxu0 %v15118_v21  ;;  %10420 = vmatpush1.bf16.msra.mxu1 %v15121_v51 }
 0xa89   : > { %10339 = vmatprep.subr.bf16.mxu0 %v15126_v30  ;;  %10421 = vmatprep.subr.bf16.mxu1 %v15129_v4 }
 0xa8c   : > { %10340 = vmatpush1.bf16.msra.mxu0 %v15124_v0  ;;  %10422 = vmatpush1.bf16.msra.mxu1 %v15127_v13 }
 0xa8d   : > { %10341 = vmatprep.subr.bf16.mxu0 %v15132_v25  ;;  %10423 = vmatprep.subr.bf16.mxu1 %v15135_v26 }
 0xa90   : > { %10342 = vmatpush1.bf16.msra.mxu0 %v15130_v29  ;;  %10424 = vmatpush1.bf16.msra.mxu1 %v15133_v9  ;;  %v15202_v29 = vld [vmem:[%s16230_s25 + $0x1ac0] ss:$16 sps:$4 sm:$0xff]   ;;  %v15205_v9 = vld [vmem:[%s16230_s25 + $0x1ac8] ss:$16 sps:$4 sm:$0xff]  }
 0xa91   : > { %10343 = vmatprep.subr.bf16.mxu0 %v15138_v10  ;;  %10425 = vmatprep.subr.bf16.mxu1 %v15141_v50 }
 0xa94   : > { %10344 = vmatpush1.bf16.msra.mxu0 %v15136_v43  ;;  %10426 = vmatpush1.bf16.msra.mxu1 %v15139_v55  ;;  %v15210_v43 = vld [vmem:[%s16230_s25 + $0x1ae4] ss:$16 sps:$4 sm:$0xff]   ;;  %v15213_v55 = vld [vmem:[%s16230_s25 + $0x1aec] ss:$16 sps:$4 sm:$0xff]  }
 0xa95   : > { %10345 = vmatprep.subr.bf16.mxu0 %v15144_v46  ;;  %10427 = vmatprep.subr.bf16.mxu1 %v15147_v45 }
 0xa98   : > { %10346 = vmatpush1.bf16.msra.mxu0 %v15142_v38  ;;  %10428 = vmatpush1.bf16.msra.mxu1 %v15145_v32  ;;  %v15208_v32 = vld [vmem:[%s16230_s25 + $0x1ae0] ss:$16 sps:$4 sm:$0xff]  }
 0xa99   : > { %10347 = vmatprep.subr.bf16.mxu0 %v15150_v40  ;;  %10429 = vmatprep.subr.bf16.mxu1 %v15153_v37  ;;  %v15211_v40 = vld [vmem:[%s16230_s25 + $0x1ae8] ss:$16 sps:$4 sm:$0xff]   ;;  %v15216_v37 = vld [vmem:[%s16230_s25 + $0x1b04] ss:$16 sps:$4 sm:$0xff]  }
 0xa9c   : > { %10348 = vmatpush1.bf16.msra.mxu0 %v15148_v35  ;;  %10430 = vmatpush1.bf16.msra.mxu1 %v15151_v31  ;;  %v15219_v35 = vld [vmem:[%s16230_s25 + $0x1b0c] ss:$16 sps:$4 sm:$0xff]  }
 0xa9d   : > { %10349 = vmatprep.subr.bf16.mxu0 %v15156_v60  ;;  %10431 = vmatprep.subr.bf16.mxu1 %v15159_v61  ;;  %v15214_v60 = vld [vmem:[%s16230_s25 + $0x1b00] ss:$16 sps:$4 sm:$0xff]   ;;  %v15217_v61 = vld [vmem:[%s16230_s25 + $0x1b08] ss:$16 sps:$4 sm:$0xff]  }
 0xaa0   : > { %10350 = vmatpush1.bf16.msra.mxu0 %v15154_v14  ;;  %10432 = vmatpush1.bf16.msra.mxu1 %v15157_v47  ;;  %v15222_v14 = vld [vmem:[%s16230_s25 + $0x1b24] ss:$16 sps:$4 sm:$0xff]   ;;  %v15225_v47 = vld [vmem:[%s16230_s25 + $0x1b2c] ss:$16 sps:$4 sm:$0xff]  }
 0xaa1   : > { %10351 = vmatprep.subr.bf16.mxu0 %v15162_v58  ;;  %10433 = vmatprep.subr.bf16.mxu1 %v15165_v18  ;;  %v15220_v58 = vld [vmem:[%s16230_s25 + $0x1b20] ss:$16 sps:$4 sm:$0xff]   ;;  %v15223_v18 = vld [vmem:[%s16230_s25 + $0x1b28] ss:$16 sps:$4 sm:$0xff]  }
 0xaa4   : > { %10352 = vmatpush1.bf16.msra.mxu0 %v15160_v48  ;;  %10434 = vmatpush1.bf16.msra.mxu1 %v15163_v19  ;;  %v15231_v48 = vld [vmem:[%s16230_s25 + $0x1b4c] ss:$16 sps:$4 sm:$0xff]   ;;  %v15226_v19 = vld [vmem:[%s16230_s25 + $0x1b40] ss:$16 sps:$4 sm:$0xff]  }
 0xaa5   : > { %10362 = vmatprep.subr.bf16.mxu0 %v15168_v44  ;;  %10444 = vmatprep.subr.bf16.mxu1 %v15171_v16  ;;  %v15229_v44 = vld [vmem:[%s16230_s25 + $0x1b48] ss:$16 sps:$4 sm:$0xff]   ;;  %v15234_v16 = vld [vmem:[%s16230_s25 + $0x1b64] ss:$16 sps:$4 sm:$0xff]  }
 0xaa7   : > { %10354 = vmatmul.mubr.bf16.vlgmr.msra.gmra.mrb[24].mxu0 %v9673_v20  ;;  %10436 = vmatmul.mubr.bf16.vlgmr.msra.gmra.mrb[24].mxu1 %v9673_v20  ;;  %v15237_v20 = vld [vmem:[%s16230_s25 + $0x1b6c] ss:$16 sps:$4 sm:$0xff]  }
 0xaa8   : > { %10363 = vmatpush1.bf16.msra.mxu0 %v15166_v33  ;;  %10445 = vmatpush1.bf16.msra.mxu1 %v15169_v7  ;;  %v15232_v33 = vld [vmem:[%s16230_s25 + $0x1b60] ss:$16 sps:$4 sm:$0xff]   ;;  %v15235_v7 = vld [vmem:[%s16230_s25 + $0x1b68] ss:$16 sps:$4 sm:$0xff]  }
 0xaa9   : > { %10364 = vmatprep.subr.bf16.mxu0 %v15174_v24  ;;  %10446 = vmatprep.subr.bf16.mxu1 %v15177_v15  ;;  %v15240_v24 = vld [vmem:[%s16230_s25 + $0x1b84] ss:$16 sps:$4 sm:$0xff]   ;;  %v15243_v15 = vld [vmem:[%s16230_s25 + $0x1b8c] ss:$16 sps:$4 sm:$0xff]  }
 0xaaa   : > { %10394 = vmatprep.mubr.bf16.mxu0 %v9676_v5  ;;  %10476 = vmatprep.mubr.bf16.mxu1 %v9676_v5  ;;  %v15238_v5 = vld [vmem:[%s16230_s25 + $0x1b80] ss:$16 sps:$4 sm:$0xff]  }
 0xaac   : > { %10365 = vmatpush1.bf16.msra.mxu0 %v15172_v36  ;;  %10447 = vmatpush1.bf16.msra.mxu1 %v15175_v57  ;;  %v15241_v36 = vld [vmem:[%s16230_s25 + $0x1b88] ss:$16 sps:$4 sm:$0xff]   ;;  %v15246_v57 = vld [vmem:[%s16230_s25 + $0x1ba4] ss:$16 sps:$4 sm:$0xff]  }
 0xaad   : > { %10366 = vmatprep.subr.bf16.mxu0 %v15180_v28  ;;  %10448 = vmatprep.subr.bf16.mxu1 %v15183_v53  ;;  %v15249_v28 = vld [vmem:[%s16230_s25 + $0x1bac] ss:$16 sps:$4 sm:$0xff]   ;;  %v15244_v53 = vld [vmem:[%s16230_s25 + $0x1ba0] ss:$16 sps:$4 sm:$0xff]  }
 0xab0   : > { %10367 = vmatpush1.bf16.msra.mxu0 %v15178_v12  ;;  %10449 = vmatpush1.bf16.msra.mxu1 %v15181_v27  ;;  %v15247_v12 = vld [vmem:[%s16230_s25 + $0x1ba8] ss:$16 sps:$4 sm:$0xff]   ;;  %v15252_v27 = vld [vmem:[%s16230_s25 + $0x1bc4] ss:$16 sps:$4 sm:$0xff]  }
 0xab1   : > { %10368 = vmatprep.subr.bf16.mxu0 %v15186_v63  ;;  %10450 = vmatprep.subr.bf16.mxu1 %v15189_v17  ;;  %v15255_v63 = vld [vmem:[%s16230_s25 + $0x1bcc] ss:$16 sps:$4 sm:$0xff]   ;;  %v15250_v17 = vld [vmem:[%s16230_s25 + $0x1bc0] ss:$16 sps:$4 sm:$0xff]  }
 0xab4   : > { %10369 = vmatpush1.bf16.msra.mxu0 %v15184_v11  ;;  %10451 = vmatpush1.bf16.msra.mxu1 %v15187_v23  ;;  %v15253_v11 = vld [vmem:[%s16230_s25 + $0x1bc8] ss:$16 sps:$4 sm:$0xff]   ;;  %v15258_v23 = vld [vmem:[%s16230_s25 + $0x1be4] ss:$16 sps:$4 sm:$0xff]  }
 0xab5   : > { %10370 = vmatprep.subr.bf16.mxu0 %v15192_v8  ;;  %10452 = vmatprep.subr.bf16.mxu1 %v15195_v39  ;;  %v15261_v8 = vld [vmem:[%s16230_s25 + $0x1bec] ss:$16 sps:$4 sm:$0xff]   ;;  %v15256_v39 = vld [vmem:[%s16230_s25 + $0x1be0] ss:$16 sps:$4 sm:$0xff]  }
 0xab8   : > { %10371 = vmatpush1.bf16.msra.mxu0 %v15190_v62  ;;  %10453 = vmatpush1.bf16.msra.mxu1 %v15193_v3  ;;  %v15259_v62 = vld [vmem:[%s16230_s25 + $0x1be8] ss:$16 sps:$4 sm:$0xff]   ;;  %v15264_v3 = vld [vmem:[%s16230_s25 + $0x1c04] ss:$16 sps:$4 sm:$0xff]  }
 0xab9   : > { %10372 = vmatprep.subr.bf16.mxu0 %v15198_v52  ;;  %10454 = vmatprep.subr.bf16.mxu1 %v15201_v59  ;;  %v15267_v52 = vld [vmem:[%s16230_s25 + $0x1c0c] ss:$16 sps:$4 sm:$0xff]   ;;  %v9675_v59 = vrot.slane %v18217_v42, 6  ;;  %v15268_v42 = vld [vmem:[%s16230_s25 + $0x1c20] ss:$16 sps:$4 sm:$0xff]  }
 0xaba   : > { %v8470_v21 = vpop.f32.mrb[16].mxu0  ;;  %v8552_v51 = vpop.f32.mrb[16].mxu1 }
 0xabb   : > { %v8472_v30 = vpop.f32.mrb[17].mxu0  ;;  %v8554_v4 = vpop.f32.mrb[17].mxu1 }
 0xabc   : > { %v8563_v0 = vcombine.low %v8470_v21, %v8472_v30  ;;  %v8564_v13 = vcombine.low %v8552_v51, %v8554_v4  ;;  %v8474_v25 = vpop.f32.mrb[18].mxu0  ;;  %v8556_v26 = vpop.f32.mrb[18].mxu1  ;;  %10373 = vmatpush1.bf16.msra.mxu0 %v15196_v22  ;;  %10455 = vmatpush1.bf16.msra.mxu1 %v15199_v34  ;;  %v15262_v22 = vld [vmem:[%s16230_s25 + $0x1c00] ss:$16 sps:$4 sm:$0xff]   ;;  %v15265_v34 = vld [vmem:[%s16230_s25 + $0x1c08] ss:$16 sps:$4 sm:$0xff]  }
 0xabd   : > { %v8475_v10 = vpop.f32.mrb[19].mxu0  ;;  %v8557_v50 = vpop.f32.mrb[19].mxu1  ;;  %10374 = vmatprep.subr.bf16.mxu0 %v15204_v41  ;;  %10456 = vmatprep.subr.bf16.mxu1 %v15207_v56  ;;  %v15270_v41 = vld [vmem:[%s16230_s25 + $0x1c24] ss:$16 sps:$4 sm:$0xff]   ;;  %v15273_v56 = vld [vmem:[%s16230_s25 + $0x1c2c] ss:$16 sps:$4 sm:$0xff]  }
 0xabe   : > { %v8571_v46 = vrot.slane %v8563_v0, %v17741_v1  ;;  %v8578_v45 = vrot.slane %v8564_v13, %v17741_v1  ;;  %v10637_v21 = vrot.slane %v18225_v2, 7  ;;  %v15271_v51 = vld [vmem:[%s16230_s25 + $0x1c28] ss:$16 sps:$4 sm:$0xff]   ;;  %v15276_v30 = vld [vmem:[%s16230_s25 + $0x1c44] ss:$16 sps:$4 sm:$0xff]  }
 0xabf   : > { %v15279_v4 = vld [vmem:[%s16230_s25 + $0x1c4c] ss:$16 sps:$4 sm:$0xff]   ;;  %v15274_v2 = vld [vmem:[%s16230_s25 + $0x1c40] ss:$16 sps:$4 sm:$0xff]   ;;  %v15277_v0 = vld [vmem:[%s16230_s25 + $0x1c48] ss:$16 sps:$4 sm:$0xff]  }
 0xac0   : > { %v8579_v38 = vcombine.low %v8571_v46, %v8578_v45  ;;  %10375 = vmatpush1.bf16.msra.mxu0 %v15202_v29  ;;  %10457 = vmatpush1.bf16.msra.mxu1 %v15205_v9  ;;  %v15282_v13 = vld [vmem:[%s16230_s25 + $0x1c64] ss:$16 sps:$4 sm:$0xff]   ;;  %v15285_v25 = vld [vmem:[%s16230_s25 + $0x1c6c] ss:$16 sps:$4 sm:$0xff]   ;;  %v15280_v26 = vld [vmem:[%s16230_s25 + $0x1c60] ss:$16 sps:$4 sm:$0xff]  }
 0xac1   : > { %10376 = vmatprep.subr.bf16.mxu0 %v15210_v43  ;;  %10458 = vmatprep.subr.bf16.mxu1 %v15213_v55  ;;  %v15283_v29 = vld [vmem:[%s16230_s25 + $0x1c68] ss:$16 sps:$4 sm:$0xff]   ;;  %v15288_v9 = vld [vmem:[%s16230_s25 + $0x1c84] ss:$16 sps:$4 sm:$0xff]   ;;  %v15291_v10 = vld [vmem:[%s16230_s25 + $0x1c8c] ss:$16 sps:$4 sm:$0xff]  }
 0xac2   : > { %v18331_v31 = vadd.f32 %v8579_v38, %v18182_v54  ;;  %v15228_v54 = vld [vmem:[%s16230_s25 + $0x1b44] ss:$16 sps:$4 sm:$0xff]   ;;  %v15286_v50 = vld [vmem:[%s16230_s25 + $0x1c80] ss:$16 sps:$4 sm:$0xff]   ;;  %v15289_v43 = vld [vmem:[%s16230_s25 + $0x1c88] ss:$16 sps:$4 sm:$0xff]  }
 0xac3   : > { %v15294_v55 = vld [vmem:[%s16230_s25 + $0x1ca4] ss:$16 sps:$4 sm:$0xff]   ;;  %v15297_v46 = vld [vmem:[%s16230_s25 + $0x1cac] ss:$16 sps:$4 sm:$0xff]   ;;  %v15292_v45 = vld [vmem:[%s16230_s25 + $0x1ca0] ss:$16 sps:$4 sm:$0xff]  }
 0xac4   : > { %10377 = vmatpush1.bf16.msra.mxu0 %v15208_v32  ;;  %10459 = vmatpush1.bf16.msra.mxu1 %v15211_v40  ;;  %v15295_v38 = vld [vmem:[%s16230_s25 + $0x1ca8] ss:$16 sps:$4 sm:$0xff]   ;;  %v15300_v32 = vld [vmem:[%s16230_s25 + $0x1cc4] ss:$16 sps:$4 sm:$0xff]   ;;  %v15303_v40 = vld [vmem:[%s16230_s25 + $0x1ccc] ss:$16 sps:$4 sm:$0xff]  }
 0xac5   : > { %10378 = vmatprep.subr.bf16.mxu0 %v15216_v37  ;;  %10460 = vmatprep.subr.bf16.mxu1 %v15219_v35  ;;  %v15298_v37 = vld [vmem:[%s16230_s25 + $0x1cc0] ss:$16 sps:$4 sm:$0xff]   ;;  %v15301_v35 = vld [vmem:[%s16230_s25 + $0x1cc8] ss:$16 sps:$4 sm:$0xff]  }
 0xac8   : > { %10379 = vmatpush1.bf16.msra.mxu0 %v15214_v60  ;;  %10461 = vmatpush1.bf16.msra.mxu1 %v15217_v61  ;;  %v15306_v60 = vld [vmem:[%s16230_s25 + $0x1ce4] ss:$16 sps:$4 sm:$0xff]   ;;  %v15309_v61 = vld [vmem:[%s16230_s25 + $0x1cec] ss:$16 sps:$4 sm:$0xff]  }
 0xac9   : > { %10380 = vmatprep.subr.bf16.mxu0 %v15222_v14  ;;  %10462 = vmatprep.subr.bf16.mxu1 %v15225_v47  ;;  %v15304_v14 = vld [vmem:[%s16230_s25 + $0x1ce0] ss:$16 sps:$4 sm:$0xff]   ;;  %v15307_v47 = vld [vmem:[%s16230_s25 + $0x1ce8] ss:$16 sps:$4 sm:$0xff]  }
 0xacc   : > { %10381 = vmatpush1.bf16.msra.mxu0 %v15220_v58  ;;  %10463 = vmatpush1.bf16.msra.mxu1 %v15223_v18  ;;  %v15312_v58 = vld [vmem:[%s16230_s25 + $0x1d04] ss:$16 sps:$4 sm:$0xff]   ;;  %v15315_v18 = vld [vmem:[%s16230_s25 + $0x1d0c] ss:$16 sps:$4 sm:$0xff]  }
 0xacd   : > { %10382 = vmatprep.subr.bf16.mxu0 %v15228_v54  ;;  %10464 = vmatprep.subr.bf16.mxu1 %v15231_v48  ;;  %v15310_v54 = vld [vmem:[%s16230_s25 + $0x1d00] ss:$16 sps:$4 sm:$0xff]   ;;  %v15313_v48 = vld [vmem:[%s16230_s25 + $0x1d08] ss:$16 sps:$4 sm:$0xff]  }
 0xad0   : > { %10383 = vmatpush1.bf16.msra.mxu0 %v15226_v19  ;;  %10465 = vmatpush1.bf16.msra.mxu1 %v15229_v44  ;;  %v15318_v19 = vld [vmem:[%s16230_s25 + $0x1d24] ss:$16 sps:$4 sm:$0xff]   ;;  %v15321_v44 = vld [vmem:[%s16230_s25 + $0x1d2c] ss:$16 sps:$4 sm:$0xff]  }
 0xad1   : > { %10384 = vmatprep.subr.bf16.mxu0 %v15234_v16  ;;  %10466 = vmatprep.subr.bf16.mxu1 %v15237_v20  ;;  %v15316_v16 = vld [vmem:[%s16230_s25 + $0x1d20] ss:$16 sps:$4 sm:$0xff]   ;;  %v15319_v20 = vld [vmem:[%s16230_s25 + $0x1d28] ss:$16 sps:$4 sm:$0xff]  }
 0xad4   : > { %10385 = vmatpush1.bf16.msra.mxu0 %v15232_v33  ;;  %10467 = vmatpush1.bf16.msra.mxu1 %v15235_v7  ;;  %v15324_v33 = vld [vmem:[%s16230_s25 + $0x1d44] ss:$16 sps:$4 sm:$0xff]   ;;  %v15327_v7 = vld [vmem:[%s16230_s25 + $0x1d4c] ss:$16 sps:$4 sm:$0xff]  }
 0xad5   : > { %10386 = vmatprep.subr.bf16.mxu0 %v15240_v24  ;;  %10468 = vmatprep.subr.bf16.mxu1 %v15243_v15  ;;  %v15322_v24 = vld [vmem:[%s16230_s25 + $0x1d40] ss:$16 sps:$4 sm:$0xff]   ;;  %v15325_v15 = vld [vmem:[%s16230_s25 + $0x1d48] ss:$16 sps:$4 sm:$0xff]  }
 0xad8   : > { %10387 = vmatpush1.bf16.msra.mxu0 %v15238_v5  ;;  %10469 = vmatpush1.bf16.msra.mxu1 %v15241_v36  ;;  %v15330_v5 = vld [vmem:[%s16230_s25 + $0x1d64] ss:$16 sps:$4 sm:$0xff]   ;;  %v15333_v36 = vld [vmem:[%s16230_s25 + $0x1d6c] ss:$16 sps:$4 sm:$0xff]  }
 0xad9   : > { %10388 = vmatprep.subr.bf16.mxu0 %v15246_v57  ;;  %10470 = vmatprep.subr.bf16.mxu1 %v15249_v28  ;;  %v15328_v57 = vld [vmem:[%s16230_s25 + $0x1d60] ss:$16 sps:$4 sm:$0xff]   ;;  %v15331_v28 = vld [vmem:[%s16230_s25 + $0x1d68] ss:$16 sps:$4 sm:$0xff]  }
 0xadc   : > { %10389 = vmatpush1.bf16.msra.mxu0 %v15244_v53  ;;  %10471 = vmatpush1.bf16.msra.mxu1 %v15247_v12  ;;  %v15336_v53 = vld [vmem:[%s16230_s25 + $0x1d84] ss:$16 sps:$4 sm:$0xff]   ;;  %v15339_v12 = vld [vmem:[%s16230_s25 + $0x1d8c] ss:$16 sps:$4 sm:$0xff]  }
 0xadd   : > { %10390 = vmatprep.subr.bf16.mxu0 %v15252_v27  ;;  %10472 = vmatprep.subr.bf16.mxu1 %v15255_v63  ;;  %v15334_v27 = vld [vmem:[%s16230_s25 + $0x1d80] ss:$16 sps:$4 sm:$0xff]   ;;  %v15337_v63 = vld [vmem:[%s16230_s25 + $0x1d88] ss:$16 sps:$4 sm:$0xff]  }
 0xae0   : > { %10391 = vmatpush1.bf16.msra.mxu0 %v15250_v17  ;;  %10473 = vmatpush1.bf16.msra.mxu1 %v15253_v11  ;;  %v15342_v17 = vld [vmem:[%s16230_s25 + $0x1da4] ss:$16 sps:$4 sm:$0xff]   ;;  %v15345_v11 = vld [vmem:[%s16230_s25 + $0x1dac] ss:$16 sps:$4 sm:$0xff]  }
 0xae1   : > { %10392 = vmatprep.subr.bf16.mxu0 %v15258_v23  ;;  %10474 = vmatprep.subr.bf16.mxu1 %v15261_v8  ;;  %v15340_v23 = vld [vmem:[%s16230_s25 + $0x1da0] ss:$16 sps:$4 sm:$0xff]   ;;  %v15343_v8 = vld [vmem:[%s16230_s25 + $0x1da8] ss:$16 sps:$4 sm:$0xff]  }
 0xae4   : > { %10393 = vmatpush1.bf16.msra.mxu0 %v15256_v39  ;;  %10475 = vmatpush1.bf16.msra.mxu1 %v15259_v62  ;;  %v15348_v39 = vld [vmem:[%s16230_s25 + $0x1dc4] ss:$16 sps:$4 sm:$0xff]   ;;  %v15351_v62 = vld [vmem:[%s16230_s25 + $0x1dcc] ss:$16 sps:$4 sm:$0xff]  }
 0xae5   : > { %11284 = vmatprep.subr.bf16.mxu0 %v15264_v3  ;;  %11366 = vmatprep.subr.bf16.mxu1 %v15267_v52  ;;  %v15346_v3 = vld [vmem:[%s16230_s25 + $0x1dc0] ss:$16 sps:$4 sm:$0xff]   ;;  %v15349_v52 = vld [vmem:[%s16230_s25 + $0x1dc8] ss:$16 sps:$4 sm:$0xff]  }
 0xae7   : > { %10395 = vmatmul.mubr.bf16.vlgmr.msra.gmra.mrb[24].mxu0 %v9675_v59  ;;  %10477 = vmatmul.mubr.bf16.vlgmr.msra.gmra.mrb[24].mxu1 %v9675_v59  ;;  %v15354_v59 = vld [vmem:[%s16230_s25 + $0x1de4] ss:$16 sps:$4 sm:$0xff]  }
 0xae8   : > { %11285 = vmatpush1.bf16.msra.mxu0 %v15262_v22  ;;  %11367 = vmatpush1.bf16.msra.mxu1 %v15265_v34  ;;  %v15357_v22 = vld [vmem:[%s16230_s25 + $0x1dec] ss:$16 sps:$4 sm:$0xff]   ;;  %v15352_v34 = vld [vmem:[%s16230_s25 + $0x1de0] ss:$16 sps:$4 sm:$0xff]  }
 0xae9   : > { %11286 = vmatprep.subr.bf16.mxu0 %v15270_v41  ;;  %11368 = vmatprep.subr.bf16.mxu1 %v15273_v56  ;;  %v15355_v41 = vld [vmem:[%s16230_s25 + $0x1de8] ss:$16 sps:$4 sm:$0xff]   ;;  %v15360_v56 = vld [vmem:[%s16230_s25 + $0x1e04] ss:$16 sps:$4 sm:$0xff]  }
 0xaea   : > { %11316 = vmatprep.mubr.bf16.mxu0 %v10637_v21  ;;  %11398 = vmatprep.mubr.bf16.mxu1 %v10637_v21  ;;  %v15363_v21 = vld [vmem:[%s16230_s25 + $0x1e0c] ss:$16 sps:$4 sm:$0xff]  }
 0xaec   : > { %11287 = vmatpush1.bf16.msra.mxu0 %v15268_v42  ;;  %11369 = vmatpush1.bf16.msra.mxu1 %v15271_v51  ;;  %v10636_v42 = vrot.slane %v18289_v6, 7  ;;  %v15358_v51 = vld [vmem:[%s16230_s25 + $0x1e00] ss:$16 sps:$4 sm:$0xff]  }
 0xaed   : > { %11288 = vmatprep.subr.bf16.mxu0 %v15276_v30  ;;  %11370 = vmatprep.subr.bf16.mxu1 %v15279_v4  ;;  %v15361_v30 = vld [vmem:[%s16230_s25 + $0x1e08] ss:$16 sps:$4 sm:$0xff]   ;;  %v15366_v4 = vld [vmem:[%s16230_s25 + $0x1e24] ss:$16 sps:$4 sm:$0xff]   ;;  %v15364_v6 = vld [vmem:[%s16230_s25 + $0x1e20] ss:$16 sps:$4 sm:$0xff]  }
 0xaf0   : > { %11289 = vmatpush1.bf16.msra.mxu0 %v15274_v2  ;;  %11371 = vmatpush1.bf16.msra.mxu1 %v15277_v0  ;;  %v15369_v2 = vld [vmem:[%s16230_s25 + $0x1e2c] ss:$16 sps:$4 sm:$0xff]   ;;  %v10639_v0 = vrot.slane %v18297_v49, 7  ;;  %v15370_v49 = vld [vmem:[%s16230_s25 + $0x1e40] ss:$16 sps:$4 sm:$0xff]  }
 0xaf1   : > { %11290 = vmatprep.subr.bf16.mxu0 %v15282_v13  ;;  %11372 = vmatprep.subr.bf16.mxu1 %v15285_v25  ;;  %v15367_v13 = vld [vmem:[%s16230_s25 + $0x1e28] ss:$16 sps:$4 sm:$0xff]   ;;  %v15372_v25 = vld [vmem:[%s16230_s25 + $0x1e44] ss:$16 sps:$4 sm:$0xff]  }
 0xaf4   : > { %11291 = vmatpush1.bf16.msra.mxu0 %v15280_v26  ;;  %11373 = vmatpush1.bf16.msra.mxu1 %v15283_v29  ;;  %v15375_v26 = vld [vmem:[%s16230_s25 + $0x1e4c] ss:$16 sps:$4 sm:$0xff]   ;;  %v15373_v29 = vld [vmem:[%s16230_s25 + $0x1e48] ss:$16 sps:$4 sm:$0xff]  }
 0xaf5   : > { %11292 = vmatprep.subr.bf16.mxu0 %v15288_v9  ;;  %11374 = vmatprep.subr.bf16.mxu1 %v15291_v10  ;;  %v15378_v9 = vld [vmem:[%s16230_s25 + $0x1e64] ss:$16 sps:$4 sm:$0xff]   ;;  %v15381_v10 = vld [vmem:[%s16230_s25 + $0x1e6c] ss:$16 sps:$4 sm:$0xff]  }
 0xaf8   : > { %11293 = vmatpush1.bf16.msra.mxu0 %v15286_v50  ;;  %11375 = vmatpush1.bf16.msra.mxu1 %v15289_v43  ;;  %v15376_v50 = vld [vmem:[%s16230_s25 + $0x1e60] ss:$16 sps:$4 sm:$0xff]   ;;  %v15379_v43 = vld [vmem:[%s16230_s25 + $0x1e68] ss:$16 sps:$4 sm:$0xff]  }
 0xaf9   : > { %11294 = vmatprep.subr.bf16.mxu0 %v15294_v55  ;;  %11376 = vmatprep.subr.bf16.mxu1 %v15297_v46  ;;  %v15384_v55 = vld [vmem:[%s16230_s25 + $0x1e84] ss:$16 sps:$4 sm:$0xff]   ;;  %v15387_v46 = vld [vmem:[%s16230_s25 + $0x1e8c] ss:$16 sps:$4 sm:$0xff]  }
 0xafc   : > { %11295 = vmatpush1.bf16.msra.mxu0 %v15292_v45  ;;  %11377 = vmatpush1.bf16.msra.mxu1 %v15295_v38  ;;  %v15382_v45 = vld [vmem:[%s16230_s25 + $0x1e80] ss:$16 sps:$4 sm:$0xff]   ;;  %v15385_v38 = vld [vmem:[%s16230_s25 + $0x1e88] ss:$16 sps:$4 sm:$0xff]  }
 0xafd   : > { %11296 = vmatprep.subr.bf16.mxu0 %v15300_v32  ;;  %11378 = vmatprep.subr.bf16.mxu1 %v15303_v40  ;;  %v15390_v32 = vld [vmem:[%s16230_s25 + $0x1ea4] ss:$16 sps:$4 sm:$0xff]   ;;  %v15393_v40 = vld [vmem:[%s16230_s25 + $0x1eac] ss:$16 sps:$4 sm:$0xff]  }
 0xb00   : > { %11297 = vmatpush1.bf16.msra.mxu0 %v15298_v37  ;;  %11379 = vmatpush1.bf16.msra.mxu1 %v15301_v35  ;;  %v15388_v37 = vld [vmem:[%s16230_s25 + $0x1ea0] ss:$16 sps:$4 sm:$0xff]   ;;  %v15391_v35 = vld [vmem:[%s16230_s25 + $0x1ea8] ss:$16 sps:$4 sm:$0xff]  }
 0xb01   : > { %11298 = vmatprep.subr.bf16.mxu0 %v15306_v60  ;;  %11380 = vmatprep.subr.bf16.mxu1 %v15309_v61  ;;  %v15396_v60 = vld [vmem:[%s16230_s25 + $0x1ec4] ss:$16 sps:$4 sm:$0xff]   ;;  %v15399_v61 = vld [vmem:[%s16230_s25 + $0x1ecc] ss:$16 sps:$4 sm:$0xff]  }
 0xb04   : > { %11299 = vmatpush1.bf16.msra.mxu0 %v15304_v14  ;;  %11381 = vmatpush1.bf16.msra.mxu1 %v15307_v47 }
 0xb05   : > { %11300 = vmatprep.subr.bf16.mxu0 %v15312_v58  ;;  %11382 = vmatprep.subr.bf16.mxu1 %v15315_v18 }
 0xb08   : > { %11301 = vmatpush1.bf16.msra.mxu0 %v15310_v54  ;;  %11383 = vmatpush1.bf16.msra.mxu1 %v15313_v48 }
 0xb09   : > { %11302 = vmatprep.subr.bf16.mxu0 %v15318_v19  ;;  %11384 = vmatprep.subr.bf16.mxu1 %v15321_v44 }
 0xb0c   : > { %11303 = vmatpush1.bf16.msra.mxu0 %v15316_v16  ;;  %11385 = vmatpush1.bf16.msra.mxu1 %v15319_v20  ;;  %v15394_v16 = vld [vmem:[%s16230_s25 + $0x1ec0] ss:$16 sps:$4 sm:$0xff]   ;;  %v15397_v20 = vld [vmem:[%s16230_s25 + $0x1ec8] ss:$16 sps:$4 sm:$0xff]  }
 0xb0d   : > { %11304 = vmatprep.subr.bf16.mxu0 %v15324_v33  ;;  %11386 = vmatprep.subr.bf16.mxu1 %v15327_v7 }
 0xb10   : > { %11305 = vmatpush1.bf16.msra.mxu0 %v15322_v24  ;;  %11387 = vmatpush1.bf16.msra.mxu1 %v15325_v15  ;;  %v15402_v24 = vld [vmem:[%s16230_s25 + $0x1ee4] ss:$16 sps:$4 sm:$0xff]   ;;  %v15405_v15 = vld [vmem:[%s16230_s25 + $0x1eec] ss:$16 sps:$4 sm:$0xff]  }
 0xb11   : > { %11306 = vmatprep.subr.bf16.mxu0 %v15330_v5  ;;  %11388 = vmatprep.subr.bf16.mxu1 %v15333_v36 }
 0xb14   : > { %11307 = vmatpush1.bf16.msra.mxu0 %v15328_v57  ;;  %11389 = vmatpush1.bf16.msra.mxu1 %v15331_v28  ;;  %v15400_v28 = vld [vmem:[%s16230_s25 + $0x1ee0] ss:$16 sps:$4 sm:$0xff]  }
 0xb15   : > { %11308 = vmatprep.subr.bf16.mxu0 %v15336_v53  ;;  %11390 = vmatprep.subr.bf16.mxu1 %v15339_v12  ;;  %v15403_v53 = vld [vmem:[%s16230_s25 + $0x1ee8] ss:$16 sps:$4 sm:$0xff]   ;;  %v15408_v12 = vld [vmem:[%s16230_s25 + $0x1f04] ss:$16 sps:$4 sm:$0xff]  }
 0xb18   : > { %11309 = vmatpush1.bf16.msra.mxu0 %v15334_v27  ;;  %11391 = vmatpush1.bf16.msra.mxu1 %v15337_v63  ;;  %v15411_v27 = vld [vmem:[%s16230_s25 + $0x1f0c] ss:$16 sps:$4 sm:$0xff]  }
 0xb19   : > { %11310 = vmatprep.subr.bf16.mxu0 %v15342_v17  ;;  %11392 = vmatprep.subr.bf16.mxu1 %v15345_v11  ;;  %v15406_v17 = vld [vmem:[%s16230_s25 + $0x1f00] ss:$16 sps:$4 sm:$0xff]   ;;  %v15409_v11 = vld [vmem:[%s16230_s25 + $0x1f08] ss:$16 sps:$4 sm:$0xff]  }
 0xb1c   : > { %11311 = vmatpush1.bf16.msra.mxu0 %v15340_v23  ;;  %11393 = vmatpush1.bf16.msra.mxu1 %v15343_v8  ;;  %v15414_v23 = vld [vmem:[%s16230_s25 + $0x1f24] ss:$16 sps:$4 sm:$0xff]   ;;  %v15417_v8 = vld [vmem:[%s16230_s25 + $0x1f2c] ss:$16 sps:$4 sm:$0xff]  }
 0xb1d   : > { %11312 = vmatprep.subr.bf16.mxu0 %v15348_v39  ;;  %11394 = vmatprep.subr.bf16.mxu1 %v15351_v62  ;;  %v15412_v39 = vld [vmem:[%s16230_s25 + $0x1f20] ss:$16 sps:$4 sm:$0xff]   ;;  %v15415_v62 = vld [vmem:[%s16230_s25 + $0x1f28] ss:$16 sps:$4 sm:$0xff]  }
 0xb20   : > { %11313 = vmatpush1.bf16.msra.mxu0 %v15346_v3  ;;  %11395 = vmatpush1.bf16.msra.mxu1 %v15349_v52  ;;  %v15423_v3 = vld [vmem:[%s16230_s25 + $0x1f4c] ss:$16 sps:$4 sm:$0xff]   ;;  %v15418_v52 = vld [vmem:[%s16230_s25 + $0x1f40] ss:$16 sps:$4 sm:$0xff]  }
 0xb21   : > { %11314 = vmatprep.subr.bf16.mxu0 %v15354_v59  ;;  %11396 = vmatprep.subr.bf16.mxu1 %v15357_v22  ;;  %v15421_v59 = vld [vmem:[%s16230_s25 + $0x1f48] ss:$16 sps:$4 sm:$0xff]   ;;  %v15426_v22 = vld [vmem:[%s16230_s25 + $0x1f64] ss:$16 sps:$4 sm:$0xff]  }
 0xb24   : > { %11315 = vmatpush1.bf16.msra.mxu0 %v15352_v34  ;;  %11397 = vmatpush1.bf16.msra.mxu1 %v15355_v41  ;;  %v15429_v34 = vld [vmem:[%s16230_s25 + $0x1f6c] ss:$16 sps:$4 sm:$0xff]   ;;  %v15424_v41 = vld [vmem:[%s16230_s25 + $0x1f60] ss:$16 sps:$4 sm:$0xff]  }
 0xb25   : > { %11325 = vmatprep.subr.bf16.mxu0 %v15360_v56  ;;  %11407 = vmatprep.subr.bf16.mxu1 %v15363_v21  ;;  %v15427_v56 = vld [vmem:[%s16230_s25 + $0x1f68] ss:$16 sps:$4 sm:$0xff]   ;;  %v15432_v21 = vld [vmem:[%s16230_s25 + $0x1f84] ss:$16 sps:$4 sm:$0xff]  }
 0xb27   : > { %11317 = vmatmul.mubr.bf16.vlgmr.msra.gmra.mrb[28].mxu0 %v10636_v42  ;;  %11399 = vmatmul.mubr.bf16.vlgmr.msra.gmra.mrb[28].mxu1 %v10636_v42  ;;  %v15435_v42 = vld [vmem:[%s16230_s25 + $0x1f8c] ss:$16 sps:$4 sm:$0xff]  }
 0xb28   : > { %11326 = vmatpush1.bf16.msra.mxu0 %v15358_v51  ;;  %11408 = vmatpush1.bf16.msra.mxu1 %v15361_v30  ;;  %v15430_v51 = vld [vmem:[%s16230_s25 + $0x1f80] ss:$16 sps:$4 sm:$0xff]   ;;  %v15433_v30 = vld [vmem:[%s16230_s25 + $0x1f88] ss:$16 sps:$4 sm:$0xff]  }
 0xb29   : > { %11327 = vmatprep.subr.bf16.mxu0 %v15366_v4  ;;  %11409 = vmatprep.subr.bf16.mxu1 %v15369_v2  ;;  %v15438_v4 = vld [vmem:[%s16230_s25 + $0x1fa4] ss:$16 sps:$4 sm:$0xff]   ;;  %v15441_v2 = vld [vmem:[%s16230_s25 + $0x1fac] ss:$16 sps:$4 sm:$0xff]  }
 0xb2a   : > { %11357 = vmatprep.mubr.bf16.mxu0 %v10639_v0  ;;  %11439 = vmatprep.mubr.bf16.mxu1 %v10639_v0  ;;  %v15436_v0 = vld [vmem:[%s16230_s25 + $0x1fa0] ss:$16 sps:$4 sm:$0xff]  }
 0xb2c   : > { %11328 = vmatpush1.bf16.msra.mxu0 %v15364_v6  ;;  %11410 = vmatpush1.bf16.msra.mxu1 %v15367_v13  ;;  %v15439_v6 = vld [vmem:[%s16230_s25 + $0x1fa8] ss:$16 sps:$4 sm:$0xff]   ;;  %v15444_v13 = vld [vmem:[%s16230_s25 + $0x1fc4] ss:$16 sps:$4 sm:$0xff]  }
 0xb2d   : > { %11329 = vmatprep.subr.bf16.mxu0 %v15372_v25  ;;  %11411 = vmatprep.subr.bf16.mxu1 %v15375_v26  ;;  %v15447_v25 = vld [vmem:[%s16230_s25 + $0x1fcc] ss:$16 sps:$4 sm:$0xff]   ;;  %v15442_v26 = vld [vmem:[%s16230_s25 + $0x1fc0] ss:$16 sps:$4 sm:$0xff]  }
 0xb30   : > { %11330 = vmatpush1.bf16.msra.mxu0 %v15370_v49  ;;  %11412 = vmatpush1.bf16.msra.mxu1 %v15373_v29  ;;  %v15445_v49 = vld [vmem:[%s16230_s25 + $0x1fc8] ss:$16 sps:$4 sm:$0xff]   ;;  %v15450_v29 = vld [vmem:[%s16230_s25 + $0x1fe4] ss:$16 sps:$4 sm:$0xff]  }
 0xb31   : > { %11331 = vmatprep.subr.bf16.mxu0 %v15378_v9  ;;  %11413 = vmatprep.subr.bf16.mxu1 %v15381_v10  ;;  %v15453_v9 = vld [vmem:[%s16230_s25 + $0x1fec] ss:$16 sps:$4 sm:$0xff]   ;;  %v15448_v10 = vld [vmem:[%s16230_s25 + $0x1fe0] ss:$16 sps:$4 sm:$0xff]  }
 0xb34   : > { %11332 = vmatpush1.bf16.msra.mxu0 %v15376_v50  ;;  %11414 = vmatpush1.bf16.msra.mxu1 %v15379_v43  ;;  %v15451_v50 = vld [vmem:[%s16230_s25 + $0x1fe8] ss:$16 sps:$4 sm:$0xff]   ;;  %v15469_v43 = vld [vmem:[%s17412_s27 + $0x10] sm:$0xff] }
 0xb35   : > { %11333 = vmatprep.subr.bf16.mxu0 %v15384_v55  ;;  %11415 = vmatprep.subr.bf16.mxu1 %v15387_v46  ;;  %v10638_v55 = vrot.slane %v15469_v43, 7 }
 0xb38   : > { %11334 = vmatpush1.bf16.msra.mxu0 %v15382_v45  ;;  %11416 = vmatpush1.bf16.msra.mxu1 %v15385_v38 }
 0xb39   : > { %11335 = vmatprep.subr.bf16.mxu0 %v15390_v32  ;;  %11417 = vmatprep.subr.bf16.mxu1 %v15393_v40 }
 0xb3a   : > { %v9433_v14 = vpop.f32.mrb[20].mxu0  ;;  %v9515_v47 = vpop.f32.mrb[20].mxu1 }
 0xb3b   : > { %v9435_v58 = vpop.f32.mrb[21].mxu0  ;;  %v9517_v18 = vpop.f32.mrb[21].mxu1 }
 0xb3c   : > { %v9526_v54 = vcombine.low %v9433_v14, %v9435_v58  ;;  %v9527_v48 = vcombine.low %v9515_v47, %v9517_v18  ;;  %v9437_v19 = vpop.f32.mrb[22].mxu0  ;;  %v9519_v44 = vpop.f32.mrb[22].mxu1  ;;  %11336 = vmatpush1.bf16.msra.mxu0 %v15388_v37  ;;  %11418 = vmatpush1.bf16.msra.mxu1 %v15391_v35 }
 0xb3d   : > { %v9438_v33 = vpop.f32.mrb[23].mxu0  ;;  %v9520_v7 = vpop.f32.mrb[23].mxu1  ;;  %11337 = vmatprep.subr.bf16.mxu0 %v15396_v60  ;;  %11419 = vmatprep.subr.bf16.mxu1 %v15399_v61 }
 0xb3e   : > { %v9534_v5 = vrot.slane %v9526_v54, %v17741_v1  ;;  %v9541_v36 = vrot.slane %v9527_v48, %v17741_v1 }
 0xb40   : > { %v9542_v57 = vcombine.low %v9534_v5, %v9541_v36  ;;  %11338 = vmatpush1.bf16.msra.mxu0 %v15394_v16  ;;  %11420 = vmatpush1.bf16.msra.mxu1 %v15397_v20 }
 0xb41   : > { %11339 = vmatprep.subr.bf16.mxu0 %v15402_v24  ;;  %11421 = vmatprep.subr.bf16.mxu1 %v15405_v15 }
 0xb42   : > { %v18468_v63 = vadd.f32 %v9542_v57, %v18331_v31  ;;  %v15420_v31 = vld [vmem:[%s16230_s25 + $0x1f44] ss:$16 sps:$4 sm:$0xff]  }
 0xb44   : > { %11340 = vmatpush1.bf16.msra.mxu0 %v15400_v28  ;;  %11422 = vmatpush1.bf16.msra.mxu1 %v15403_v53 }
 0xb45   : > { %11341 = vmatprep.subr.bf16.mxu0 %v15408_v12  ;;  %11423 = vmatprep.subr.bf16.mxu1 %v15411_v27  ;;  %v11494_v12 = vld [vmem:[#allocation18 + $0x80] sm:$0xff] (!%p13177_p13)  ;;  %v11495_v27 = vld [vmem:[#allocation18 + $0x88] sm:$0xff] (!%p13177_p13) }
 0xb48   : > { %11342 = vmatpush1.bf16.msra.mxu0 %v15406_v17  ;;  %11424 = vmatpush1.bf16.msra.mxu1 %v15409_v11  ;;  %v13428_v17 = vpack.c.bf16 (!%p13177_p13), %v11495_v27, %v11494_v12  ;;  %v11479_v11 = vld [vmem:[#allocation18 + $0x8] sm:$0xff] (!%p13177_p13) }
 0xb49   : > { %11343 = vmatprep.subr.bf16.mxu0 %v15414_v23  ;;  %11425 = vmatprep.subr.bf16.mxu1 %v15417_v8  ;;  %v11526_v23 = vld [vmem:[#allocation18 + $0x180] sm:$0xff] (!%p13177_p13)  ;;  %v11527_v8 = vld [vmem:[#allocation18 + $0x188] sm:$0xff] (!%p13177_p13) }
 0xb4c   : > { %11344 = vmatpush1.bf16.msra.mxu0 %v15412_v39  ;;  %11426 = vmatpush1.bf16.msra.mxu1 %v15415_v62  ;;  %v13460_v62 = vpack.c.bf16 (!%p13177_p13), %v11527_v8, %v11526_v23  ;;  %v11521_v8 = vld [vmem:[#allocation18 + $0x158] sm:$0xff] (!%p13177_p13) }
 0xb4d   : > { %11345 = vmatprep.subr.bf16.mxu0 %v15420_v31  ;;  %11427 = vmatprep.subr.bf16.mxu1 %v15423_v3  ;;  %v11510_v31 = vld [vmem:[#allocation18 + $0x100] sm:$0xff] (!%p13177_p13)  ;;  %v11511_v3 = vld [vmem:[#allocation18 + $0x108] sm:$0xff] (!%p13177_p13) }
 0xb50   : > { %11346 = vmatpush1.bf16.msra.mxu0 %v15418_v52  ;;  %11428 = vmatpush1.bf16.msra.mxu1 %v15421_v59  ;;  %v11496_v52 = vld [vmem:[#allocation18 + $0x90] sm:$0xff] (!%p13177_p13)  ;;  %v13462_v59 = vpack.c.bf16 (!%p13177_p13), %v11511_v3, %v11510_v31  ;;  %v11538_v31 = vld [vmem:[#allocation18 + $0x1e0] sm:$0xff] (!%p13177_p13)  ;;  %v11539_v3 = vld [vmem:[#allocation18 + $0x1e8] sm:$0xff] (!%p13177_p13) }
 0xb51   : > { %11347 = vmatprep.subr.bf16.mxu0 %v15426_v22  ;;  %11429 = vmatprep.subr.bf16.mxu1 %v15429_v34  ;;  %v11497_v22 = vld [vmem:[#allocation18 + $0x98] sm:$0xff] (!%p13177_p13)  ;;  %v11480_v34 = vld [vmem:[#allocation18 + $0x10] sm:$0xff] (!%p13177_p13) }
 0xb54   : > { %11348 = vmatpush1.bf16.msra.mxu0 %v15424_v41  ;;  %11430 = vmatpush1.bf16.msra.mxu1 %v15427_v56  ;;  %v11481_v41 = vld [vmem:[#allocation18 + $0x18] sm:$0xff] (!%p13177_p13)  ;;  %v13432_v56 = vpack.c.bf16 (!%p13177_p13), %v11497_v22, %v11496_v52 }
 0xb55   : > { %11349 = vmatprep.subr.bf16.mxu0 %v15432_v21  ;;  %11431 = vmatprep.subr.bf16.mxu1 %v15435_v42  ;;  %v13434_v21 = vpack.c.bf16 (!%p13177_p13), %v11481_v41, %v11480_v34  ;;  %v11528_v42 = vld [vmem:[#allocation18 + $0x190] sm:$0xff] (!%p13177_p13)  ;;  %v11491_v41 = vld [vmem:[#allocation18 + $0x68] sm:$0xff] (!%p13177_p13) }
 0xb58   : > { %11350 = vmatpush1.bf16.msra.mxu0 %v15430_v51  ;;  %11432 = vmatpush1.bf16.msra.mxu1 %v15433_v30  ;;  %v11529_v51 = vld [vmem:[#allocation18 + $0x198] sm:$0xff] (!%p13177_p13)  ;;  %v11512_v30 = vld [vmem:[#allocation18 + $0x110] sm:$0xff] (!%p13177_p13) }
 0xb59   : > { %11351 = vmatprep.subr.bf16.mxu0 %v15438_v4  ;;  %11433 = vmatprep.subr.bf16.mxu1 %v15441_v2  ;;  %v13464_v4 = vpack.c.bf16 (!%p13177_p13), %v11529_v51, %v11528_v42  ;;  %v11513_v2 = vld [vmem:[#allocation18 + $0x118] sm:$0xff] (!%p13177_p13)  ;;  %v13484_v42 = vpack.c.bf16 (!%p13177_p13), %v11539_v3, %v11538_v31  ;;  %v11523_v51 = vld [vmem:[#allocation18 + $0x168] sm:$0xff] (!%p13177_p13) }
 0xb5c   : > { %11352 = vmatpush1.bf16.msra.mxu0 %v15436_v0  ;;  %11434 = vmatpush1.bf16.msra.mxu1 %v15439_v6  ;;  %v11498_v0 = vld [vmem:[#allocation18 + $0xa0] sm:$0xff] (!%p13177_p13)  ;;  %v11499_v6 = vld [vmem:[#allocation18 + $0xa8] sm:$0xff] (!%p13177_p13) }
 0xb5d   : > { %11353 = vmatprep.subr.bf16.mxu0 %v15444_v13  ;;  %11435 = vmatprep.subr.bf16.mxu1 %v15447_v25  ;;  %v13466_v13 = vpack.c.bf16 (!%p13177_p13), %v11513_v2, %v11512_v30  ;;  %v13436_v25 = vpack.c.bf16 (!%p13177_p13), %v11499_v6, %v11498_v0  ;;  %v11508_v30 = vld [vmem:[#allocation18 + $0xf0] sm:$0xff] (!%p13177_p13)  ;;  %v11541_v6 = vld [vmem:[#allocation18 + $0x1f8] sm:$0xff] (!%p13177_p13) }
 0xb5e   : > { %v11540_v0 = vld [vmem:[#allocation18 + $0x1f0] sm:$0xff] (!%p13177_p13) }
 0xb60   : > { %11354 = vmatpush1.bf16.msra.mxu0 %v15442_v26  ;;  %11436 = vmatpush1.bf16.msra.mxu1 %v15445_v49  ;;  %v11482_v26 = vld [vmem:[#allocation18 + $0x20] sm:$0xff] (!%p13177_p13)  ;;  %v11483_v49 = vld [vmem:[#allocation18 + $0x28] sm:$0xff] (!%p13177_p13) }
 0xb61   : > { %11355 = vmatprep.subr.bf16.mxu0 %v15450_v29  ;;  %11437 = vmatprep.subr.bf16.mxu1 %v15453_v9  ;;  %v11530_v29 = vld [vmem:[#allocation18 + $0x1a0] sm:$0xff] (!%p13177_p13)  ;;  %v11531_v9 = vld [vmem:[#allocation18 + $0x1a8] sm:$0xff] (!%p13177_p13)  ;;  %v13438_v43 = vpack.c.bf16 (!%p13177_p13), %v11483_v49, %v11482_v26 }
 0xb64   : > { %11356 = vmatpush1.bf16.msra.mxu0 %v15448_v10  ;;  %11438 = vmatpush1.bf16.msra.mxu1 %v15451_v50  ;;  %v11514_v10 = vld [vmem:[#allocation18 + $0x120] sm:$0xff] (!%p13177_p13)  ;;  %v11515_v50 = vld [vmem:[#allocation18 + $0x128] sm:$0xff] (!%p13177_p13) }
 0xb65   : > { %13429 = vmatprep.subr.bf16.mxu0 (!%p13177_p13), %v13428_v17  ;;  %13461 = vmatprep.subr.bf16.mxu1 (!%p13177_p13), %v13460_v62  ;;  %v11489_v17 = vld [vmem:[#allocation18 + $0x58] sm:$0xff] (!%p13177_p13)  ;;  %v11507_v62 = vld [vmem:[#allocation18 + $0xe8] sm:$0xff] (!%p13177_p13) }
 0xb67   : > { %11358 = vmatmul.mubr.bf16.vlgmr.msra.gmra.mrb[28].mxu0 %v10638_v55  ;;  %11440 = vmatmul.mubr.bf16.vlgmr.msra.gmra.mrb[28].mxu1 %v10638_v55  ;;  %v13468_v55 = vpack.c.bf16 (!%p13177_p13), %v11531_v9, %v11530_v29  ;;  %v11492_v9 = vld [vmem:[#allocation18 + $0x70] sm:$0xff] (!%p13177_p13) }
 0xb68   : > { %13463 = vmatpush3.bf16.msra.mxu1 (!%p13177_p13), %v13462_v59  ;;  %v11490_v59 = vld [vmem:[#allocation18 + $0x60] sm:$0xff] (!%p13177_p13) }
 0xb69   : > { %13465 = vmatprep.subr.bf16.mxu1 (!%p13177_p13), %v13464_v4  ;;  %v11509_v4 = vld [vmem:[#allocation18 + $0xf8] sm:$0xff] (!%p13177_p13) }
 0xb6a   : > { %v13456_v29 = vpack.c.bf16 (!%p13177_p13), %v11509_v4, %v11508_v30 }
 0xb6c   : > { %13467 = vmatpush3.bf16.msra.mxu1 (!%p13177_p13), %v13466_v13  ;;  %v13454_v13 = vpack.c.bf16 (!%p13177_p13), %v11491_v41, %v11490_v59 }
 0xb6d   : > { %13469 = vmatprep.subr.bf16.mxu1 (!%p13177_p13), %v13468_v55  ;;  %v11525_v55 = vld [vmem:[#allocation18 + $0x178] sm:$0xff] (!%p13177_p13) }
 0xbba   : > { %v10396_v46 = vpop.f32.mrb[24].mxu0  ;;  %v10478_v45 = vpop.f32.mrb[24].mxu1 }
 0xbbb   : > { %v10398_v38 = vpop.f32.mrb[25].mxu0  ;;  %v10480_v32 = vpop.f32.mrb[25].mxu1 }
 0xbbc   : > { %v10489_v40 = vcombine.low %v10396_v46, %v10398_v38  ;;  %v10490_v37 = vcombine.low %v10478_v45, %v10480_v32  ;;  %v10400_v35 = vpop.f32.mrb[26].mxu0  ;;  %v10482_v60 = vpop.f32.mrb[26].mxu1  ;;  %v11500_v46 = vld [vmem:[#allocation18 + $0xb0] sm:$0xff] (!%p13177_p13)  ;;  %v11501_v45 = vld [vmem:[#allocation18 + $0xb8] sm:$0xff] (!%p13177_p13)  ;;  %v13470_v32 = vpack.c.bf16 (!%p13177_p13), %v11515_v50, %v11514_v10  ;;  %v13488_v50 = vpack.c.bf16 (!%p13177_p13), %v11541_v6, %v11540_v0 }
 0xbbd   : > { %v10401_v61 = vpop.f32.mrb[27].mxu0  ;;  %v10483_v14 = vpop.f32.mrb[27].mxu1  ;;  %v11484_v38 = vld [vmem:[#allocation18 + $0x30] sm:$0xff] (!%p13177_p13)  ;;  %v11533_v60 = vld [vmem:[#allocation18 + $0x1b8] sm:$0xff] (!%p13177_p13) }
 0xbbe   : > { %v10497_v47 = vrot.slane %v10489_v40, %v17741_v1  ;;  %v10504_v58 = vrot.slane %v10490_v37, %v17741_v1  ;;  %v13440_v40 = vpack.c.bf16 (!%p13177_p13), %v11501_v45, %v11500_v46  ;;  %v11485_v37 = vld [vmem:[#allocation18 + $0x38] sm:$0xff] (!%p13177_p13)  ;;  %v11532_v35 = vld [vmem:[#allocation18 + $0x1b0] sm:$0xff] (!%p13177_p13)  ;;  %13471 = vmatpush3.bf16.msra.mxu1 (!%p13177_p13), %v13470_v32 }
 0xbbf   : > { %v13472_v61 = vpack.c.bf16 (!%p13177_p13), %v11533_v60, %v11532_v35  ;;  %v11516_v14 = vld [vmem:[#allocation18 + $0x130] sm:$0xff] (!%p13177_p13)  ;;  %v11493_v10 = vld [vmem:[#allocation18 + $0x78] sm:$0xff] (!%p13177_p13)  ;;  %v13178_v35 = vld [vmem:[#allocation19] ss:$0 sm:$0xff] (!%p13177_p13) }
 0xbc0   : > { %v10505_v18 = vcombine.low %v10497_v47, %v10504_v58  ;;  %v11517_v47 = vld [vmem:[#allocation18 + $0x138] sm:$0xff] (!%p13177_p13)  ;;  %v11502_v58 = vld [vmem:[#allocation18 + $0xc0] sm:$0xff] (!%p13177_p13) }
 0xbc1   : > { %13473 = vmatprep.subr.bf16.mxu1 (!%p13177_p13), %v13472_v61 }
 0xbc2   : > { %v10507_v54 = vadd.f32 %v10505_v18, %v18468_v63  ;;  %v11478_v63 = vld [vmem:[#allocation18] sm:$0xff] (!%p13177_p13)  ;;  %v11503_v18 = vld [vmem:[#allocation18 + $0xc8] sm:$0xff] (!%p13177_p13) }
 0xbc3   : > { %v13430_v39 = vpack.c.bf16 (!%p13177_p13), %v11479_v11, %v11478_v63  ;;  %v11488_v63 = vld [vmem:[#allocation18 + $0x50] sm:$0xff] (!%p13177_p13) }
 0xbc4   : > { %v11520_v11 = vld [vmem:[#allocation18 + $0x150] sm:$0xff] (!%p13177_p13)  ;;  %v13450_v52 = vpack.c.bf16 (!%p13177_p13), %v11489_v17, %v11488_v63 }
 0xbc5   : > { %13431 = vmatpush3.bf16.msra.mxu0 (!%p13177_p13), %v13430_v39  ;;  %v11506_v39 = vld [vmem:[#allocation18 + $0xe0] sm:$0xff] (!%p13177_p13)  ;;  %v13482_v22 = vpack.c.bf16 (!%p13177_p13), %v11521_v8, %v11520_v11 }
 0xbc6   : > { %13433 = vmatprep.subr.bf16.mxu0 (!%p13177_p13), %v13432_v56  ;;  %v13452_v34 = vpack.c.bf16 (!%p13177_p13), %v11507_v62, %v11506_v39  ;;  %v11522_v56 = vld [vmem:[#allocation18 + $0x160] sm:$0xff] (!%p13177_p13) }
 0xbc7   : > { %v13486_v49 = vpack.c.bf16 (!%p13177_p13), %v11523_v51, %v11522_v56 }
 0xbc9   : > { %13435 = vmatpush3.bf16.msra.mxu0 (!%p13177_p13), %v13434_v21 }
 0xbca   : > { %13437 = vmatprep.subr.bf16.mxu0 (!%p13177_p13), %v13436_v25 }
 0xbcd   : > { %13439 = vmatpush3.bf16.msra.mxu0 (!%p13177_p13), %v13438_v43  ;;  %v11524_v43 = vld [vmem:[#allocation18 + $0x170] sm:$0xff] (!%p13177_p13) }
 0xbce   : > { %13441 = vmatprep.subr.bf16.mxu0 (!%p13177_p13), %v13440_v40  ;;  %v13490_v40 = vpack.c.bf16 (!%p13177_p13), %v11525_v55, %v11524_v43 }
 0xc3a   : > { %v11359_v48 = vpop.f32.mrb[28].mxu0  ;;  %v11441_v19 = vpop.f32.mrb[28].mxu1 }
 0xc3b   : > { %v11361_v44 = vpop.f32.mrb[29].mxu0  ;;  %v11443_v16 = vpop.f32.mrb[29].mxu1 }
 0xc3c   : > { %v11452_v20 = vcombine.low %v11359_v48, %v11361_v44  ;;  %v11453_v33 = vcombine.low %v11441_v19, %v11443_v16  ;;  %v11363_v7 = vpop.f32.mrb[30].mxu0  ;;  %v11445_v24 = vpop.f32.mrb[30].mxu1  ;;  %v11534_v48 = vld [vmem:[#allocation18 + $0x1c0] sm:$0xff] (!%p13177_p13)  ;;  %v11535_v19 = vld [vmem:[#allocation18 + $0x1c8] sm:$0xff] (!%p13177_p13)  ;;  %v13474_v44 = vpack.c.bf16 (!%p13177_p13), %v11517_v47, %v11516_v14  ;;  %v13444_v16 = vpack.c.bf16 (!%p13177_p13), %v11503_v18, %v11502_v58 }
 0xc3d   : > { %v11364_v15 = vpop.f32.mrb[31].mxu0  ;;  %v11446_v5 = vpop.f32.mrb[31].mxu1  ;;  %v11518_v7 = vld [vmem:[#allocation18 + $0x140] sm:$0xff] (!%p13177_p13)  ;;  %v13476_v24 = vpack.c.bf16 (!%p13177_p13), %v11535_v19, %v11534_v48 }
 0xc3e   : > { %v11460_v36 = vrot.slane %v11452_v20, %v17741_v1  ;;  %v11467_v57 = vrot.slane %v11453_v33, %v17741_v1  ;;  %11475 = sbr.rel (%p13177_p13) target bundleno = 3379 (0xd33), region = 112  ;;  %v11486_v20 = vld [vmem:[#allocation18 + $0x40] sm:$0xff] (!%p13177_p13)  ;;  %v11487_v33 = vld [vmem:[#allocation18 + $0x48] sm:$0xff] (!%p13177_p13)  ;;  %v11504_v5 = vld [vmem:[#allocation18 + $0xd0] sm:$0xff] (!%p13177_p13)  ;;  %13475 = vmatpush3.bf16.msra.mxu1 (!%p13177_p13), %v13474_v44 }
 0xc3f   : > { %v11519_v15 = vld [vmem:[#allocation18 + $0x148] sm:$0xff] (!%p13177_p13)  ;;  %13477 = vmatprep.subr.bf16.mxu1 (!%p13177_p13), %v13476_v24 }
 0xc40   : > { %v11468_v28 = vcombine.low %v11460_v36, %v11467_v57  ;;  %v11505_v36 = vld [vmem:[#allocation18 + $0xd8] sm:$0xff] (!%p13177_p13)  ;;  %v11536_v57 = vld [vmem:[#allocation18 + $0x1d0] sm:$0xff] (!%p13177_p13)  ;;  %v13478_v12 = vpack.c.bf16 (!%p13177_p13), %v11519_v15, %v11518_v7 }
 0xc41   : > { %v13448_v27 = vpack.c.bf16 (!%p13177_p13), %v11505_v36, %v11504_v5 }
 0xc42   : > { %v11470_v53 = vadd.f32 %v11468_v28, %v10507_v54  ;;  %v13442_v54 = vpack.c.bf16 (!%p13177_p13), %v11485_v37, %v11484_v38  ;;  %v11537_v28 = vld [vmem:[#allocation18 + $0x1d8] sm:$0xff] (!%p13177_p13)  ;;  %13479 = vmatpush3.bf16.msra.mxu1 (!%p13177_p13), %v13478_v12  ;;  %v13458_v38 = vpack.c.bf16 (!%p13177_p13), %v11493_v10, %v11492_v9 }
 0xc43   : > { %v13480_v23 = vpack.c.bf16 (!%p13177_p13), %v11537_v28, %v11536_v57 }
 0xc44   : > { %11471 = vst [vmem:[#allocation3] sm:$0xff] %v11470_v53  ;;  %13443 = vmatpush3.bf16.msra.mxu0 (!%p13177_p13), %v13442_v54  ;;  %v13446_v53 = vpack.c.bf16 (!%p13177_p13), %v11487_v33, %v11486_v20 }
 0xc45   : > { %13445 = vmatprep.subr.bf16.mxu0 %v13444_v16  ;;  %13481 = vmatprep.subr.bf16.mxu1 %v13480_v23 }
 0xc46   : > { %13483 = vmatpush3.bf16.msra.mxu1 %v13482_v22 }
 0xc47   : > { %13485 = vmatprep.subr.bf16.mxu1 %v13484_v42 }
 0xc48   : > { %13447 = vmatpush3.bf16.msra.mxu0 %v13446_v53 }
 0xc49   : > { %13449 = vmatprep.subr.bf16.mxu0 %v13448_v27 }
 0xc4a   : > { %13487 = vmatpush3.bf16.msra.mxu1 %v13486_v49 }
 0xc4b   : > { %v11476_v21 = vld [vmem:[#allocation3] sm:$0xff]  ;;  %13489 = vmatprep.subr.bf16.mxu1 %v13488_v50 }
 0xc4c   : > { %v11477_v2 = vmax.f32 %v11476_v21, 0.0  ;;  %13451 = vmatpush3.bf16.msra.mxu0 %v13450_v52 }
 0xc4d   : > { %13453 = vmatprep.subr.bf16.mxu0 %v13452_v34 }
 0xc4e   : > { %v11557_v25 = vrot.slane %v11477_v2, %v17741_v1  ;;  %v11550_v26 = vcombine.high %v11477_v2, %v11477_v2  ;;  %13491 = vmatpush3.bf16.msra.mxu1 %v13490_v40 }
 0xc50   : > { %v11565_v46 = vcombine.high %v11557_v25, %v11557_v25  ;;  %v11564_v45 = vrot.slane %v11550_v26, %v17741_v1  ;;  %13455 = vmatpush3.bf16.msra.mxu0 %v13454_v13 }
 0xc51   : > { %13457 = vmatprep.subr.bf16.mxu0 %v13456_v29 }
 0xc52   : > { %11635 = vmatprep.mubr.f32.mxu0 %v11565_v46  ;;  %v11566_v32 = vcombine.high %v11564_v45, %v11564_v45 }
 0xc54   : > { %11705 = vmatprep.mubr.f32.mxu1 %v11566_v32  ;;  %13459 = vmatpush3.bf16.msra.mxu0 %v13458_v38 }
 0xc55   : > { %11706 = vmatmul.mubr.f32.vlgmr.msra.gmra.mrb[0].mxu1 %v11564_v45 }
 0xc57   : > { %11636 = vmatmul.mubr.f32.vlgmr.msra.gmra.mrb[0].mxu0 %v11557_v25 }
 0xd28   : > { %v13253_v61 = vpop.f32.mrb[0].mxu1 }
 0xd29   : > { %v13254_v47 = vpop.f32.mrb[1].mxu1 }
 0xd2a   : > { %v13218_v37 = vpop.f32.mrb[0].mxu0  ;;  %v13255_v1 = vadd.f32 %v13254_v47, %v13253_v61 }
 0xd2b   : > { %v13219_v60 = vpop.f32.mrb[1].mxu0 }
 0xd2c   : > { %v13220_v14 = vadd.f32 %v13219_v60, %v13218_v37 }
 0xd2e   : > { %v11638_v58 = vadd.f32 %v13220_v14, %v13178_v35 }
 0xd30   : > { %v11708_v18 = vadd.f32 %v13255_v1, %v11638_v58 }
 0xd32   : > { %11711 = vst [vmem:[#allocation21] sm:$0x3] %v11708_v18 }
 0xd33 PF: > { %p13661_p2 = scmp.eq.s32.totalorder %s15945_s23, 7  ;;  %s15863_s25 = smov [#allocation21]  }
 0xd34   : > { %s11719_s22 = sshll.u32 %s15863_s25, 4  ;;  %s11720_s22 = int_to_ptr.vmem [resolvable:$true] %s11719_s22 }
 0xd35   : > { %s15752_s26 = scalar_lea.vmem %s11720_s22, 32  ;;  %p15759_p4 = scmp.lt.s32.totalorder %s11720_s22, %s11720_s22 }
 0xd36   : > { %p15753_p9 = scmp.ne.s32.totalorder %s11720_s22, %s15752_s26  ;;  %p15760_p6 = scmp.lt.s32.totalorder %s15752_s26, %s15752_s26 }
 0xd38   : > { %p15754_p3 = pnand %p15753_p9, %p13661_p2  ;;  %p15761_p11 = por %p15760_p6, %p15759_p4 }
 0xd3a   : > { %p15755_p1 = pneg %p15754_p3 }
 0xd3c   : > { %p15762_p12 = pnand %p15761_p11, %p15755_p1 }
 0xd3e   : > { %15765 = shalt.err (!%p15762_p12)
}
 0xd3f   : > { %s18818_s12 = sld [smem:[#allocation83_spill]] }
 0xd45   : > { %s15766_s13 = scalar_lea.hbm %s18818_s12, 32 }
 0xd46   : > { %p15767_p0 = scmp.ne.s32.totalorder %s18818_s12, %s15766_s13  ;;  %p15772_p7 = scmp.lt.u32.totalorder %s15766_s13, %s18818_s12 }
 0xd48   : > { %p15768_p5 = pnand %p15767_p0, %p13661_p2 }
 0xd4a   : > { %p15769_p8 = pneg %p15768_p5 }
 0xd4c   : > { %p15774_p10 = pnand %p15772_p7, %p15769_p8 }
 0xd4e   : > { %15777 = shalt.err (!%p15774_p10)
}
 0xd4f   : > { %13607 = dma.vmem_to_hbm [thread:$0]  (%p13661_p2), %s11720_s22, 32, %s18818_s12, [#allocation6]  }
 0xd50   : > { %15823 = dma.done.wait (%p13661_p2), [#allocation6], 32  }
 0xd51   : > { %15825 = vsyncadd (%p13661_p2), [#allocation6], 4294967264 }
 0xd52 PF: > { %p27_p13 = scmp.ge.s32.totalorder %s16149_s16, 10   ;;  %s18819_s17 = smov %s15832_s18 }
 0xd53   : > { %s18820_s18 = smov %s15836_s19  ;;  %s18821_s19 = smov %s16160_s21 }
 0xd54   : > { %s18822_s20 = smov %s16149_s16  ;;  %29 = sbr.rel (!%p27_p13) target bundleno = 14 (0xe), region = 147 }
 0xd5b   :  { %11732 = vsyncpa [#allocation5], 1 }
 0xd5c   :  { %11734 = vsyncpa [#allocation5 + $0x1], 1 }
 0xd5d   :  { %11735 = vsyncpa [#allocation8], 1 }
 0xd5e   :  { %11736 = vsyncpa [#allocation11], 1 }
 0xd5f   :  { %11737 = vsyncpa [#allocation14], 1 }
 0xd60   :  { %11739 = vsyncpa [#allocation14 + $0x1], 1 }
 0xd61   :  { %11740 = vsyncpa [#allocation17], 1 }
 0xd62   :  { %11741 = vsyncpa [#allocation20], 1 }
 0xd63   :  { %11742 = vsyncpa [#allocation6], 1 }
 0xd64   :  { %11744 = vsyncpa [#allocation6 + $0x1], 1 }

</bundles_post_ra>
